<compile_context>
chip_gen: v5e
topology: v5e:2x2
jax: 0.10.0
libtpu: 0.0.40
codegen_flags: <defaults>
</compile_context>

<pallas_src>
import jax
import jax.numpy as jnp
import numpy as np
from jax import lax
from jax.experimental import pallas as pl
from jax.experimental.pallas import tpu as pltpu

# Paper hyper-params (MultiHeadAttention defaults h=8, dm=512, dk=dv=64; PFFN/LayerNorm 512/2048).
H, DM, DK, DV, DFF = 8, 512, 64, 64, 2048
EPS = 1e-5          # nn.LayerNorm default
TFF = 1024          # FFN tile width along the 2048 (dff) axis -> 2 grid steps


def encoder_layer_kernel(x_ref, wq_ref, wk_ref, wv_ref, wo_ref,
                         w1_ref, b1_ref, w2_ref, b2_ref, gamma_ref, beta_ref,
                         out_ref, y_ref, ybf_ref, acc_ref):
    t = pl.program_id(0)
    gamma = gamma_ref[...]                         # (1, dm) f32
    beta = beta_ref[...]                           # (1, dm) f32

    def layer_norm(z):                             # z: (S, dm) f32
        mu = jnp.mean(z, axis=-1, keepdims=True)
        var = jnp.mean((z - mu) ** 2, axis=-1, keepdims=True)
        return (z - mu) * lax.rsqrt(var + EPS) * gamma + beta

    # ---------------- tile 0: multi-head attention + first residual/LayerNorm --------------
    @pl.when(t == 0)
    def _():
        x_bf = x_ref[...]                          # (S, dm) bf16
        x = x_bf.astype(jnp.float32)
        S = x_bf.shape[0]

        # Broadcast x once across the head axis; all per-head work below is batched over
        # that leading axis, so every (S, dk) slab stays 128-lane aligned.
        xh = jnp.broadcast_to(x_bf, (H, S, DM))    # (H, S, dm) bf16

        # Batched QKV projections (bf16 MXU, f32 accumulation). 1/sqrt(dk) is folded into
        # W_q at param-prep time.
        q = jnp.einsum('hsd,hdk->hsk', xh, wq_ref[...],
                       preferred_element_type=jnp.float32)        # (H, S, dk)
        k = jnp.einsum('hsd,hdk->hsk', xh, wk_ref[...],
                       preferred_element_type=jnp.float32)        # (H, S, dk)
        v = jnp.einsum('hsd,hdk->hsk', xh, wv_ref[...],
                       preferred_element_type=jnp.float32)        # (H, S, dv)

        # Batched scores / softmax / PV.  S is small, so full (H, S, S) scores are fine.
        s = jnp.einsum('hqd,hkd->hqk', q, k,
                       preferred_element_type=jnp.float32)        # (H, S, S)
        s = s - jnp.max(s, axis=-1, keepdims=True)
        p = jnp.exp(s)
        p = p / jnp.sum(p, axis=-1, keepdims=True)                # exact division (precision policy)
        o = jnp.einsum('hqk,hkv->hqv', p, v,
                       preferred_element_type=jnp.float32)        # (H, S, dv)

        # Output projection without concatenating heads: per-head partials against the
        # matching W_o row-block, summed over heads == hstack(heads) @ W_o.
        partial = jnp.einsum('hqv,hvm->hqm', o.astype(jnp.bfloat16), wo_ref[...],
                             preferred_element_type=jnp.float32)  # (H, S, dm)
        attn = jnp.sum(partial, axis=0)                           # (S, dm)

        y = layer_norm(x + attn)                   # x = norm(x + attn(x, x, x))
        y_ref[...] = y
        ybf_ref[...] = y.astype(jnp.bfloat16)      # cast hoisted out of the FFN tile loop
        acc_ref[...] = jnp.zeros_like(acc_ref)

    # ---------------- every tile: stream one DFF slice of the FFN ----------------
    h1 = jnp.dot(ybf_ref[...], w1_ref[...],
                 preferred_element_type=jnp.float32) + b1_ref[...]
    h1 = jnp.maximum(h1, 0.0).astype(jnp.bfloat16)                # (S, TFF)
    acc_ref[...] += jnp.dot(h1, w2_ref[...], preferred_element_type=jnp.float32)

    # ---------------- last tile: bias, second residual/LayerNorm, write out ----------------
    @pl.when(t == pl.num_programs(0) - 1)
    def _():
        ffn = acc_ref[...] + b2_ref[...]
        out_ref[...] = layer_norm(y_ref[...] + ffn).astype(out_ref.dtype)


def encoder_layer(x, params):
    (wq, wk, wv, wo, w1, b1, w2, b2, gamma, beta) = params
    S = x.shape[0]
    n_tiles = DFF // TFF
    grid_spec = pltpu.PrefetchScalarGridSpec(
        num_scalar_prefetch=0,
        grid=(n_tiles,),
        in_specs=[
            pl.BlockSpec((S, DM), lambda t: (0, 0)),             # x        (resident)
            pl.BlockSpec((H, DM, DK), lambda t: (0, 0, 0)),      # Wq       (resident)
            pl.BlockSpec((H, DM, DK), lambda t: (0, 0, 0)),      # Wk       (resident)
            pl.BlockSpec((H, DM, DV), lambda t: (0, 0, 0)),      # Wv       (resident)
            pl.BlockSpec((H, DV, DM), lambda t: (0, 0, 0)),      # Wo       (resident)
            pl.BlockSpec((DM, TFF), lambda t: (0, t)),           # W1 tile  (streamed)
            pl.BlockSpec((1, TFF), lambda t: (0, t)),            # b1 tile  (streamed)
            pl.BlockSpec((TFF, DM), lambda t: (t, 0)),           # W2 tile  (streamed)
            pl.BlockSpec((1, DM), lambda t: (0, 0)),             # b2       (resident)
            pl.BlockSpec((1, DM), lambda t: (0, 0)),             # gamma    (resident)
            pl.BlockSpec((1, DM), lambda t: (0, 0)),             # beta     (resident)
        ],
        out_specs=pl.BlockSpec((S, DM), lambda t: (0, 0)),       # output   (resident)
        scratch_shapes=[
            pltpu.VMEM((S, DM), jnp.float32),                    # y = norm(x + attn), f32
            pltpu.VMEM((S, DM), jnp.bfloat16),                   # y in bf16 (FFN input)
            pltpu.VMEM((S, DM), jnp.float32),                    # FFN accumulator
        ],
    )
    return pl.pallas_call(
        encoder_layer_kernel,
        out_shape=jax.ShapeDtypeStruct((S, DM), jnp.float32),
        grid_spec=grid_spec,
        compiler_params=pltpu.CompilerParams(
            dimension_semantics=("arbitrary",),                  # reduction over DFF tiles
            vmem_limit_bytes=32 << 20,                           # <= v7x 64 MiB physical VMEM
        ),
    )(x, wq, wk, wv, wo, w1, b1, w2, b2, gamma, beta)


def reference(x_bf16, params):
    """Pure-JAX reference of the module math, mirroring the kernel's bf16 precision policy."""
    (wq, wk, wv, wo, w1, b1, w2, b2, gamma, beta) = params
    f32 = jnp.float32
    x = x_bf16.astype(f32)

    def ln(z):
        mu = jnp.mean(z, axis=-1, keepdims=True)
        var = jnp.mean((z - mu) ** 2, axis=-1, keepdims=True)
        return (z - mu) / jnp.sqrt(var + EPS) * gamma + beta

    q = jnp.einsum('sd,hdk->hsk', x, wq.astype(f32))
    k = jnp.einsum('sd,hdk->hsk', x, wk.astype(f32))
    v = jnp.einsum('sd,hdk->hsk', x, wv.astype(f32))
    s = jnp.einsum('hqd,hkd->hqk', q, k)          # 1/sqrt(dk) already folded into Wq
    p = jax.nn.softmax(s, axis=-1)
    o = jnp.einsum('hqk,hkv->hqv', p, v)
    o_bf = o.astype(jnp.bfloat16).astype(f32)
    attn = jnp.einsum('hqv,hvm->qm', o_bf, wo.astype(f32))
    y = ln(x + attn)

    y_bf = y.astype(jnp.bfloat16).astype(f32)
    h1 = jnp.maximum(y_bf @ w1.astype(f32) + b1, 0.0)
    h1 = h1.astype(jnp.bfloat16).astype(f32)
    ffn = h1 @ w2.astype(f32) + b2
    return ln(y + ffn)


def init_params(key):
    ks = jax.random.split(key, 8)
    # Master weights in f32 (torch used randn / Linear init; scaled for numerical sanity).
    wq = jax.random.normal(ks[0], (H, DM, DK), jnp.float32) * (DM ** -0.5)
    wk = jax.random.normal(ks[1], (H, DM, DK), jnp.float32) * (DM ** -0.5)
    wv = jax.random.normal(ks[2], (H, DM, DV), jnp.float32) * (DM ** -0.5)
    wo = jax.random.normal(ks[3], (H * DV, DM), jnp.float32) * ((H * DV) ** -0.5)
    w1 = jax.random.normal(ks[4], (DM, DFF), jnp.float32) * (DM ** -0.5)
    b1 = jax.random.normal(ks[5], (1, DFF), jnp.float32) * 0.02
    w2 = jax.random.normal(ks[6], (DFF, DM), jnp.float32) * (DFF ** -0.5)
    b2 = jax.random.normal(ks[7], (1, DM), jnp.float32) * 0.02
    gamma = jnp.ones((1, DM), jnp.float32)    # nn.LayerNorm default weight
    beta = jnp.zeros((1, DM), jnp.float32)    # nn.LayerNorm default bias

    # Fold the 1/sqrt(dk) attention scale into W_q (exact in f32, before the bf16 cast).
    wq = wq * (DK ** -0.5)
    # W_o row-block h (rows h*dv:(h+1)*dv) is exactly the projection for head h.
    wo3 = wo.reshape(H, DV, DM)

    return (wq.astype(jnp.bfloat16), wk.astype(jnp.bfloat16), wv.astype(jnp.bfloat16),
            wo3.astype(jnp.bfloat16),
            w1.astype(jnp.bfloat16), b1, w2.astype(jnp.bfloat16), b2,
            gamma, beta)


if __name__ == "__main__":
    key = jax.random.PRNGKey(0)
    pkey, xkey = jax.random.split(key)
    params = init_params(pkey)

    S = 8  # small seq length; d_model is fixed at 512 by the module
    x = jax.random.normal(xkey, (S, DM), jnp.float32).astype(jnp.bfloat16)

    out = jax.block_until_ready(jax.jit(encoder_layer)(x, params))
    ref = jax.block_until_ready(reference(x, params))
    np.testing.assert_allclose(np.asarray(out), np.asarray(ref), rtol=1e-2, atol=1e-2)

    print("KERNEL_OK")
</pallas_src>

<mosaic_0001>
module attributes {stable_mosaic.version = 11 : i64} {
  func.func @encoder_layer_kernel(%arg0: i32, %arg1: memref<8x512xbf16, #tpu.memory_space<vmem>>, %arg2: memref<8x512x64xbf16, #tpu.memory_space<vmem>>, %arg3: memref<8x512x64xbf16, #tpu.memory_space<vmem>>, %arg4: memref<8x512x64xbf16, #tpu.memory_space<vmem>>, %arg5: memref<8x64x512xbf16, #tpu.memory_space<vmem>>, %arg6: memref<512x1024xbf16, #tpu.memory_space<vmem>>, %arg7: memref<1x1024xf32, #tpu.memory_space<vmem>>, %arg8: memref<1024x512xbf16, #tpu.memory_space<vmem>>, %arg9: memref<1x512xf32, #tpu.memory_space<vmem>>, %arg10: memref<1x512xf32, #tpu.memory_space<vmem>>, %arg11: memref<1x512xf32, #tpu.memory_space<vmem>>, %arg12: memref<8x512xf32, #tpu.memory_space<vmem>>, %arg13: memref<8x512xf32, #tpu.memory_space<vmem>>, %arg14: memref<8x512xbf16, #tpu.memory_space<vmem>>, %arg15: memref<8x512xf32, #tpu.memory_space<vmem>>) attributes {dimension_semantics = [#tpu.dimension_semantics<arbitrary>], iteration_bounds = array<i64: 2>, scalar_prefetch = 0 : i64, scratch_operands = 3 : i64, tpu.core_type = #tpu.core_type<tc>, window_params = [{pipeline_mode = #tpu.pipeline_mode<synchronous>, transform_indices = @transform_0, window_bounds = array<i64: 8, 512>}, {pipeline_mode = #tpu.pipeline_mode<synchronous>, transform_indices = @transform_1, window_bounds = array<i64: 8, 512, 64>}, {pipeline_mode = #tpu.pipeline_mode<synchronous>, transform_indices = @transform_2, window_bounds = array<i64: 8, 512, 64>}, {pipeline_mode = #tpu.pipeline_mode<synchronous>, transform_indices = @transform_3, window_bounds = array<i64: 8, 512, 64>}, {pipeline_mode = #tpu.pipeline_mode<synchronous>, transform_indices = @transform_4, window_bounds = array<i64: 8, 64, 512>}, {transform_indices = @transform_5, window_bounds = array<i64: 512, 1024>}, {transform_indices = @transform_6, window_bounds = array<i64: 1, 1024>}, {transform_indices = @transform_7, window_bounds = array<i64: 1024, 512>}, {pipeline_mode = #tpu.pipeline_mode<synchronous>, transform_indices = @transform_8, window_bounds = array<i64: 1, 512>}, {pipeline_mode = #tpu.pipeline_mode<synchronous>, transform_indices = @transform_9, window_bounds = array<i64: 1, 512>}, {pipeline_mode = #tpu.pipeline_mode<synchronous>, transform_indices = @transform_10, window_bounds = array<i64: 1, 512>}, {pipeline_mode = #tpu.pipeline_mode<synchronous>, transform_indices = @transform_11, window_bounds = array<i64: 8, 512>}]} {
    %c0 = arith.constant 0 : index
    %c0_0 = arith.constant 0 : index
    %0 = vector.load %arg10[%c0, %c0_0] : memref<1x512xf32, #tpu.memory_space<vmem>>, vector<1x512xf32>
    %c0_1 = arith.constant 0 : index
    %c0_2 = arith.constant 0 : index
    %1 = vector.load %arg11[%c0_1, %c0_2] : memref<1x512xf32, #tpu.memory_space<vmem>>, vector<1x512xf32>
    %c0_i32 = arith.constant 0 : i32
    %2 = arith.cmpi eq, %arg0, %c0_i32 : i32
    %3 = arith.extui %2 : i1 to i32
    %c0_i32_3 = arith.constant 0 : i32
    %4 = arith.cmpi ne, %3, %c0_i32_3 : i32
    scf.if %4 {
      %c0_19 = arith.constant 0 : index
      %c0_20 = arith.constant 0 : index
      %22 = vector.load %arg1[%c0_19, %c0_20] : memref<8x512xbf16, #tpu.memory_space<vmem>>, vector<8x512xbf16>
      %23 = arith.extf %22 : vector<8x512xbf16> to vector<8x512xf32>
      %24 = vector.shape_cast %22 : vector<8x512xbf16> to vector<1x8x512xbf16>
      %25 = vector.broadcast %24 : vector<1x8x512xbf16> to vector<8x8x512xbf16>
      %c0_21 = arith.constant 0 : index
      %c0_22 = arith.constant 0 : index
      %c0_23 = arith.constant 0 : index
      %26 = vector.load %arg2[%c0_21, %c0_22, %c0_23] : memref<8x512x64xbf16, #tpu.memory_space<vmem>>, vector<8x512x64xbf16>
      "tpu.trace_start"() <{level = 10 : i32, message = "hsd,hdk->hsk"}> : () -> ()
      %cst_24 = arith.constant dense<0.000000e+00> : vector<8x8x64xf32>
      %27 = tpu.matmul %25, %26, %cst_24 {dimension_numbers = #tpu.dot_dimension_numbers<[2], [1], [1], [2], [0, 0, 0, 1, 1, 2], [0], [0]>} : vector<8x8x512xbf16>, vector<8x512x64xbf16>, vector<8x8x64xf32> -> vector<8x8x64xf32>
      "tpu.trace_stop"() : () -> ()
      %c0_25 = arith.constant 0 : index
      %c0_26 = arith.constant 0 : index
      %c0_27 = arith.constant 0 : index
      %28 = vector.load %arg3[%c0_25, %c0_26, %c0_27] : memref<8x512x64xbf16, #tpu.memory_space<vmem>>, vector<8x512x64xbf16>
      "tpu.trace_start"() <{level = 10 : i32, message = "hsd,hdk->hsk"}> : () -> ()
      %cst_28 = arith.constant dense<0.000000e+00> : vector<8x8x64xf32>
      %29 = tpu.matmul %25, %28, %cst_28 {dimension_numbers = #tpu.dot_dimension_numbers<[2], [1], [1], [2], [0, 0, 0, 1, 1, 2], [0], [0]>} : vector<8x8x512xbf16>, vector<8x512x64xbf16>, vector<8x8x64xf32> -> vector<8x8x64xf32>
      "tpu.trace_stop"() : () -> ()
      %c0_29 = arith.constant 0 : index
      %c0_30 = arith.constant 0 : index
      %c0_31 = arith.constant 0 : index
      %30 = vector.load %arg4[%c0_29, %c0_30, %c0_31] : memref<8x512x64xbf16, #tpu.memory_space<vmem>>, vector<8x512x64xbf16>
      "tpu.trace_start"() <{level = 10 : i32, message = "hsd,hdk->hsk"}> : () -> ()
      %cst_32 = arith.constant dense<0.000000e+00> : vector<8x8x64xf32>
      %31 = tpu.matmul %25, %30, %cst_32 {dimension_numbers = #tpu.dot_dimension_numbers<[2], [1], [1], [2], [0, 0, 0, 1, 1, 2], [0], [0]>} : vector<8x8x512xbf16>, vector<8x512x64xbf16>, vector<8x8x64xf32> -> vector<8x8x64xf32>
      "tpu.trace_stop"() : () -> ()
      "tpu.trace_start"() <{level = 10 : i32, message = "hqd,hkd->hqk"}> : () -> ()
      %cst_33 = arith.constant dense<0.000000e+00> : vector<8x8x8xf32>
      %32 = tpu.matmul %27, %29, %cst_33 {dimension_numbers = #tpu.dot_dimension_numbers<[2], [2], [1], [1], [0, 0, 0, 1, 1, 1], [0], [0]>} : vector<8x8x64xf32>, vector<8x8x64xf32>, vector<8x8x8xf32> -> vector<8x8x8xf32>
      "tpu.trace_stop"() : () -> ()
      %cst_34 = arith.constant dense<0xFF800000> : vector<8x8xf32>
      %33 = vector.multi_reduction <maximumf>, %32, %cst_34 [2] : vector<8x8x8xf32> to vector<8x8xf32>
      %34 = vector.shape_cast %33 : vector<8x8xf32> to vector<8x8x1xf32>
      %35 = vector.broadcast %34 : vector<8x8x1xf32> to vector<8x8x8xf32>
      %36 = arith.subf %32, %35 : vector<8x8x8xf32>
      %37 = math.exp %36 : vector<8x8x8xf32>
      %cst_35 = arith.constant dense<0.000000e+00> : vector<8x8xf32>
      %38 = vector.multi_reduction <add>, %37, %cst_35 [2] : vector<8x8x8xf32> to vector<8x8xf32>
      %39 = vector.shape_cast %38 : vector<8x8xf32> to vector<8x8x1xf32>
      %40 = vector.broadcast %39 : vector<8x8x1xf32> to vector<8x8x8xf32>
      %41 = arith.divf %37, %40 : vector<8x8x8xf32>
      "tpu.trace_start"() <{level = 10 : i32, message = "hqk,hkv->hqv"}> : () -> ()
      %cst_36 = arith.constant dense<0.000000e+00> : vector<8x8x64xf32>
      %42 = tpu.matmul %41, %31, %cst_36 {dimension_numbers = #tpu.dot_dimension_numbers<[2], [1], [1], [2], [0, 0, 0, 1, 1, 2], [0], [0]>} : vector<8x8x8xf32>, vector<8x8x64xf32>, vector<8x8x64xf32> -> vector<8x8x64xf32>
      "tpu.trace_stop"() : () -> ()
      %43 = arith.truncf %42 : vector<8x8x64xf32> to vector<8x8x64xbf16>
      %c0_37 = arith.constant 0 : index
      %c0_38 = arith.constant 0 : index
      %c0_39 = arith.constant 0 : index
      %44 = vector.load %arg5[%c0_37, %c0_38, %c0_39] : memref<8x64x512xbf16, #tpu.memory_space<vmem>>, vector<8x64x512xbf16>
      "tpu.trace_start"() <{level = 10 : i32, message = "hqv,hvm->hqm"}> : () -> ()
      %cst_40 = arith.constant dense<0.000000e+00> : vector<8x8x512xf32>
      %45 = tpu.matmul %43, %44, %cst_40 {dimension_numbers = #tpu.dot_dimension_numbers<[2], [1], [1], [2], [0, 0, 0, 1, 1, 2], [0], [0]>} : vector<8x8x64xbf16>, vector<8x64x512xbf16>, vector<8x8x512xf32> -> vector<8x8x512xf32>
      "tpu.trace_stop"() : () -> ()
      %cst_41 = arith.constant dense<0.000000e+00> : vector<8x512xf32>
      %46 = vector.multi_reduction <add>, %45, %cst_41 [0] : vector<8x8x512xf32> to vector<8x512xf32>
      %47 = arith.addf %23, %46 : vector<8x512xf32>
      %cst_42 = arith.constant dense<0.000000e+00> : vector<8xf32>
      %48 = vector.multi_reduction <add>, %47, %cst_42 [1] : vector<8x512xf32> to vector<8xf32>
      %49 = vector.shape_cast %48 : vector<8xf32> to vector<8x1xf32>
      %cst_43 = arith.constant 5.120000e+02 : f32
      %50 = vector.broadcast %cst_43 : f32 to vector<8x1xf32>
      %51 = arith.divf %49, %50 : vector<8x1xf32>
      %52 = vector.broadcast %51 : vector<8x1xf32> to vector<8x512xf32>
      %53 = arith.subf %47, %52 : vector<8x512xf32>
      %54 = arith.mulf %53, %53 : vector<8x512xf32>
      %cst_44 = arith.constant dense<0.000000e+00> : vector<8xf32>
      %55 = vector.multi_reduction <add>, %54, %cst_44 [1] : vector<8x512xf32> to vector<8xf32>
      %56 = vector.shape_cast %55 : vector<8xf32> to vector<8x1xf32>
      %cst_45 = arith.constant 5.120000e+02 : f32
      %57 = vector.broadcast %cst_45 : f32 to vector<8x1xf32>
      %58 = arith.divf %56, %57 : vector<8x1xf32>
      %59 = vector.broadcast %51 : vector<8x1xf32> to vector<8x512xf32>
      %60 = arith.subf %47, %59 : vector<8x512xf32>
      %cst_46 = arith.constant 9.99999974E-6 : f32
      %61 = vector.broadcast %cst_46 : f32 to vector<8x1xf32>
      %62 = arith.addf %58, %61 : vector<8x1xf32>
      %63 = math.rsqrt %62 : vector<8x1xf32>
      %64 = vector.broadcast %63 : vector<8x1xf32> to vector<8x512xf32>
      %65 = arith.mulf %60, %64 : vector<8x512xf32>
      %66 = vector.broadcast %0 : vector<1x512xf32> to vector<8x512xf32>
      %67 = arith.mulf %65, %66 : vector<8x512xf32>
      %68 = vector.broadcast %1 : vector<1x512xf32> to vector<8x512xf32>
      %69 = arith.addf %67, %68 : vector<8x512xf32>
      %c0_47 = arith.constant 0 : index
      %c0_48 = arith.constant 0 : index
      %70 = vector.load %arg13[%c0_47, %c0_48] : memref<8x512xf32, #tpu.memory_space<vmem>>, vector<8x512xf32>
      tpu.vector_store %arg13[%c0_47, %c0_48], %69 {strides = array<i32>} : memref<8x512xf32, #tpu.memory_space<vmem>>, vector<8x512xf32>,
      %71 = arith.truncf %69 : vector<8x512xf32> to vector<8x512xbf16>
      %c0_49 = arith.constant 0 : index
      %c0_50 = arith.constant 0 : index
      %72 = vector.load %arg14[%c0_49, %c0_50] : memref<8x512xbf16, #tpu.memory_space<vmem>>, vector<8x512xbf16>
      tpu.vector_store %arg14[%c0_49, %c0_50], %71 {strides = array<i32>} : memref<8x512xbf16, #tpu.memory_space<vmem>>, vector<8x512xbf16>,
      %cst_51 = arith.constant 0.000000e+00 : f32
      %73 = vector.broadcast %cst_51 : f32 to vector<8x512xf32>
      %c0_52 = arith.constant 0 : index
      %c0_53 = arith.constant 0 : index
      %74 = vector.load %arg15[%c0_52, %c0_53] : memref<8x512xf32, #tpu.memory_space<vmem>>, vector<8x512xf32>
      tpu.vector_store %arg15[%c0_52, %c0_53], %73 {strides = array<i32>} : memref<8x512xf32, #tpu.memory_space<vmem>>, vector<8x512xf32>,
    } else {
    }
    %c0_4 = arith.constant 0 : index
    %c0_5 = arith.constant 0 : index
    %5 = vector.load %arg14[%c0_4, %c0_5] : memref<8x512xbf16, #tpu.memory_space<vmem>>, vector<8x512xbf16>
    %c0_6 = arith.constant 0 : index
    %c0_7 = arith.constant 0 : index
    %6 = vector.load %arg6[%c0_6, %c0_7] : memref<512x1024xbf16, #tpu.memory_space<vmem>>, vector<512x1024xbf16>
    %cst = arith.constant dense<0.000000e+00> : vector<8x1024xf32>
    %7 = tpu.matmul %5, %6, %cst {dimension_numbers = #tpu.dot_dimension_numbers<[1], [0], [0], [1], [0, 0, 1, 1], [], []>} : vector<8x512xbf16>, vector<512x1024xbf16>, vector<8x1024xf32> -> vector<8x1024xf32>
    %c0_8 = arith.constant 0 : index
    %c0_9 = arith.constant 0 : index
    %8 = vector.load %arg7[%c0_8, %c0_9] : memref<1x1024xf32, #tpu.memory_space<vmem>>, vector<1x1024xf32>
    %9 = vector.broadcast %8 : vector<1x1024xf32> to vector<8x1024xf32>
    %10 = arith.addf %7, %9 : vector<8x1024xf32>
    %cst_10 = arith.constant 0.000000e+00 : f32
    %11 = vector.broadcast %cst_10 : f32 to vector<8x1024xf32>
    %12 = arith.maximumf %10, %11 : vector<8x1024xf32>
    %13 = arith.truncf %12 : vector<8x1024xf32> to vector<8x1024xbf16>
    %c0_11 = arith.constant 0 : index
    %c0_12 = arith.constant 0 : index
    %14 = vector.load %arg15[%c0_11, %c0_12] : memref<8x512xf32, #tpu.memory_space<vmem>>, vector<8x512xf32>
    %c0_13 = arith.constant 0 : index
    %c0_14 = arith.constant 0 : index
    %15 = vector.load %arg8[%c0_13, %c0_14] : memref<1024x512xbf16, #tpu.memory_space<vmem>>, vector<1024x512xbf16>
    %cst_15 = arith.constant dense<0.000000e+00> : vector<8x512xf32>
    %16 = tpu.matmul %13, %15, %cst_15 {dimension_numbers = #tpu.dot_dimension_numbers<[1], [0], [0], [1], [0, 0, 1, 1], [], []>} : vector<8x1024xbf16>, vector<1024x512xbf16>, vector<8x512xf32> -> vector<8x512xf32>
    %17 = arith.addf %14, %16 : vector<8x512xf32>
    %c0_16 = arith.constant 0 : index
    %c0_17 = arith.constant 0 : index
    %18 = vector.load %arg15[%c0_16, %c0_17] : memref<8x512xf32, #tpu.memory_space<vmem>>, vector<8x512xf32>
    tpu.vector_store %arg15[%c0_16, %c0_17], %17 {strides = array<i32>} : memref<8x512xf32, #tpu.memory_space<vmem>>, vector<8x512xf32>,
    %c1_i32 = arith.constant 1 : i32
    %19 = arith.cmpi eq, %arg0, %c1_i32 : i32
    %20 = arith.extui %19 : i1 to i32
    %c0_i32_18 = arith.constant 0 : i32
    %21 = arith.cmpi ne, %20, %c0_i32_18 : i32
    scf.if %21 {
      %c0_19 = arith.constant 0 : index
      %c0_20 = arith.constant 0 : index
      %22 = vector.load %arg15[%c0_19, %c0_20] : memref<8x512xf32, #tpu.memory_space<vmem>>, vector<8x512xf32>
      %c0_21 = arith.constant 0 : index
      %c0_22 = arith.constant 0 : index
      %23 = vector.load %arg9[%c0_21, %c0_22] : memref<1x512xf32, #tpu.memory_space<vmem>>, vector<1x512xf32>
      %24 = vector.broadcast %23 : vector<1x512xf32> to vector<8x512xf32>
      %25 = arith.addf %22, %24 : vector<8x512xf32>
      %c0_23 = arith.constant 0 : index
      %c0_24 = arith.constant 0 : index
      %26 = vector.load %arg13[%c0_23, %c0_24] : memref<8x512xf32, #tpu.memory_space<vmem>>, vector<8x512xf32>
      %27 = arith.addf %26, %25 : vector<8x512xf32>
      %cst_25 = arith.constant dense<0.000000e+00> : vector<8xf32>
      %28 = vector.multi_reduction <add>, %27, %cst_25 [1] : vector<8x512xf32> to vector<8xf32>
      %29 = vector.shape_cast %28 : vector<8xf32> to vector<8x1xf32>
      %cst_26 = arith.constant 5.120000e+02 : f32
      %30 = vector.broadcast %cst_26 : f32 to vector<8x1xf32>
      %31 = arith.divf %29, %30 : vector<8x1xf32>
      %32 = vector.broadcast %31 : vector<8x1xf32> to vector<8x512xf32>
      %33 = arith.subf %27, %32 : vector<8x512xf32>
      %34 = arith.mulf %33, %33 : vector<8x512xf32>
      %cst_27 = arith.constant dense<0.000000e+00> : vector<8xf32>
      %35 = vector.multi_reduction <add>, %34, %cst_27 [1] : vector<8x512xf32> to vector<8xf32>
      %36 = vector.shape_cast %35 : vector<8xf32> to vector<8x1xf32>
      %cst_28 = arith.constant 5.120000e+02 : f32
      %37 = vector.broadcast %cst_28 : f32 to vector<8x1xf32>
      %38 = arith.divf %36, %37 : vector<8x1xf32>
      %39 = vector.broadcast %31 : vector<8x1xf32> to vector<8x512xf32>
      %40 = arith.subf %27, %39 : vector<8x512xf32>
      %cst_29 = arith.constant 9.99999974E-6 : f32
      %41 = vector.broadcast %cst_29 : f32 to vector<8x1xf32>
      %42 = arith.addf %38, %41 : vector<8x1xf32>
      %43 = math.rsqrt %42 : vector<8x1xf32>
      %44 = vector.broadcast %43 : vector<8x1xf32> to vector<8x512xf32>
      %45 = arith.mulf %40, %44 : vector<8x512xf32>
      %46 = vector.broadcast %0 : vector<1x512xf32> to vector<8x512xf32>
      %47 = arith.mulf %45, %46 : vector<8x512xf32>
      %48 = vector.broadcast %1 : vector<1x512xf32> to vector<8x512xf32>
      %49 = arith.addf %47, %48 : vector<8x512xf32>
      %c0_30 = arith.constant 0 : index
      %c0_31 = arith.constant 0 : index
      %50 = vector.load %arg12[%c0_30, %c0_31] : memref<8x512xf32, #tpu.memory_space<vmem>>, vector<8x512xf32>
      tpu.vector_store %arg12[%c0_30, %c0_31], %49 {strides = array<i32>} : memref<8x512xf32, #tpu.memory_space<vmem>>, vector<8x512xf32>,
    } else {
    }
    return
  }
  func.func @transform_0(%arg0: i32) -> (i32, i32) {
    %c0_i32 = arith.constant 0 : i32
    %c0_i32_0 = arith.constant 0 : i32
    %c0_i32_1 = arith.constant 0 : i32
    return %c0_i32, %c0_i32_0 : i32, i32
  }
  func.func @transform_1(%arg0: i32) -> (i32, i32, i32) {
    %c0_i32 = arith.constant 0 : i32
    %c0_i32_0 = arith.constant 0 : i32
    %c0_i32_1 = arith.constant 0 : i32
    %c0_i32_2 = arith.constant 0 : i32
    return %c0_i32, %c0_i32_0, %c0_i32_1 : i32, i32, i32
  }
  func.func @transform_2(%arg0: i32) -> (i32, i32, i32) {
    %c0_i32 = arith.constant 0 : i32
    %c0_i32_0 = arith.constant 0 : i32
    %c0_i32_1 = arith.constant 0 : i32
    %c0_i32_2 = arith.constant 0 : i32
    return %c0_i32, %c0_i32_0, %c0_i32_1 : i32, i32, i32
  }
  func.func @transform_3(%arg0: i32) -> (i32, i32, i32) {
    %c0_i32 = arith.constant 0 : i32
    %c0_i32_0 = arith.constant 0 : i32
    %c0_i32_1 = arith.constant 0 : i32
    %c0_i32_2 = arith.constant 0 : i32
    return %c0_i32, %c0_i32_0, %c0_i32_1 : i32, i32, i32
  }
  func.func @transform_4(%arg0: i32) -> (i32, i32, i32) {
    %c0_i32 = arith.constant 0 : i32
    %c0_i32_0 = arith.constant 0 : i32
    %c0_i32_1 = arith.constant 0 : i32
    %c0_i32_2 = arith.constant 0 : i32
    return %c0_i32, %c0_i32_0, %c0_i32_1 : i32, i32, i32
  }
  func.func @transform_5(%arg0: i32) -> (i32, i32) {
    %c0_i32 = arith.constant 0 : i32
    %c0_i32_0 = arith.constant 0 : i32
    return %c0_i32, %arg0 : i32, i32
  }
  func.func @transform_6(%arg0: i32) -> (i32, i32) {
    %c0_i32 = arith.constant 0 : i32
    %c0_i32_0 = arith.constant 0 : i32
    return %c0_i32, %arg0 : i32, i32
  }
  func.func @transform_7(%arg0: i32) -> (i32, i32) {
    %c0_i32 = arith.constant 0 : i32
    %c0_i32_0 = arith.constant 0 : i32
    return %arg0, %c0_i32 : i32, i32
  }
  func.func @transform_8(%arg0: i32) -> (i32, i32) {
    %c0_i32 = arith.constant 0 : i32
    %c0_i32_0 = arith.constant 0 : i32
    %c0_i32_1 = arith.constant 0 : i32
    return %c0_i32, %c0_i32_0 : i32, i32
  }
  func.func @transform_9(%arg0: i32) -> (i32, i32) {
    %c0_i32 = arith.constant 0 : i32
    %c0_i32_0 = arith.constant 0 : i32
    %c0_i32_1 = arith.constant 0 : i32
    return %c0_i32, %c0_i32_0 : i32, i32
  }
  func.func @transform_10(%arg0: i32) -> (i32, i32) {
    %c0_i32 = arith.constant 0 : i32
    %c0_i32_0 = arith.constant 0 : i32
    %c0_i32_1 = arith.constant 0 : i32
    return %c0_i32, %c0_i32_0 : i32, i32
  }
  func.func @transform_11(%arg0: i32) -> (i32, i32) {
    %c0_i32 = arith.constant 0 : i32
    %c0_i32_0 = arith.constant 0 : i32
    %c0_i32_1 = arith.constant 0 : i32
    return %c0_i32, %c0_i32_0 : i32, i32
  }
}

</mosaic_0001>

<bundles_post_ra>
// kernel: encoder_layer.1
= control target key start
LH: loop header
LB: loop body
LE: loop exit
PB: predicated region body
PF: predicated region fallthrough
CT: control target
= control target key end

     0   :  { %s26715_s0 = inlined_call_operand.hbm [shape: bf16[8,512], index: 0, kind: input, shape index: {}]   ;;  %s26716_s1 = inlined_call_operand.vmem [shape: bf16[8,512,64], index: 1, kind: input, shape index: {}]   ;;  %s26717_s2 = inlined_call_operand.vmem [shape: bf16[8,512,64], index: 2, kind: input, shape index: {}]   ;;  %s26718_s3 = inlined_call_operand.vmem [shape: bf16[8,512,64], index: 3, kind: input, shape index: {}]   ;;  %s26719_s4 = inlined_call_operand.hbm [shape: bf16[8,64,512], index: 4, kind: input, shape index: {}]   ;;  %s26720_s5 = inlined_call_operand.vmem [shape: bf16[512,2048], index: 5, kind: input, shape index: {}]   ;;  %s26721_s6 = inlined_call_operand.hbm [shape: f32[1,2048], index: 6, kind: input, shape index: {}]   ;;  %s26722_s7 = inlined_call_operand.vmem [shape: bf16[2048,512], index: 7, kind: input, shape index: {}]   ;;  %s26723_s8 = inlined_call_operand.hbm [shape: f32[1,512], index: 8, kind: input, shape index: {}]   ;;  %s26724_s9 = inlined_call_operand.hbm [shape: f32[1,512], index: 9, kind: input, shape index: {}]   ;;  %s26725_s10 = inlined_call_operand.hbm [shape: f32[1,512], index: 10, kind: input, shape index: {}]   ;;  %s26726_s11 = inlined_call_operand.hbm [shape: f32[8,512], index: 11, kind: output, shape index: {}]  }
   0x1   :  { %26730 = sst [smem:[#allocation25_spill]] %s26718_s3 }
   0x2   :  { %26731 = sst [smem:[#allocation26_spill]] %s26719_s4 }
   0x3   :  { %26732 = sst [smem:[#allocation27_spill]] %s26724_s9 }
   0x4   :  { %26733 = sst [smem:[#allocation28_spill]] %s26726_s11 }
   0x5   :  { %16 = vsyncpa [#allocation6], 0 }
   0x6   :  { %17 = vsyncpa [#allocation9], 0 }
   0x7   :  { %18 = vsyncpa [#allocation14], 0 }
   0x8   :  { %19 = vsyncpa [#allocation7], 0  ;;  %s22179_s17 = smov 0   ;;  %s22181_s18 = smov 0  }
   0x9   :  { %s22183_s19 = smov 0   ;;  %s22185_s20 = smov 0  }
   0xa LB: > { %s22198_s21 = sadd.s32 4294967295, %s22106_s20   ;;  %s22201_s22 = sadd.s32 1, %s22106_s20   ;;  %s22106_s20 = sphi %s22185_s20, %s26744_s20   ;;  %s22102_s19 = sphi %s22183_s19, %s26748_s19   ;;  %s22098_s18 = sphi %s22181_s18, %s26747_s18   ;;  %s22094_s17 = sphi %s22179_s17, %s26746_s17  }
   0xb   : > { %26734 = sst [smem:[#allocation23_spill]] %s22201_s22  ;;  %s134_s23 = ssub.s32 %s22106_s20, %s22201_s22 }
   0xc   : > { %s137_s24 = sadd.s32 1, %s22102_s19  ;;  %p135_p0 = scmp.eq.s32.totalorder %s134_s23, 0 }
   0xd   : > { %p144_p1 = scmp.ne.s32.totalorder %s22102_s19, %s22098_s18  ;;  %p145_p2 = scmp.eq.s32.totalorder %s22106_s20, 0 }
   0xe   : > { %p176_p3 = scmp.ne.s32.totalorder %s22098_s18, %s22094_s17  ;;  %p177_p5 = scmp.eq.s32.totalorder %s22198_s21, 0 }
   0xf   : > { %s22211_s25 = scalar_select %p135_p0, %s22102_s19, %s137_s24  }
  0x10   : > { %p22213_p4 = por %p145_p2, %p144_p1  ;;  %p14579_p6 = scmp.ge.s32.totalorder %s22106_s20, 1 }
  0x11   : > { %26735 = sst [smem:[#allocation24_spill]] %s22211_s25  ;;  %p297_p7 = scmp.lt.s32.totalorder %s22106_s20, 3 }
  0x12   : > { %p22222_p8 = por %p177_p5, %p176_p3  ;;  %p14580_p9 = scmp.ne.s32.totalorder %s22198_s21, 0 }
  0x13   : > { %p22227_p10 = pnand %p14579_p6, %p297_p7  ;;  %s26739_s4 = sld [smem:[#allocation26_spill]] }
  0x14   : > { %s22108_s13 = smov [#allocation8]   ;;  %s26741_s9 = sld [smem:[#allocation27_spill]] }
  0x15   : > { %p21732_p11 = pneg %p22227_p10  ;;  %s331_s14 = sshll.u32 %s22108_s13, 4  ;;  %s332_s14 = int_to_ptr.vmem [resolvable:$true] %s331_s14 }
  0x16   : > { %s22109_s24 = smov 256   ;;  %s22110_s29 = smov 16  }
  0x17   : > { %p22238_p12 = pnand %p21732_p11, %p177_p5  ;;  %s22111_s30 = smov [#allocation13]  }
  0x18   : > { %s358_s13 = sshll.u32 %s22111_s30, 4  ;;  %s309_s22 = sshll.u32 %s26715_s0, 4  ;;  %s359_s13 = int_to_ptr.vmem [resolvable:$true] %s358_s13  ;;  %s310_s22 = int_to_ptr.hbm [resolvable:$true] %s309_s22 }
  0x19   : > { %s329_s12 = sshll.u32 %s26739_s4, 4  ;;  %s22112_s11 = smov [#allocation5]   ;;  %s330_s12 = int_to_ptr.hbm [resolvable:$true] %s329_s12 }
  0x1a   : > { %s356_s23 = sshll.u32 %s26741_s9, 4  ;;  %s344_s9 = sshll.u32 %s26723_s8, 4  ;;  %s357_s23 = int_to_ptr.hbm [resolvable:$true] %s356_s23  ;;  %s345_s9 = int_to_ptr.hbm [resolvable:$true] %s344_s9 }
  0x1b   : > { %21738 = dma.hbm_to_vmem [thread:$0]  (!%p22238_p12), %s330_s12, 16384, %s332_s14, [#allocation9], %s22109_s24, %s22109_s24, %s22110_s29  }
  0x1c   : > { %21744 = dma.hbm_to_vmem [thread:$0]  (!%p22238_p12), %s357_s23, 64, %s359_s13, [#allocation14]  }
  0x1d   : > { %s311_s3 = sshll.u32 %s22112_s11, 4  ;;  %s22113_s12 = smov [#allocation12]   ;;  %s312_s3 = int_to_ptr.vmem [resolvable:$true] %s311_s3 }
  0x1e   : > { %21735 = dma.hbm_to_vmem [thread:$0]  (!%p22238_p12), %s310_s22, 256, %s312_s3, [#allocation6]  }
  0x1f   : > { %s346_s14 = sshll.u32 %s22113_s12, 4  ;;  %s368_s25 = sshll.u32 %s26725_s10, 4  ;;  %s347_s14 = int_to_ptr.vmem [resolvable:$true] %s346_s14  ;;  %s369_s25 = int_to_ptr.hbm [resolvable:$true] %s368_s25 }
  0x20   : > { %21741 = dma.hbm_to_vmem [thread:$0]  (!%p22238_p12), %s345_s9, 64, %s347_s14, [#allocation9]  }
  0x21   : > { %s22114_s23 = smov [#allocation15]   ;;  %p14585_p13 = scmp.ge.s32.totalorder %s22106_s20, 2 }
  0x22   : > { %s370_s29 = sshll.u32 %s22114_s23, 4  ;;  %s371_s29 = int_to_ptr.vmem [resolvable:$true] %s370_s29 }
  0x23   : > { %21747 = dma.hbm_to_vmem [thread:$0]  (!%p22238_p12), %s369_s25, 64, %s371_s29, [#allocation14]  }
  0x24   : > { %377 = sbr.rel (%p14585_p13) target bundleno = 317 (0x13d), region = 48 }
  0x29   : > { %380 = sbr.rel (!%p22213_p4) target bundleno = 301 (0x12d), region = 52  ;;  %s382_s3 = sand.u32 (%p22213_p4), 1, %s22102_s19  }
  0x2a   : > { %s20296_s11 = sshll.u32 (%p22213_p4), %s22106_s20, 5  ;;  %s14586_s22 = sshll.u32 (%p22213_p4), %s382_s3, 11 }
  0x2b   : > { %s22272_s9 = scalar_lea.vmem (%p22213_p4), %s26720_s5, %s20296_s11  ;;  %s22277_s15 = scalar_lea.vmem (%p22213_p4), [#allocation10], %s14586_s22 }
  0x2c   : > { %v400_v0 = vld [vmem:[%s22272_s9] sm:$0xff] (%p22213_p4)  ;;  %v402_v1 = vld [vmem:[%s22272_s9 + $0x8] sm:$0xff] (%p22213_p4)  ;;  %v404_v2 = vld [vmem:[%s22272_s9 + $0x10] sm:$0xff] (%p22213_p4) }
  0x2d   : > { %401 = vst [vmem:[%s22277_s15] sm:$0xff] (%p22213_p4), %v400_v0  ;;  %v406_v3 = vld [vmem:[%s22272_s9 + $0x18] sm:$0xff] (%p22213_p4)  ;;  %v408_v4 = vld [vmem:[%s22272_s9 + $0x40] sm:$0xff] (%p22213_p4)  ;;  %v410_v5 = vld [vmem:[%s22272_s9 + $0x48] sm:$0xff] (%p22213_p4) }
  0x2e   : > { %403 = vst [vmem:[%s22277_s15 + $0x8] sm:$0xff] %v402_v1  ;;  %v412_v6 = vld [vmem:[%s22272_s9 + $0x50] sm:$0xff]  ;;  %v414_v7 = vld [vmem:[%s22272_s9 + $0x58] sm:$0xff]  ;;  %v416_v8 = vld [vmem:[%s22272_s9 + $0x80] sm:$0xff] }
  0x2f   : > { %405 = vst [vmem:[%s22277_s15 + $0x10] sm:$0xff] %v404_v2  ;;  %v418_v9 = vld [vmem:[%s22272_s9 + $0x88] sm:$0xff]  ;;  %v420_v10 = vld [vmem:[%s22272_s9 + $0x90] sm:$0xff]  ;;  %v422_v11 = vld [vmem:[%s22272_s9 + $0x98] sm:$0xff] }
  0x30   : > { %407 = vst [vmem:[%s22277_s15 + $0x18] sm:$0xff] %v406_v3  ;;  %v424_v12 = vld [vmem:[%s22272_s9 + $0xc0] sm:$0xff]  ;;  %v426_v13 = vld [vmem:[%s22272_s9 + $0xc8] sm:$0xff]  ;;  %v428_v14 = vld [vmem:[%s22272_s9 + $0xd0] sm:$0xff] }
  0x31   : > { %409 = vst [vmem:[%s22277_s15 + $0x20] sm:$0xff] %v408_v4  ;;  %v430_v15 = vld [vmem:[%s22272_s9 + $0xd8] sm:$0xff]  ;;  %v432_v16 = vld [vmem:[%s22272_s9 + $0x100] sm:$0xff]  ;;  %v434_v17 = vld [vmem:[%s22272_s9 + $0x108] sm:$0xff] }
  0x32   : > { %411 = vst [vmem:[%s22277_s15 + $0x28] sm:$0xff] %v410_v5  ;;  %v436_v18 = vld [vmem:[%s22272_s9 + $0x110] sm:$0xff]  ;;  %v438_v19 = vld [vmem:[%s22272_s9 + $0x118] sm:$0xff]  ;;  %v440_v20 = vld [vmem:[%s22272_s9 + $0x140] sm:$0xff] }
  0x33   : > { %413 = vst [vmem:[%s22277_s15 + $0x30] sm:$0xff] %v412_v6  ;;  %v442_v21 = vld [vmem:[%s22272_s9 + $0x148] sm:$0xff]  ;;  %v444_v22 = vld [vmem:[%s22272_s9 + $0x150] sm:$0xff]  ;;  %v446_v23 = vld [vmem:[%s22272_s9 + $0x158] sm:$0xff] }
  0x34   : > { %415 = vst [vmem:[%s22277_s15 + $0x38] sm:$0xff] %v414_v7  ;;  %v448_v24 = vld [vmem:[%s22272_s9 + $0x180] sm:$0xff]  ;;  %v450_v25 = vld [vmem:[%s22272_s9 + $0x188] sm:$0xff]  ;;  %v452_v26 = vld [vmem:[%s22272_s9 + $0x190] sm:$0xff] }
  0x35   : > { %417 = vst [vmem:[%s22277_s15 + $0x40] sm:$0xff] %v416_v8  ;;  %v454_v27 = vld [vmem:[%s22272_s9 + $0x198] sm:$0xff]  ;;  %v456_v28 = vld [vmem:[%s22272_s9 + $0x1c0] sm:$0xff]  ;;  %v458_v29 = vld [vmem:[%s22272_s9 + $0x1c8] sm:$0xff] }
  0x36   : > { %419 = vst [vmem:[%s22277_s15 + $0x48] sm:$0xff] %v418_v9  ;;  %v460_v30 = vld [vmem:[%s22272_s9 + $0x1d0] sm:$0xff]  ;;  %v462_v31 = vld [vmem:[%s22272_s9 + $0x1d8] sm:$0xff]  ;;  %v464_v32 = vld [vmem:[%s22272_s9 + $0x200] sm:$0xff] }
  0x37   : > { %421 = vst [vmem:[%s22277_s15 + $0x50] sm:$0xff] %v420_v10  ;;  %v466_v33 = vld [vmem:[%s22272_s9 + $0x208] sm:$0xff]  ;;  %v468_v34 = vld [vmem:[%s22272_s9 + $0x210] sm:$0xff]  ;;  %v470_v35 = vld [vmem:[%s22272_s9 + $0x218] sm:$0xff] }
  0x38   : > { %423 = vst [vmem:[%s22277_s15 + $0x58] sm:$0xff] %v422_v11  ;;  %v472_v36 = vld [vmem:[%s22272_s9 + $0x240] sm:$0xff]  ;;  %v474_v37 = vld [vmem:[%s22272_s9 + $0x248] sm:$0xff]  ;;  %v476_v38 = vld [vmem:[%s22272_s9 + $0x250] sm:$0xff] }
  0x39   : > { %425 = vst [vmem:[%s22277_s15 + $0x60] sm:$0xff] %v424_v12  ;;  %v478_v39 = vld [vmem:[%s22272_s9 + $0x258] sm:$0xff]  ;;  %v480_v40 = vld [vmem:[%s22272_s9 + $0x280] sm:$0xff]  ;;  %v482_v41 = vld [vmem:[%s22272_s9 + $0x288] sm:$0xff] }
  0x3a   : > { %427 = vst [vmem:[%s22277_s15 + $0x68] sm:$0xff] %v426_v13  ;;  %v484_v42 = vld [vmem:[%s22272_s9 + $0x290] sm:$0xff]  ;;  %v486_v43 = vld [vmem:[%s22272_s9 + $0x298] sm:$0xff]  ;;  %v488_v44 = vld [vmem:[%s22272_s9 + $0x2c0] sm:$0xff] }
  0x3b   : > { %429 = vst [vmem:[%s22277_s15 + $0x70] sm:$0xff] %v428_v14  ;;  %v490_v45 = vld [vmem:[%s22272_s9 + $0x2c8] sm:$0xff]  ;;  %v492_v46 = vld [vmem:[%s22272_s9 + $0x2d0] sm:$0xff]  ;;  %v494_v47 = vld [vmem:[%s22272_s9 + $0x2d8] sm:$0xff] }
  0x3c   : > { %431 = vst [vmem:[%s22277_s15 + $0x78] sm:$0xff] %v430_v15  ;;  %v496_v48 = vld [vmem:[%s22272_s9 + $0x300] sm:$0xff]  ;;  %v498_v49 = vld [vmem:[%s22272_s9 + $0x308] sm:$0xff]  ;;  %v500_v50 = vld [vmem:[%s22272_s9 + $0x310] sm:$0xff] }
  0x3d   : > { %433 = vst [vmem:[%s22277_s15 + $0x80] sm:$0xff] %v432_v16  ;;  %v502_v51 = vld [vmem:[%s22272_s9 + $0x318] sm:$0xff]  ;;  %v504_v52 = vld [vmem:[%s22272_s9 + $0x340] sm:$0xff]  ;;  %v506_v53 = vld [vmem:[%s22272_s9 + $0x348] sm:$0xff] }
  0x3e   : > { %435 = vst [vmem:[%s22277_s15 + $0x88] sm:$0xff] %v434_v17  ;;  %v508_v54 = vld [vmem:[%s22272_s9 + $0x350] sm:$0xff]  ;;  %v510_v55 = vld [vmem:[%s22272_s9 + $0x358] sm:$0xff]  ;;  %v512_v56 = vld [vmem:[%s22272_s9 + $0x380] sm:$0xff] }
  0x3f   : > { %437 = vst [vmem:[%s22277_s15 + $0x90] sm:$0xff] %v436_v18  ;;  %v514_v57 = vld [vmem:[%s22272_s9 + $0x388] sm:$0xff]  ;;  %v516_v58 = vld [vmem:[%s22272_s9 + $0x390] sm:$0xff]  ;;  %v518_v59 = vld [vmem:[%s22272_s9 + $0x398] sm:$0xff] }
  0x40   : > { %439 = vst [vmem:[%s22277_s15 + $0x98] sm:$0xff] %v438_v19  ;;  %v520_v60 = vld [vmem:[%s22272_s9 + $0x3c0] sm:$0xff]  ;;  %v522_v61 = vld [vmem:[%s22272_s9 + $0x3c8] sm:$0xff]  ;;  %v524_v62 = vld [vmem:[%s22272_s9 + $0x3d0] sm:$0xff] }
  0x41   : > { %441 = vst [vmem:[%s22277_s15 + $0xa0] sm:$0xff] %v440_v20  ;;  %v526_v63 = vld [vmem:[%s22272_s9 + $0x3d8] sm:$0xff]  ;;  %v528_v0 = vld [vmem:[%s22272_s9 + $0x400] sm:$0xff]  ;;  %v530_v1 = vld [vmem:[%s22272_s9 + $0x408] sm:$0xff] }
  0x42   : > { %443 = vst [vmem:[%s22277_s15 + $0xa8] sm:$0xff] %v442_v21  ;;  %v532_v2 = vld [vmem:[%s22272_s9 + $0x410] sm:$0xff]  ;;  %v534_v3 = vld [vmem:[%s22272_s9 + $0x418] sm:$0xff]  ;;  %v536_v4 = vld [vmem:[%s22272_s9 + $0x440] sm:$0xff] }
  0x43   : > { %445 = vst [vmem:[%s22277_s15 + $0xb0] sm:$0xff] %v444_v22  ;;  %v538_v5 = vld [vmem:[%s22272_s9 + $0x448] sm:$0xff]  ;;  %v540_v6 = vld [vmem:[%s22272_s9 + $0x450] sm:$0xff]  ;;  %v542_v7 = vld [vmem:[%s22272_s9 + $0x458] sm:$0xff] }
  0x44   : > { %447 = vst [vmem:[%s22277_s15 + $0xb8] sm:$0xff] %v446_v23  ;;  %v544_v8 = vld [vmem:[%s22272_s9 + $0x480] sm:$0xff]  ;;  %v546_v9 = vld [vmem:[%s22272_s9 + $0x488] sm:$0xff]  ;;  %v548_v10 = vld [vmem:[%s22272_s9 + $0x490] sm:$0xff] }
  0x45   : > { %449 = vst [vmem:[%s22277_s15 + $0xc0] sm:$0xff] %v448_v24  ;;  %v550_v11 = vld [vmem:[%s22272_s9 + $0x498] sm:$0xff]  ;;  %v552_v12 = vld [vmem:[%s22272_s9 + $0x4c0] sm:$0xff]  ;;  %v554_v13 = vld [vmem:[%s22272_s9 + $0x4c8] sm:$0xff] }
  0x46   : > { %451 = vst [vmem:[%s22277_s15 + $0xc8] sm:$0xff] %v450_v25  ;;  %v556_v14 = vld [vmem:[%s22272_s9 + $0x4d0] sm:$0xff]  ;;  %v558_v15 = vld [vmem:[%s22272_s9 + $0x4d8] sm:$0xff]  ;;  %v560_v16 = vld [vmem:[%s22272_s9 + $0x500] sm:$0xff] }
  0x47   : > { %453 = vst [vmem:[%s22277_s15 + $0xd0] sm:$0xff] %v452_v26  ;;  %v562_v17 = vld [vmem:[%s22272_s9 + $0x508] sm:$0xff]  ;;  %v564_v18 = vld [vmem:[%s22272_s9 + $0x510] sm:$0xff]  ;;  %v566_v19 = vld [vmem:[%s22272_s9 + $0x518] sm:$0xff] }
  0x48   : > { %455 = vst [vmem:[%s22277_s15 + $0xd8] sm:$0xff] %v454_v27  ;;  %v568_v20 = vld [vmem:[%s22272_s9 + $0x540] sm:$0xff]  ;;  %v570_v21 = vld [vmem:[%s22272_s9 + $0x548] sm:$0xff]  ;;  %v572_v22 = vld [vmem:[%s22272_s9 + $0x550] sm:$0xff] }
  0x49   : > { %457 = vst [vmem:[%s22277_s15 + $0xe0] sm:$0xff] %v456_v28  ;;  %v574_v23 = vld [vmem:[%s22272_s9 + $0x558] sm:$0xff]  ;;  %v576_v24 = vld [vmem:[%s22272_s9 + $0x580] sm:$0xff]  ;;  %v578_v25 = vld [vmem:[%s22272_s9 + $0x588] sm:$0xff] }
  0x4a   : > { %459 = vst [vmem:[%s22277_s15 + $0xe8] sm:$0xff] %v458_v29  ;;  %v580_v26 = vld [vmem:[%s22272_s9 + $0x590] sm:$0xff]  ;;  %v582_v27 = vld [vmem:[%s22272_s9 + $0x598] sm:$0xff]  ;;  %v584_v28 = vld [vmem:[%s22272_s9 + $0x5c0] sm:$0xff] }
  0x4b   : > { %461 = vst [vmem:[%s22277_s15 + $0xf0] sm:$0xff] %v460_v30  ;;  %v586_v29 = vld [vmem:[%s22272_s9 + $0x5c8] sm:$0xff]  ;;  %v588_v30 = vld [vmem:[%s22272_s9 + $0x5d0] sm:$0xff] }
  0x4c   : > { %463 = vst [vmem:[%s22277_s15 + $0xf8] sm:$0xff] %v462_v31  ;;  %v590_v31 = vld [vmem:[%s22272_s9 + $0x5d8] sm:$0xff] }
  0x4d   : > { %465 = vst [vmem:[%s22277_s15 + $0x100] sm:$0xff] %v464_v32  ;;  %v592_v32 = vld [vmem:[%s22272_s9 + $0x600] sm:$0xff] }
  0x4e   : > { %467 = vst [vmem:[%s22277_s15 + $0x108] sm:$0xff] %v466_v33  ;;  %v594_v33 = vld [vmem:[%s22272_s9 + $0x608] sm:$0xff] }
  0x4f   : > { %469 = vst [vmem:[%s22277_s15 + $0x110] sm:$0xff] %v468_v34  ;;  %v596_v34 = vld [vmem:[%s22272_s9 + $0x610] sm:$0xff] }
  0x50   : > { %471 = vst [vmem:[%s22277_s15 + $0x118] sm:$0xff] %v470_v35  ;;  %v598_v35 = vld [vmem:[%s22272_s9 + $0x618] sm:$0xff] }
  0x51   : > { %473 = vst [vmem:[%s22277_s15 + $0x120] sm:$0xff] %v472_v36  ;;  %v600_v36 = vld [vmem:[%s22272_s9 + $0x640] sm:$0xff] }
  0x52   : > { %475 = vst [vmem:[%s22277_s15 + $0x128] sm:$0xff] %v474_v37  ;;  %v602_v37 = vld [vmem:[%s22272_s9 + $0x648] sm:$0xff] }
  0x53   : > { %477 = vst [vmem:[%s22277_s15 + $0x130] sm:$0xff] %v476_v38  ;;  %v604_v38 = vld [vmem:[%s22272_s9 + $0x650] sm:$0xff] }
  0x54   : > { %479 = vst [vmem:[%s22277_s15 + $0x138] sm:$0xff] %v478_v39  ;;  %v606_v39 = vld [vmem:[%s22272_s9 + $0x658] sm:$0xff] }
  0x55   : > { %481 = vst [vmem:[%s22277_s15 + $0x140] sm:$0xff] %v480_v40  ;;  %v608_v40 = vld [vmem:[%s22272_s9 + $0x680] sm:$0xff] }
  0x56   : > { %483 = vst [vmem:[%s22277_s15 + $0x148] sm:$0xff] %v482_v41  ;;  %v610_v41 = vld [vmem:[%s22272_s9 + $0x688] sm:$0xff] }
  0x57   : > { %485 = vst [vmem:[%s22277_s15 + $0x150] sm:$0xff] %v484_v42  ;;  %v612_v42 = vld [vmem:[%s22272_s9 + $0x690] sm:$0xff] }
  0x58   : > { %487 = vst [vmem:[%s22277_s15 + $0x158] sm:$0xff] %v486_v43  ;;  %v614_v43 = vld [vmem:[%s22272_s9 + $0x698] sm:$0xff] }
  0x59   : > { %489 = vst [vmem:[%s22277_s15 + $0x160] sm:$0xff] %v488_v44  ;;  %v616_v44 = vld [vmem:[%s22272_s9 + $0x6c0] sm:$0xff] }
  0x5a   : > { %491 = vst [vmem:[%s22277_s15 + $0x168] sm:$0xff] %v490_v45  ;;  %v618_v45 = vld [vmem:[%s22272_s9 + $0x6c8] sm:$0xff] }
  0x5b   : > { %493 = vst [vmem:[%s22277_s15 + $0x170] sm:$0xff] %v492_v46  ;;  %v620_v46 = vld [vmem:[%s22272_s9 + $0x6d0] sm:$0xff] }
  0x5c   : > { %495 = vst [vmem:[%s22277_s15 + $0x178] sm:$0xff] %v494_v47  ;;  %v622_v47 = vld [vmem:[%s22272_s9 + $0x6d8] sm:$0xff] }
  0x5d   : > { %497 = vst [vmem:[%s22277_s15 + $0x180] sm:$0xff] %v496_v48  ;;  %v624_v48 = vld [vmem:[%s22272_s9 + $0x700] sm:$0xff] }
  0x5e   : > { %499 = vst [vmem:[%s22277_s15 + $0x188] sm:$0xff] %v498_v49  ;;  %v626_v49 = vld [vmem:[%s22272_s9 + $0x708] sm:$0xff] }
  0x5f   : > { %501 = vst [vmem:[%s22277_s15 + $0x190] sm:$0xff] %v500_v50  ;;  %v628_v50 = vld [vmem:[%s22272_s9 + $0x710] sm:$0xff] }
  0x60   : > { %503 = vst [vmem:[%s22277_s15 + $0x198] sm:$0xff] %v502_v51  ;;  %v630_v51 = vld [vmem:[%s22272_s9 + $0x718] sm:$0xff] }
  0x61   : > { %505 = vst [vmem:[%s22277_s15 + $0x1a0] sm:$0xff] %v504_v52  ;;  %v632_v52 = vld [vmem:[%s22272_s9 + $0x740] sm:$0xff] }
  0x62   : > { %507 = vst [vmem:[%s22277_s15 + $0x1a8] sm:$0xff] %v506_v53  ;;  %v634_v53 = vld [vmem:[%s22272_s9 + $0x748] sm:$0xff] }
  0x63   : > { %509 = vst [vmem:[%s22277_s15 + $0x1b0] sm:$0xff] %v508_v54  ;;  %v636_v54 = vld [vmem:[%s22272_s9 + $0x750] sm:$0xff] }
  0x64   : > { %511 = vst [vmem:[%s22277_s15 + $0x1b8] sm:$0xff] %v510_v55  ;;  %v638_v55 = vld [vmem:[%s22272_s9 + $0x758] sm:$0xff] }
  0x65   : > { %513 = vst [vmem:[%s22277_s15 + $0x1c0] sm:$0xff] %v512_v56  ;;  %v640_v56 = vld [vmem:[%s22272_s9 + $0x780] sm:$0xff] }
  0x66   : > { %515 = vst [vmem:[%s22277_s15 + $0x1c8] sm:$0xff] %v514_v57  ;;  %v642_v57 = vld [vmem:[%s22272_s9 + $0x788] sm:$0xff] }
  0x67   : > { %517 = vst [vmem:[%s22277_s15 + $0x1d0] sm:$0xff] %v516_v58  ;;  %v644_v58 = vld [vmem:[%s22272_s9 + $0x790] sm:$0xff] }
  0x68   : > { %519 = vst [vmem:[%s22277_s15 + $0x1d8] sm:$0xff] %v518_v59  ;;  %v646_v59 = vld [vmem:[%s22272_s9 + $0x798] sm:$0xff] }
  0x69   : > { %521 = vst [vmem:[%s22277_s15 + $0x1e0] sm:$0xff] %v520_v60  ;;  %v648_v60 = vld [vmem:[%s22272_s9 + $0x7c0] sm:$0xff] }
  0x6a   : > { %523 = vst [vmem:[%s22277_s15 + $0x1e8] sm:$0xff] %v522_v61  ;;  %v650_v61 = vld [vmem:[%s22272_s9 + $0x7c8] sm:$0xff] }
  0x6b   : > { %525 = vst [vmem:[%s22277_s15 + $0x1f0] sm:$0xff] %v524_v62  ;;  %v652_v62 = vld [vmem:[%s22272_s9 + $0x7d0] sm:$0xff] }
  0x6c   : > { %527 = vst [vmem:[%s22277_s15 + $0x1f8] sm:$0xff] %v526_v63  ;;  %v654_v63 = vld [vmem:[%s22272_s9 + $0x7d8] sm:$0xff] }
  0x6d   : > { %529 = vst [vmem:[%s22277_s15 + $0x200] sm:$0xff] %v528_v0  ;;  %v656_v0 = vld [vmem:[%s22272_s9 + $0x800] sm:$0xff] }
  0x6e   : > { %531 = vst [vmem:[%s22277_s15 + $0x208] sm:$0xff] %v530_v1  ;;  %v658_v1 = vld [vmem:[%s22272_s9 + $0x808] sm:$0xff] }
  0x6f   : > { %533 = vst [vmem:[%s22277_s15 + $0x210] sm:$0xff] %v532_v2  ;;  %v660_v2 = vld [vmem:[%s22272_s9 + $0x810] sm:$0xff] }
  0x70   : > { %535 = vst [vmem:[%s22277_s15 + $0x218] sm:$0xff] %v534_v3  ;;  %v662_v3 = vld [vmem:[%s22272_s9 + $0x818] sm:$0xff] }
  0x71   : > { %537 = vst [vmem:[%s22277_s15 + $0x220] sm:$0xff] %v536_v4  ;;  %v664_v4 = vld [vmem:[%s22272_s9 + $0x840] sm:$0xff] }
  0x72   : > { %539 = vst [vmem:[%s22277_s15 + $0x228] sm:$0xff] %v538_v5  ;;  %v666_v5 = vld [vmem:[%s22272_s9 + $0x848] sm:$0xff] }
  0x73   : > { %541 = vst [vmem:[%s22277_s15 + $0x230] sm:$0xff] %v540_v6  ;;  %v668_v6 = vld [vmem:[%s22272_s9 + $0x850] sm:$0xff] }
  0x74   : > { %543 = vst [vmem:[%s22277_s15 + $0x238] sm:$0xff] %v542_v7  ;;  %v670_v7 = vld [vmem:[%s22272_s9 + $0x858] sm:$0xff] }
  0x75   : > { %545 = vst [vmem:[%s22277_s15 + $0x240] sm:$0xff] %v544_v8  ;;  %v672_v8 = vld [vmem:[%s22272_s9 + $0x880] sm:$0xff] }
  0x76   : > { %547 = vst [vmem:[%s22277_s15 + $0x248] sm:$0xff] %v546_v9  ;;  %v674_v9 = vld [vmem:[%s22272_s9 + $0x888] sm:$0xff] }
  0x77   : > { %549 = vst [vmem:[%s22277_s15 + $0x250] sm:$0xff] %v548_v10  ;;  %v676_v10 = vld [vmem:[%s22272_s9 + $0x890] sm:$0xff] }
  0x78   : > { %551 = vst [vmem:[%s22277_s15 + $0x258] sm:$0xff] %v550_v11  ;;  %v678_v11 = vld [vmem:[%s22272_s9 + $0x898] sm:$0xff] }
  0x79   : > { %553 = vst [vmem:[%s22277_s15 + $0x260] sm:$0xff] %v552_v12  ;;  %v680_v12 = vld [vmem:[%s22272_s9 + $0x8c0] sm:$0xff] }
  0x7a   : > { %555 = vst [vmem:[%s22277_s15 + $0x268] sm:$0xff] %v554_v13  ;;  %v682_v13 = vld [vmem:[%s22272_s9 + $0x8c8] sm:$0xff] }
  0x7b   : > { %557 = vst [vmem:[%s22277_s15 + $0x270] sm:$0xff] %v556_v14  ;;  %v684_v14 = vld [vmem:[%s22272_s9 + $0x8d0] sm:$0xff] }
  0x7c   : > { %559 = vst [vmem:[%s22277_s15 + $0x278] sm:$0xff] %v558_v15  ;;  %v686_v15 = vld [vmem:[%s22272_s9 + $0x8d8] sm:$0xff] }
  0x7d   : > { %561 = vst [vmem:[%s22277_s15 + $0x280] sm:$0xff] %v560_v16  ;;  %v688_v16 = vld [vmem:[%s22272_s9 + $0x900] sm:$0xff] }
  0x7e   : > { %563 = vst [vmem:[%s22277_s15 + $0x288] sm:$0xff] %v562_v17  ;;  %v690_v17 = vld [vmem:[%s22272_s9 + $0x908] sm:$0xff] }
  0x7f   : > { %565 = vst [vmem:[%s22277_s15 + $0x290] sm:$0xff] %v564_v18  ;;  %v692_v18 = vld [vmem:[%s22272_s9 + $0x910] sm:$0xff] }
  0x80   : > { %567 = vst [vmem:[%s22277_s15 + $0x298] sm:$0xff] %v566_v19  ;;  %v694_v19 = vld [vmem:[%s22272_s9 + $0x918] sm:$0xff] }
  0x81   : > { %569 = vst [vmem:[%s22277_s15 + $0x2a0] sm:$0xff] %v568_v20  ;;  %v696_v20 = vld [vmem:[%s22272_s9 + $0x940] sm:$0xff] }
  0x82   : > { %571 = vst [vmem:[%s22277_s15 + $0x2a8] sm:$0xff] %v570_v21  ;;  %v698_v21 = vld [vmem:[%s22272_s9 + $0x948] sm:$0xff] }
  0x83   : > { %573 = vst [vmem:[%s22277_s15 + $0x2b0] sm:$0xff] %v572_v22  ;;  %v700_v22 = vld [vmem:[%s22272_s9 + $0x950] sm:$0xff] }
  0x84   : > { %575 = vst [vmem:[%s22277_s15 + $0x2b8] sm:$0xff] %v574_v23  ;;  %v702_v23 = vld [vmem:[%s22272_s9 + $0x958] sm:$0xff] }
  0x85   : > { %577 = vst [vmem:[%s22277_s15 + $0x2c0] sm:$0xff] %v576_v24  ;;  %v704_v24 = vld [vmem:[%s22272_s9 + $0x980] sm:$0xff] }
  0x86   : > { %579 = vst [vmem:[%s22277_s15 + $0x2c8] sm:$0xff] %v578_v25  ;;  %v706_v25 = vld [vmem:[%s22272_s9 + $0x988] sm:$0xff] }
  0x87   : > { %581 = vst [vmem:[%s22277_s15 + $0x2d0] sm:$0xff] %v580_v26  ;;  %v708_v26 = vld [vmem:[%s22272_s9 + $0x990] sm:$0xff] }
  0x88   : > { %583 = vst [vmem:[%s22277_s15 + $0x2d8] sm:$0xff] %v582_v27  ;;  %v710_v27 = vld [vmem:[%s22272_s9 + $0x998] sm:$0xff] }
  0x89   : > { %585 = vst [vmem:[%s22277_s15 + $0x2e0] sm:$0xff] %v584_v28  ;;  %v712_v28 = vld [vmem:[%s22272_s9 + $0x9c0] sm:$0xff] }
  0x8a   : > { %587 = vst [vmem:[%s22277_s15 + $0x2e8] sm:$0xff] %v586_v29  ;;  %v714_v29 = vld [vmem:[%s22272_s9 + $0x9c8] sm:$0xff] }
  0x8b   : > { %589 = vst [vmem:[%s22277_s15 + $0x2f0] sm:$0xff] %v588_v30  ;;  %v716_v30 = vld [vmem:[%s22272_s9 + $0x9d0] sm:$0xff] }
  0x8c   : > { %591 = vst [vmem:[%s22277_s15 + $0x2f8] sm:$0xff] %v590_v31  ;;  %v718_v31 = vld [vmem:[%s22272_s9 + $0x9d8] sm:$0xff] }
  0x8d   : > { %593 = vst [vmem:[%s22277_s15 + $0x300] sm:$0xff] %v592_v32  ;;  %v720_v32 = vld [vmem:[%s22272_s9 + $0xa00] sm:$0xff] }
  0x8e   : > { %595 = vst [vmem:[%s22277_s15 + $0x308] sm:$0xff] %v594_v33  ;;  %v722_v33 = vld [vmem:[%s22272_s9 + $0xa08] sm:$0xff] }
  0x8f   : > { %597 = vst [vmem:[%s22277_s15 + $0x310] sm:$0xff] %v596_v34  ;;  %v724_v34 = vld [vmem:[%s22272_s9 + $0xa10] sm:$0xff] }
  0x90   : > { %599 = vst [vmem:[%s22277_s15 + $0x318] sm:$0xff] %v598_v35  ;;  %v726_v35 = vld [vmem:[%s22272_s9 + $0xa18] sm:$0xff] }
  0x91   : > { %601 = vst [vmem:[%s22277_s15 + $0x320] sm:$0xff] %v600_v36  ;;  %v728_v36 = vld [vmem:[%s22272_s9 + $0xa40] sm:$0xff] }
  0x92   : > { %603 = vst [vmem:[%s22277_s15 + $0x328] sm:$0xff] %v602_v37  ;;  %v730_v37 = vld [vmem:[%s22272_s9 + $0xa48] sm:$0xff] }
  0x93   : > { %605 = vst [vmem:[%s22277_s15 + $0x330] sm:$0xff] %v604_v38  ;;  %v732_v38 = vld [vmem:[%s22272_s9 + $0xa50] sm:$0xff] }
  0x94   : > { %607 = vst [vmem:[%s22277_s15 + $0x338] sm:$0xff] %v606_v39  ;;  %v734_v39 = vld [vmem:[%s22272_s9 + $0xa58] sm:$0xff] }
  0x95   : > { %609 = vst [vmem:[%s22277_s15 + $0x340] sm:$0xff] %v608_v40  ;;  %v736_v40 = vld [vmem:[%s22272_s9 + $0xa80] sm:$0xff] }
  0x96   : > { %611 = vst [vmem:[%s22277_s15 + $0x348] sm:$0xff] %v610_v41  ;;  %v738_v41 = vld [vmem:[%s22272_s9 + $0xa88] sm:$0xff] }
  0x97   : > { %613 = vst [vmem:[%s22277_s15 + $0x350] sm:$0xff] %v612_v42  ;;  %v740_v42 = vld [vmem:[%s22272_s9 + $0xa90] sm:$0xff] }
  0x98   : > { %615 = vst [vmem:[%s22277_s15 + $0x358] sm:$0xff] %v614_v43  ;;  %v742_v43 = vld [vmem:[%s22272_s9 + $0xa98] sm:$0xff] }
  0x99   : > { %617 = vst [vmem:[%s22277_s15 + $0x360] sm:$0xff] %v616_v44  ;;  %v744_v44 = vld [vmem:[%s22272_s9 + $0xac0] sm:$0xff] }
  0x9a   : > { %619 = vst [vmem:[%s22277_s15 + $0x368] sm:$0xff] %v618_v45  ;;  %v746_v45 = vld [vmem:[%s22272_s9 + $0xac8] sm:$0xff] }
  0x9b   : > { %621 = vst [vmem:[%s22277_s15 + $0x370] sm:$0xff] %v620_v46  ;;  %v748_v46 = vld [vmem:[%s22272_s9 + $0xad0] sm:$0xff] }
  0x9c   : > { %623 = vst [vmem:[%s22277_s15 + $0x378] sm:$0xff] %v622_v47  ;;  %v750_v47 = vld [vmem:[%s22272_s9 + $0xad8] sm:$0xff] }
  0x9d   : > { %625 = vst [vmem:[%s22277_s15 + $0x380] sm:$0xff] %v624_v48  ;;  %v752_v48 = vld [vmem:[%s22272_s9 + $0xb00] sm:$0xff] }
  0x9e   : > { %627 = vst [vmem:[%s22277_s15 + $0x388] sm:$0xff] %v626_v49  ;;  %v754_v49 = vld [vmem:[%s22272_s9 + $0xb08] sm:$0xff] }
  0x9f   : > { %629 = vst [vmem:[%s22277_s15 + $0x390] sm:$0xff] %v628_v50  ;;  %v756_v50 = vld [vmem:[%s22272_s9 + $0xb10] sm:$0xff] }
  0xa0   : > { %631 = vst [vmem:[%s22277_s15 + $0x398] sm:$0xff] %v630_v51  ;;  %v758_v51 = vld [vmem:[%s22272_s9 + $0xb18] sm:$0xff] }
  0xa1   : > { %633 = vst [vmem:[%s22277_s15 + $0x3a0] sm:$0xff] %v632_v52  ;;  %v760_v52 = vld [vmem:[%s22272_s9 + $0xb40] sm:$0xff] }
  0xa2   : > { %635 = vst [vmem:[%s22277_s15 + $0x3a8] sm:$0xff] %v634_v53  ;;  %v762_v53 = vld [vmem:[%s22272_s9 + $0xb48] sm:$0xff] }
  0xa3   : > { %637 = vst [vmem:[%s22277_s15 + $0x3b0] sm:$0xff] %v636_v54  ;;  %v764_v54 = vld [vmem:[%s22272_s9 + $0xb50] sm:$0xff] }
  0xa4   : > { %639 = vst [vmem:[%s22277_s15 + $0x3b8] sm:$0xff] %v638_v55  ;;  %v766_v55 = vld [vmem:[%s22272_s9 + $0xb58] sm:$0xff] }
  0xa5   : > { %641 = vst [vmem:[%s22277_s15 + $0x3c0] sm:$0xff] %v640_v56  ;;  %v768_v56 = vld [vmem:[%s22272_s9 + $0xb80] sm:$0xff] }
  0xa6   : > { %643 = vst [vmem:[%s22277_s15 + $0x3c8] sm:$0xff] %v642_v57  ;;  %v770_v57 = vld [vmem:[%s22272_s9 + $0xb88] sm:$0xff] }
  0xa7   : > { %645 = vst [vmem:[%s22277_s15 + $0x3d0] sm:$0xff] %v644_v58  ;;  %v772_v58 = vld [vmem:[%s22272_s9 + $0xb90] sm:$0xff] }
  0xa8   : > { %647 = vst [vmem:[%s22277_s15 + $0x3d8] sm:$0xff] %v646_v59  ;;  %v774_v59 = vld [vmem:[%s22272_s9 + $0xb98] sm:$0xff] }
  0xa9   : > { %649 = vst [vmem:[%s22277_s15 + $0x3e0] sm:$0xff] %v648_v60  ;;  %v776_v60 = vld [vmem:[%s22272_s9 + $0xbc0] sm:$0xff] }
  0xaa   : > { %651 = vst [vmem:[%s22277_s15 + $0x3e8] sm:$0xff] %v650_v61  ;;  %v778_v61 = vld [vmem:[%s22272_s9 + $0xbc8] sm:$0xff] }
  0xab   : > { %653 = vst [vmem:[%s22277_s15 + $0x3f0] sm:$0xff] %v652_v62  ;;  %v780_v62 = vld [vmem:[%s22272_s9 + $0xbd0] sm:$0xff] }
  0xac   : > { %655 = vst [vmem:[%s22277_s15 + $0x3f8] sm:$0xff] %v654_v63  ;;  %v782_v63 = vld [vmem:[%s22272_s9 + $0xbd8] sm:$0xff] }
  0xad   : > { %657 = vst [vmem:[%s22277_s15 + $0x400] sm:$0xff] %v656_v0  ;;  %v784_v0 = vld [vmem:[%s22272_s9 + $0xc00] sm:$0xff] }
  0xae   : > { %659 = vst [vmem:[%s22277_s15 + $0x408] sm:$0xff] %v658_v1  ;;  %v786_v1 = vld [vmem:[%s22272_s9 + $0xc08] sm:$0xff] }
  0xaf   : > { %661 = vst [vmem:[%s22277_s15 + $0x410] sm:$0xff] %v660_v2  ;;  %v788_v2 = vld [vmem:[%s22272_s9 + $0xc10] sm:$0xff] }
  0xb0   : > { %663 = vst [vmem:[%s22277_s15 + $0x418] sm:$0xff] %v662_v3  ;;  %v790_v3 = vld [vmem:[%s22272_s9 + $0xc18] sm:$0xff] }
  0xb1   : > { %665 = vst [vmem:[%s22277_s15 + $0x420] sm:$0xff] %v664_v4  ;;  %v792_v4 = vld [vmem:[%s22272_s9 + $0xc40] sm:$0xff] }
  0xb2   : > { %667 = vst [vmem:[%s22277_s15 + $0x428] sm:$0xff] %v666_v5  ;;  %v794_v5 = vld [vmem:[%s22272_s9 + $0xc48] sm:$0xff] }
  0xb3   : > { %669 = vst [vmem:[%s22277_s15 + $0x430] sm:$0xff] %v668_v6  ;;  %v796_v6 = vld [vmem:[%s22272_s9 + $0xc50] sm:$0xff] }
  0xb4   : > { %671 = vst [vmem:[%s22277_s15 + $0x438] sm:$0xff] %v670_v7  ;;  %v798_v7 = vld [vmem:[%s22272_s9 + $0xc58] sm:$0xff] }
  0xb5   : > { %673 = vst [vmem:[%s22277_s15 + $0x440] sm:$0xff] %v672_v8  ;;  %v800_v8 = vld [vmem:[%s22272_s9 + $0xc80] sm:$0xff] }
  0xb6   : > { %675 = vst [vmem:[%s22277_s15 + $0x448] sm:$0xff] %v674_v9  ;;  %v802_v9 = vld [vmem:[%s22272_s9 + $0xc88] sm:$0xff] }
  0xb7   : > { %677 = vst [vmem:[%s22277_s15 + $0x450] sm:$0xff] %v676_v10  ;;  %v804_v10 = vld [vmem:[%s22272_s9 + $0xc90] sm:$0xff] }
  0xb8   : > { %679 = vst [vmem:[%s22277_s15 + $0x458] sm:$0xff] %v678_v11  ;;  %v806_v11 = vld [vmem:[%s22272_s9 + $0xc98] sm:$0xff] }
  0xb9   : > { %681 = vst [vmem:[%s22277_s15 + $0x460] sm:$0xff] %v680_v12  ;;  %v808_v12 = vld [vmem:[%s22272_s9 + $0xcc0] sm:$0xff] }
  0xba   : > { %683 = vst [vmem:[%s22277_s15 + $0x468] sm:$0xff] %v682_v13  ;;  %v810_v13 = vld [vmem:[%s22272_s9 + $0xcc8] sm:$0xff] }
  0xbb   : > { %685 = vst [vmem:[%s22277_s15 + $0x470] sm:$0xff] %v684_v14  ;;  %v812_v14 = vld [vmem:[%s22272_s9 + $0xcd0] sm:$0xff] }
  0xbc   : > { %687 = vst [vmem:[%s22277_s15 + $0x478] sm:$0xff] %v686_v15  ;;  %v814_v15 = vld [vmem:[%s22272_s9 + $0xcd8] sm:$0xff] }
  0xbd   : > { %689 = vst [vmem:[%s22277_s15 + $0x480] sm:$0xff] %v688_v16  ;;  %v816_v16 = vld [vmem:[%s22272_s9 + $0xd00] sm:$0xff] }
  0xbe   : > { %691 = vst [vmem:[%s22277_s15 + $0x488] sm:$0xff] %v690_v17  ;;  %v818_v17 = vld [vmem:[%s22272_s9 + $0xd08] sm:$0xff] }
  0xbf   : > { %693 = vst [vmem:[%s22277_s15 + $0x490] sm:$0xff] %v692_v18  ;;  %v820_v18 = vld [vmem:[%s22272_s9 + $0xd10] sm:$0xff] }
  0xc0   : > { %695 = vst [vmem:[%s22277_s15 + $0x498] sm:$0xff] %v694_v19  ;;  %v822_v19 = vld [vmem:[%s22272_s9 + $0xd18] sm:$0xff] }
  0xc1   : > { %697 = vst [vmem:[%s22277_s15 + $0x4a0] sm:$0xff] %v696_v20  ;;  %v824_v20 = vld [vmem:[%s22272_s9 + $0xd40] sm:$0xff] }
  0xc2   : > { %699 = vst [vmem:[%s22277_s15 + $0x4a8] sm:$0xff] %v698_v21  ;;  %v826_v21 = vld [vmem:[%s22272_s9 + $0xd48] sm:$0xff] }
  0xc3   : > { %701 = vst [vmem:[%s22277_s15 + $0x4b0] sm:$0xff] %v700_v22  ;;  %v828_v22 = vld [vmem:[%s22272_s9 + $0xd50] sm:$0xff] }
  0xc4   : > { %703 = vst [vmem:[%s22277_s15 + $0x4b8] sm:$0xff] %v702_v23  ;;  %v830_v23 = vld [vmem:[%s22272_s9 + $0xd58] sm:$0xff] }
  0xc5   : > { %705 = vst [vmem:[%s22277_s15 + $0x4c0] sm:$0xff] %v704_v24  ;;  %v832_v24 = vld [vmem:[%s22272_s9 + $0xd80] sm:$0xff] }
  0xc6   : > { %707 = vst [vmem:[%s22277_s15 + $0x4c8] sm:$0xff] %v706_v25  ;;  %v834_v25 = vld [vmem:[%s22272_s9 + $0xd88] sm:$0xff] }
  0xc7   : > { %709 = vst [vmem:[%s22277_s15 + $0x4d0] sm:$0xff] %v708_v26  ;;  %v836_v26 = vld [vmem:[%s22272_s9 + $0xd90] sm:$0xff] }
  0xc8   : > { %711 = vst [vmem:[%s22277_s15 + $0x4d8] sm:$0xff] %v710_v27  ;;  %v838_v27 = vld [vmem:[%s22272_s9 + $0xd98] sm:$0xff] }
  0xc9   : > { %713 = vst [vmem:[%s22277_s15 + $0x4e0] sm:$0xff] %v712_v28  ;;  %v840_v28 = vld [vmem:[%s22272_s9 + $0xdc0] sm:$0xff] }
  0xca   : > { %715 = vst [vmem:[%s22277_s15 + $0x4e8] sm:$0xff] %v714_v29  ;;  %v842_v29 = vld [vmem:[%s22272_s9 + $0xdc8] sm:$0xff] }
  0xcb   : > { %717 = vst [vmem:[%s22277_s15 + $0x4f0] sm:$0xff] %v716_v30  ;;  %v844_v30 = vld [vmem:[%s22272_s9 + $0xdd0] sm:$0xff] }
  0xcc   : > { %719 = vst [vmem:[%s22277_s15 + $0x4f8] sm:$0xff] %v718_v31  ;;  %v846_v31 = vld [vmem:[%s22272_s9 + $0xdd8] sm:$0xff] }
  0xcd   : > { %721 = vst [vmem:[%s22277_s15 + $0x500] sm:$0xff] %v720_v32  ;;  %v848_v32 = vld [vmem:[%s22272_s9 + $0xe00] sm:$0xff] }
  0xce   : > { %723 = vst [vmem:[%s22277_s15 + $0x508] sm:$0xff] %v722_v33  ;;  %v850_v33 = vld [vmem:[%s22272_s9 + $0xe08] sm:$0xff] }
  0xcf   : > { %725 = vst [vmem:[%s22277_s15 + $0x510] sm:$0xff] %v724_v34  ;;  %v852_v34 = vld [vmem:[%s22272_s9 + $0xe10] sm:$0xff] }
  0xd0   : > { %727 = vst [vmem:[%s22277_s15 + $0x518] sm:$0xff] %v726_v35  ;;  %v854_v35 = vld [vmem:[%s22272_s9 + $0xe18] sm:$0xff] }
  0xd1   : > { %729 = vst [vmem:[%s22277_s15 + $0x520] sm:$0xff] %v728_v36  ;;  %v856_v36 = vld [vmem:[%s22272_s9 + $0xe40] sm:$0xff] }
  0xd2   : > { %731 = vst [vmem:[%s22277_s15 + $0x528] sm:$0xff] %v730_v37  ;;  %v858_v37 = vld [vmem:[%s22272_s9 + $0xe48] sm:$0xff] }
  0xd3   : > { %733 = vst [vmem:[%s22277_s15 + $0x530] sm:$0xff] %v732_v38  ;;  %v860_v38 = vld [vmem:[%s22272_s9 + $0xe50] sm:$0xff] }
  0xd4   : > { %735 = vst [vmem:[%s22277_s15 + $0x538] sm:$0xff] %v734_v39  ;;  %v862_v39 = vld [vmem:[%s22272_s9 + $0xe58] sm:$0xff] }
  0xd5   : > { %737 = vst [vmem:[%s22277_s15 + $0x540] sm:$0xff] %v736_v40  ;;  %v864_v40 = vld [vmem:[%s22272_s9 + $0xe80] sm:$0xff] }
  0xd6   : > { %739 = vst [vmem:[%s22277_s15 + $0x548] sm:$0xff] %v738_v41  ;;  %v866_v41 = vld [vmem:[%s22272_s9 + $0xe88] sm:$0xff] }
  0xd7   : > { %741 = vst [vmem:[%s22277_s15 + $0x550] sm:$0xff] %v740_v42  ;;  %v868_v42 = vld [vmem:[%s22272_s9 + $0xe90] sm:$0xff] }
  0xd8   : > { %743 = vst [vmem:[%s22277_s15 + $0x558] sm:$0xff] %v742_v43  ;;  %v870_v43 = vld [vmem:[%s22272_s9 + $0xe98] sm:$0xff] }
  0xd9   : > { %745 = vst [vmem:[%s22277_s15 + $0x560] sm:$0xff] %v744_v44  ;;  %v872_v44 = vld [vmem:[%s22272_s9 + $0xec0] sm:$0xff] }
  0xda   : > { %747 = vst [vmem:[%s22277_s15 + $0x568] sm:$0xff] %v746_v45  ;;  %v874_v45 = vld [vmem:[%s22272_s9 + $0xec8] sm:$0xff] }
  0xdb   : > { %749 = vst [vmem:[%s22277_s15 + $0x570] sm:$0xff] %v748_v46  ;;  %v876_v46 = vld [vmem:[%s22272_s9 + $0xed0] sm:$0xff] }
  0xdc   : > { %751 = vst [vmem:[%s22277_s15 + $0x578] sm:$0xff] %v750_v47  ;;  %v878_v47 = vld [vmem:[%s22272_s9 + $0xed8] sm:$0xff] }
  0xdd   : > { %753 = vst [vmem:[%s22277_s15 + $0x580] sm:$0xff] %v752_v48  ;;  %v880_v48 = vld [vmem:[%s22272_s9 + $0xf00] sm:$0xff] }
  0xde   : > { %755 = vst [vmem:[%s22277_s15 + $0x588] sm:$0xff] %v754_v49  ;;  %v882_v49 = vld [vmem:[%s22272_s9 + $0xf08] sm:$0xff] }
  0xdf   : > { %757 = vst [vmem:[%s22277_s15 + $0x590] sm:$0xff] %v756_v50  ;;  %v884_v50 = vld [vmem:[%s22272_s9 + $0xf10] sm:$0xff] }
  0xe0   : > { %759 = vst [vmem:[%s22277_s15 + $0x598] sm:$0xff] %v758_v51  ;;  %v886_v51 = vld [vmem:[%s22272_s9 + $0xf18] sm:$0xff] }
  0xe1   : > { %761 = vst [vmem:[%s22277_s15 + $0x5a0] sm:$0xff] %v760_v52  ;;  %v888_v52 = vld [vmem:[%s22272_s9 + $0xf40] sm:$0xff] }
  0xe2   : > { %763 = vst [vmem:[%s22277_s15 + $0x5a8] sm:$0xff] %v762_v53  ;;  %v890_v53 = vld [vmem:[%s22272_s9 + $0xf48] sm:$0xff] }
  0xe3   : > { %765 = vst [vmem:[%s22277_s15 + $0x5b0] sm:$0xff] %v764_v54  ;;  %v892_v54 = vld [vmem:[%s22272_s9 + $0xf50] sm:$0xff] }
  0xe4   : > { %767 = vst [vmem:[%s22277_s15 + $0x5b8] sm:$0xff] %v766_v55  ;;  %v894_v55 = vld [vmem:[%s22272_s9 + $0xf58] sm:$0xff] }
  0xe5   : > { %769 = vst [vmem:[%s22277_s15 + $0x5c0] sm:$0xff] %v768_v56  ;;  %v896_v56 = vld [vmem:[%s22272_s9 + $0xf80] sm:$0xff] }
  0xe6   : > { %771 = vst [vmem:[%s22277_s15 + $0x5c8] sm:$0xff] %v770_v57  ;;  %v898_v57 = vld [vmem:[%s22272_s9 + $0xf88] sm:$0xff] }
  0xe7   : > { %773 = vst [vmem:[%s22277_s15 + $0x5d0] sm:$0xff] %v772_v58  ;;  %v900_v58 = vld [vmem:[%s22272_s9 + $0xf90] sm:$0xff] }
  0xe8   : > { %775 = vst [vmem:[%s22277_s15 + $0x5d8] sm:$0xff] %v774_v59  ;;  %v902_v59 = vld [vmem:[%s22272_s9 + $0xf98] sm:$0xff] }
  0xe9   : > { %777 = vst [vmem:[%s22277_s15 + $0x5e0] sm:$0xff] %v776_v60  ;;  %v904_v60 = vld [vmem:[%s22272_s9 + $0xfc0] sm:$0xff] }
  0xea   : > { %779 = vst [vmem:[%s22277_s15 + $0x5e8] sm:$0xff] %v778_v61  ;;  %v906_v61 = vld [vmem:[%s22272_s9 + $0xfc8] sm:$0xff] }
  0xeb   : > { %781 = vst [vmem:[%s22277_s15 + $0x5f0] sm:$0xff] %v780_v62  ;;  %v908_v62 = vld [vmem:[%s22272_s9 + $0xfd0] sm:$0xff] }
  0xec   : > { %783 = vst [vmem:[%s22277_s15 + $0x5f8] sm:$0xff] %v782_v63  ;;  %v910_v63 = vld [vmem:[%s22272_s9 + $0xfd8] sm:$0xff] }
  0xed   : > { %785 = vst [vmem:[%s22277_s15 + $0x600] sm:$0xff] %v784_v0 }
  0xee   : > { %787 = vst [vmem:[%s22277_s15 + $0x608] sm:$0xff] %v786_v1 }
  0xef   : > { %789 = vst [vmem:[%s22277_s15 + $0x610] sm:$0xff] %v788_v2 }
  0xf0   : > { %791 = vst [vmem:[%s22277_s15 + $0x618] sm:$0xff] %v790_v3 }
  0xf1   : > { %793 = vst [vmem:[%s22277_s15 + $0x620] sm:$0xff] %v792_v4 }
  0xf2   : > { %795 = vst [vmem:[%s22277_s15 + $0x628] sm:$0xff] %v794_v5 }
  0xf3   : > { %797 = vst [vmem:[%s22277_s15 + $0x630] sm:$0xff] %v796_v6 }
  0xf4   : > { %799 = vst [vmem:[%s22277_s15 + $0x638] sm:$0xff] %v798_v7 }
  0xf5   : > { %801 = vst [vmem:[%s22277_s15 + $0x640] sm:$0xff] %v800_v8 }
  0xf6   : > { %803 = vst [vmem:[%s22277_s15 + $0x648] sm:$0xff] %v802_v9 }
  0xf7   : > { %805 = vst [vmem:[%s22277_s15 + $0x650] sm:$0xff] %v804_v10 }
  0xf8   : > { %807 = vst [vmem:[%s22277_s15 + $0x658] sm:$0xff] %v806_v11 }
  0xf9   : > { %809 = vst [vmem:[%s22277_s15 + $0x660] sm:$0xff] %v808_v12 }
  0xfa   : > { %811 = vst [vmem:[%s22277_s15 + $0x668] sm:$0xff] %v810_v13 }
  0xfb   : > { %813 = vst [vmem:[%s22277_s15 + $0x670] sm:$0xff] %v812_v14 }
  0xfc   : > { %815 = vst [vmem:[%s22277_s15 + $0x678] sm:$0xff] %v814_v15 }
  0xfd   : > { %817 = vst [vmem:[%s22277_s15 + $0x680] sm:$0xff] %v816_v16 }
  0xfe   : > { %819 = vst [vmem:[%s22277_s15 + $0x688] sm:$0xff] %v818_v17 }
  0xff   : > { %821 = vst [vmem:[%s22277_s15 + $0x690] sm:$0xff] %v820_v18 }
 0x100   : > { %823 = vst [vmem:[%s22277_s15 + $0x698] sm:$0xff] %v822_v19 }
 0x101   : > { %825 = vst [vmem:[%s22277_s15 + $0x6a0] sm:$0xff] %v824_v20 }
 0x102   : > { %827 = vst [vmem:[%s22277_s15 + $0x6a8] sm:$0xff] %v826_v21 }
 0x103   : > { %829 = vst [vmem:[%s22277_s15 + $0x6b0] sm:$0xff] %v828_v22 }
 0x104   : > { %831 = vst [vmem:[%s22277_s15 + $0x6b8] sm:$0xff] %v830_v23 }
 0x105   : > { %833 = vst [vmem:[%s22277_s15 + $0x6c0] sm:$0xff] %v832_v24 }
 0x106   : > { %835 = vst [vmem:[%s22277_s15 + $0x6c8] sm:$0xff] %v834_v25 }
 0x107   : > { %837 = vst [vmem:[%s22277_s15 + $0x6d0] sm:$0xff] %v836_v26 }
 0x108   : > { %839 = vst [vmem:[%s22277_s15 + $0x6d8] sm:$0xff] %v838_v27 }
 0x109   : > { %841 = vst [vmem:[%s22277_s15 + $0x6e0] sm:$0xff] %v840_v28 }
 0x10a   : > { %843 = vst [vmem:[%s22277_s15 + $0x6e8] sm:$0xff] %v842_v29 }
 0x10b   : > { %845 = vst [vmem:[%s22277_s15 + $0x6f0] sm:$0xff] %v844_v30 }
 0x10c   : > { %847 = vst [vmem:[%s22277_s15 + $0x6f8] sm:$0xff] %v846_v31 }
 0x10d   : > { %849 = vst [vmem:[%s22277_s15 + $0x700] sm:$0xff] %v848_v32 }
 0x10e   : > { %851 = vst [vmem:[%s22277_s15 + $0x708] sm:$0xff] %v850_v33 }
 0x10f   : > { %853 = vst [vmem:[%s22277_s15 + $0x710] sm:$0xff] %v852_v34 }
 0x110   : > { %855 = vst [vmem:[%s22277_s15 + $0x718] sm:$0xff] %v854_v35 }
 0x111   : > { %857 = vst [vmem:[%s22277_s15 + $0x720] sm:$0xff] %v856_v36 }
 0x112   : > { %859 = vst [vmem:[%s22277_s15 + $0x728] sm:$0xff] %v858_v37 }
 0x113   : > { %861 = vst [vmem:[%s22277_s15 + $0x730] sm:$0xff] %v860_v38 }
 0x114   : > { %863 = vst [vmem:[%s22277_s15 + $0x738] sm:$0xff] %v862_v39 }
 0x115   : > { %865 = vst [vmem:[%s22277_s15 + $0x740] sm:$0xff] %v864_v40 }
 0x116   : > { %867 = vst [vmem:[%s22277_s15 + $0x748] sm:$0xff] %v866_v41 }
 0x117   : > { %869 = vst [vmem:[%s22277_s15 + $0x750] sm:$0xff] %v868_v42 }
 0x118   : > { %871 = vst [vmem:[%s22277_s15 + $0x758] sm:$0xff] %v870_v43 }
 0x119   : > { %873 = vst [vmem:[%s22277_s15 + $0x760] sm:$0xff] %v872_v44 }
 0x11a   : > { %875 = vst [vmem:[%s22277_s15 + $0x768] sm:$0xff] %v874_v45 }
 0x11b   : > { %877 = vst [vmem:[%s22277_s15 + $0x770] sm:$0xff] %v876_v46 }
 0x11c   : > { %879 = vst [vmem:[%s22277_s15 + $0x778] sm:$0xff] %v878_v47 }
 0x11d   : > { %881 = vst [vmem:[%s22277_s15 + $0x780] sm:$0xff] %v880_v48 }
 0x11e   : > { %883 = vst [vmem:[%s22277_s15 + $0x788] sm:$0xff] %v882_v49 }
 0x11f   : > { %885 = vst [vmem:[%s22277_s15 + $0x790] sm:$0xff] %v884_v50 }
 0x120   : > { %887 = vst [vmem:[%s22277_s15 + $0x798] sm:$0xff] %v886_v51 }
 0x121   : > { %889 = vst [vmem:[%s22277_s15 + $0x7a0] sm:$0xff] %v888_v52 }
 0x122   : > { %891 = vst [vmem:[%s22277_s15 + $0x7a8] sm:$0xff] %v890_v53 }
 0x123   : > { %893 = vst [vmem:[%s22277_s15 + $0x7b0] sm:$0xff] %v892_v54 }
 0x124   : > { %895 = vst [vmem:[%s22277_s15 + $0x7b8] sm:$0xff] %v894_v55 }
 0x125   : > { %897 = vst [vmem:[%s22277_s15 + $0x7c0] sm:$0xff] %v896_v56 }
 0x126   : > { %899 = vst [vmem:[%s22277_s15 + $0x7c8] sm:$0xff] %v898_v57 }
 0x127   : > { %901 = vst [vmem:[%s22277_s15 + $0x7d0] sm:$0xff] %v900_v58 }
 0x128   : > { %903 = vst [vmem:[%s22277_s15 + $0x7d8] sm:$0xff] %v902_v59 }
 0x129   : > { %905 = vst [vmem:[%s22277_s15 + $0x7e0] sm:$0xff] %v904_v60 }
 0x12a   : > { %907 = vst [vmem:[%s22277_s15 + $0x7e8] sm:$0xff] %v906_v61 }
 0x12b   : > { %909 = vst [vmem:[%s22277_s15 + $0x7f0] sm:$0xff] %v908_v62 }
 0x12c   : > { %911 = vst [vmem:[%s22277_s15 + $0x7f8] sm:$0xff] %v910_v63 }
 0x12d PF: > { %s918_s16 = sand.u32 1, %s22106_s20   ;;  %s920_s17 = sand.u32 1, %s22102_s19  }
 0x12e   : > { %s14589_s12 = sshll.u32 %s920_s17, 3  ;;  %s14590_s14 = sshll.u32 %s22106_s20, 3 }
 0x12f   : > { %s926_s25 = scalar_lea.hbm %s26721_s6, %s14590_s14  ;;  %s922_s23 = scalar_lea.vmem [#allocation11], %s14589_s12 }
 0x130   : > { %s930_s29 = sshll.u32 %s922_s23, 4  ;;  %s928_s3 = sshll.u32 %s926_s25, 4  ;;  %s931_s29 = int_to_ptr.vmem [resolvable:$true] %s930_s29  ;;  %s929_s3 = int_to_ptr.hbm [resolvable:$true] %s928_s3 }
 0x131   : > { %s919_s11 = scalar_lea.sflag [#allocation6], %s918_s16  ;;  %s21996_s22 = sshra.s32 %s929_s3, 4  ;;  %s21997_s22 = int_to_ptr.hbm [resolvable:$true] %s21996_s22 }
 0x132   : > { %s21998_s30 = scalar_lea.hbm %s21997_s22, 8  ;;  %s22002_s20 = scalar_lea.hbm %s26721_s6, 16 }
 0x133   : > { %p21999_p0 = scmp.ne.s32.totalorder %s21997_s22, %s21998_s30  ;;  %p22003_p3 = scmp.lt.s32.totalorder %s21997_s22, %s26721_s6 }
 0x134   : > { %p22004_p6 = scmp.lt.s32.totalorder %s22002_s20, %s21998_s30 }
 0x135   : > { %p22000_p1 = pnand %p21999_p0, %p22213_p4 }
 0x136   : > { %p22005_p7 = por %p22004_p6, %p22003_p3 }
 0x137   : > { %p22001_p2 = pneg %p22000_p1 }
 0x139   : > { %p22006_p11 = pnand %p22005_p7, %p22001_p2 }
 0x13b   : > { %22009 = shalt.err (!%p22006_p11)
}
 0x13c   : > { %21716 = dma.hbm_to_vmem [thread:$0]  (%p22213_p4), %s929_s3, 128, %s931_s29, %s919_s11  }
 0x13d PF: > { %949 = sbr.rel (%p22227_p10) target bundleno = 3287 (0xcd7), region = 83 }
 0x142   : > { %22069 = dma.done.wait (%p177_p5), [#allocation6], 256  }
 0x143   : > { %22071 = vsyncadd (%p177_p5), [#allocation6], 4294967040 }
 0x144   : > { %22073 = dma.done.wait (%p177_p5), [#allocation9], 16384  }
 0x145   : > { %22075 = vsyncadd (%p177_p5), [#allocation9], 4294950912  ;;  %s962_s26 = sand.u32 1, %s22098_s18   ;;  %s968_s16 = sand.u32 1, %s22198_s21  }
 0x146   : > { %s14594_s12 = sshll.u32 %s962_s26, 11  ;;  %s22816_s28 = sshll.u32 %s962_s26, 3 }
 0x147   : > { %s22818_s14 = scalar_lea.vmem [#allocation10], %s14594_s12  ;;  %s969_s24 = scalar_lea.sflag [#allocation6], %s968_s16 }
 0x148   : > { %s972_s4 = scalar_lea.vmem [#allocation11], %s22816_s28 }
 0x149   : > { %22077 = dma.done.wait (%p22222_p8), %s969_s24, 128  }
 0x14a   : > { %22079 = vsyncadd (%p22222_p8), %s969_s24, 4294967168 }
 0x14b   : > { %22081 = dma.done.wait (%p177_p5), [#allocation9], 64  }
 0x14c   : > { %22083 = vsyncadd (%p177_p5), [#allocation9], 4294967232 }
 0x14d   : > { %22085 = dma.done.wait (%p177_p5), [#allocation14], 128  }
 0x14e   : > { %22087 = vsyncadd (%p177_p5), [#allocation14], 4294967168  ;;  %s14599_s25 = sshll.u32 %s22198_s21, 7  ;;  %v22839_v0 = vld [vmem:[#allocation13] sm:$0xf]  ;;  %s26742_s30 = sld [smem:[#allocation25_spill]] (!%p14580_p9) }
 0x14f   : > { %p1035_p4 = scmp.lt.s32.totalorder %s14599_s25, 255  ;;  %v22841_v1 = vld [vmem:[#allocation15] sm:$0xf]  ;;  %1047 = sbr.rel (%p14580_p9) target bundleno = 2245 (0x8c5), region = 115 }
 0x151   : > { %s26750_s25 = smov (!%p1035_p4, %s14599_s25), 255 }
 0x152   : > { %s20297_s23 = sshll.u32 %s26750_s25, 4 }
 0x153   : > { %s22837_s3 = scalar_lea.vmem %s26722_s7, %s20297_s23 }
 0x154   : > { %v20305_v2 = vld [vmem:[%s26716_s1 + $0x38] sm:$0xff]  ;;  %v20304_v6 = vld [vmem:[%s26716_s1 + $0x30] sm:$0xff]  ;;  %v20303_v10 = vld [vmem:[%s26716_s1 + $0x28] sm:$0xff]  ;;  %vm8460_vm0 = vcmask 523264   ;;  %vm8669_vm1 = vcmask 64512  }
 0x155   : > { %v20313_v3 = vld [vmem:[%s26716_s1 + $0x78] sm:$0xff]  ;;  %1772 = vmatpush.bf16.msra.mxu0 %v20305_v2  ;;  %v20312_v7 = vld [vmem:[%s26716_s1 + $0x70] sm:$0xff]  ;;  %v20311_v11 = vld [vmem:[%s26716_s1 + $0x68] sm:$0xff] }
 0x156   : > { %v20321_v4 = vld [vmem:[%s26716_s1 + $0xb8] sm:$0xff]  ;;  %1785 = vmatpush.bf16.msra.mxu1 %v20313_v3  ;;  %v20320_v8 = vld [vmem:[%s26716_s1 + $0xb0] sm:$0xff]  ;;  %v20319_v12 = vld [vmem:[%s26716_s1 + $0xa8] sm:$0xff] }
 0x157   : > { %v20329_v5 = vld [vmem:[%s26716_s1 + $0xf8] sm:$0xff]  ;;  %1798 = vmatpush.bf16.msra.mxu2 %v20321_v4  ;;  %v20328_v9 = vld [vmem:[%s26716_s1 + $0xf0] sm:$0xff]  ;;  %v20327_v13 = vld [vmem:[%s26716_s1 + $0xe8] sm:$0xff] }
 0x158   : > { %1811 = vmatpush.bf16.msra.mxu3 %v20329_v5  ;;  %v20302_v14 = vld [vmem:[%s26716_s1 + $0x20] sm:$0xff]  ;;  %v20301_v18 = vld [vmem:[%s26716_s1 + $0x18] sm:$0xff]  ;;  %v20300_v22 = vld [vmem:[%s26716_s1 + $0x10] sm:$0xff] }
 0x159   : > { %1773 = vmatpush.bf16.msra.mxu0 %v20304_v6  ;;  %v20310_v15 = vld [vmem:[%s26716_s1 + $0x60] sm:$0xff]  ;;  %v20309_v19 = vld [vmem:[%s26716_s1 + $0x58] sm:$0xff]  ;;  %v20308_v23 = vld [vmem:[%s26716_s1 + $0x50] sm:$0xff] }
 0x15a   : > { %1786 = vmatpush.bf16.msra.mxu1 %v20312_v7  ;;  %v20318_v16 = vld [vmem:[%s26716_s1 + $0xa0] sm:$0xff]  ;;  %v20317_v20 = vld [vmem:[%s26716_s1 + $0x98] sm:$0xff]  ;;  %v20316_v24 = vld [vmem:[%s26716_s1 + $0x90] sm:$0xff] }
 0x15b   : > { %1799 = vmatpush.bf16.msra.mxu2 %v20320_v8  ;;  %v20326_v17 = vld [vmem:[%s26716_s1 + $0xe0] sm:$0xff]  ;;  %v20325_v21 = vld [vmem:[%s26716_s1 + $0xd8] sm:$0xff]  ;;  %v20324_v25 = vld [vmem:[%s26716_s1 + $0xd0] sm:$0xff] }
 0x15c   : > { %1812 = vmatpush.bf16.msra.mxu3 %v20328_v9  ;;  %v20299_v26 = vld [vmem:[%s26716_s1 + $0x8] sm:$0xff]  ;;  %v1048_v30 = vld [vmem:[#allocation5] sm:$0xff]  ;;  %v1049_v31 = vld [vmem:[#allocation5 + $0x8] sm:$0xff] }
 0x15d   : > { %1774 = vmatpush.bf16.msra.mxu0 %v20303_v10  ;;  %v20307_v27 = vld [vmem:[%s26716_s1 + $0x48] sm:$0xff]  ;;  %v20298_v32 = vld [vmem:[%s26716_s1] sm:$0xff]  ;;  %v1568_v34 = vunpack.c.l.b16 %v1048_v30  ;;  %v1570_v35 = vunpack.c.l.b16 %v1049_v31  ;;  %v1571_v38 = vunpack.c.h.b16 %v1049_v31  ;;  %v1569_v39 = vunpack.c.h.b16 %v1048_v30  ;;  %v20337_v40 = vld [vmem:[%s26716_s1 + $0x138] sm:$0xff] }
 0x15e   : > { %1787 = vmatpush.bf16.msra.mxu1 %v20311_v11  ;;  %v20315_v28 = vld [vmem:[%s26716_s1 + $0x88] sm:$0xff]  ;;  %v20306_v33 = vld [vmem:[%s26716_s1 + $0x40] sm:$0xff]  ;;  %v20345_v41 = vld [vmem:[%s26716_s1 + $0x178] sm:$0xff] }
 0x15f   : > { %1800 = vmatpush.bf16.msra.mxu2 %v20319_v12  ;;  %v20323_v29 = vld [vmem:[%s26716_s1 + $0xc8] sm:$0xff]  ;;  %v20314_v36 = vld [vmem:[%s26716_s1 + $0x80] sm:$0xff]  ;;  %v20353_v42 = vld [vmem:[%s26716_s1 + $0x1b8] sm:$0xff]  ;;  %v22953_v44 = vpack.c.b16 %v1568_v34, %v1568_v34  ;;  %v22955_v45 = vpack.c.b16 %v1570_v35, %v1570_v35  ;;  %v22957_v46 = vpack.c.b16 %v1571_v38, %v1571_v38  ;;  %v22959_v47 = vpack.c.b16 %v1569_v39, %v1569_v39 }
 0x160   : > { %1813 = vmatpush.bf16.msra.mxu3 %v20327_v13  ;;  %v20322_v37 = vld [vmem:[%s26716_s1 + $0xc0] sm:$0xff]  ;;  %v20361_v43 = vld [vmem:[%s26716_s1 + $0x1f8] sm:$0xff]  ;;  %v20336_v48 = vld [vmem:[%s26716_s1 + $0x130] sm:$0xff] }
 0x161   : > { %1775 = vmatpush.bf16.msra.mxu0 %v20302_v14  ;;  %v20344_v49 = vld [vmem:[%s26716_s1 + $0x170] sm:$0xff]  ;;  %v20335_v52 = vld [vmem:[%s26716_s1 + $0x128] sm:$0xff]  ;;  %v20334_v56 = vld [vmem:[%s26716_s1 + $0x120] sm:$0xff] }
 0x162   : > { %1788 = vmatpush.bf16.msra.mxu1 %v20310_v15  ;;  %v20352_v50 = vld [vmem:[%s26716_s1 + $0x1b0] sm:$0xff]  ;;  %v20343_v53 = vld [vmem:[%s26716_s1 + $0x168] sm:$0xff]  ;;  %v20342_v57 = vld [vmem:[%s26716_s1 + $0x160] sm:$0xff] }
 0x163   : > { %1801 = vmatpush.bf16.msra.mxu2 %v20318_v16  ;;  %v20360_v51 = vld [vmem:[%s26716_s1 + $0x1f0] sm:$0xff]  ;;  %v20351_v54 = vld [vmem:[%s26716_s1 + $0x1a8] sm:$0xff]  ;;  %v20350_v58 = vld [vmem:[%s26716_s1 + $0x1a0] sm:$0xff] }
 0x164   : > { %1814 = vmatpush.bf16.msra.mxu3 %v20326_v17  ;;  %v20359_v55 = vld [vmem:[%s26716_s1 + $0x1e8] sm:$0xff]  ;;  %v20358_v59 = vld [vmem:[%s26716_s1 + $0x1e0] sm:$0xff]  ;;  %v20333_v60 = vld [vmem:[%s26716_s1 + $0x118] sm:$0xff] }
 0x165   : > { %1776 = vmatpush.bf16.msra.mxu0 %v20301_v18  ;;  %v20341_v61 = vld [vmem:[%s26716_s1 + $0x158] sm:$0xff]  ;;  %v20332_v2 = vld [vmem:[%s26716_s1 + $0x110] sm:$0xff]  ;;  %v20331_v6 = vld [vmem:[%s26716_s1 + $0x108] sm:$0xff] }
 0x166   : > { %1789 = vmatpush.bf16.msra.mxu1 %v20309_v19  ;;  %v20349_v62 = vld [vmem:[%s26716_s1 + $0x198] sm:$0xff]  ;;  %v20340_v3 = vld [vmem:[%s26716_s1 + $0x150] sm:$0xff]  ;;  %v20339_v7 = vld [vmem:[%s26716_s1 + $0x148] sm:$0xff] }
 0x167   : > { %1802 = vmatpush.bf16.msra.mxu2 %v20317_v20  ;;  %v20357_v63 = vld [vmem:[%s26716_s1 + $0x1d8] sm:$0xff]  ;;  %v20348_v4 = vld [vmem:[%s26716_s1 + $0x190] sm:$0xff]  ;;  %v20347_v8 = vld [vmem:[%s26716_s1 + $0x188] sm:$0xff] }
 0x168   : > { %1815 = vmatpush.bf16.msra.mxu3 %v20325_v21  ;;  %v20356_v5 = vld [vmem:[%s26716_s1 + $0x1d0] sm:$0xff]  ;;  %v20355_v9 = vld [vmem:[%s26716_s1 + $0x1c8] sm:$0xff]  ;;  %v20330_v10 = vld [vmem:[%s26716_s1 + $0x100] sm:$0xff] }
 0x169   : > { %1777 = vmatpush.bf16.msra.mxu0 %v20300_v22  ;;  %v20338_v11 = vld [vmem:[%s26716_s1 + $0x140] sm:$0xff]  ;;  %v20369_v14 = vld [vmem:[%s26716_s1 + $0x238] sm:$0xff]  ;;  %v20368_v18 = vld [vmem:[%s26716_s1 + $0x230] sm:$0xff] }
 0x16a   : > { %1790 = vmatpush.bf16.msra.mxu1 %v20308_v23  ;;  %v20346_v12 = vld [vmem:[%s26716_s1 + $0x180] sm:$0xff]  ;;  %v20377_v15 = vld [vmem:[%s26716_s1 + $0x278] sm:$0xff]  ;;  %v20376_v19 = vld [vmem:[%s26716_s1 + $0x270] sm:$0xff] }
 0x16b   : > { %1803 = vmatpush.bf16.msra.mxu2 %v20316_v24  ;;  %v20354_v13 = vld [vmem:[%s26716_s1 + $0x1c0] sm:$0xff]  ;;  %v20385_v16 = vld [vmem:[%s26716_s1 + $0x2b8] sm:$0xff]  ;;  %v20384_v20 = vld [vmem:[%s26716_s1 + $0x2b0] sm:$0xff] }
 0x16c   : > { %1816 = vmatpush.bf16.msra.mxu3 %v20324_v25  ;;  %v20393_v17 = vld [vmem:[%s26716_s1 + $0x2f8] sm:$0xff]  ;;  %v20392_v21 = vld [vmem:[%s26716_s1 + $0x2f0] sm:$0xff]  ;;  %v20367_v22 = vld [vmem:[%s26716_s1 + $0x228] sm:$0xff] }
 0x16d   : > { %1778 = vmatpush.bf16.msra.mxu0 %v20299_v26  ;;  %v20375_v23 = vld [vmem:[%s26716_s1 + $0x268] sm:$0xff]  ;;  %v20366_v26 = vld [vmem:[%s26716_s1 + $0x220] sm:$0xff]  ;;  %v20365_v30 = vld [vmem:[%s26716_s1 + $0x218] sm:$0xff] }
 0x16e   : > { %1791 = vmatpush.bf16.msra.mxu1 %v20307_v27  ;;  %v20383_v24 = vld [vmem:[%s26716_s1 + $0x2a8] sm:$0xff]  ;;  %v20374_v27 = vld [vmem:[%s26716_s1 + $0x260] sm:$0xff]  ;;  %v20373_v31 = vld [vmem:[%s26716_s1 + $0x258] sm:$0xff] }
 0x16f   : > { %1804 = vmatpush.bf16.msra.mxu2 %v20315_v28  ;;  %v20391_v25 = vld [vmem:[%s26716_s1 + $0x2e8] sm:$0xff]  ;;  %v20382_v28 = vld [vmem:[%s26716_s1 + $0x2a0] sm:$0xff]  ;;  %v20364_v34 = vld [vmem:[%s26716_s1 + $0x210] sm:$0xff] }
 0x170   : > { %1817 = vmatpush.bf16.msra.mxu3 %v20323_v29  ;;  %v20390_v29 = vld [vmem:[%s26716_s1 + $0x2e0] sm:$0xff]  ;;  %v20372_v35 = vld [vmem:[%s26716_s1 + $0x250] sm:$0xff]  ;;  %v20363_v38 = vld [vmem:[%s26716_s1 + $0x208] sm:$0xff] }
 0x171   : > { %1779 = vmatpush.bf16.msra.mxu0 %v20298_v32  ;;  %v20381_v32 = vld [vmem:[%s26716_s1 + $0x298] sm:$0xff]  ;;  %v20371_v39 = vld [vmem:[%s26716_s1 + $0x248] sm:$0xff] }
 0x172   : > { %1792 = vmatpush.bf16.msra.mxu1 %v20306_v33  ;;  %v20389_v33 = vld [vmem:[%s26716_s1 + $0x2d8] sm:$0xff] }
 0x173   : > { %1805 = vmatpush.bf16.msra.mxu2 %v20314_v36  ;;  %v20380_v36 = vld [vmem:[%s26716_s1 + $0x290] sm:$0xff] }
 0x174   : > { %1818 = vmatpush.bf16.msra.mxu3 %v20322_v37  ;;  %1780 = vmatmul.bf16.vlgmr.msra.gmra.mxu0 %v22953_v44  ;;  %v20388_v37 = vld [vmem:[%s26716_s1 + $0x2d0] sm:$0xff] }
 0x175   : > { %2016 = vmatpush.bf16.msrb.mxu0 %v20337_v40  ;;  %1793 = vmatmul.bf16.vlgmr.msra.gmra.mxu1 %v22959_v47  ;;  %v20379_v40 = vld [vmem:[%s26716_s1 + $0x288] sm:$0xff] }
 0x176   : > { %2029 = vmatpush.bf16.msrb.mxu1 %v20345_v41  ;;  %1806 = vmatmul.bf16.vlgmr.msra.gmra.mxu2 %v22955_v45  ;;  %v20387_v41 = vld [vmem:[%s26716_s1 + $0x2c8] sm:$0xff] }
 0x177   : > { %2042 = vmatpush.bf16.msrb.mxu2 %v20353_v42  ;;  %1819 = vmatmul.bf16.vlgmr.msra.gmra.mxu3 %v22957_v46  ;;  %v20362_v42 = vld [vmem:[%s26716_s1 + $0x200] sm:$0xff] }
 0x178   : > { %2055 = vmatpush.bf16.msrb.mxu3 %v20361_v43  ;;  %v20370_v43 = vld [vmem:[%s26716_s1 + $0x240] sm:$0xff] }
 0x179   : > { %2017 = vmatpush.bf16.msrb.mxu0 %v20336_v48  ;;  %v20378_v48 = vld [vmem:[%s26716_s1 + $0x280] sm:$0xff] }
 0x17a   : > { %2030 = vmatpush.bf16.msrb.mxu1 %v20344_v49  ;;  %v20386_v49 = vld [vmem:[%s26716_s1 + $0x2c0] sm:$0xff] }
 0x17b   : > { %2043 = vmatpush.bf16.msrb.mxu2 %v20352_v50  ;;  %v20401_v50 = vld [vmem:[%s26716_s1 + $0x338] sm:$0xff] }
 0x17c   : > { %2056 = vmatpush.bf16.msrb.mxu3 %v20360_v51  ;;  %v20409_v51 = vld [vmem:[%s26716_s1 + $0x378] sm:$0xff] }
 0x17d   : > { %2018 = vmatpush.bf16.msrb.mxu0 %v20335_v52  ;;  %v20417_v52 = vld [vmem:[%s26716_s1 + $0x3b8] sm:$0xff] }
 0x17e   : > { %2031 = vmatpush.bf16.msrb.mxu1 %v20343_v53  ;;  %v20425_v53 = vld [vmem:[%s26716_s1 + $0x3f8] sm:$0xff] }
 0x17f   : > { %2044 = vmatpush.bf16.msrb.mxu2 %v20351_v54  ;;  %v20400_v54 = vld [vmem:[%s26716_s1 + $0x330] sm:$0xff] }
 0x180   : > { %2057 = vmatpush.bf16.msrb.mxu3 %v20359_v55  ;;  %v20408_v55 = vld [vmem:[%s26716_s1 + $0x370] sm:$0xff] }
 0x181   : > { %2019 = vmatpush.bf16.msrb.mxu0 %v20334_v56  ;;  %v20416_v56 = vld [vmem:[%s26716_s1 + $0x3b0] sm:$0xff] }
 0x182   : > { %2032 = vmatpush.bf16.msrb.mxu1 %v20342_v57  ;;  %v20424_v57 = vld [vmem:[%s26716_s1 + $0x3f0] sm:$0xff] }
 0x183   : > { %2045 = vmatpush.bf16.msrb.mxu2 %v20350_v58  ;;  %v20399_v58 = vld [vmem:[%s26716_s1 + $0x328] sm:$0xff] }
 0x184   : > { %2058 = vmatpush.bf16.msrb.mxu3 %v20358_v59  ;;  %v20407_v59 = vld [vmem:[%s26716_s1 + $0x368] sm:$0xff] }
 0x185   : > { %2020 = vmatpush.bf16.msrb.mxu0 %v20333_v60  ;;  %v20415_v60 = vld [vmem:[%s26716_s1 + $0x3a8] sm:$0xff] }
 0x186   : > { %2033 = vmatpush.bf16.msrb.mxu1 %v20341_v61  ;;  %v20423_v61 = vld [vmem:[%s26716_s1 + $0x3e8] sm:$0xff] }
 0x187   : > { %2046 = vmatpush.bf16.msrb.mxu2 %v20349_v62  ;;  %v20398_v62 = vld [vmem:[%s26716_s1 + $0x320] sm:$0xff] }
 0x188   : > { %2059 = vmatpush.bf16.msrb.mxu3 %v20357_v63  ;;  %v20406_v63 = vld [vmem:[%s26716_s1 + $0x360] sm:$0xff] }
 0x189   : > { %2021 = vmatpush.bf16.msrb.mxu0 %v20332_v2  ;;  %v20414_v2 = vld [vmem:[%s26716_s1 + $0x3a0] sm:$0xff] }
 0x18a   : > { %2034 = vmatpush.bf16.msrb.mxu1 %v20340_v3  ;;  %v20422_v3 = vld [vmem:[%s26716_s1 + $0x3e0] sm:$0xff] }
 0x18b   : > { %2047 = vmatpush.bf16.msrb.mxu2 %v20348_v4  ;;  %v20397_v4 = vld [vmem:[%s26716_s1 + $0x318] sm:$0xff] }
 0x18c   : > { %2060 = vmatpush.bf16.msrb.mxu3 %v20356_v5  ;;  %v20405_v5 = vld [vmem:[%s26716_s1 + $0x358] sm:$0xff] }
 0x18d   : > { %2022 = vmatpush.bf16.msrb.mxu0 %v20331_v6  ;;  %v20413_v6 = vld [vmem:[%s26716_s1 + $0x398] sm:$0xff] }
 0x18e   : > { %2035 = vmatpush.bf16.msrb.mxu1 %v20339_v7  ;;  %v20421_v7 = vld [vmem:[%s26716_s1 + $0x3d8] sm:$0xff] }
 0x18f   : > { %2048 = vmatpush.bf16.msrb.mxu2 %v20347_v8  ;;  %v20396_v8 = vld [vmem:[%s26716_s1 + $0x310] sm:$0xff] }
 0x190   : > { %2061 = vmatpush.bf16.msrb.mxu3 %v20355_v9  ;;  %v20404_v9 = vld [vmem:[%s26716_s1 + $0x350] sm:$0xff] }
 0x191   : > { %2023 = vmatpush.bf16.msrb.mxu0 %v20330_v10  ;;  %v20412_v10 = vld [vmem:[%s26716_s1 + $0x390] sm:$0xff] }
 0x192   : > { %2036 = vmatpush.bf16.msrb.mxu1 %v20338_v11  ;;  %v20420_v11 = vld [vmem:[%s26716_s1 + $0x3d0] sm:$0xff] }
 0x193   : > { %2049 = vmatpush.bf16.msrb.mxu2 %v20346_v12  ;;  %v20395_v12 = vld [vmem:[%s26716_s1 + $0x308] sm:$0xff] }
 0x194   : > { %2062 = vmatpush.bf16.msrb.mxu3 %v20354_v13  ;;  %2024 = vmatmul.bf16.vlgmr.msrb.gmra.mxu0 %v22953_v44  ;;  %v20403_v13 = vld [vmem:[%s26716_s1 + $0x348] sm:$0xff] }
 0x195   : > { %2260 = vmatpush.bf16.msra.mxu0 %v20369_v14  ;;  %2037 = vmatmul.bf16.vlgmr.msrb.gmra.mxu1 %v22959_v47  ;;  %v20411_v14 = vld [vmem:[%s26716_s1 + $0x388] sm:$0xff] }
 0x196   : > { %2273 = vmatpush.bf16.msra.mxu1 %v20377_v15  ;;  %2050 = vmatmul.bf16.vlgmr.msrb.gmra.mxu2 %v22955_v45  ;;  %v20419_v15 = vld [vmem:[%s26716_s1 + $0x3c8] sm:$0xff] }
 0x197   : > { %2286 = vmatpush.bf16.msra.mxu2 %v20385_v16  ;;  %2063 = vmatmul.bf16.vlgmr.msrb.gmra.mxu3 %v22957_v46  ;;  %v20394_v16 = vld [vmem:[%s26716_s1 + $0x300] sm:$0xff] }
 0x198   : > { %2299 = vmatpush.bf16.msra.mxu3 %v20393_v17  ;;  %v20402_v17 = vld [vmem:[%s26716_s1 + $0x340] sm:$0xff] }
 0x199   : > { %2261 = vmatpush.bf16.msra.mxu0 %v20368_v18  ;;  %v20410_v18 = vld [vmem:[%s26716_s1 + $0x380] sm:$0xff] }
 0x19a   : > { %2274 = vmatpush.bf16.msra.mxu1 %v20376_v19  ;;  %v20418_v19 = vld [vmem:[%s26716_s1 + $0x3c0] sm:$0xff] }
 0x19b   : > { %2287 = vmatpush.bf16.msra.mxu2 %v20384_v20  ;;  %v20433_v20 = vld [vmem:[%s26716_s1 + $0x438] sm:$0xff] }
 0x19c   : > { %2300 = vmatpush.bf16.msra.mxu3 %v20392_v21  ;;  %v20441_v21 = vld [vmem:[%s26716_s1 + $0x478] sm:$0xff] }
 0x19d   : > { %2262 = vmatpush.bf16.msra.mxu0 %v20367_v22  ;;  %v20449_v22 = vld [vmem:[%s26716_s1 + $0x4b8] sm:$0xff] }
 0x19e   : > { %2275 = vmatpush.bf16.msra.mxu1 %v20375_v23  ;;  %v20457_v23 = vld [vmem:[%s26716_s1 + $0x4f8] sm:$0xff] }
 0x19f   : > { %2288 = vmatpush.bf16.msra.mxu2 %v20383_v24  ;;  %v20432_v24 = vld [vmem:[%s26716_s1 + $0x430] sm:$0xff] }
 0x1a0   : > { %2301 = vmatpush.bf16.msra.mxu3 %v20391_v25  ;;  %v20440_v25 = vld [vmem:[%s26716_s1 + $0x470] sm:$0xff] }
 0x1a1   : > { %2263 = vmatpush.bf16.msra.mxu0 %v20366_v26  ;;  %v20448_v26 = vld [vmem:[%s26716_s1 + $0x4b0] sm:$0xff] }
 0x1a2   : > { %2276 = vmatpush.bf16.msra.mxu1 %v20374_v27  ;;  %v20456_v27 = vld [vmem:[%s26716_s1 + $0x4f0] sm:$0xff] }
 0x1a3   : > { %2289 = vmatpush.bf16.msra.mxu2 %v20382_v28  ;;  %v20431_v28 = vld [vmem:[%s26716_s1 + $0x428] sm:$0xff] }
 0x1a4   : > { %2302 = vmatpush.bf16.msra.mxu3 %v20390_v29  ;;  %v20439_v29 = vld [vmem:[%s26716_s1 + $0x468] sm:$0xff] }
 0x1a5   : > { %2264 = vmatpush.bf16.msra.mxu0 %v20365_v30  ;;  %v20447_v30 = vld [vmem:[%s26716_s1 + $0x4a8] sm:$0xff] }
 0x1a6   : > { %2277 = vmatpush.bf16.msra.mxu1 %v20373_v31  ;;  %v20455_v31 = vld [vmem:[%s26716_s1 + $0x4e8] sm:$0xff] }
 0x1a7   : > { %2290 = vmatpush.bf16.msra.mxu2 %v20381_v32  ;;  %v20430_v32 = vld [vmem:[%s26716_s1 + $0x420] sm:$0xff] }
 0x1a8   : > { %2303 = vmatpush.bf16.msra.mxu3 %v20389_v33  ;;  %v20438_v33 = vld [vmem:[%s26716_s1 + $0x460] sm:$0xff] }
 0x1a9   : > { %2265 = vmatpush.bf16.msra.mxu0 %v20364_v34  ;;  %v20446_v34 = vld [vmem:[%s26716_s1 + $0x4a0] sm:$0xff] }
 0x1aa   : > { %2278 = vmatpush.bf16.msra.mxu1 %v20372_v35  ;;  %v20454_v35 = vld [vmem:[%s26716_s1 + $0x4e0] sm:$0xff] }
 0x1ab   : > { %2291 = vmatpush.bf16.msra.mxu2 %v20380_v36  ;;  %v20429_v36 = vld [vmem:[%s26716_s1 + $0x418] sm:$0xff] }
 0x1ac   : > { %2304 = vmatpush.bf16.msra.mxu3 %v20388_v37  ;;  %v20437_v37 = vld [vmem:[%s26716_s1 + $0x458] sm:$0xff] }
 0x1ad   : > { %2266 = vmatpush.bf16.msra.mxu0 %v20363_v38  ;;  %v20445_v38 = vld [vmem:[%s26716_s1 + $0x498] sm:$0xff] }
 0x1ae   : > { %2279 = vmatpush.bf16.msra.mxu1 %v20371_v39  ;;  %v20453_v39 = vld [vmem:[%s26716_s1 + $0x4d8] sm:$0xff] }
 0x1af   : > { %2292 = vmatpush.bf16.msra.mxu2 %v20379_v40  ;;  %v20428_v40 = vld [vmem:[%s26716_s1 + $0x410] sm:$0xff] }
 0x1b0   : > { %2305 = vmatpush.bf16.msra.mxu3 %v20387_v41  ;;  %v20436_v41 = vld [vmem:[%s26716_s1 + $0x450] sm:$0xff] }
 0x1b1   : > { %2267 = vmatpush.bf16.msra.mxu0 %v20362_v42  ;;  %v20444_v42 = vld [vmem:[%s26716_s1 + $0x490] sm:$0xff] }
 0x1b2   : > { %2280 = vmatpush.bf16.msra.mxu1 %v20370_v43  ;;  %v20452_v43 = vld [vmem:[%s26716_s1 + $0x4d0] sm:$0xff] }
 0x1b3   : > { %2293 = vmatpush.bf16.msra.mxu2 %v20378_v48  ;;  %v20427_v48 = vld [vmem:[%s26716_s1 + $0x408] sm:$0xff] }
 0x1b4   : > { %2306 = vmatpush.bf16.msra.mxu3 %v20386_v49  ;;  %2268 = vmatmul.bf16.vlgmr.msra.gmra.mxu0 %v22953_v44  ;;  %v20435_v49 = vld [vmem:[%s26716_s1 + $0x448] sm:$0xff] }
 0x1b5   : > { %2504 = vmatpush.bf16.msrb.mxu0 %v20401_v50  ;;  %2281 = vmatmul.bf16.vlgmr.msra.gmra.mxu1 %v22959_v47  ;;  %v20443_v50 = vld [vmem:[%s26716_s1 + $0x488] sm:$0xff] }
 0x1b6   : > { %2517 = vmatpush.bf16.msrb.mxu1 %v20409_v51  ;;  %2294 = vmatmul.bf16.vlgmr.msra.gmra.mxu2 %v22955_v45  ;;  %v20451_v51 = vld [vmem:[%s26716_s1 + $0x4c8] sm:$0xff] }
 0x1b7   : > { %2530 = vmatpush.bf16.msrb.mxu2 %v20417_v52  ;;  %2307 = vmatmul.bf16.vlgmr.msra.gmra.mxu3 %v22957_v46  ;;  %v20426_v52 = vld [vmem:[%s26716_s1 + $0x400] sm:$0xff] }
 0x1b8   : > { %2543 = vmatpush.bf16.msrb.mxu3 %v20425_v53  ;;  %v20434_v53 = vld [vmem:[%s26716_s1 + $0x440] sm:$0xff] }
 0x1b9   : > { %2505 = vmatpush.bf16.msrb.mxu0 %v20400_v54  ;;  %v20442_v54 = vld [vmem:[%s26716_s1 + $0x480] sm:$0xff] }
 0x1ba   : > { %2518 = vmatpush.bf16.msrb.mxu1 %v20408_v55  ;;  %v20450_v55 = vld [vmem:[%s26716_s1 + $0x4c0] sm:$0xff] }
 0x1bb   : > { %2531 = vmatpush.bf16.msrb.mxu2 %v20416_v56  ;;  %v20465_v56 = vld [vmem:[%s26716_s1 + $0x538] sm:$0xff] }
 0x1bc   : > { %2544 = vmatpush.bf16.msrb.mxu3 %v20424_v57  ;;  %v20473_v57 = vld [vmem:[%s26716_s1 + $0x578] sm:$0xff] }
 0x1bd   : > { %2506 = vmatpush.bf16.msrb.mxu0 %v20399_v58  ;;  %v20481_v58 = vld [vmem:[%s26716_s1 + $0x5b8] sm:$0xff] }
 0x1be   : > { %2519 = vmatpush.bf16.msrb.mxu1 %v20407_v59  ;;  %v20489_v59 = vld [vmem:[%s26716_s1 + $0x5f8] sm:$0xff] }
 0x1bf   : > { %2532 = vmatpush.bf16.msrb.mxu2 %v20415_v60  ;;  %v20464_v60 = vld [vmem:[%s26716_s1 + $0x530] sm:$0xff] }
 0x1c0   : > { %2545 = vmatpush.bf16.msrb.mxu3 %v20423_v61  ;;  %v20472_v61 = vld [vmem:[%s26716_s1 + $0x570] sm:$0xff] }
 0x1c1   : > { %2507 = vmatpush.bf16.msrb.mxu0 %v20398_v62  ;;  %v20480_v62 = vld [vmem:[%s26716_s1 + $0x5b0] sm:$0xff] }
 0x1c2   : > { %2520 = vmatpush.bf16.msrb.mxu1 %v20406_v63  ;;  %v20488_v63 = vld [vmem:[%s26716_s1 + $0x5f0] sm:$0xff] }
 0x1c3   : > { %2533 = vmatpush.bf16.msrb.mxu2 %v20414_v2  ;;  %v20463_v2 = vld [vmem:[%s26716_s1 + $0x528] sm:$0xff] }
 0x1c4   : > { %2546 = vmatpush.bf16.msrb.mxu3 %v20422_v3  ;;  %v20471_v3 = vld [vmem:[%s26716_s1 + $0x568] sm:$0xff] }
 0x1c5   : > { %2508 = vmatpush.bf16.msrb.mxu0 %v20397_v4  ;;  %v20479_v4 = vld [vmem:[%s26716_s1 + $0x5a8] sm:$0xff] }
 0x1c6   : > { %2521 = vmatpush.bf16.msrb.mxu1 %v20405_v5  ;;  %v20487_v5 = vld [vmem:[%s26716_s1 + $0x5e8] sm:$0xff] }
 0x1c7   : > { %2534 = vmatpush.bf16.msrb.mxu2 %v20413_v6 }
 0x1c8   : > { %2547 = vmatpush.bf16.msrb.mxu3 %v20421_v7  ;;  %v20462_v7 = vld [vmem:[%s26716_s1 + $0x520] sm:$0xff] }
 0x1c9   : > { %2509 = vmatpush.bf16.msrb.mxu0 %v20396_v8  ;;  %v20470_v8 = vld [vmem:[%s26716_s1 + $0x560] sm:$0xff] }
 0x1ca   : > { %2522 = vmatpush.bf16.msrb.mxu1 %v20404_v9 }
 0x1cb   : > { %2535 = vmatpush.bf16.msrb.mxu2 %v20412_v10  ;;  %v20478_v10 = vld [vmem:[%s26716_s1 + $0x5a0] sm:$0xff] }
 0x1cc   : > { %2548 = vmatpush.bf16.msrb.mxu3 %v20420_v11  ;;  %v20486_v11 = vld [vmem:[%s26716_s1 + $0x5e0] sm:$0xff] }
 0x1cd   : > { %2510 = vmatpush.bf16.msrb.mxu0 %v20395_v12 }
 0x1ce   : > { %2523 = vmatpush.bf16.msrb.mxu1 %v20403_v13  ;;  %v20461_v13 = vld [vmem:[%s26716_s1 + $0x518] sm:$0xff] }
 0x1cf   : > { %2536 = vmatpush.bf16.msrb.mxu2 %v20411_v14  ;;  %v20469_v14 = vld [vmem:[%s26716_s1 + $0x558] sm:$0xff] }
 0x1d0   : > { %2549 = vmatpush.bf16.msrb.mxu3 %v20419_v15  ;;  %v20477_v15 = vld [vmem:[%s26716_s1 + $0x598] sm:$0xff] }
 0x1d1   : > { %2511 = vmatpush.bf16.msrb.mxu0 %v20394_v16  ;;  %v20485_v16 = vld [vmem:[%s26716_s1 + $0x5d8] sm:$0xff] }
 0x1d2   : > { %2524 = vmatpush.bf16.msrb.mxu1 %v20402_v17 }
 0x1d3   : > { %2537 = vmatpush.bf16.msrb.mxu2 %v20410_v18 }
 0x1d4   : > { %2550 = vmatpush.bf16.msrb.mxu3 %v20418_v19  ;;  %2512 = vmatmul.bf16.vlgmr.msrb.gmra.mxu0 %v22953_v44 }
 0x1d5   : > { %2748 = vmatpush.bf16.msra.mxu0 %v20433_v20  ;;  %2525 = vmatmul.bf16.vlgmr.msrb.gmra.mxu1 %v22959_v47 }
 0x1d6   : > { %2761 = vmatpush.bf16.msra.mxu1 %v20441_v21  ;;  %2538 = vmatmul.bf16.vlgmr.msrb.gmra.mxu2 %v22955_v45  ;;  %v20460_v21 = vld [vmem:[%s26716_s1 + $0x510] sm:$0xff] }
 0x1d7   : > { %2774 = vmatpush.bf16.msra.mxu2 %v20449_v22  ;;  %2551 = vmatmul.bf16.vlgmr.msrb.gmra.mxu3 %v22957_v46  ;;  %v20468_v22 = vld [vmem:[%s26716_s1 + $0x550] sm:$0xff] }
 0x1d8   : > { %2787 = vmatpush.bf16.msra.mxu3 %v20457_v23 }
 0x1d9   : > { %2749 = vmatpush.bf16.msra.mxu0 %v20432_v24 }
 0x1da   : > { %2762 = vmatpush.bf16.msra.mxu1 %v20440_v25  ;;  %v20476_v25 = vld [vmem:[%s26716_s1 + $0x590] sm:$0xff] }
 0x1db   : > { %2775 = vmatpush.bf16.msra.mxu2 %v20448_v26  ;;  %v20484_v26 = vld [vmem:[%s26716_s1 + $0x5d0] sm:$0xff] }
 0x1dc   : > { %2788 = vmatpush.bf16.msra.mxu3 %v20456_v27  ;;  %v20459_v27 = vld [vmem:[%s26716_s1 + $0x508] sm:$0xff] }
 0x1dd   : > { %2750 = vmatpush.bf16.msra.mxu0 %v20431_v28  ;;  %v20467_v28 = vld [vmem:[%s26716_s1 + $0x548] sm:$0xff] }
 0x1de   : > { %2763 = vmatpush.bf16.msra.mxu1 %v20439_v29  ;;  %v20475_v29 = vld [vmem:[%s26716_s1 + $0x588] sm:$0xff] }
 0x1df   : > { %2776 = vmatpush.bf16.msra.mxu2 %v20447_v30  ;;  %v20483_v30 = vld [vmem:[%s26716_s1 + $0x5c8] sm:$0xff] }
 0x1e0   : > { %2789 = vmatpush.bf16.msra.mxu3 %v20455_v31 }
 0x1e1   : > { %2751 = vmatpush.bf16.msra.mxu0 %v20430_v32 }
 0x1e2   : > { %2764 = vmatpush.bf16.msra.mxu1 %v20438_v33  ;;  %v20458_v33 = vld [vmem:[%s26716_s1 + $0x500] sm:$0xff] }
 0x1e3   : > { %2777 = vmatpush.bf16.msra.mxu2 %v20446_v34  ;;  %v20466_v34 = vld [vmem:[%s26716_s1 + $0x540] sm:$0xff] }
 0x1e4   : > { %2790 = vmatpush.bf16.msra.mxu3 %v20454_v35  ;;  %v20474_v35 = vld [vmem:[%s26716_s1 + $0x580] sm:$0xff] }
 0x1e5   : > { %2752 = vmatpush.bf16.msra.mxu0 %v20429_v36  ;;  %v20482_v36 = vld [vmem:[%s26716_s1 + $0x5c0] sm:$0xff] }
 0x1e6   : > { %2765 = vmatpush.bf16.msra.mxu1 %v20437_v37  ;;  %v20497_v37 = vld [vmem:[%s26716_s1 + $0x638] sm:$0xff] }
 0x1e7   : > { %2778 = vmatpush.bf16.msra.mxu2 %v20445_v38  ;;  %v20505_v38 = vld [vmem:[%s26716_s1 + $0x678] sm:$0xff] }
 0x1e8   : > { %2791 = vmatpush.bf16.msra.mxu3 %v20453_v39  ;;  %v20513_v39 = vld [vmem:[%s26716_s1 + $0x6b8] sm:$0xff] }
 0x1e9   : > { %2753 = vmatpush.bf16.msra.mxu0 %v20428_v40  ;;  %v20521_v40 = vld [vmem:[%s26716_s1 + $0x6f8] sm:$0xff] }
 0x1ea   : > { %2766 = vmatpush.bf16.msra.mxu1 %v20436_v41  ;;  %v20496_v41 = vld [vmem:[%s26716_s1 + $0x630] sm:$0xff] }
 0x1eb   : > { %2779 = vmatpush.bf16.msra.mxu2 %v20444_v42  ;;  %v20504_v42 = vld [vmem:[%s26716_s1 + $0x670] sm:$0xff] }
 0x1ec   : > { %2792 = vmatpush.bf16.msra.mxu3 %v20452_v43  ;;  %v20512_v43 = vld [vmem:[%s26716_s1 + $0x6b0] sm:$0xff] }
 0x1ed   : > { %2754 = vmatpush.bf16.msra.mxu0 %v20427_v48  ;;  %v20520_v48 = vld [vmem:[%s26716_s1 + $0x6f0] sm:$0xff] }
 0x1ee   : > { %2767 = vmatpush.bf16.msra.mxu1 %v20435_v49  ;;  %v20495_v49 = vld [vmem:[%s26716_s1 + $0x628] sm:$0xff] }
 0x1ef   : > { %2780 = vmatpush.bf16.msra.mxu2 %v20443_v50  ;;  %v20503_v50 = vld [vmem:[%s26716_s1 + $0x668] sm:$0xff] }
 0x1f0   : > { %2793 = vmatpush.bf16.msra.mxu3 %v20451_v51  ;;  %v20511_v51 = vld [vmem:[%s26716_s1 + $0x6a8] sm:$0xff] }
 0x1f1   : > { %2755 = vmatpush.bf16.msra.mxu0 %v20426_v52  ;;  %v1781_v6 = vpop.f32.mrf.mxu0  ;;  %v20519_v52 = vld [vmem:[%s26716_s1 + $0x6e8] sm:$0xff] }
 0x1f2   : > { %2768 = vmatpush.bf16.msra.mxu1 %v20434_v53  ;;  %v1794_v9 = vpop.f32.mrf.mxu1 }
 0x1f3   : > { %2781 = vmatpush.bf16.msra.mxu2 %v20442_v54  ;;  %v1795_v12 = vadd.f32 %v1794_v9, %v1781_v6  ;;  %v20494_v54 = vld [vmem:[%s26716_s1 + $0x620] sm:$0xff]  ;;  %v20492_v6 = vld [vmem:[%s26716_s1 + $0x610] sm:$0xff] }
 0x1f4   : > { %2794 = vmatpush.bf16.msra.mxu3 %v20450_v55  ;;  %2756 = vmatmul.bf16.vlgmr.msra.gmra.mxu0 %v22953_v44  ;;  %v20502_v55 = vld [vmem:[%s26716_s1 + $0x660] sm:$0xff] }
 0x1f5   : > { %2992 = vmatpush.bf16.msrb.mxu0 %v20465_v56  ;;  %2769 = vmatmul.bf16.vlgmr.msra.gmra.mxu1 %v22959_v47 }
 0x1f6   : > { %3005 = vmatpush.bf16.msrb.mxu1 %v20473_v57  ;;  %2782 = vmatmul.bf16.vlgmr.msra.gmra.mxu2 %v22955_v45  ;;  %v20510_v57 = vld [vmem:[%s26716_s1 + $0x6a0] sm:$0xff] }
 0x1f7   : > { %3018 = vmatpush.bf16.msrb.mxu2 %v20481_v58  ;;  %2795 = vmatmul.bf16.vlgmr.msra.gmra.mxu3 %v22957_v46  ;;  %v20518_v58 = vld [vmem:[%s26716_s1 + $0x6e0] sm:$0xff] }
 0x1f8   : > { %3031 = vmatpush.bf16.msrb.mxu3 %v20489_v59 }
 0x1f9   : > { %2993 = vmatpush.bf16.msrb.mxu0 %v20464_v60  ;;  %v1807_v17 = vpop.f32.mrf.mxu2  ;;  %v1783_v20 = vpop.f32.mrf.mxu0  ;;  %v20493_v60 = vld [vmem:[%s26716_s1 + $0x618] sm:$0xff] }
 0x1fa   : > { %3006 = vmatpush.bf16.msrb.mxu1 %v20472_v61  ;;  %v1808_v18 = vadd.f32 %v1807_v17, %v1795_v12  ;;  %v1820_v19 = vpop.f32.mrf.mxu3  ;;  %v1796_v24 = vpop.f32.mrf.mxu1  ;;  %v20501_v61 = vld [vmem:[%s26716_s1 + $0x658] sm:$0xff]  ;;  %v20491_v12 = vld [vmem:[%s26716_s1 + $0x608] sm:$0xff]  ;;  %v20506_v20 = vld [vmem:[%s26716_s1 + $0x680] sm:$0xff] }
 0x1fb   : > { %3019 = vmatpush.bf16.msrb.mxu2 %v20480_v62  ;;  %v20509_v62 = vld [vmem:[%s26716_s1 + $0x698] sm:$0xff] }
 0x1fc   : > { %3032 = vmatpush.bf16.msrb.mxu3 %v20488_v63  ;;  %v23419_v23 = vadd.f32 %v1820_v19, %v1808_v18  ;;  %v20517_v63 = vld [vmem:[%s26716_s1 + $0x6d8] sm:$0xff]  ;;  %v20490_v18 = vld [vmem:[%s26716_s1 + $0x600] sm:$0xff] }
 0x1fd   : > { %2994 = vmatpush.bf16.msrb.mxu0 %v20463_v2  ;;  %v20498_v19 = vld [vmem:[%s26716_s1 + $0x640] sm:$0xff]  ;;  %v20537_v24 = vld [vmem:[%s26716_s1 + $0x778] sm:$0xff] }
 0x1fe   : > { %3007 = vmatpush.bf16.msrb.mxu1 %v20471_v3 }
 0x1ff   : > { %3020 = vmatpush.bf16.msrb.mxu2 %v20479_v4 }
 0x200   : > { %3033 = vmatpush.bf16.msrb.mxu3 %v20487_v5 }
 0x201   : > { %2995 = vmatpush.bf16.msrb.mxu0 %v20462_v7  ;;  %v1809_v31 = vpop.f32.mrf.mxu2  ;;  %v20500_v7 = vld [vmem:[%s26716_s1 + $0x650] sm:$0xff] }
 0x202   : > { %3008 = vmatpush.bf16.msrb.mxu1 %v20470_v8  ;;  %v1822_v32 = vpop.f32.mrf.mxu3  ;;  %v20527_v31 = vld [vmem:[%s26716_s1 + $0x728] sm:$0xff] }
 0x203   : > { %3021 = vmatpush.bf16.msrb.mxu2 %v20478_v10  ;;  %v20508_v10 = vld [vmem:[%s26716_s1 + $0x690] sm:$0xff]  ;;  %v20535_v32 = vld [vmem:[%s26716_s1 + $0x768] sm:$0xff] }
 0x204   : > { %3034 = vmatpush.bf16.msrb.mxu3 %v20486_v11  ;;  %v20516_v11 = vld [vmem:[%s26716_s1 + $0x6d0] sm:$0xff] }
 0x205   : > { %2996 = vmatpush.bf16.msrb.mxu0 %v20461_v13  ;;  %v20499_v13 = vld [vmem:[%s26716_s1 + $0x648] sm:$0xff] }
 0x206   : > { %3009 = vmatpush.bf16.msrb.mxu1 %v20469_v14  ;;  %v20507_v14 = vld [vmem:[%s26716_s1 + $0x688] sm:$0xff] }
 0x207   : > { %3022 = vmatpush.bf16.msrb.mxu2 %v20477_v15  ;;  %v20515_v15 = vld [vmem:[%s26716_s1 + $0x6c8] sm:$0xff] }
 0x208   : > { %3035 = vmatpush.bf16.msrb.mxu3 %v20485_v16 }
 0x209   : > { %2997 = vmatpush.bf16.msrb.mxu0 %v20460_v21  ;;  %v20514_v21 = vld [vmem:[%s26716_s1 + $0x6c0] sm:$0xff] }
 0x20a   : > { %3010 = vmatpush.bf16.msrb.mxu1 %v20468_v22  ;;  %v20529_v22 = vld [vmem:[%s26716_s1 + $0x738] sm:$0xff] }
 0x20b   : > { %3023 = vmatpush.bf16.msrb.mxu2 %v20476_v25  ;;  %v20545_v25 = vld [vmem:[%s26716_s1 + $0x7b8] sm:$0xff] }
 0x20c   : > { %3036 = vmatpush.bf16.msrb.mxu3 %v20484_v26  ;;  %v20553_v26 = vld [vmem:[%s26716_s1 + $0x7f8] sm:$0xff] }
 0x20d   : > { %2998 = vmatpush.bf16.msrb.mxu0 %v20459_v27  ;;  %v20528_v27 = vld [vmem:[%s26716_s1 + $0x730] sm:$0xff] }
 0x20e   : > { %3011 = vmatpush.bf16.msrb.mxu1 %v20467_v28  ;;  %v20536_v28 = vld [vmem:[%s26716_s1 + $0x770] sm:$0xff] }
 0x20f   : > { %3024 = vmatpush.bf16.msrb.mxu2 %v20475_v29  ;;  %v20544_v29 = vld [vmem:[%s26716_s1 + $0x7b0] sm:$0xff] }
 0x210   : > { %3037 = vmatpush.bf16.msrb.mxu3 %v20483_v30  ;;  %v20552_v30 = vld [vmem:[%s26716_s1 + $0x7f0] sm:$0xff] }
 0x211   : > { %2999 = vmatpush.bf16.msrb.mxu0 %v20458_v33  ;;  %v2025_v53 = vpop.f32.mrf.mxu0  ;;  %v20543_v33 = vld [vmem:[%s26716_s1 + $0x7a8] sm:$0xff] }
 0x212   : > { %3012 = vmatpush.bf16.msrb.mxu1 %v20466_v34  ;;  %v2038_v56 = vpop.f32.mrf.mxu1  ;;  %v20551_v34 = vld [vmem:[%s26716_s1 + $0x7e8] sm:$0xff] }
 0x213   : > { %3025 = vmatpush.bf16.msrb.mxu2 %v20474_v35  ;;  %v2039_v59 = vadd.f32 %v2038_v56, %v2025_v53 }
 0x214   : > { %3038 = vmatpush.bf16.msrb.mxu3 %v20482_v36  ;;  %3000 = vmatmul.bf16.vlgmr.msrb.gmra.mxu0 %v22953_v44  ;;  %v20526_v36 = vld [vmem:[%s26716_s1 + $0x720] sm:$0xff] }
 0x215   : > { %3236 = vmatpush.bf16.msra.mxu0 %v20497_v37  ;;  %3013 = vmatmul.bf16.vlgmr.msrb.gmra.mxu1 %v22959_v47  ;;  %v20534_v37 = vld [vmem:[%s26716_s1 + $0x760] sm:$0xff] }
 0x216   : > { %3249 = vmatpush.bf16.msra.mxu1 %v20505_v38  ;;  %3026 = vmatmul.bf16.vlgmr.msrb.gmra.mxu2 %v22955_v45 }
 0x217   : > { %3262 = vmatpush.bf16.msra.mxu2 %v20513_v39  ;;  %3039 = vmatmul.bf16.vlgmr.msrb.gmra.mxu3 %v22957_v46  ;;  %v20542_v39 = vld [vmem:[%s26716_s1 + $0x7a0] sm:$0xff] }
 0x218   : > { %3275 = vmatpush.bf16.msra.mxu3 %v20521_v40  ;;  %v20550_v40 = vld [vmem:[%s26716_s1 + $0x7e0] sm:$0xff] }
 0x219   : > { %3237 = vmatpush.bf16.msra.mxu0 %v20496_v41  ;;  %v2051_v2 = vpop.f32.mrf.mxu2  ;;  %v2027_v5 = vpop.f32.mrf.mxu0 }
 0x21a   : > { %3250 = vmatpush.bf16.msra.mxu1 %v20504_v42  ;;  %v2052_v3 = vadd.f32 %v2051_v2, %v2039_v59  ;;  %v2064_v4 = vpop.f32.mrf.mxu3  ;;  %v2040_v9 = vpop.f32.mrf.mxu1  ;;  %v20525_v42 = vld [vmem:[%s26716_s1 + $0x718] sm:$0xff]  ;;  %v20548_v59 = vld [vmem:[%s26716_s1 + $0x7d0] sm:$0xff]  ;;  %v20530_v5 = vld [vmem:[%s26716_s1 + $0x740] sm:$0xff] }
 0x21b   : > { %3263 = vmatpush.bf16.msra.mxu2 %v20512_v43  ;;  %v20533_v43 = vld [vmem:[%s26716_s1 + $0x758] sm:$0xff] }
 0x21c   : > { %3276 = vmatpush.bf16.msra.mxu3 %v20520_v48  ;;  %v23521_v8 = vadd.f32 %v2064_v4, %v2052_v3  ;;  %v20541_v48 = vld [vmem:[%s26716_s1 + $0x798] sm:$0xff]  ;;  %v20522_v4 = vld [vmem:[%s26716_s1 + $0x700] sm:$0xff] }
 0x21d   : > { %3238 = vmatpush.bf16.msra.mxu0 %v20495_v49  ;;  %v20549_v49 = vld [vmem:[%s26716_s1 + $0x7d8] sm:$0xff] }
 0x21e   : > { %3251 = vmatpush.bf16.msra.mxu1 %v20503_v50  ;;  %v20561_v9 = vld [vmem:[%s26717_s2 + $0x38] sm:$0xff] }
 0x21f   : > { %3264 = vmatpush.bf16.msra.mxu2 %v20511_v51 }
 0x220   : > { %3277 = vmatpush.bf16.msra.mxu3 %v20519_v52 }
 0x221   : > { %3239 = vmatpush.bf16.msra.mxu0 %v20494_v54  ;;  %v2053_v16 = vpop.f32.mrf.mxu2  ;;  %v20524_v54 = vld [vmem:[%s26716_s1 + $0x710] sm:$0xff] }
 0x222   : > { %3252 = vmatpush.bf16.msra.mxu1 %v20502_v55  ;;  %v2066_v17 = vpop.f32.mrf.mxu3  ;;  %v20532_v55 = vld [vmem:[%s26716_s1 + $0x750] sm:$0xff] }
 0x223   : > { %3265 = vmatpush.bf16.msra.mxu2 %v20510_v57  ;;  %v20584_v16 = vld [vmem:[%s26717_s2 + $0xf0] sm:$0xff]  ;;  %v20559_v17 = vld [vmem:[%s26717_s2 + $0x28] sm:$0xff] }
 0x224   : > { %3278 = vmatpush.bf16.msra.mxu3 %v20518_v58  ;;  %v20540_v58 = vld [vmem:[%s26716_s1 + $0x790] sm:$0xff] }
 0x225   : > { %3240 = vmatpush.bf16.msra.mxu0 %v20493_v60  ;;  %v20523_v60 = vld [vmem:[%s26716_s1 + $0x708] sm:$0xff] }
 0x226   : > { %3253 = vmatpush.bf16.msra.mxu1 %v20501_v61  ;;  %v20531_v61 = vld [vmem:[%s26716_s1 + $0x748] sm:$0xff] }
 0x227   : > { %3266 = vmatpush.bf16.msra.mxu2 %v20509_v62  ;;  %v20539_v62 = vld [vmem:[%s26716_s1 + $0x788] sm:$0xff] }
 0x228   : > { %3279 = vmatpush.bf16.msra.mxu3 %v20517_v63  ;;  %v20547_v63 = vld [vmem:[%s26716_s1 + $0x7c8] sm:$0xff] }
 0x229   : > { %3241 = vmatpush.bf16.msra.mxu0 %v20492_v6  ;;  %v20538_v6 = vld [vmem:[%s26716_s1 + $0x780] sm:$0xff] }
 0x22a   : > { %3254 = vmatpush.bf16.msra.mxu1 %v20500_v7  ;;  %v20546_v7 = vld [vmem:[%s26716_s1 + $0x7c0] sm:$0xff] }
 0x22b   : > { %3267 = vmatpush.bf16.msra.mxu2 %v20508_v10  ;;  %v20569_v10 = vld [vmem:[%s26717_s2 + $0x78] sm:$0xff] }
 0x22c   : > { %3280 = vmatpush.bf16.msra.mxu3 %v20516_v11  ;;  %v20577_v11 = vld [vmem:[%s26717_s2 + $0xb8] sm:$0xff] }
 0x22d   : > { %3242 = vmatpush.bf16.msra.mxu0 %v20491_v12  ;;  %v20585_v12 = vld [vmem:[%s26717_s2 + $0xf8] sm:$0xff] }
 0x22e   : > { %3255 = vmatpush.bf16.msra.mxu1 %v20499_v13  ;;  %v20560_v13 = vld [vmem:[%s26717_s2 + $0x30] sm:$0xff] }
 0x22f   : > { %3268 = vmatpush.bf16.msra.mxu2 %v20507_v14  ;;  %v20568_v14 = vld [vmem:[%s26717_s2 + $0x70] sm:$0xff] }
 0x230   : > { %3281 = vmatpush.bf16.msra.mxu3 %v20515_v15  ;;  %v20576_v15 = vld [vmem:[%s26717_s2 + $0xb0] sm:$0xff] }
 0x231   : > { %3243 = vmatpush.bf16.msra.mxu0 %v20490_v18  ;;  %v2269_v35 = vpop.f32.mrf.mxu0  ;;  %v20567_v18 = vld [vmem:[%s26717_s2 + $0x68] sm:$0xff] }
 0x232   : > { %3256 = vmatpush.bf16.msra.mxu1 %v20498_v19  ;;  %v2282_v38 = vpop.f32.mrf.mxu1  ;;  %v20575_v19 = vld [vmem:[%s26717_s2 + $0xa8] sm:$0xff] }
 0x233   : > { %3269 = vmatpush.bf16.msra.mxu2 %v20506_v20  ;;  %v2283_v41 = vadd.f32 %v2282_v38, %v2269_v35  ;;  %v20583_v20 = vld [vmem:[%s26717_s2 + $0xe8] sm:$0xff]  ;;  %v20564_v38 = vld [vmem:[%s26717_s2 + $0x50] sm:$0xff] }
 0x234   : > { %3282 = vmatpush.bf16.msra.mxu3 %v20514_v21  ;;  %3244 = vmatmul.bf16.vlgmr.msra.gmra.mxu0 %v22953_v44 }
 0x235   : > { %3480 = vmatpush.bf16.msrb.mxu0 %v20529_v22  ;;  %3257 = vmatmul.bf16.vlgmr.msra.gmra.mxu1 %v22959_v47  ;;  %v20558_v22 = vld [vmem:[%s26717_s2 + $0x20] sm:$0xff] }
 0x236   : > { %3493 = vmatpush.bf16.msrb.mxu1 %v20537_v24  ;;  %3270 = vmatmul.bf16.vlgmr.msra.gmra.mxu2 %v22955_v45  ;;  %v20566_v24 = vld [vmem:[%s26717_s2 + $0x60] sm:$0xff] }
 0x237   : > { %3506 = vmatpush.bf16.msrb.mxu2 %v20545_v25  ;;  %3283 = vmatmul.bf16.vlgmr.msra.gmra.mxu3 %v22957_v46 }
 0x238   : > { %3519 = vmatpush.bf16.msrb.mxu3 %v20553_v26  ;;  %v20574_v26 = vld [vmem:[%s26717_s2 + $0xa0] sm:$0xff] }
 0x239   : > { %3481 = vmatpush.bf16.msrb.mxu0 %v20528_v27  ;;  %v2295_v50 = vpop.f32.mrf.mxu2  ;;  %v2271_v53 = vpop.f32.mrf.mxu0  ;;  %v20582_v27 = vld [vmem:[%s26717_s2 + $0xe0] sm:$0xff] }
 0x23a   : > { %3494 = vmatpush.bf16.msrb.mxu1 %v20536_v28  ;;  %v2296_v51 = vadd.f32 %v2295_v50, %v2283_v41  ;;  %v2308_v52 = vpop.f32.mrf.mxu3  ;;  %v2284_v57 = vpop.f32.mrf.mxu1  ;;  %v20572_v41 = vld [vmem:[%s26717_s2 + $0x90] sm:$0xff]  ;;  %v20579_v50 = vld [vmem:[%s26717_s2 + $0xc8] sm:$0xff]  ;;  %v20554_v53 = vld [vmem:[%s26717_s2] sm:$0xff] }
 0x23b   : > { %3507 = vmatpush.bf16.msrb.mxu2 %v20544_v29  ;;  %v20557_v29 = vld [vmem:[%s26717_s2 + $0x18] sm:$0xff]  ;;  %v20578_v57 = vld [vmem:[%s26717_s2 + $0xc0] sm:$0xff] }
 0x23c   : > { %3520 = vmatpush.bf16.msrb.mxu3 %v20552_v30  ;;  %v23623_v56 = vadd.f32 %v2308_v52, %v2296_v51  ;;  %v20565_v30 = vld [vmem:[%s26717_s2 + $0x58] sm:$0xff] }
 0x23d   : > { %3482 = vmatpush.bf16.msrb.mxu0 %v20527_v31  ;;  %v20573_v31 = vld [vmem:[%s26717_s2 + $0x98] sm:$0xff] }
 0x23e   : > { %3495 = vmatpush.bf16.msrb.mxu1 %v20535_v32  ;;  %v20581_v32 = vld [vmem:[%s26717_s2 + $0xd8] sm:$0xff] }
 0x23f   : > { %3508 = vmatpush.bf16.msrb.mxu2 %v20543_v33 }
 0x240   : > { %3521 = vmatpush.bf16.msrb.mxu3 %v20551_v34 }
 0x241   : > { %3483 = vmatpush.bf16.msrb.mxu0 %v20526_v36  ;;  %v2297_v2 = vpop.f32.mrf.mxu2 }
 0x242   : > { %3496 = vmatpush.bf16.msrb.mxu1 %v20534_v37  ;;  %v2310_v3 = vpop.f32.mrf.mxu3  ;;  %v20556_v37 = vld [vmem:[%s26717_s2 + $0x10] sm:$0xff] }
 0x243   : > { %3509 = vmatpush.bf16.msrb.mxu2 %v20542_v39  ;;  %v20608_v2 = vld [vmem:[%s26717_s2 + $0x1b0] sm:$0xff] }
 0x244   : > { %3522 = vmatpush.bf16.msrb.mxu3 %v20550_v40  ;;  %v20616_v3 = vld [vmem:[%s26717_s2 + $0x1f0] sm:$0xff] }
 0x245   : > { %3484 = vmatpush.bf16.msrb.mxu0 %v20525_v42  ;;  %v20580_v42 = vld [vmem:[%s26717_s2 + $0xd0] sm:$0xff] }
 0x246   : > { %3497 = vmatpush.bf16.msrb.mxu1 %v20533_v43  ;;  %v20555_v43 = vld [vmem:[%s26717_s2 + $0x8] sm:$0xff] }
 0x247   : > { %3510 = vmatpush.bf16.msrb.mxu2 %v20541_v48  ;;  %v20563_v48 = vld [vmem:[%s26717_s2 + $0x48] sm:$0xff] }
 0x248   : > { %3523 = vmatpush.bf16.msrb.mxu3 %v20549_v49  ;;  %v20571_v49 = vld [vmem:[%s26717_s2 + $0x88] sm:$0xff] }
 0x249   : > { %3485 = vmatpush.bf16.msrb.mxu0 %v20524_v54  ;;  %v20562_v54 = vld [vmem:[%s26717_s2 + $0x40] sm:$0xff] }
 0x24a   : > { %3498 = vmatpush.bf16.msrb.mxu1 %v20532_v55  ;;  %v20570_v55 = vld [vmem:[%s26717_s2 + $0x80] sm:$0xff] }
 0x24b   : > { %3511 = vmatpush.bf16.msrb.mxu2 %v20540_v58  ;;  %v20593_v58 = vld [vmem:[%s26717_s2 + $0x138] sm:$0xff] }
 0x24c   : > { %3524 = vmatpush.bf16.msrb.mxu3 %v20548_v59  ;;  %v20601_v59 = vld [vmem:[%s26717_s2 + $0x178] sm:$0xff] }
 0x24d   : > { %3486 = vmatpush.bf16.msrb.mxu0 %v20523_v60  ;;  %v20609_v60 = vld [vmem:[%s26717_s2 + $0x1b8] sm:$0xff] }
 0x24e   : > { %3499 = vmatpush.bf16.msrb.mxu1 %v20531_v61  ;;  %v20617_v61 = vld [vmem:[%s26717_s2 + $0x1f8] sm:$0xff] }
 0x24f   : > { %3512 = vmatpush.bf16.msrb.mxu2 %v20539_v62  ;;  %v20592_v62 = vld [vmem:[%s26717_s2 + $0x130] sm:$0xff] }
 0x250   : > { %3525 = vmatpush.bf16.msrb.mxu3 %v20547_v63  ;;  %v20600_v63 = vld [vmem:[%s26717_s2 + $0x170] sm:$0xff] }
 0x251   : > { %3487 = vmatpush.bf16.msrb.mxu0 %v20522_v4  ;;  %v2513_v21 = vpop.f32.mrf.mxu0  ;;  %v20591_v4 = vld [vmem:[%s26717_s2 + $0x128] sm:$0xff] }
 0x252   : > { %3500 = vmatpush.bf16.msrb.mxu1 %v20530_v5  ;;  %v2526_v25 = vpop.f32.mrf.mxu1  ;;  %v20599_v5 = vld [vmem:[%s26717_s2 + $0x168] sm:$0xff] }
 0x253   : > { %3513 = vmatpush.bf16.msrb.mxu2 %v20538_v6  ;;  %v2527_v28 = vadd.f32 %v2526_v25, %v2513_v21  ;;  %v20607_v6 = vld [vmem:[%s26717_s2 + $0x1a8] sm:$0xff]  ;;  %v20588_v25 = vld [vmem:[%s26717_s2 + $0x110] sm:$0xff] }
 0x254   : > { %3526 = vmatpush.bf16.msrb.mxu3 %v20546_v7  ;;  %3488 = vmatmul.bf16.vlgmr.msrb.gmra.mxu0 %v22953_v44  ;;  %v20615_v7 = vld [vmem:[%s26717_s2 + $0x1e8] sm:$0xff] }
 0x255   : > { %4236 = vmatpush.bf16.msra.mxu0 %v20561_v9  ;;  %3501 = vmatmul.bf16.vlgmr.msrb.gmra.mxu1 %v22959_v47 }
 0x256   : > { %4249 = vmatpush.bf16.msra.mxu1 %v20569_v10  ;;  %3514 = vmatmul.bf16.vlgmr.msrb.gmra.mxu2 %v22955_v45  ;;  %v20590_v10 = vld [vmem:[%s26717_s2 + $0x120] sm:$0xff] }
 0x257   : > { %4262 = vmatpush.bf16.msra.mxu2 %v20577_v11  ;;  %3527 = vmatmul.bf16.vlgmr.msrb.gmra.mxu3 %v22957_v46  ;;  %v20598_v11 = vld [vmem:[%s26717_s2 + $0x160] sm:$0xff] }
 0x258   : > { %4275 = vmatpush.bf16.msra.mxu3 %v20585_v12 }
 0x259   : > { %4237 = vmatpush.bf16.msra.mxu0 %v20560_v13  ;;  %v2539_v33 = vpop.f32.mrf.mxu2  ;;  %v2515_v36 = vpop.f32.mrf.mxu0  ;;  %v20606_v13 = vld [vmem:[%s26717_s2 + $0x1a0] sm:$0xff] }
 0x25a   : > { %4250 = vmatpush.bf16.msra.mxu1 %v20568_v14  ;;  %v2540_v34 = vadd.f32 %v2539_v33, %v2527_v28  ;;  %v2552_v35 = vpop.f32.mrf.mxu3  ;;  %v2528_v40 = vpop.f32.mrf.mxu1  ;;  %v20614_v14 = vld [vmem:[%s26717_s2 + $0x1e0] sm:$0xff]  ;;  %v20603_v33 = vld [vmem:[%s26717_s2 + $0x188] sm:$0xff] }
 0x25b   : > { %4263 = vmatpush.bf16.msra.mxu2 %v20576_v15  ;;  %v20602_v40 = vld [vmem:[%s26717_s2 + $0x180] sm:$0xff] }
 0x25c   : > { %4276 = vmatpush.bf16.msra.mxu3 %v20584_v16  ;;  %v23725_v39 = vadd.f32 %v2552_v35, %v2540_v34  ;;  %v20589_v16 = vld [vmem:[%s26717_s2 + $0x118] sm:$0xff]  ;;  %v20611_v34 = vld [vmem:[%s26717_s2 + $0x1c8] sm:$0xff] }
 0x25d   : > { %4238 = vmatpush.bf16.msra.mxu0 %v20559_v17  ;;  %v20597_v17 = vld [vmem:[%s26717_s2 + $0x158] sm:$0xff] }
 0x25e   : > { %4251 = vmatpush.bf16.msra.mxu1 %v20567_v18  ;;  %v20605_v18 = vld [vmem:[%s26717_s2 + $0x198] sm:$0xff] }
 0x25f   : > { %4264 = vmatpush.bf16.msra.mxu2 %v20575_v19  ;;  %v20613_v19 = vld [vmem:[%s26717_s2 + $0x1d8] sm:$0xff] }
 0x260   : > { %4277 = vmatpush.bf16.msra.mxu3 %v20583_v20 }
 0x261   : > { %4239 = vmatpush.bf16.msra.mxu0 %v20558_v22  ;;  %v2541_v51 = vpop.f32.mrf.mxu2 }
 0x262   : > { %4252 = vmatpush.bf16.msra.mxu1 %v20566_v24  ;;  %v2554_v52 = vpop.f32.mrf.mxu3  ;;  %v20632_v51 = vld [vmem:[%s26717_s2 + $0x270] sm:$0xff] }
 0x263   : > { %4265 = vmatpush.bf16.msra.mxu2 %v20574_v26  ;;  %v20596_v26 = vld [vmem:[%s26717_s2 + $0x150] sm:$0xff] }
 0x264   : > { %4278 = vmatpush.bf16.msra.mxu3 %v20582_v27  ;;  %v20640_v52 = vld [vmem:[%s26717_s2 + $0x2b0] sm:$0xff] }
 0x265   : > { %4240 = vmatpush.bf16.msra.mxu0 %v20557_v29  ;;  %v20604_v29 = vld [vmem:[%s26717_s2 + $0x190] sm:$0xff] }
 0x266   : > { %4253 = vmatpush.bf16.msra.mxu1 %v20565_v30  ;;  %v20612_v30 = vld [vmem:[%s26717_s2 + $0x1d0] sm:$0xff] }
 0x267   : > { %4266 = vmatpush.bf16.msra.mxu2 %v20573_v31  ;;  %v20587_v31 = vld [vmem:[%s26717_s2 + $0x108] sm:$0xff] }
 0x268   : > { %4279 = vmatpush.bf16.msra.mxu3 %v20581_v32  ;;  %v20595_v32 = vld [vmem:[%s26717_s2 + $0x148] sm:$0xff] }
 0x269   : > { %4241 = vmatpush.bf16.msra.mxu0 %v20556_v37  ;;  %v20586_v37 = vld [vmem:[%s26717_s2 + $0x100] sm:$0xff] }
 0x26a   : > { %4254 = vmatpush.bf16.msra.mxu1 %v20564_v38  ;;  %v20594_v38 = vld [vmem:[%s26717_s2 + $0x140] sm:$0xff] }
 0x26b   : > { %4267 = vmatpush.bf16.msra.mxu2 %v20572_v41  ;;  %v20610_v41 = vld [vmem:[%s26717_s2 + $0x1c0] sm:$0xff] }
 0x26c   : > { %4280 = vmatpush.bf16.msra.mxu3 %v20580_v42  ;;  %v20625_v42 = vld [vmem:[%s26717_s2 + $0x238] sm:$0xff] }
 0x26d   : > { %4242 = vmatpush.bf16.msra.mxu0 %v20555_v43  ;;  %v20633_v43 = vld [vmem:[%s26717_s2 + $0x278] sm:$0xff] }
 0x26e   : > { %4255 = vmatpush.bf16.msra.mxu1 %v20563_v48  ;;  %v20641_v48 = vld [vmem:[%s26717_s2 + $0x2b8] sm:$0xff] }
 0x26f   : > { %4268 = vmatpush.bf16.msra.mxu2 %v20571_v49  ;;  %v20649_v49 = vld [vmem:[%s26717_s2 + $0x2f8] sm:$0xff] }
 0x270   : > { %4281 = vmatpush.bf16.msra.mxu3 %v20579_v50  ;;  %v20624_v50 = vld [vmem:[%s26717_s2 + $0x230] sm:$0xff] }
 0x271   : > { %4243 = vmatpush.bf16.msra.mxu0 %v20554_v53  ;;  %v2757_v9 = vpop.f32.mrf.mxu0  ;;  %v20648_v53 = vld [vmem:[%s26717_s2 + $0x2f0] sm:$0xff] }
 0x272   : > { %4256 = vmatpush.bf16.msra.mxu1 %v20562_v54  ;;  %v2770_v12 = vpop.f32.mrf.mxu1  ;;  %v20623_v54 = vld [vmem:[%s26717_s2 + $0x228] sm:$0xff] }
 0x273   : > { %4269 = vmatpush.bf16.msra.mxu2 %v20570_v55  ;;  %v2771_v15 = vadd.f32 %v2770_v12, %v2757_v9  ;;  %v20631_v55 = vld [vmem:[%s26717_s2 + $0x268] sm:$0xff] }
 0x274   : > { %4282 = vmatpush.bf16.msra.mxu3 %v20578_v57  ;;  %4244 = vmatmul.bf16.vlgmr.msra.gmra.mxu0 %v22953_v44  ;;  %v20639_v57 = vld [vmem:[%s26717_s2 + $0x2a8] sm:$0xff] }
 0x275   : > { %4480 = vmatpush.bf16.msrb.mxu0 %v20593_v58  ;;  %4257 = vmatmul.bf16.vlgmr.msra.gmra.mxu1 %v22959_v47  ;;  %v20647_v58 = vld [vmem:[%s26717_s2 + $0x2e8] sm:$0xff] }
 0x276   : > { %4493 = vmatpush.bf16.msrb.mxu1 %v20601_v59  ;;  %4270 = vmatmul.bf16.vlgmr.msra.gmra.mxu2 %v22955_v45 }
 0x277   : > { %4506 = vmatpush.bf16.msrb.mxu2 %v20609_v60  ;;  %4283 = vmatmul.bf16.vlgmr.msra.gmra.mxu3 %v22957_v46  ;;  %v20622_v60 = vld [vmem:[%s26717_s2 + $0x220] sm:$0xff] }
 0x278   : > { %4519 = vmatpush.bf16.msrb.mxu3 %v20617_v61  ;;  %v20630_v61 = vld [vmem:[%s26717_s2 + $0x260] sm:$0xff] }
 0x279   : > { %4481 = vmatpush.bf16.msrb.mxu0 %v20592_v62  ;;  %v2783_v20 = vpop.f32.mrf.mxu2  ;;  %v2759_v24 = vpop.f32.mrf.mxu0 }
 0x27a   : > { %4494 = vmatpush.bf16.msrb.mxu1 %v20600_v63  ;;  %v2784_v21 = vadd.f32 %v2783_v20, %v2771_v15  ;;  %v2796_v22 = vpop.f32.mrf.mxu3  ;;  %v2772_v28 = vpop.f32.mrf.mxu1  ;;  %v20638_v63 = vld [vmem:[%s26717_s2 + $0x2a0] sm:$0xff]  ;;  %v20627_v20 = vld [vmem:[%s26717_s2 + $0x248] sm:$0xff] }
 0x27b   : > { %4507 = vmatpush.bf16.msrb.mxu2 %v20608_v2  ;;  %v20646_v2 = vld [vmem:[%s26717_s2 + $0x2e0] sm:$0xff] }
 0x27c   : > { %4520 = vmatpush.bf16.msrb.mxu3 %v20616_v3  ;;  %v23827_v27 = vadd.f32 %v2796_v22, %v2784_v21  ;;  %v20635_v21 = vld [vmem:[%s26717_s2 + $0x288] sm:$0xff]  ;;  %v20626_v28 = vld [vmem:[%s26717_s2 + $0x240] sm:$0xff] }
 0x27d   : > { %4482 = vmatpush.bf16.msrb.mxu0 %v20591_v4  ;;  %v20621_v4 = vld [vmem:[%s26717_s2 + $0x218] sm:$0xff]  ;;  %v20643_v22 = vld [vmem:[%s26717_s2 + $0x2c8] sm:$0xff] }
 0x27e   : > { %4495 = vmatpush.bf16.msrb.mxu1 %v20599_v5  ;;  %v20629_v5 = vld [vmem:[%s26717_s2 + $0x258] sm:$0xff] }
 0x27f   : > { %4508 = vmatpush.bf16.msrb.mxu2 %v20607_v6  ;;  %v20637_v6 = vld [vmem:[%s26717_s2 + $0x298] sm:$0xff] }
 0x280   : > { %4521 = vmatpush.bf16.msrb.mxu3 %v20615_v7  ;;  %v20645_v7 = vld [vmem:[%s26717_s2 + $0x2d8] sm:$0xff] }
 0x281   : > { %4483 = vmatpush.bf16.msrb.mxu0 %v20590_v10  ;;  %v2785_v35 = vpop.f32.mrf.mxu2 }
 0x282   : > { %4496 = vmatpush.bf16.msrb.mxu1 %v20598_v11  ;;  %v2798_v36 = vpop.f32.mrf.mxu3  ;;  %v20656_v35 = vld [vmem:[%s26717_s2 + $0x330] sm:$0xff] }
 0x283   : > { %4509 = vmatpush.bf16.msrb.mxu2 %v20606_v13  ;;  %v20620_v13 = vld [vmem:[%s26717_s2 + $0x210] sm:$0xff] }
 0x284   : > { %4522 = vmatpush.bf16.msrb.mxu3 %v20614_v14  ;;  %v20628_v14 = vld [vmem:[%s26717_s2 + $0x250] sm:$0xff] }
 0x285   : > { %4484 = vmatpush.bf16.msrb.mxu0 %v20589_v16  ;;  %v20664_v36 = vld [vmem:[%s26717_s2 + $0x370] sm:$0xff] }
 0x286   : > { %4497 = vmatpush.bf16.msrb.mxu1 %v20597_v17  ;;  %v20636_v17 = vld [vmem:[%s26717_s2 + $0x290] sm:$0xff] }
 0x287   : > { %4510 = vmatpush.bf16.msrb.mxu2 %v20605_v18  ;;  %v20644_v18 = vld [vmem:[%s26717_s2 + $0x2d0] sm:$0xff] }
 0x288   : > { %4523 = vmatpush.bf16.msrb.mxu3 %v20613_v19  ;;  %v20619_v19 = vld [vmem:[%s26717_s2 + $0x208] sm:$0xff] }
 0x289   : > { %4485 = vmatpush.bf16.msrb.mxu0 %v20588_v25 }
 0x28a   : > { %4498 = vmatpush.bf16.msrb.mxu1 %v20596_v26  ;;  %v20618_v26 = vld [vmem:[%s26717_s2 + $0x200] sm:$0xff] }
 0x28b   : > { %4511 = vmatpush.bf16.msrb.mxu2 %v20604_v29  ;;  %v20634_v29 = vld [vmem:[%s26717_s2 + $0x280] sm:$0xff] }
 0x28c   : > { %4524 = vmatpush.bf16.msrb.mxu3 %v20612_v30  ;;  %v20642_v30 = vld [vmem:[%s26717_s2 + $0x2c0] sm:$0xff] }
 0x28d   : > { %4486 = vmatpush.bf16.msrb.mxu0 %v20587_v31  ;;  %v20657_v31 = vld [vmem:[%s26717_s2 + $0x338] sm:$0xff] }
 0x28e   : > { %4499 = vmatpush.bf16.msrb.mxu1 %v20595_v32  ;;  %v20665_v32 = vld [vmem:[%s26717_s2 + $0x378] sm:$0xff] }
 0x28f   : > { %4512 = vmatpush.bf16.msrb.mxu2 %v20603_v33  ;;  %v20673_v33 = vld [vmem:[%s26717_s2 + $0x3b8] sm:$0xff] }
 0x290   : > { %4525 = vmatpush.bf16.msrb.mxu3 %v20611_v34  ;;  %v20681_v34 = vld [vmem:[%s26717_s2 + $0x3f8] sm:$0xff] }
 0x291   : > { %4487 = vmatpush.bf16.msrb.mxu0 %v20586_v37  ;;  %v3001_v59 = vpop.f32.mrf.mxu0  ;;  %v20672_v37 = vld [vmem:[%s26717_s2 + $0x3b0] sm:$0xff] }
 0x292   : > { %4500 = vmatpush.bf16.msrb.mxu1 %v20594_v38  ;;  %v3014_v62 = vpop.f32.mrf.mxu1  ;;  %v20680_v38 = vld [vmem:[%s26717_s2 + $0x3f0] sm:$0xff] }
 0x293   : > { %4513 = vmatpush.bf16.msrb.mxu2 %v20602_v40  ;;  %v3015_v3 = vadd.f32 %v3014_v62, %v3001_v59  ;;  %v20655_v40 = vld [vmem:[%s26717_s2 + $0x328] sm:$0xff]  ;;  %v20677_v59 = vld [vmem:[%s26717_s2 + $0x3d8] sm:$0xff] }
 0x294   : > { %4526 = vmatpush.bf16.msrb.mxu3 %v20610_v41  ;;  %4488 = vmatmul.bf16.vlgmr.msrb.gmra.mxu0 %v22953_v44  ;;  %v20663_v41 = vld [vmem:[%s26717_s2 + $0x368] sm:$0xff] }
 0x295   : > { %4724 = vmatpush.bf16.msra.mxu0 %v20625_v42  ;;  %4501 = vmatmul.bf16.vlgmr.msrb.gmra.mxu1 %v22959_v47  ;;  %v20671_v42 = vld [vmem:[%s26717_s2 + $0x3a8] sm:$0xff] }
 0x296   : > { %4737 = vmatpush.bf16.msra.mxu1 %v20633_v43  ;;  %4514 = vmatmul.bf16.vlgmr.msrb.gmra.mxu2 %v22955_v45  ;;  %v20679_v43 = vld [vmem:[%s26717_s2 + $0x3e8] sm:$0xff] }
 0x297   : > { %4750 = vmatpush.bf16.msra.mxu2 %v20641_v48  ;;  %4527 = vmatmul.bf16.vlgmr.msrb.gmra.mxu3 %v22957_v46 }
 0x298   : > { %4763 = vmatpush.bf16.msra.mxu3 %v20649_v49  ;;  %v20654_v49 = vld [vmem:[%s26717_s2 + $0x320] sm:$0xff] }
 0x299   : > { %4725 = vmatpush.bf16.msra.mxu0 %v20624_v50  ;;  %v3027_v9 = vpop.f32.mrf.mxu2  ;;  %v3003_v12 = vpop.f32.mrf.mxu0  ;;  %v20662_v50 = vld [vmem:[%s26717_s2 + $0x360] sm:$0xff] }
 0x29a   : > { %4738 = vmatpush.bf16.msra.mxu1 %v20632_v51  ;;  %v3028_v10 = vadd.f32 %v3027_v9, %v3015_v3  ;;  %v3040_v11 = vpop.f32.mrf.mxu3  ;;  %v3016_v16 = vpop.f32.mrf.mxu1  ;;  %v20660_v3 = vld [vmem:[%s26717_s2 + $0x350] sm:$0xff]  ;;  %v20651_v9 = vld [vmem:[%s26717_s2 + $0x308] sm:$0xff] }
 0x29b   : > { %4751 = vmatpush.bf16.msra.mxu2 %v20640_v52  ;;  %v20670_v52 = vld [vmem:[%s26717_s2 + $0x3a0] sm:$0xff]  ;;  %v20675_v12 = vld [vmem:[%s26717_s2 + $0x3c8] sm:$0xff] }
 0x29c   : > { %4764 = vmatpush.bf16.msra.mxu3 %v20648_v53  ;;  %v23929_v15 = vadd.f32 %v3040_v11, %v3028_v10  ;;  %v20678_v53 = vld [vmem:[%s26717_s2 + $0x3e0] sm:$0xff]  ;;  %v20659_v10 = vld [vmem:[%s26717_s2 + $0x348] sm:$0xff] }
 0x29d   : > { %4726 = vmatpush.bf16.msra.mxu0 %v20623_v54  ;;  %v20667_v11 = vld [vmem:[%s26717_s2 + $0x388] sm:$0xff]  ;;  %v20650_v16 = vld [vmem:[%s26717_s2 + $0x300] sm:$0xff] }
 0x29e   : > { %4739 = vmatpush.bf16.msra.mxu1 %v20631_v55  ;;  %v20653_v55 = vld [vmem:[%s26717_s2 + $0x318] sm:$0xff] }
 0x29f   : > { %4752 = vmatpush.bf16.msra.mxu2 %v20639_v57  ;;  %v20661_v57 = vld [vmem:[%s26717_s2 + $0x358] sm:$0xff] }
 0x2a0   : > { %4765 = vmatpush.bf16.msra.mxu3 %v20647_v58  ;;  %v20669_v58 = vld [vmem:[%s26717_s2 + $0x398] sm:$0xff] }
 0x2a1   : > { %4727 = vmatpush.bf16.msra.mxu0 %v20622_v60  ;;  %v3029_v24 = vpop.f32.mrf.mxu2 }
 0x2a2   : > { %4740 = vmatpush.bf16.msra.mxu1 %v20630_v61  ;;  %v3042_v25 = vpop.f32.mrf.mxu3  ;;  %v20713_v24 = vld [vmem:[%s26717_s2 + $0x4f8] sm:$0xff] }
 0x2a3   : > { %4753 = vmatpush.bf16.msra.mxu2 %v20638_v63  ;;  %v20688_v25 = vld [vmem:[%s26717_s2 + $0x430] sm:$0xff] }
 0x2a4   : > { %4766 = vmatpush.bf16.msra.mxu3 %v20646_v2  ;;  %v20652_v2 = vld [vmem:[%s26717_s2 + $0x310] sm:$0xff] }
 0x2a5   : > { %4728 = vmatpush.bf16.msra.mxu0 %v20621_v4 }
 0x2a6   : > { %4741 = vmatpush.bf16.msra.mxu1 %v20629_v5 }
 0x2a7   : > { %4754 = vmatpush.bf16.msra.mxu2 %v20637_v6  ;;  %v20668_v6 = vld [vmem:[%s26717_s2 + $0x390] sm:$0xff] }
 0x2a8   : > { %4767 = vmatpush.bf16.msra.mxu3 %v20645_v7  ;;  %v20676_v7 = vld [vmem:[%s26717_s2 + $0x3d0] sm:$0xff] }
 0x2a9   : > { %4729 = vmatpush.bf16.msra.mxu0 %v20620_v13 }
 0x2aa   : > { %4742 = vmatpush.bf16.msra.mxu1 %v20628_v14 }
 0x2ab   : > { %4755 = vmatpush.bf16.msra.mxu2 %v20636_v17  ;;  %v20658_v17 = vld [vmem:[%s26717_s2 + $0x340] sm:$0xff] }
 0x2ac   : > { %4768 = vmatpush.bf16.msra.mxu3 %v20644_v18  ;;  %v20666_v18 = vld [vmem:[%s26717_s2 + $0x380] sm:$0xff] }
 0x2ad   : > { %4730 = vmatpush.bf16.msra.mxu0 %v20619_v19  ;;  %v20674_v19 = vld [vmem:[%s26717_s2 + $0x3c0] sm:$0xff] }
 0x2ae   : > { %4743 = vmatpush.bf16.msra.mxu1 %v20627_v20  ;;  %v20689_v20 = vld [vmem:[%s26717_s2 + $0x438] sm:$0xff] }
 0x2af   : > { %4756 = vmatpush.bf16.msra.mxu2 %v20635_v21  ;;  %v20697_v21 = vld [vmem:[%s26717_s2 + $0x478] sm:$0xff] }
 0x2b0   : > { %4769 = vmatpush.bf16.msra.mxu3 %v20643_v22  ;;  %v20705_v22 = vld [vmem:[%s26717_s2 + $0x4b8] sm:$0xff] }
 0x2b1   : > { %4731 = vmatpush.bf16.msra.mxu0 %v20618_v26  ;;  %v3245_v48 = vpop.f32.mrf.mxu0  ;;  %v20696_v26 = vld [vmem:[%s26717_s2 + $0x470] sm:$0xff] }
 0x2b2   : > { %4744 = vmatpush.bf16.msra.mxu1 %v20626_v28  ;;  %v3258_v51 = vpop.f32.mrf.mxu1  ;;  %v20704_v28 = vld [vmem:[%s26717_s2 + $0x4b0] sm:$0xff] }
 0x2b3   : > { %4757 = vmatpush.bf16.msra.mxu2 %v20634_v29  ;;  %v3259_v54 = vadd.f32 %v3258_v51, %v3245_v48  ;;  %v20712_v29 = vld [vmem:[%s26717_s2 + $0x4f0] sm:$0xff]  ;;  %v20701_v48 = vld [vmem:[%s26717_s2 + $0x498] sm:$0xff] }
 0x2b4   : > { %4770 = vmatpush.bf16.msra.mxu3 %v20642_v30  ;;  %4732 = vmatmul.bf16.vlgmr.msra.gmra.mxu0 %v22953_v44  ;;  %v20687_v30 = vld [vmem:[%s26717_s2 + $0x428] sm:$0xff] }
 0x2b5   : > { %4968 = vmatpush.bf16.msrb.mxu0 %v20657_v31  ;;  %4745 = vmatmul.bf16.vlgmr.msra.gmra.mxu1 %v22959_v47  ;;  %v20695_v31 = vld [vmem:[%s26717_s2 + $0x468] sm:$0xff] }
 0x2b6   : > { %4981 = vmatpush.bf16.msrb.mxu1 %v20665_v32  ;;  %4758 = vmatmul.bf16.vlgmr.msra.gmra.mxu2 %v22955_v45  ;;  %v20703_v32 = vld [vmem:[%s26717_s2 + $0x4a8] sm:$0xff] }
 0x2b7   : > { %4994 = vmatpush.bf16.msrb.mxu2 %v20673_v33  ;;  %4771 = vmatmul.bf16.vlgmr.msra.gmra.mxu3 %v22957_v46  ;;  %v20711_v33 = vld [vmem:[%s26717_s2 + $0x4e8] sm:$0xff] }
 0x2b8   : > { %5007 = vmatpush.bf16.msrb.mxu3 %v20681_v34 }
 0x2b9   : > { %4969 = vmatpush.bf16.msrb.mxu0 %v20656_v35  ;;  %v3271_v60 = vpop.f32.mrf.mxu2  ;;  %v3247_v63 = vpop.f32.mrf.mxu0  ;;  %v20686_v35 = vld [vmem:[%s26717_s2 + $0x420] sm:$0xff] }
 0x2ba   : > { %4982 = vmatpush.bf16.msrb.mxu1 %v20664_v36  ;;  %v3272_v61 = vadd.f32 %v3271_v60, %v3259_v54  ;;  %v3284_v62 = vpop.f32.mrf.mxu3  ;;  %v3260_v5 = vpop.f32.mrf.mxu1  ;;  %v20694_v36 = vld [vmem:[%s26717_s2 + $0x460] sm:$0xff]  ;;  %v20684_v54 = vld [vmem:[%s26717_s2 + $0x410] sm:$0xff]  ;;  %v20699_v63 = vld [vmem:[%s26717_s2 + $0x488] sm:$0xff] }
 0x2bb   : > { %4995 = vmatpush.bf16.msrb.mxu2 %v20672_v37  ;;  %v20708_v60 = vld [vmem:[%s26717_s2 + $0x4d0] sm:$0xff] }
 0x2bc   : > { %5008 = vmatpush.bf16.msrb.mxu3 %v20680_v38  ;;  %v24031_v4 = vadd.f32 %v3284_v62, %v3272_v61  ;;  %v20702_v38 = vld [vmem:[%s26717_s2 + $0x4a0] sm:$0xff]  ;;  %v20683_v61 = vld [vmem:[%s26717_s2 + $0x408] sm:$0xff] }
 0x2bd   : > { %4970 = vmatpush.bf16.msrb.mxu0 %v20655_v40  ;;  %v20710_v40 = vld [vmem:[%s26717_s2 + $0x4e0] sm:$0xff]  ;;  %v20691_v62 = vld [vmem:[%s26717_s2 + $0x448] sm:$0xff] }
 0x2be   : > { %4983 = vmatpush.bf16.msrb.mxu1 %v20663_v41 }
 0x2bf   : > { %4996 = vmatpush.bf16.msrb.mxu2 %v20671_v42  ;;  %v20685_v42 = vld [vmem:[%s26717_s2 + $0x418] sm:$0xff] }
 0x2c0   : > { %5009 = vmatpush.bf16.msrb.mxu3 %v20679_v43  ;;  %v20693_v43 = vld [vmem:[%s26717_s2 + $0x458] sm:$0xff] }
 0x2c1   : > { %4971 = vmatpush.bf16.msrb.mxu0 %v20654_v49  ;;  %v3273_v13 = vpop.f32.mrf.mxu2  ;;  %v20709_v49 = vld [vmem:[%s26717_s2 + $0x4d8] sm:$0xff] }
 0x2c2   : > { %4984 = vmatpush.bf16.msrb.mxu1 %v20662_v50  ;;  %v3286_v14 = vpop.f32.mrf.mxu3  ;;  %v20737_v13 = vld [vmem:[%s26717_s2 + $0x5b8] sm:$0xff] }
 0x2c3   : > { %4997 = vmatpush.bf16.msrb.mxu2 %v20670_v52  ;;  %v20745_v14 = vld [vmem:[%s26717_s2 + $0x5f8] sm:$0xff] }
 0x2c4   : > { %5010 = vmatpush.bf16.msrb.mxu3 %v20678_v53 }
 0x2c5   : > { %4972 = vmatpush.bf16.msrb.mxu0 %v20653_v55  ;;  %v20692_v55 = vld [vmem:[%s26717_s2 + $0x450] sm:$0xff] }
 0x2c6   : > { %4985 = vmatpush.bf16.msrb.mxu1 %v20661_v57 }
 0x2c7   : > { %4998 = vmatpush.bf16.msrb.mxu2 %v20669_v58 }
 0x2c8   : > { %5011 = vmatpush.bf16.msrb.mxu3 %v20677_v59  ;;  %v20700_v59 = vld [vmem:[%s26717_s2 + $0x490] sm:$0xff] }
 0x2c9   : > { %4973 = vmatpush.bf16.msrb.mxu0 %v20652_v2  ;;  %v20707_v2 = vld [vmem:[%s26717_s2 + $0x4c8] sm:$0xff] }
 0x2ca   : > { %4986 = vmatpush.bf16.msrb.mxu1 %v20660_v3 }
 0x2cb   : > { %4999 = vmatpush.bf16.msrb.mxu2 %v20668_v6  ;;  %v20682_v6 = vld [vmem:[%s26717_s2 + $0x400] sm:$0xff] }
 0x2cc   : > { %5012 = vmatpush.bf16.msrb.mxu3 %v20676_v7  ;;  %v20690_v7 = vld [vmem:[%s26717_s2 + $0x440] sm:$0xff] }
 0x2cd   : > { %4974 = vmatpush.bf16.msrb.mxu0 %v20651_v9  ;;  %v20698_v9 = vld [vmem:[%s26717_s2 + $0x480] sm:$0xff] }
 0x2ce   : > { %4987 = vmatpush.bf16.msrb.mxu1 %v20659_v10  ;;  %v20706_v10 = vld [vmem:[%s26717_s2 + $0x4c0] sm:$0xff] }
 0x2cf   : > { %5000 = vmatpush.bf16.msrb.mxu2 %v20667_v11  ;;  %v20721_v11 = vld [vmem:[%s26717_s2 + $0x538] sm:$0xff] }
 0x2d0   : > { %5013 = vmatpush.bf16.msrb.mxu3 %v20675_v12  ;;  %v20729_v12 = vld [vmem:[%s26717_s2 + $0x578] sm:$0xff] }
 0x2d1   : > { %4975 = vmatpush.bf16.msrb.mxu0 %v20650_v16  ;;  %v3489_v34 = vpop.f32.mrf.mxu0  ;;  %v20720_v16 = vld [vmem:[%s26717_s2 + $0x530] sm:$0xff] }
 0x2d2   : > { %4988 = vmatpush.bf16.msrb.mxu1 %v20658_v17  ;;  %v3502_v37 = vpop.f32.mrf.mxu1  ;;  %v20728_v17 = vld [vmem:[%s26717_s2 + $0x570] sm:$0xff] }
 0x2d3   : > { %5001 = vmatpush.bf16.msrb.mxu2 %v20666_v18  ;;  %v3503_v41 = vadd.f32 %v3502_v37, %v3489_v34  ;;  %v20736_v18 = vld [vmem:[%s26717_s2 + $0x5b0] sm:$0xff]  ;;  %v20725_v34 = vld [vmem:[%s26717_s2 + $0x558] sm:$0xff] }
 0x2d4   : > { %5014 = vmatpush.bf16.msrb.mxu3 %v20674_v19  ;;  %4976 = vmatmul.bf16.vlgmr.msrb.gmra.mxu0 %v22953_v44  ;;  %v20744_v19 = vld [vmem:[%s26717_s2 + $0x5f0] sm:$0xff] }
 0x2d5   : > { %5212 = vmatpush.bf16.msra.mxu0 %v20689_v20  ;;  %4989 = vmatmul.bf16.vlgmr.msrb.gmra.mxu1 %v22959_v47  ;;  %v20719_v20 = vld [vmem:[%s26717_s2 + $0x528] sm:$0xff] }
 0x2d6   : > { %5225 = vmatpush.bf16.msra.mxu1 %v20697_v21  ;;  %5002 = vmatmul.bf16.vlgmr.msrb.gmra.mxu2 %v22955_v45  ;;  %v20727_v21 = vld [vmem:[%s26717_s2 + $0x568] sm:$0xff] }
 0x2d7   : > { %5238 = vmatpush.bf16.msra.mxu2 %v20705_v22  ;;  %5015 = vmatmul.bf16.vlgmr.msrb.gmra.mxu3 %v22957_v46  ;;  %v20735_v22 = vld [vmem:[%s26717_s2 + $0x5a8] sm:$0xff] }
 0x2d8   : > { %5251 = vmatpush.bf16.msra.mxu3 %v20713_v24  ;;  %v20743_v24 = vld [vmem:[%s26717_s2 + $0x5e8] sm:$0xff] }
 0x2d9   : > { %5213 = vmatpush.bf16.msra.mxu0 %v20688_v25  ;;  %v3515_v50 = vpop.f32.mrf.mxu2  ;;  %v3491_v53 = vpop.f32.mrf.mxu0 }
 0x2da   : > { %5226 = vmatpush.bf16.msra.mxu1 %v20696_v26  ;;  %v3516_v51 = vadd.f32 %v3515_v50, %v3503_v41  ;;  %v3528_v52 = vpop.f32.mrf.mxu3  ;;  %v3504_v58 = vpop.f32.mrf.mxu1  ;;  %v20718_v26 = vld [vmem:[%s26717_s2 + $0x520] sm:$0xff]  ;;  %v20732_v50 = vld [vmem:[%s26717_s2 + $0x590] sm:$0xff]  ;;  %v20723_v53 = vld [vmem:[%s26717_s2 + $0x548] sm:$0xff] }
 0x2db   : > { %5239 = vmatpush.bf16.msra.mxu2 %v20704_v28  ;;  %v20726_v28 = vld [vmem:[%s26717_s2 + $0x560] sm:$0xff] }
 0x2dc   : > { %5252 = vmatpush.bf16.msra.mxu3 %v20712_v29  ;;  %v24133_v57 = vadd.f32 %v3528_v52, %v3516_v51  ;;  %v20740_v51 = vld [vmem:[%s26717_s2 + $0x5d0] sm:$0xff]  ;;  %v20715_v52 = vld [vmem:[%s26717_s2 + $0x508] sm:$0xff] }
 0x2dd   : > { %5214 = vmatpush.bf16.msra.mxu0 %v20687_v30  ;;  %v20734_v30 = vld [vmem:[%s26717_s2 + $0x5a0] sm:$0xff] }
 0x2de   : > { %5227 = vmatpush.bf16.msra.mxu1 %v20695_v31  ;;  %v20742_v31 = vld [vmem:[%s26717_s2 + $0x5e0] sm:$0xff] }
 0x2df   : > { %5240 = vmatpush.bf16.msra.mxu2 %v20703_v32 }
 0x2e0   : > { %5253 = vmatpush.bf16.msra.mxu3 %v20711_v33  ;;  %v20717_v33 = vld [vmem:[%s26717_s2 + $0x518] sm:$0xff] }
 0x2e1   : > { %5215 = vmatpush.bf16.msra.mxu0 %v20686_v35  ;;  %v3517_v3 = vpop.f32.mrf.mxu2  ;;  %v20733_v35 = vld [vmem:[%s26717_s2 + $0x598] sm:$0xff] }
 0x2e2   : > { %5228 = vmatpush.bf16.msra.mxu1 %v20694_v36  ;;  %v3530_v5 = vpop.f32.mrf.mxu3  ;;  %v20741_v36 = vld [vmem:[%s26717_s2 + $0x5d8] sm:$0xff] }
 0x2e3   : > { %5241 = vmatpush.bf16.msra.mxu2 %v20702_v38  ;;  %v20761_v3 = vld [vmem:[%s26717_s2 + $0x678] sm:$0xff] }
 0x2e4   : > { %5254 = vmatpush.bf16.msra.mxu3 %v20710_v40  ;;  %v20769_v5 = vld [vmem:[%s26717_s2 + $0x6b8] sm:$0xff] }
 0x2e5   : > { %5216 = vmatpush.bf16.msra.mxu0 %v20685_v42  ;;  %v20716_v42 = vld [vmem:[%s26717_s2 + $0x510] sm:$0xff] }
 0x2e6   : > { %5229 = vmatpush.bf16.msra.mxu1 %v20693_v43  ;;  %v20724_v43 = vld [vmem:[%s26717_s2 + $0x550] sm:$0xff] }
 0x2e7   : > { %5242 = vmatpush.bf16.msra.mxu2 %v20701_v48 }
 0x2e8   : > { %5255 = vmatpush.bf16.msra.mxu3 %v20709_v49 }
 0x2e9   : > { %5217 = vmatpush.bf16.msra.mxu0 %v20684_v54  ;;  %v20731_v54 = vld [vmem:[%s26717_s2 + $0x588] sm:$0xff] }
 0x2ea   : > { %5230 = vmatpush.bf16.msra.mxu1 %v20692_v55  ;;  %v20739_v55 = vld [vmem:[%s26717_s2 + $0x5c8] sm:$0xff] }
 0x2eb   : > { %5243 = vmatpush.bf16.msra.mxu2 %v20700_v59 }
 0x2ec   : > { %5256 = vmatpush.bf16.msra.mxu3 %v20708_v60  ;;  %v20714_v60 = vld [vmem:[%s26717_s2 + $0x500] sm:$0xff] }
 0x2ed   : > { %5218 = vmatpush.bf16.msra.mxu0 %v20683_v61  ;;  %v20722_v61 = vld [vmem:[%s26717_s2 + $0x540] sm:$0xff] }
 0x2ee   : > { %5231 = vmatpush.bf16.msra.mxu1 %v20691_v62  ;;  %v20730_v62 = vld [vmem:[%s26717_s2 + $0x580] sm:$0xff] }
 0x2ef   : > { %5244 = vmatpush.bf16.msra.mxu2 %v20699_v63  ;;  %v20738_v63 = vld [vmem:[%s26717_s2 + $0x5c0] sm:$0xff] }
 0x2f0   : > { %5257 = vmatpush.bf16.msra.mxu3 %v20707_v2  ;;  %v20753_v2 = vld [vmem:[%s26717_s2 + $0x638] sm:$0xff] }
 0x2f1   : > { %5219 = vmatpush.bf16.msra.mxu0 %v20682_v6  ;;  %v4245_v25 = vpop.f32.mrf.mxu0  ;;  %v20777_v6 = vld [vmem:[%s26717_s2 + $0x6f8] sm:$0xff] }
 0x2f2   : > { %5232 = vmatpush.bf16.msra.mxu1 %v20690_v7  ;;  %v4258_v29 = vpop.f32.mrf.mxu1  ;;  %v20752_v7 = vld [vmem:[%s26717_s2 + $0x630] sm:$0xff] }
 0x2f3   : > { %5245 = vmatpush.bf16.msra.mxu2 %v20698_v9  ;;  %v4259_v32 = vadd.f32 %v4258_v29, %v4245_v25  ;;  %v20760_v9 = vld [vmem:[%s26717_s2 + $0x670] sm:$0xff]  ;;  %v20749_v25 = vld [vmem:[%s26717_s2 + $0x618] sm:$0xff] }
 0x2f4   : > { %5258 = vmatpush.bf16.msra.mxu3 %v20706_v10  ;;  %5220 = vmatmul.bf16.vlgmr.msra.gmra.mxu0 %v22953_v44  ;;  %v20768_v10 = vld [vmem:[%s26717_s2 + $0x6b0] sm:$0xff]  ;;  %v20773_v29 = vld [vmem:[%s26717_s2 + $0x6d8] sm:$0xff] }
 0x2f5   : > { %5456 = vmatpush.bf16.msrb.mxu0 %v20721_v11  ;;  %5233 = vmatmul.bf16.vlgmr.msra.gmra.mxu1 %v22959_v47  ;;  %v20776_v11 = vld [vmem:[%s26717_s2 + $0x6f0] sm:$0xff] }
 0x2f6   : > { %5469 = vmatpush.bf16.msrb.mxu1 %v20729_v12  ;;  %5246 = vmatmul.bf16.vlgmr.msra.gmra.mxu2 %v22955_v45  ;;  %v20751_v12 = vld [vmem:[%s26717_s2 + $0x628] sm:$0xff] }
 0x2f7   : > { %5482 = vmatpush.bf16.msrb.mxu2 %v20737_v13  ;;  %5259 = vmatmul.bf16.vlgmr.msra.gmra.mxu3 %v22957_v46  ;;  %v20759_v13 = vld [vmem:[%s26717_s2 + $0x668] sm:$0xff] }
 0x2f8   : > { %5495 = vmatpush.bf16.msrb.mxu3 %v20745_v14  ;;  %v20767_v14 = vld [vmem:[%s26717_s2 + $0x6a8] sm:$0xff] }
 0x2f9   : > { %5457 = vmatpush.bf16.msrb.mxu0 %v20720_v16  ;;  %v4271_v37 = vpop.f32.mrf.mxu2  ;;  %v4247_v41 = vpop.f32.mrf.mxu0  ;;  %v20775_v16 = vld [vmem:[%s26717_s2 + $0x6e8] sm:$0xff] }
 0x2fa   : > { %5470 = vmatpush.bf16.msrb.mxu1 %v20728_v17  ;;  %v4272_v38 = vadd.f32 %v4271_v37, %v4259_v32  ;;  %v4284_v40 = vpop.f32.mrf.mxu3  ;;  %v4260_v49 = vpop.f32.mrf.mxu1  ;;  %v20747_v41 = vld [vmem:[%s26717_s2 + $0x608] sm:$0xff] }
 0x2fb   : > { %5483 = vmatpush.bf16.msrb.mxu2 %v20736_v18  ;;  %v20750_v18 = vld [vmem:[%s26717_s2 + $0x620] sm:$0xff]  ;;  %v20771_v49 = vld [vmem:[%s26717_s2 + $0x6c8] sm:$0xff] }
 0x2fc   : > { %5496 = vmatpush.bf16.msrb.mxu3 %v20744_v19  ;;  %v24235_v48 = vadd.f32 %v4284_v40, %v4272_v38  ;;  %v20758_v19 = vld [vmem:[%s26717_s2 + $0x660] sm:$0xff]  ;;  %v20764_v38 = vld [vmem:[%s26717_s2 + $0x690] sm:$0xff] }
 0x2fd   : > { %5458 = vmatpush.bf16.msrb.mxu0 %v20719_v20  ;;  %v20772_v40 = vld [vmem:[%s26717_s2 + $0x6d0] sm:$0xff] }
 0x2fe   : > { %5471 = vmatpush.bf16.msrb.mxu1 %v20727_v21  ;;  %v20766_v21 = vld [vmem:[%s26717_s2 + $0x6a0] sm:$0xff] }
 0x2ff   : > { %5484 = vmatpush.bf16.msrb.mxu2 %v20735_v22  ;;  %v20774_v22 = vld [vmem:[%s26717_s2 + $0x6e0] sm:$0xff] }
 0x300   : > { %5497 = vmatpush.bf16.msrb.mxu3 %v20743_v24 }
 0x301   : > { %5459 = vmatpush.bf16.msrb.mxu0 %v20718_v26  ;;  %v4273_v58 = vpop.f32.mrf.mxu2  ;;  %v20757_v26 = vld [vmem:[%s26717_s2 + $0x658] sm:$0xff] }
 0x302   : > { %5472 = vmatpush.bf16.msrb.mxu1 %v20726_v28  ;;  %v4286_v59 = vpop.f32.mrf.mxu3  ;;  %v20765_v28 = vld [vmem:[%s26717_s2 + $0x698] sm:$0xff] }
 0x303   : > { %5485 = vmatpush.bf16.msrb.mxu2 %v20734_v30  ;;  %v20785_v58 = vld [vmem:[%s26717_s2 + $0x738] sm:$0xff] }
 0x304   : > { %5498 = vmatpush.bf16.msrb.mxu3 %v20742_v31  ;;  %v20793_v59 = vld [vmem:[%s26717_s2 + $0x778] sm:$0xff] }
 0x305   : > { %5460 = vmatpush.bf16.msrb.mxu0 %v20717_v33 }
 0x306   : > { %5473 = vmatpush.bf16.msrb.mxu1 %v20725_v34  ;;  %v20748_v34 = vld [vmem:[%s26717_s2 + $0x610] sm:$0xff] }
 0x307   : > { %5486 = vmatpush.bf16.msrb.mxu2 %v20733_v35  ;;  %v20756_v35 = vld [vmem:[%s26717_s2 + $0x650] sm:$0xff] }
 0x308   : > { %5499 = vmatpush.bf16.msrb.mxu3 %v20741_v36 }
 0x309   : > { %5461 = vmatpush.bf16.msrb.mxu0 %v20716_v42  ;;  %v20755_v42 = vld [vmem:[%s26717_s2 + $0x648] sm:$0xff] }
 0x30a   : > { %5474 = vmatpush.bf16.msrb.mxu1 %v20724_v43  ;;  %v20763_v43 = vld [vmem:[%s26717_s2 + $0x688] sm:$0xff] }
 0x30b   : > { %5487 = vmatpush.bf16.msrb.mxu2 %v20732_v50 }
 0x30c   : > { %5500 = vmatpush.bf16.msrb.mxu3 %v20740_v51 }
 0x30d   : > { %5462 = vmatpush.bf16.msrb.mxu0 %v20715_v52  ;;  %v20746_v52 = vld [vmem:[%s26717_s2 + $0x600] sm:$0xff] }
 0x30e   : > { %5475 = vmatpush.bf16.msrb.mxu1 %v20723_v53  ;;  %v20754_v53 = vld [vmem:[%s26717_s2 + $0x640] sm:$0xff] }
 0x30f   : > { %5488 = vmatpush.bf16.msrb.mxu2 %v20731_v54  ;;  %v20762_v54 = vld [vmem:[%s26717_s2 + $0x680] sm:$0xff] }
 0x310   : > { %5501 = vmatpush.bf16.msrb.mxu3 %v20739_v55  ;;  %v20770_v55 = vld [vmem:[%s26717_s2 + $0x6c0] sm:$0xff] }
 0x311   : > { %5463 = vmatpush.bf16.msrb.mxu0 %v20714_v60  ;;  %v4489_v17 = vpop.f32.mrf.mxu0  ;;  %v20801_v60 = vld [vmem:[%s26717_s2 + $0x7b8] sm:$0xff] }
 0x312   : > { %5476 = vmatpush.bf16.msrb.mxu1 %v20722_v61  ;;  %v4502_v20 = vpop.f32.mrf.mxu1  ;;  %v20809_v61 = vld [vmem:[%s26717_s2 + $0x7f8] sm:$0xff] }
 0x313   : > { %5489 = vmatpush.bf16.msrb.mxu2 %v20730_v62  ;;  %v4503_v24 = vadd.f32 %v4502_v20, %v4489_v17  ;;  %v20784_v62 = vld [vmem:[%s26717_s2 + $0x730] sm:$0xff]  ;;  %v20797_v20 = vld [vmem:[%s26717_s2 + $0x798] sm:$0xff] }
 0x314   : > { %5502 = vmatpush.bf16.msrb.mxu3 %v20738_v63  ;;  %5464 = vmatmul.bf16.vlgmr.msrb.gmra.mxu0 %v22953_v44  ;;  %v20792_v63 = vld [vmem:[%s26717_s2 + $0x770] sm:$0xff] }
 0x315   : > { %5700 = vmatpush.bf16.msra.mxu0 %v20753_v2  ;;  %5477 = vmatmul.bf16.vlgmr.msrb.gmra.mxu1 %v22959_v47  ;;  %v20800_v2 = vld [vmem:[%s26717_s2 + $0x7b0] sm:$0xff] }
 0x316   : > { %5713 = vmatpush.bf16.msra.mxu1 %v20761_v3  ;;  %5490 = vmatmul.bf16.vlgmr.msrb.gmra.mxu2 %v22955_v45  ;;  %v20808_v3 = vld [vmem:[%s26717_s2 + $0x7f0] sm:$0xff] }
 0x317   : > { %5726 = vmatpush.bf16.msra.mxu2 %v20769_v5  ;;  %5503 = vmatmul.bf16.vlgmr.msrb.gmra.mxu3 %v22957_v46  ;;  %v20783_v5 = vld [vmem:[%s26717_s2 + $0x728] sm:$0xff] }
 0x318   : > { %5739 = vmatpush.bf16.msra.mxu3 %v20777_v6  ;;  %v20791_v6 = vld [vmem:[%s26717_s2 + $0x768] sm:$0xff] }
 0x319   : > { %5701 = vmatpush.bf16.msra.mxu0 %v20752_v7  ;;  %v4515_v30 = vpop.f32.mrf.mxu2  ;;  %v4491_v33 = vpop.f32.mrf.mxu0  ;;  %v20799_v7 = vld [vmem:[%s26717_s2 + $0x7a8] sm:$0xff] }
 0x31a   : > { %5714 = vmatpush.bf16.msra.mxu1 %v20760_v9  ;;  %v4516_v31 = vadd.f32 %v4515_v30, %v4503_v24  ;;  %v4528_v32 = vpop.f32.mrf.mxu3  ;;  %v4504_v37 = vpop.f32.mrf.mxu1  ;;  %v20807_v9 = vld [vmem:[%s26717_s2 + $0x7e8] sm:$0xff]  ;;  %v20804_v33 = vld [vmem:[%s26717_s2 + $0x7d0] sm:$0xff] }
 0x31b   : > { %5727 = vmatpush.bf16.msra.mxu2 %v20768_v10  ;;  %v20795_v37 = vld [vmem:[%s26717_s2 + $0x788] sm:$0xff] }
 0x31c   : > { %5740 = vmatpush.bf16.msra.mxu3 %v20776_v11  ;;  %v24337_v36 = vadd.f32 %v4528_v32, %v4516_v31  ;;  %v20782_v11 = vld [vmem:[%s26717_s2 + $0x720] sm:$0xff]  ;;  %v20796_v32 = vld [vmem:[%s26717_s2 + $0x790] sm:$0xff] }
 0x31d   : > { %5702 = vmatpush.bf16.msra.mxu0 %v20751_v12  ;;  %v20790_v12 = vld [vmem:[%s26717_s2 + $0x760] sm:$0xff] }
 0x31e   : > { %5715 = vmatpush.bf16.msra.mxu1 %v20759_v13 }
 0x31f   : > { %5728 = vmatpush.bf16.msra.mxu2 %v20767_v14  ;;  %v20798_v14 = vld [vmem:[%s26717_s2 + $0x7a0] sm:$0xff] }
 0x320   : > { %5741 = vmatpush.bf16.msra.mxu3 %v20775_v16  ;;  %v20806_v16 = vld [vmem:[%s26717_s2 + $0x7e0] sm:$0xff] }
 0x321   : > { %5703 = vmatpush.bf16.msra.mxu0 %v20750_v18  ;;  %v4517_v50 = vpop.f32.mrf.mxu2  ;;  %v20781_v18 = vld [vmem:[%s26717_s2 + $0x718] sm:$0xff] }
 0x322   : > { %5716 = vmatpush.bf16.msra.mxu1 %v20758_v19  ;;  %v4530_v51 = vpop.f32.mrf.mxu3  ;;  %v20789_v19 = vld [vmem:[%s26717_s2 + $0x758] sm:$0xff]  ;;  %v20802_v50 = vld [vmem:[%s26717_s2 + $0x7c0] sm:$0xff] }
 0x323   : > { %5729 = vmatpush.bf16.msra.mxu2 %v20766_v21  ;;  %v20805_v21 = vld [vmem:[%s26717_s2 + $0x7d8] sm:$0xff] }
 0x324   : > { %5742 = vmatpush.bf16.msra.mxu3 %v20774_v22  ;;  %v20817_v51 = vld [vmem:[%s26742_s30 + $0x38] sm:$0xff] }
 0x325   : > { %5704 = vmatpush.bf16.msra.mxu0 %v20749_v25 }
 0x326   : > { %5717 = vmatpush.bf16.msra.mxu1 %v20757_v26 }
 0x327   : > { %5730 = vmatpush.bf16.msra.mxu2 %v20765_v28  ;;  %v20780_v28 = vld [vmem:[%s26717_s2 + $0x710] sm:$0xff] }
 0x328   : > { %5743 = vmatpush.bf16.msra.mxu3 %v20773_v29  ;;  %v20788_v29 = vld [vmem:[%s26717_s2 + $0x750] sm:$0xff] }
 0x329   : > { %5705 = vmatpush.bf16.msra.mxu0 %v20748_v34  ;;  %v20779_v34 = vld [vmem:[%s26717_s2 + $0x708] sm:$0xff] }
 0x32a   : > { %5718 = vmatpush.bf16.msra.mxu1 %v20756_v35  ;;  %v20787_v35 = vld [vmem:[%s26717_s2 + $0x748] sm:$0xff] }
 0x32b   : > { %5731 = vmatpush.bf16.msra.mxu2 %v20764_v38  ;;  %v20803_v38 = vld [vmem:[%s26717_s2 + $0x7c8] sm:$0xff] }
 0x32c   : > { %5744 = vmatpush.bf16.msra.mxu3 %v20772_v40 }
 0x32d   : > { %5706 = vmatpush.bf16.msra.mxu0 %v20747_v41 }
 0x32e   : > { %5719 = vmatpush.bf16.msra.mxu1 %v20755_v42  ;;  %v20778_v42 = vld [vmem:[%s26717_s2 + $0x700] sm:$0xff] }
 0x32f   : > { %5732 = vmatpush.bf16.msra.mxu2 %v20763_v43  ;;  %v20786_v43 = vld [vmem:[%s26717_s2 + $0x740] sm:$0xff] }
 0x330   : > { %5745 = vmatpush.bf16.msra.mxu3 %v20771_v49  ;;  %v20794_v49 = vld [vmem:[%s26717_s2 + $0x780] sm:$0xff] }
 0x331   : > { %5707 = vmatpush.bf16.msra.mxu0 %v20746_v52  ;;  %v4733_v10 = vpop.f32.mrf.mxu0  ;;  %v20825_v52 = vld [vmem:[%s26742_s30 + $0x78] sm:$0xff] }
 0x332   : > { %5720 = vmatpush.bf16.msra.mxu1 %v20754_v53  ;;  %v4746_v13 = vpop.f32.mrf.mxu1  ;;  %v20833_v53 = vld [vmem:[%s26742_s30 + $0xb8] sm:$0xff] }
 0x333   : > { %5733 = vmatpush.bf16.msra.mxu2 %v20762_v54  ;;  %v4747_v17 = vadd.f32 %v4746_v13, %v4733_v10  ;;  %v20841_v54 = vld [vmem:[%s26742_s30 + $0xf8] sm:$0xff]  ;;  %v20838_v10 = vld [vmem:[%s26742_s30 + $0xe0] sm:$0xff] }
 0x334   : > { %5746 = vmatpush.bf16.msra.mxu3 %v20770_v55  ;;  %5708 = vmatmul.bf16.vlgmr.msra.gmra.mxu0 %v22953_v44  ;;  %v20816_v55 = vld [vmem:[%s26742_s30 + $0x30] sm:$0xff]  ;;  %v20821_v13 = vld [vmem:[%s26742_s30 + $0x58] sm:$0xff] }
 0x335   : > { %5944 = vmatpush.bf16.msrb.mxu0 %v20785_v58  ;;  %5721 = vmatmul.bf16.vlgmr.msra.gmra.mxu1 %v22959_v47  ;;  %v20824_v58 = vld [vmem:[%s26742_s30 + $0x70] sm:$0xff] }
 0x336   : > { %5957 = vmatpush.bf16.msrb.mxu1 %v20793_v59  ;;  %5734 = vmatmul.bf16.vlgmr.msra.gmra.mxu2 %v22955_v45  ;;  %v20832_v59 = vld [vmem:[%s26742_s30 + $0xb0] sm:$0xff] }
 0x337   : > { %5970 = vmatpush.bf16.msrb.mxu2 %v20801_v60  ;;  %5747 = vmatmul.bf16.vlgmr.msra.gmra.mxu3 %v22957_v46  ;;  %v20840_v60 = vld [vmem:[%s26742_s30 + $0xf0] sm:$0xff] }
 0x338   : > { %5983 = vmatpush.bf16.msrb.mxu3 %v20809_v61  ;;  %v20815_v61 = vld [vmem:[%s26742_s30 + $0x28] sm:$0xff] }
 0x339   : > { %5945 = vmatpush.bf16.msrb.mxu0 %v20784_v62  ;;  %v4759_v22 = vpop.f32.mrf.mxu2  ;;  %v4735_v26 = vpop.f32.mrf.mxu0  ;;  %v20823_v62 = vld [vmem:[%s26742_s30 + $0x68] sm:$0xff] }
 0x33a   : > { %5958 = vmatpush.bf16.msrb.mxu1 %v20792_v63  ;;  %v4760_v24 = vadd.f32 %v4759_v22, %v4747_v17  ;;  %v4772_v25 = vpop.f32.mrf.mxu3  ;;  %v4748_v31 = vpop.f32.mrf.mxu1  ;;  %v20831_v63 = vld [vmem:[%s26742_s30 + $0xa8] sm:$0xff]  ;;  %v20820_v22 = vld [vmem:[%s26742_s30 + $0x50] sm:$0xff] }
 0x33b   : > { %5971 = vmatpush.bf16.msrb.mxu2 %v20800_v2  ;;  %v20839_v2 = vld [vmem:[%s26742_s30 + $0xe8] sm:$0xff]  ;;  %v20828_v26 = vld [vmem:[%s26742_s30 + $0x90] sm:$0xff] }
 0x33c   : > { %5984 = vmatpush.bf16.msrb.mxu3 %v20808_v3  ;;  %v24439_v30 = vadd.f32 %v4772_v25, %v4760_v24  ;;  %v20819_v31 = vld [vmem:[%s26742_s30 + $0x48] sm:$0xff] }
 0x33d   : > { %5946 = vmatpush.bf16.msrb.mxu0 %v20783_v5  ;;  %v20814_v5 = vld [vmem:[%s26742_s30 + $0x20] sm:$0xff] }
 0x33e   : > { %5959 = vmatpush.bf16.msrb.mxu1 %v20791_v6  ;;  %v20822_v6 = vld [vmem:[%s26742_s30 + $0x60] sm:$0xff] }
 0x33f   : > { %5972 = vmatpush.bf16.msrb.mxu2 %v20799_v7 }
 0x340   : > { %5985 = vmatpush.bf16.msrb.mxu3 %v20807_v9  ;;  %v20830_v9 = vld [vmem:[%s26742_s30 + $0xa0] sm:$0xff] }
 0x341   : > { %5947 = vmatpush.bf16.msrb.mxu0 %v20782_v11  ;;  %v4761_v40 = vpop.f32.mrf.mxu2 }
 0x342   : > { %5960 = vmatpush.bf16.msrb.mxu1 %v20790_v12  ;;  %v4774_v41 = vpop.f32.mrf.mxu3  ;;  %v20813_v12 = vld [vmem:[%s26742_s30 + $0x18] sm:$0xff]  ;;  %v20826_v40 = vld [vmem:[%s26742_s30 + $0x80] sm:$0xff] }
 0x343   : > { %5973 = vmatpush.bf16.msrb.mxu2 %v20798_v14  ;;  %v20829_v14 = vld [vmem:[%s26742_s30 + $0x98] sm:$0xff]  ;;  %v20834_v41 = vld [vmem:[%s26742_s30 + $0xc0] sm:$0xff] }
 0x344   : > { %5986 = vmatpush.bf16.msrb.mxu3 %v20806_v16  ;;  %v20837_v16 = vld [vmem:[%s26742_s30 + $0xd8] sm:$0xff] }
 0x345   : > { %5948 = vmatpush.bf16.msrb.mxu0 %v20781_v18 }
 0x346   : > { %5961 = vmatpush.bf16.msrb.mxu1 %v20789_v19 }
 0x347   : > { %5974 = vmatpush.bf16.msrb.mxu2 %v20797_v20 }
 0x348   : > { %5987 = vmatpush.bf16.msrb.mxu3 %v20805_v21  ;;  %v20812_v21 = vld [vmem:[%s26742_s30 + $0x10] sm:$0xff] }
 0x349   : > { %5949 = vmatpush.bf16.msrb.mxu0 %v20780_v28  ;;  %v20836_v28 = vld [vmem:[%s26742_s30 + $0xd0] sm:$0xff] }
 0x34a   : > { %5962 = vmatpush.bf16.msrb.mxu1 %v20788_v29  ;;  %v20811_v29 = vld [vmem:[%s26742_s30 + $0x8] sm:$0xff] }
 0x34b   : > { %5975 = vmatpush.bf16.msrb.mxu2 %v20796_v32  ;;  %v20827_v32 = vld [vmem:[%s26742_s30 + $0x88] sm:$0xff] }
 0x34c   : > { %5988 = vmatpush.bf16.msrb.mxu3 %v20804_v33  ;;  %v20835_v33 = vld [vmem:[%s26742_s30 + $0xc8] sm:$0xff] }
 0x34d   : > { %5950 = vmatpush.bf16.msrb.mxu0 %v20779_v34 }
 0x34e   : > { %5963 = vmatpush.bf16.msrb.mxu1 %v20787_v35 }
 0x34f   : > { %5976 = vmatpush.bf16.msrb.mxu2 %v20795_v37  ;;  %v20810_v37 = vld [vmem:[%s26742_s30] sm:$0xff] }
 0x350   : > { %5989 = vmatpush.bf16.msrb.mxu3 %v20803_v38  ;;  %v20818_v38 = vld [vmem:[%s26742_s30 + $0x40] sm:$0xff] }
 0x351   : > { %5951 = vmatpush.bf16.msrb.mxu0 %v20778_v42  ;;  %v4977_v3 = vpop.f32.mrf.mxu0  ;;  %v20849_v42 = vld [vmem:[%s26742_s30 + $0x138] sm:$0xff] }
 0x352   : > { %5964 = vmatpush.bf16.msrb.mxu1 %v20786_v43  ;;  %v4990_v7 = vpop.f32.mrf.mxu1  ;;  %v20857_v43 = vld [vmem:[%s26742_s30 + $0x178] sm:$0xff] }
 0x353   : > { %5977 = vmatpush.bf16.msrb.mxu2 %v20794_v49  ;;  %v4991_v11 = vadd.f32 %v4990_v7, %v4977_v3  ;;  %v20865_v49 = vld [vmem:[%s26742_s30 + $0x1b8] sm:$0xff]  ;;  %v20862_v3 = vld [vmem:[%s26742_s30 + $0x1a0] sm:$0xff] }
 0x354   : > { %5990 = vmatpush.bf16.msrb.mxu3 %v20802_v50  ;;  %5952 = vmatmul.bf16.vlgmr.msrb.gmra.mxu0 %v22953_v44  ;;  %v20873_v50 = vld [vmem:[%s26742_s30 + $0x1f8] sm:$0xff] }
 0x355   : > { %6700 = vmatpush.bf16.msra.mxu0 %v20817_v51  ;;  %5965 = vmatmul.bf16.vlgmr.msrb.gmra.mxu1 %v22959_v47  ;;  %v20848_v51 = vld [vmem:[%s26742_s30 + $0x130] sm:$0xff]  ;;  %v20853_v7 = vld [vmem:[%s26742_s30 + $0x158] sm:$0xff] }
 0x356   : > { %6713 = vmatpush.bf16.msra.mxu1 %v20825_v52  ;;  %5978 = vmatmul.bf16.vlgmr.msrb.gmra.mxu2 %v22955_v45  ;;  %v20856_v52 = vld [vmem:[%s26742_s30 + $0x170] sm:$0xff] }
 0x357   : > { %6726 = vmatpush.bf16.msra.mxu2 %v20833_v53  ;;  %5991 = vmatmul.bf16.vlgmr.msrb.gmra.mxu3 %v22957_v46  ;;  %v20864_v53 = vld [vmem:[%s26742_s30 + $0x1b0] sm:$0xff] }
 0x358   : > { %6739 = vmatpush.bf16.msra.mxu3 %v20841_v54  ;;  %v20872_v54 = vld [vmem:[%s26742_s30 + $0x1f0] sm:$0xff] }
 0x359   : > { %6701 = vmatpush.bf16.msra.mxu0 %v20816_v55  ;;  %v5003_v17 = vpop.f32.mrf.mxu2  ;;  %v4979_v20 = vpop.f32.mrf.mxu0  ;;  %v20847_v55 = vld [vmem:[%s26742_s30 + $0x128] sm:$0xff] }
 0x35a   : > { %6714 = vmatpush.bf16.msra.mxu1 %v20824_v58  ;;  %v5004_v18 = vadd.f32 %v5003_v17, %v4991_v11  ;;  %v5016_v19 = vpop.f32.mrf.mxu3  ;;  %v4992_v25 = vpop.f32.mrf.mxu1  ;;  %v20855_v58 = vld [vmem:[%s26742_s30 + $0x168] sm:$0xff] }
 0x35b   : > { %6727 = vmatpush.bf16.msra.mxu2 %v20832_v59  ;;  %v20863_v59 = vld [vmem:[%s26742_s30 + $0x1a8] sm:$0xff] }
 0x35c   : > { %6740 = vmatpush.bf16.msra.mxu3 %v20840_v60  ;;  %v24541_v24 = vadd.f32 %v5016_v19, %v5004_v18  ;;  %v20871_v60 = vld [vmem:[%s26742_s30 + $0x1e8] sm:$0xff]  ;;  %v20860_v18 = vld [vmem:[%s26742_s30 + $0x190] sm:$0xff] }
 0x35d   : > { %6702 = vmatpush.bf16.msra.mxu0 %v20815_v61  ;;  %v20868_v19 = vld [vmem:[%s26742_s30 + $0x1d0] sm:$0xff]  ;;  %v20843_v20 = vld [vmem:[%s26742_s30 + $0x108] sm:$0xff] }
 0x35e   : > { %6715 = vmatpush.bf16.msra.mxu1 %v20823_v62  ;;  %v20846_v62 = vld [vmem:[%s26742_s30 + $0x120] sm:$0xff]  ;;  %v20867_v25 = vld [vmem:[%s26742_s30 + $0x1c8] sm:$0xff] }
 0x35f   : > { %6728 = vmatpush.bf16.msra.mxu2 %v20831_v63  ;;  %v20854_v63 = vld [vmem:[%s26742_s30 + $0x160] sm:$0xff] }
 0x360   : > { %6741 = vmatpush.bf16.msra.mxu3 %v20839_v2 }
 0x361   : > { %6703 = vmatpush.bf16.msra.mxu0 %v20814_v5  ;;  %v5005_v34 = vpop.f32.mrf.mxu2  ;;  %v20870_v5 = vld [vmem:[%s26742_s30 + $0x1e0] sm:$0xff] }
 0x362   : > { %6716 = vmatpush.bf16.msra.mxu1 %v20822_v6  ;;  %v5018_v35 = vpop.f32.mrf.mxu3  ;;  %v20845_v6 = vld [vmem:[%s26742_s30 + $0x118] sm:$0xff] }
 0x363   : > { %6729 = vmatpush.bf16.msra.mxu2 %v20830_v9  ;;  %v20861_v9 = vld [vmem:[%s26742_s30 + $0x198] sm:$0xff] }
 0x364   : > { %6742 = vmatpush.bf16.msra.mxu3 %v20838_v10  ;;  %v20869_v10 = vld [vmem:[%s26742_s30 + $0x1d8] sm:$0xff] }
 0x365   : > { %6704 = vmatpush.bf16.msra.mxu0 %v20813_v12  ;;  %v20881_v34 = vld [vmem:[%s26742_s30 + $0x238] sm:$0xff] }
 0x366   : > { %6717 = vmatpush.bf16.msra.mxu1 %v20821_v13  ;;  %v20889_v35 = vld [vmem:[%s26742_s30 + $0x278] sm:$0xff] }
 0x367   : > { %6730 = vmatpush.bf16.msra.mxu2 %v20829_v14  ;;  %v20844_v14 = vld [vmem:[%s26742_s30 + $0x110] sm:$0xff] }
 0x368   : > { %6743 = vmatpush.bf16.msra.mxu3 %v20837_v16  ;;  %v20852_v16 = vld [vmem:[%s26742_s30 + $0x150] sm:$0xff] }
 0x369   : > { %6705 = vmatpush.bf16.msra.mxu0 %v20812_v21  ;;  %v20851_v21 = vld [vmem:[%s26742_s30 + $0x148] sm:$0xff] }
 0x36a   : > { %6718 = vmatpush.bf16.msra.mxu1 %v20820_v22  ;;  %v20859_v22 = vld [vmem:[%s26742_s30 + $0x188] sm:$0xff] }
 0x36b   : > { %6731 = vmatpush.bf16.msra.mxu2 %v20828_v26 }
 0x36c   : > { %6744 = vmatpush.bf16.msra.mxu3 %v20836_v28 }
 0x36d   : > { %6706 = vmatpush.bf16.msra.mxu0 %v20811_v29  ;;  %v20842_v29 = vld [vmem:[%s26742_s30 + $0x100] sm:$0xff] }
 0x36e   : > { %6719 = vmatpush.bf16.msra.mxu1 %v20819_v31  ;;  %v20850_v31 = vld [vmem:[%s26742_s30 + $0x140] sm:$0xff] }
 0x36f   : > { %6732 = vmatpush.bf16.msra.mxu2 %v20827_v32  ;;  %v20858_v32 = vld [vmem:[%s26742_s30 + $0x180] sm:$0xff] }
 0x370   : > { %6745 = vmatpush.bf16.msra.mxu3 %v20835_v33  ;;  %v20866_v33 = vld [vmem:[%s26742_s30 + $0x1c0] sm:$0xff] }
 0x371   : > { %6707 = vmatpush.bf16.msra.mxu0 %v20810_v37  ;;  %v24613_v61 = vpop.f32.mrf.mxu0  ;;  %v20897_v37 = vld [vmem:[%s26742_s30 + $0x2b8] sm:$0xff] }
 0x372   : > { %6720 = vmatpush.bf16.msra.mxu1 %v20818_v38  ;;  %v24621_v2 = vpop.f32.mrf.mxu1  ;;  %v20905_v38 = vld [vmem:[%s26742_s30 + $0x2f8] sm:$0xff] }
 0x373   : > { %6733 = vmatpush.bf16.msra.mxu2 %v20826_v40  ;;  %v20880_v40 = vld [vmem:[%s26742_s30 + $0x230] sm:$0xff] }
 0x374   : > { %6746 = vmatpush.bf16.msra.mxu3 %v20834_v41  ;;  %6708 = vmatmul.bf16.vlgmr.msra.gmra.mxu0 %v22953_v44  ;;  %v20888_v41 = vld [vmem:[%s26742_s30 + $0x270] sm:$0xff] }
 0x375   : > { %6944 = vmatpush.bf16.msrb.mxu0 %v20849_v42  ;;  %6721 = vmatmul.bf16.vlgmr.msra.gmra.mxu1 %v22959_v47  ;;  %v20896_v42 = vld [vmem:[%s26742_s30 + $0x2b0] sm:$0xff] }
 0x376   : > { %6957 = vmatpush.bf16.msrb.mxu1 %v20857_v43  ;;  %6734 = vmatmul.bf16.vlgmr.msra.gmra.mxu2 %v22955_v45  ;;  %v20904_v43 = vld [vmem:[%s26742_s30 + $0x2f0] sm:$0xff] }
 0x377   : > { %6970 = vmatpush.bf16.msrb.mxu2 %v20865_v49  ;;  %6747 = vmatmul.bf16.vlgmr.msra.gmra.mxu3 %v22957_v46  ;;  %v20879_v49 = vld [vmem:[%s26742_s30 + $0x228] sm:$0xff] }
 0x378   : > { %6983 = vmatpush.bf16.msrb.mxu3 %v20873_v50  ;;  %v20887_v50 = vld [vmem:[%s26742_s30 + $0x268] sm:$0xff] }
 0x379   : > { %6945 = vmatpush.bf16.msrb.mxu0 %v20848_v51  ;;  %v24641_v11 = vpop.f32.mrf.mxu2  ;;  %v5223_v13 = vpop.f32.mrf.mxu0  ;;  %v20895_v51 = vld [vmem:[%s26742_s30 + $0x2a8] sm:$0xff] }
 0x37a   : > { %6958 = vmatpush.bf16.msrb.mxu1 %v20856_v52  ;;  %v24643_v12 = vpop.f32.mrf.mxu3  ;;  %v5236_v17 = vpop.f32.mrf.mxu1  ;;  %v20903_v52 = vld [vmem:[%s26742_s30 + $0x2e8] sm:$0xff]  ;;  %v20884_v13 = vld [vmem:[%s26742_s30 + $0x250] sm:$0xff] }
 0x37b   : > { %6971 = vmatpush.bf16.msrb.mxu2 %v20864_v53  ;;  %v20900_v17 = vld [vmem:[%s26742_s30 + $0x2d0] sm:$0xff] }
 0x37c   : > { %6984 = vmatpush.bf16.msrb.mxu3 %v20872_v54  ;;  %v20878_v54 = vld [vmem:[%s26742_s30 + $0x220] sm:$0xff] }
 0x37d   : > { %6946 = vmatpush.bf16.msrb.mxu0 %v20847_v55  ;;  %v20886_v55 = vld [vmem:[%s26742_s30 + $0x260] sm:$0xff] }
 0x37e   : > { %6959 = vmatpush.bf16.msrb.mxu1 %v20855_v58 }
 0x37f   : > { %6972 = vmatpush.bf16.msrb.mxu2 %v20863_v59  ;;  %v20894_v59 = vld [vmem:[%s26742_s30 + $0x2a0] sm:$0xff] }
 0x380   : > { %6985 = vmatpush.bf16.msrb.mxu3 %v20871_v60  ;;  %v20902_v60 = vld [vmem:[%s26742_s30 + $0x2e0] sm:$0xff] }
 0x381   : > { %6947 = vmatpush.bf16.msrb.mxu0 %v20846_v62  ;;  %v5249_v26 = vpop.f32.mrf.mxu2  ;;  %v20877_v62 = vld [vmem:[%s26742_s30 + $0x218] sm:$0xff] }
 0x382   : > { %6960 = vmatpush.bf16.msrb.mxu1 %v20854_v63  ;;  %v5262_v28 = vpop.f32.mrf.mxu3  ;;  %v20885_v63 = vld [vmem:[%s26742_s30 + $0x258] sm:$0xff]  ;;  %v20874_v26 = vld [vmem:[%s26742_s30 + $0x200] sm:$0xff] }
 0x383   : > { %6973 = vmatpush.bf16.msrb.mxu2 %v20862_v3  ;;  %v20893_v3 = vld [vmem:[%s26742_s30 + $0x298] sm:$0xff]  ;;  %v20882_v28 = vld [vmem:[%s26742_s30 + $0x240] sm:$0xff] }
 0x384   : > { %6986 = vmatpush.bf16.msrb.mxu3 %v20870_v5  ;;  %v20901_v5 = vld [vmem:[%s26742_s30 + $0x2d8] sm:$0xff] }
 0x385   : > { %6948 = vmatpush.bf16.msrb.mxu0 %v20845_v6 }
 0x386   : > { %6961 = vmatpush.bf16.msrb.mxu1 %v20853_v7 }
 0x387   : > { %6974 = vmatpush.bf16.msrb.mxu2 %v20861_v9 }
 0x388   : > { %6987 = vmatpush.bf16.msrb.mxu3 %v20869_v10  ;;  %v20876_v10 = vld [vmem:[%s26742_s30 + $0x210] sm:$0xff] }
 0x389   : > { %6949 = vmatpush.bf16.msrb.mxu0 %v20844_v14 }
 0x38a   : > { %6962 = vmatpush.bf16.msrb.mxu1 %v20852_v16  ;;  %v20892_v16 = vld [vmem:[%s26742_s30 + $0x290] sm:$0xff] }
 0x38b   : > { %6975 = vmatpush.bf16.msrb.mxu2 %v20860_v18  ;;  %v20875_v18 = vld [vmem:[%s26742_s30 + $0x208] sm:$0xff] }
 0x38c   : > { %6988 = vmatpush.bf16.msrb.mxu3 %v20868_v19  ;;  %v20883_v19 = vld [vmem:[%s26742_s30 + $0x248] sm:$0xff] }
 0x38d   : > { %6950 = vmatpush.bf16.msrb.mxu0 %v20843_v20  ;;  %v20891_v20 = vld [vmem:[%s26742_s30 + $0x288] sm:$0xff] }
 0x38e   : > { %6963 = vmatpush.bf16.msrb.mxu1 %v20851_v21  ;;  %v20899_v21 = vld [vmem:[%s26742_s30 + $0x2c8] sm:$0xff] }
 0x38f   : > { %6976 = vmatpush.bf16.msrb.mxu2 %v20859_v22 }
 0x390   : > { %6989 = vmatpush.bf16.msrb.mxu3 %v20867_v25 }
 0x391   : > { %6951 = vmatpush.bf16.msrb.mxu0 %v20842_v29  ;;  %v24721_v53 = vpop.f32.mrf.mxu0  ;;  %v20890_v29 = vld [vmem:[%s26742_s30 + $0x280] sm:$0xff] }
 0x392   : > { %6964 = vmatpush.bf16.msrb.mxu1 %v20850_v31  ;;  %v24729_v58 = vpop.f32.mrf.mxu1  ;;  %v20898_v31 = vld [vmem:[%s26742_s30 + $0x2c0] sm:$0xff] }
 0x393   : > { %6977 = vmatpush.bf16.msrb.mxu2 %v20858_v32  ;;  %v20913_v32 = vld [vmem:[%s26742_s30 + $0x338] sm:$0xff] }
 0x394   : > { %6990 = vmatpush.bf16.msrb.mxu3 %v20866_v33  ;;  %6952 = vmatmul.bf16.vlgmr.msrb.gmra.mxu0 %v22953_v44  ;;  %v20921_v33 = vld [vmem:[%s26742_s30 + $0x378] sm:$0xff] }
 0x395   : > { %7188 = vmatpush.bf16.msra.mxu0 %v20881_v34  ;;  %6965 = vmatmul.bf16.vlgmr.msrb.gmra.mxu1 %v22959_v47  ;;  %v20929_v34 = vld [vmem:[%s26742_s30 + $0x3b8] sm:$0xff] }
 0x396   : > { %7201 = vmatpush.bf16.msra.mxu1 %v20889_v35  ;;  %6978 = vmatmul.bf16.vlgmr.msrb.gmra.mxu2 %v22955_v45  ;;  %v20937_v35 = vld [vmem:[%s26742_s30 + $0x3f8] sm:$0xff] }
 0x397   : > { %7214 = vmatpush.bf16.msra.mxu2 %v20897_v37  ;;  %6991 = vmatmul.bf16.vlgmr.msrb.gmra.mxu3 %v22957_v46  ;;  %v20912_v37 = vld [vmem:[%s26742_s30 + $0x330] sm:$0xff] }
 0x398   : > { %7227 = vmatpush.bf16.msra.mxu3 %v20905_v38  ;;  %v20920_v38 = vld [vmem:[%s26742_s30 + $0x370] sm:$0xff] }
 0x399   : > { %7189 = vmatpush.bf16.msra.mxu0 %v20880_v40  ;;  %v24749_v6 = vpop.f32.mrf.mxu2  ;;  %v5467_v9 = vpop.f32.mrf.mxu0  ;;  %v20928_v40 = vld [vmem:[%s26742_s30 + $0x3b0] sm:$0xff] }
 0x39a   : > { %7202 = vmatpush.bf16.msra.mxu1 %v20888_v41  ;;  %v24751_v7 = vpop.f32.mrf.mxu3  ;;  %v5480_v14 = vpop.f32.mrf.mxu1  ;;  %v20936_v41 = vld [vmem:[%s26742_s30 + $0x3f0] sm:$0xff]  ;;  %v20933_v9 = vld [vmem:[%s26742_s30 + $0x3d8] sm:$0xff] }
 0x39b   : > { %7215 = vmatpush.bf16.msra.mxu2 %v20896_v42  ;;  %v20911_v42 = vld [vmem:[%s26742_s30 + $0x328] sm:$0xff] }
 0x39c   : > { %7228 = vmatpush.bf16.msra.mxu3 %v20904_v43  ;;  %v20919_v43 = vld [vmem:[%s26742_s30 + $0x368] sm:$0xff] }
 0x39d   : > { %7190 = vmatpush.bf16.msra.mxu0 %v20879_v49  ;;  %v20927_v49 = vld [vmem:[%s26742_s30 + $0x3a8] sm:$0xff] }
 0x39e   : > { %7203 = vmatpush.bf16.msra.mxu1 %v20887_v50  ;;  %v20935_v50 = vld [vmem:[%s26742_s30 + $0x3e8] sm:$0xff] }
 0x39f   : > { %7216 = vmatpush.bf16.msra.mxu2 %v20895_v51 }
 0x3a0   : > { %7229 = vmatpush.bf16.msra.mxu3 %v20903_v52  ;;  %v20910_v52 = vld [vmem:[%s26742_s30 + $0x320] sm:$0xff] }
 0x3a1   : > { %7191 = vmatpush.bf16.msra.mxu0 %v20878_v54  ;;  %v5493_v22 = vpop.f32.mrf.mxu2  ;;  %v20918_v54 = vld [vmem:[%s26742_s30 + $0x360] sm:$0xff] }
 0x3a2   : > { %7204 = vmatpush.bf16.msra.mxu1 %v20886_v55  ;;  %v5506_v25 = vpop.f32.mrf.mxu3  ;;  %v20932_v22 = vld [vmem:[%s26742_s30 + $0x3d0] sm:$0xff] }
 0x3a3   : > { %7217 = vmatpush.bf16.msra.mxu2 %v20894_v59  ;;  %v20926_v59 = vld [vmem:[%s26742_s30 + $0x3a0] sm:$0xff]  ;;  %v20907_v25 = vld [vmem:[%s26742_s30 + $0x308] sm:$0xff] }
 0x3a4   : > { %7230 = vmatpush.bf16.msra.mxu3 %v20902_v60  ;;  %v20934_v60 = vld [vmem:[%s26742_s30 + $0x3e0] sm:$0xff] }
 0x3a5   : > { %7192 = vmatpush.bf16.msra.mxu0 %v20877_v62 }
 0x3a6   : > { %7205 = vmatpush.bf16.msra.mxu1 %v20885_v63  ;;  %v20909_v63 = vld [vmem:[%s26742_s30 + $0x318] sm:$0xff] }
 0x3a7   : > { %7218 = vmatpush.bf16.msra.mxu2 %v20893_v3  ;;  %v20917_v3 = vld [vmem:[%s26742_s30 + $0x358] sm:$0xff] }
 0x3a8   : > { %7231 = vmatpush.bf16.msra.mxu3 %v20901_v5  ;;  %v20925_v5 = vld [vmem:[%s26742_s30 + $0x398] sm:$0xff] }
 0x3a9   : > { %7193 = vmatpush.bf16.msra.mxu0 %v20876_v10 }
 0x3aa   : > { %7206 = vmatpush.bf16.msra.mxu1 %v20884_v13 }
 0x3ab   : > { %7219 = vmatpush.bf16.msra.mxu2 %v20892_v16 }
 0x3ac   : > { %7232 = vmatpush.bf16.msra.mxu3 %v20900_v17  ;;  %v20908_v17 = vld [vmem:[%s26742_s30 + $0x310] sm:$0xff] }
 0x3ad   : > { %7194 = vmatpush.bf16.msra.mxu0 %v20875_v18  ;;  %v20916_v18 = vld [vmem:[%s26742_s30 + $0x350] sm:$0xff] }
 0x3ae   : > { %7207 = vmatpush.bf16.msra.mxu1 %v20883_v19 }
 0x3af   : > { %7220 = vmatpush.bf16.msra.mxu2 %v20891_v20 }
 0x3b0   : > { %7233 = vmatpush.bf16.msra.mxu3 %v20899_v21  ;;  %v20924_v21 = vld [vmem:[%s26742_s30 + $0x390] sm:$0xff] }
 0x3b1   : > { %7195 = vmatpush.bf16.msra.mxu0 %v20874_v26  ;;  %v5709_v51 = vpop.f32.mrf.mxu0  ;;  %v20915_v26 = vld [vmem:[%s26742_s30 + $0x348] sm:$0xff] }
 0x3b2   : > { %7208 = vmatpush.bf16.msra.mxu1 %v20882_v28  ;;  %v5722_v55 = vpop.f32.mrf.mxu1  ;;  %v20923_v28 = vld [vmem:[%s26742_s30 + $0x388] sm:$0xff] }
 0x3b3   : > { %7221 = vmatpush.bf16.msra.mxu2 %v20890_v29  ;;  %v5723_v62 = vadd.f32 %v5722_v55, %v5709_v51  ;;  %v20931_v29 = vld [vmem:[%s26742_s30 + $0x3c8] sm:$0xff]  ;;  %v20968_v51 = vld [vmem:[%s26742_s30 + $0x4f0] sm:$0xff] }
 0x3b4   : > { %7234 = vmatpush.bf16.msra.mxu3 %v20898_v31  ;;  %7196 = vmatmul.bf16.vlgmr.msra.gmra.mxu0 %v22953_v44  ;;  %v20959_v55 = vld [vmem:[%s26742_s30 + $0x4a8] sm:$0xff] }
 0x3b5   : > { %7432 = vmatpush.bf16.msrb.mxu0 %v20913_v32  ;;  %7209 = vmatmul.bf16.vlgmr.msra.gmra.mxu1 %v22959_v47 }
 0x3b6   : > { %7445 = vmatpush.bf16.msrb.mxu1 %v20921_v33  ;;  %7222 = vmatmul.bf16.vlgmr.msra.gmra.mxu2 %v22955_v45  ;;  %v20906_v33 = vld [vmem:[%s26742_s30 + $0x300] sm:$0xff] }
 0x3b7   : > { %7458 = vmatpush.bf16.msrb.mxu2 %v20929_v34  ;;  %7235 = vmatmul.bf16.vlgmr.msra.gmra.mxu3 %v22957_v46  ;;  %v20914_v34 = vld [vmem:[%s26742_s30 + $0x340] sm:$0xff] }
 0x3b8   : > { %7471 = vmatpush.bf16.msrb.mxu3 %v20937_v35  ;;  %v20922_v35 = vld [vmem:[%s26742_s30 + $0x380] sm:$0xff] }
 0x3b9   : > { %7433 = vmatpush.bf16.msrb.mxu0 %v20912_v37  ;;  %v5735_v10 = vpop.f32.mrf.mxu2  ;;  %v5711_v16 = vpop.f32.mrf.mxu0  ;;  %v20930_v37 = vld [vmem:[%s26742_s30 + $0x3c0] sm:$0xff] }
 0x3ba   : > { %7446 = vmatpush.bf16.msrb.mxu1 %v20920_v38  ;;  %v5736_v13 = vadd.f32 %v5735_v10, %v5723_v62  ;;  %v5748_v14 = vpop.f32.mrf.mxu3  ;;  %v5724_v20 = vpop.f32.mrf.mxu1  ;;  %v20945_v38 = vld [vmem:[%s26742_s30 + $0x438] sm:$0xff]  ;;  %v20942_v62 = vld [vmem:[%s26742_s30 + $0x420] sm:$0xff] }
 0x3bb   : > { %7459 = vmatpush.bf16.msrb.mxu2 %v20928_v40  ;;  %v20953_v40 = vld [vmem:[%s26742_s30 + $0x478] sm:$0xff] }
 0x3bc   : > { %7472 = vmatpush.bf16.msrb.mxu3 %v20936_v41  ;;  %v24859_v19 = vadd.f32 %v5748_v14, %v5736_v13  ;;  %v20961_v41 = vld [vmem:[%s26742_s30 + $0x4b8] sm:$0xff] }
 0x3bd   : > { %7434 = vmatpush.bf16.msrb.mxu0 %v20911_v42  ;;  %v20969_v42 = vld [vmem:[%s26742_s30 + $0x4f8] sm:$0xff] }
 0x3be   : > { %7447 = vmatpush.bf16.msrb.mxu1 %v20919_v43  ;;  %v20944_v43 = vld [vmem:[%s26742_s30 + $0x430] sm:$0xff]  ;;  %v20941_v13 = vld [vmem:[%s26742_s30 + $0x418] sm:$0xff] }
 0x3bf   : > { %7460 = vmatpush.bf16.msrb.mxu2 %v20927_v49  ;;  %v20952_v49 = vld [vmem:[%s26742_s30 + $0x470] sm:$0xff]  ;;  %v20949_v14 = vld [vmem:[%s26742_s30 + $0x458] sm:$0xff] }
 0x3c0   : > { %7473 = vmatpush.bf16.msrb.mxu3 %v20935_v50  ;;  %v20960_v50 = vld [vmem:[%s26742_s30 + $0x4b0] sm:$0xff]  ;;  %v20957_v16 = vld [vmem:[%s26742_s30 + $0x498] sm:$0xff] }
 0x3c1   : > { %7435 = vmatpush.bf16.msrb.mxu0 %v20910_v52  ;;  %v5737_v31 = vpop.f32.mrf.mxu2  ;;  %v20943_v52 = vld [vmem:[%s26742_s30 + $0x428] sm:$0xff] }
 0x3c2   : > { %7448 = vmatpush.bf16.msrb.mxu1 %v20918_v54  ;;  %v5750_v32 = vpop.f32.mrf.mxu3  ;;  %v20951_v54 = vld [vmem:[%s26742_s30 + $0x468] sm:$0xff]  ;;  %v20956_v31 = vld [vmem:[%s26742_s30 + $0x490] sm:$0xff] }
 0x3c3   : > { %7461 = vmatpush.bf16.msrb.mxu2 %v20926_v59  ;;  %v20967_v59 = vld [vmem:[%s26742_s30 + $0x4e8] sm:$0xff]  ;;  %v20964_v32 = vld [vmem:[%s26742_s30 + $0x4d0] sm:$0xff] }
 0x3c4   : > { %7474 = vmatpush.bf16.msrb.mxu3 %v20934_v60 }
 0x3c5   : > { %7436 = vmatpush.bf16.msrb.mxu0 %v20909_v63  ;;  %v20950_v63 = vld [vmem:[%s26742_s30 + $0x460] sm:$0xff] }
 0x3c6   : > { %7449 = vmatpush.bf16.msrb.mxu1 %v20917_v3 }
 0x3c7   : > { %7462 = vmatpush.bf16.msrb.mxu2 %v20925_v5  ;;  %v20958_v5 = vld [vmem:[%s26742_s30 + $0x4a0] sm:$0xff] }
 0x3c8   : > { %7475 = vmatpush.bf16.msrb.mxu3 %v20933_v9  ;;  %v20966_v9 = vld [vmem:[%s26742_s30 + $0x4e0] sm:$0xff] }
 0x3c9   : > { %7437 = vmatpush.bf16.msrb.mxu0 %v20908_v17  ;;  %v20965_v17 = vld [vmem:[%s26742_s30 + $0x4d8] sm:$0xff] }
 0x3ca   : > { %7450 = vmatpush.bf16.msrb.mxu1 %v20916_v18 }
 0x3cb   : > { %7463 = vmatpush.bf16.msrb.mxu2 %v20924_v21 }
 0x3cc   : > { %7476 = vmatpush.bf16.msrb.mxu3 %v20932_v22 }
 0x3cd   : > { %7438 = vmatpush.bf16.msrb.mxu0 %v20907_v25  ;;  %v20940_v25 = vld [vmem:[%s26742_s30 + $0x410] sm:$0xff] }
 0x3ce   : > { %7451 = vmatpush.bf16.msrb.mxu1 %v20915_v26  ;;  %v20948_v26 = vld [vmem:[%s26742_s30 + $0x450] sm:$0xff] }
 0x3cf   : > { %7464 = vmatpush.bf16.msrb.mxu2 %v20923_v28 }
 0x3d0   : > { %7477 = vmatpush.bf16.msrb.mxu3 %v20931_v29 }
 0x3d1   : > { %7439 = vmatpush.bf16.msrb.mxu0 %v20906_v33  ;;  %v5953_v60 = vpop.f32.mrf.mxu0  ;;  %v20939_v33 = vld [vmem:[%s26742_s30 + $0x408] sm:$0xff] }
 0x3d2   : > { %7452 = vmatpush.bf16.msrb.mxu1 %v20914_v34  ;;  %v5966_v3 = vpop.f32.mrf.mxu1  ;;  %v20947_v34 = vld [vmem:[%s26742_s30 + $0x448] sm:$0xff] }
 0x3d3   : > { %7465 = vmatpush.bf16.msrb.mxu2 %v20922_v35  ;;  %v5967_v10 = vadd.f32 %v5966_v3, %v5953_v60  ;;  %v20955_v35 = vld [vmem:[%s26742_s30 + $0x488] sm:$0xff]  ;;  %v20992_v60 = vld [vmem:[%s26742_s30 + $0x5b0] sm:$0xff] }
 0x3d4   : > { %7478 = vmatpush.bf16.msrb.mxu3 %v20930_v37  ;;  %7440 = vmatmul.bf16.vlgmr.msrb.gmra.mxu0 %v22953_v44  ;;  %v20963_v37 = vld [vmem:[%s26742_s30 + $0x4c8] sm:$0xff] }
 0x3d5   : > { %7676 = vmatpush.bf16.msra.mxu0 %v20945_v38  ;;  %7453 = vmatmul.bf16.vlgmr.msrb.gmra.mxu1 %v22959_v47  ;;  %v20983_v3 = vld [vmem:[%s26742_s30 + $0x568] sm:$0xff] }
 0x3d6   : > { %7689 = vmatpush.bf16.msra.mxu1 %v20953_v40  ;;  %7466 = vmatmul.bf16.vlgmr.msrb.gmra.mxu2 %v22955_v45 }
 0x3d7   : > { %7702 = vmatpush.bf16.msra.mxu2 %v20961_v41  ;;  %7479 = vmatmul.bf16.vlgmr.msrb.gmra.mxu3 %v22957_v46  ;;  %v20938_v41 = vld [vmem:[%s26742_s30 + $0x400] sm:$0xff] }
 0x3d8   : > { %7715 = vmatpush.bf16.msra.mxu3 %v20969_v42  ;;  %v20946_v42 = vld [vmem:[%s26742_s30 + $0x440] sm:$0xff] }
 0x3d9   : > { %7677 = vmatpush.bf16.msra.mxu0 %v20944_v43  ;;  %v5979_v18 = vpop.f32.mrf.mxu2  ;;  %v5955_v22 = vpop.f32.mrf.mxu0  ;;  %v20954_v43 = vld [vmem:[%s26742_s30 + $0x480] sm:$0xff] }
 0x3da   : > { %7690 = vmatpush.bf16.msra.mxu1 %v20952_v49  ;;  %v5980_v20 = vadd.f32 %v5979_v18, %v5967_v10  ;;  %v5992_v21 = vpop.f32.mrf.mxu3  ;;  %v5968_v29 = vpop.f32.mrf.mxu1  ;;  %v20962_v49 = vld [vmem:[%s26742_s30 + $0x4c0] sm:$0xff]  ;;  %v20981_v22 = vld [vmem:[%s26742_s30 + $0x558] sm:$0xff] }
 0x3db   : > { %7703 = vmatpush.bf16.msra.mxu2 %v20960_v50  ;;  %v20977_v50 = vld [vmem:[%s26742_s30 + $0x538] sm:$0xff]  ;;  %v20998_v18 = vld [vmem:[%s26742_s30 + $0x5e0] sm:$0xff] }
 0x3dc   : > { %7716 = vmatpush.bf16.msra.mxu3 %v20968_v51  ;;  %v24961_v28 = vadd.f32 %v5992_v21, %v5980_v20  ;;  %v20985_v51 = vld [vmem:[%s26742_s30 + $0x578] sm:$0xff] }
 0x3dd   : > { %7678 = vmatpush.bf16.msra.mxu0 %v20943_v52  ;;  %v20993_v52 = vld [vmem:[%s26742_s30 + $0x5b8] sm:$0xff] }
 0x3de   : > { %7691 = vmatpush.bf16.msra.mxu1 %v20951_v54  ;;  %v21001_v54 = vld [vmem:[%s26742_s30 + $0x5f8] sm:$0xff] }
 0x3df   : > { %7704 = vmatpush.bf16.msra.mxu2 %v20959_v55  ;;  %v20976_v55 = vld [vmem:[%s26742_s30 + $0x530] sm:$0xff]  ;;  %v20973_v21 = vld [vmem:[%s26742_s30 + $0x518] sm:$0xff] }
 0x3e0   : > { %7717 = vmatpush.bf16.msra.mxu3 %v20967_v59  ;;  %v20984_v59 = vld [vmem:[%s26742_s30 + $0x570] sm:$0xff] }
 0x3e1   : > { %7679 = vmatpush.bf16.msra.mxu0 %v20942_v62  ;;  %v5981_v38 = vpop.f32.mrf.mxu2  ;;  %v21000_v62 = vld [vmem:[%s26742_s30 + $0x5f0] sm:$0xff] }
 0x3e2   : > { %7692 = vmatpush.bf16.msra.mxu1 %v20950_v63  ;;  %v5994_v40 = vpop.f32.mrf.mxu3  ;;  %v20975_v63 = vld [vmem:[%s26742_s30 + $0x528] sm:$0xff] }
 0x3e3   : > { %7705 = vmatpush.bf16.msra.mxu2 %v20958_v5  ;;  %v20991_v5 = vld [vmem:[%s26742_s30 + $0x5a8] sm:$0xff]  ;;  %v20988_v40 = vld [vmem:[%s26742_s30 + $0x590] sm:$0xff] }
 0x3e4   : > { %7718 = vmatpush.bf16.msra.mxu3 %v20966_v9  ;;  %v20999_v9 = vld [vmem:[%s26742_s30 + $0x5e8] sm:$0xff] }
 0x3e5   : > { %7680 = vmatpush.bf16.msra.mxu0 %v20941_v13  ;;  %v20974_v13 = vld [vmem:[%s26742_s30 + $0x520] sm:$0xff] }
 0x3e6   : > { %7693 = vmatpush.bf16.msra.mxu1 %v20949_v14  ;;  %v20982_v14 = vld [vmem:[%s26742_s30 + $0x560] sm:$0xff] }
 0x3e7   : > { %7706 = vmatpush.bf16.msra.mxu2 %v20957_v16 }
 0x3e8   : > { %7719 = vmatpush.bf16.msra.mxu3 %v20965_v17  ;;  %v20990_v17 = vld [vmem:[%s26742_s30 + $0x5a0] sm:$0xff] }
 0x3e9   : > { %7681 = vmatpush.bf16.msra.mxu0 %v20940_v25  ;;  %v20989_v25 = vld [vmem:[%s26742_s30 + $0x598] sm:$0xff] }
 0x3ea   : > { %7694 = vmatpush.bf16.msra.mxu1 %v20948_v26  ;;  %v20997_v26 = vld [vmem:[%s26742_s30 + $0x5d8] sm:$0xff] }
 0x3eb   : > { %7707 = vmatpush.bf16.msra.mxu2 %v20956_v31 }
 0x3ec   : > { %7720 = vmatpush.bf16.msra.mxu3 %v20964_v32 }
 0x3ed   : > { %7682 = vmatpush.bf16.msra.mxu0 %v20939_v33 }
 0x3ee   : > { %7695 = vmatpush.bf16.msra.mxu1 %v20947_v34  ;;  %v20972_v34 = vld [vmem:[%s26742_s30 + $0x510] sm:$0xff] }
 0x3ef   : > { %7708 = vmatpush.bf16.msra.mxu2 %v20955_v35  ;;  %v20980_v35 = vld [vmem:[%s26742_s30 + $0x550] sm:$0xff] }
 0x3f0   : > { %7721 = vmatpush.bf16.msra.mxu3 %v20963_v37 }
 0x3f1   : > { %7683 = vmatpush.bf16.msra.mxu0 %v20938_v41  ;;  %v6709_v10 = vpop.f32.mrf.mxu0  ;;  %v20996_v41 = vld [vmem:[%s26742_s30 + $0x5d0] sm:$0xff] }
 0x3f2   : > { %7696 = vmatpush.bf16.msra.mxu1 %v20946_v42  ;;  %v6722_v16 = vpop.f32.mrf.mxu1  ;;  %v20971_v42 = vld [vmem:[%s26742_s30 + $0x508] sm:$0xff] }
 0x3f3   : > { %7709 = vmatpush.bf16.msra.mxu2 %v20954_v43  ;;  %v6723_v20 = vadd.f32 %v6722_v16, %v6709_v10  ;;  %v20979_v43 = vld [vmem:[%s26742_s30 + $0x548] sm:$0xff]  ;;  %v21016_v10 = vld [vmem:[%s26742_s30 + $0x670] sm:$0xff] }
 0x3f4   : > { %7722 = vmatpush.bf16.msra.mxu3 %v20962_v49  ;;  %7684 = vmatmul.bf16.vlgmr.msra.gmra.mxu0 %v22953_v44  ;;  %v20987_v49 = vld [vmem:[%s26742_s30 + $0x588] sm:$0xff] }
 0x3f5   : > { %7920 = vmatpush.bf16.msrb.mxu0 %v20977_v50  ;;  %7697 = vmatmul.bf16.vlgmr.msra.gmra.mxu1 %v22959_v47  ;;  %v20995_v50 = vld [vmem:[%s26742_s30 + $0x5c8] sm:$0xff] }
 0x3f6   : > { %7933 = vmatpush.bf16.msrb.mxu1 %v20985_v51  ;;  %7710 = vmatmul.bf16.vlgmr.msra.gmra.mxu2 %v22955_v45  ;;  %v21007_v16 = vld [vmem:[%s26742_s30 + $0x628] sm:$0xff] }
 0x3f7   : > { %7946 = vmatpush.bf16.msrb.mxu2 %v20993_v52  ;;  %7723 = vmatmul.bf16.vlgmr.msra.gmra.mxu3 %v22957_v46 }
 0x3f8   : > { %7959 = vmatpush.bf16.msrb.mxu3 %v21001_v54  ;;  %v20970_v54 = vld [vmem:[%s26742_s30 + $0x500] sm:$0xff] }
 0x3f9   : > { %7921 = vmatpush.bf16.msrb.mxu0 %v20976_v55  ;;  %v6735_v29 = vpop.f32.mrf.mxu2  ;;  %v6711_v33 = vpop.f32.mrf.mxu0  ;;  %v20978_v55 = vld [vmem:[%s26742_s30 + $0x540] sm:$0xff] }
 0x3fa   : > { %7934 = vmatpush.bf16.msrb.mxu1 %v20984_v59  ;;  %v6736_v31 = vadd.f32 %v6735_v29, %v6723_v20  ;;  %v6748_v32 = vpop.f32.mrf.mxu3  ;;  %v6724_v38 = vpop.f32.mrf.mxu1  ;;  %v20986_v59 = vld [vmem:[%s26742_s30 + $0x580] sm:$0xff]  ;;  %v21031_v20 = vld [vmem:[%s26742_s30 + $0x6e8] sm:$0xff]  ;;  %v21005_v33 = vld [vmem:[%s26742_s30 + $0x618] sm:$0xff] }
 0x3fb   : > { %7947 = vmatpush.bf16.msrb.mxu2 %v20992_v60  ;;  %v20994_v60 = vld [vmem:[%s26742_s30 + $0x5c0] sm:$0xff]  ;;  %v21029_v38 = vld [vmem:[%s26742_s30 + $0x6d8] sm:$0xff] }
 0x3fc   : > { %7960 = vmatpush.bf16.msrb.mxu3 %v21000_v62  ;;  %v25063_v37 = vadd.f32 %v6748_v32, %v6736_v31  ;;  %v21009_v62 = vld [vmem:[%s26742_s30 + $0x638] sm:$0xff]  ;;  %v21022_v29 = vld [vmem:[%s26742_s30 + $0x6a0] sm:$0xff] }
 0x3fd   : > { %7922 = vmatpush.bf16.msrb.mxu0 %v20975_v63  ;;  %v21017_v63 = vld [vmem:[%s26742_s30 + $0x678] sm:$0xff]  ;;  %v21030_v31 = vld [vmem:[%s26742_s30 + $0x6e0] sm:$0xff] }
 0x3fe   : > { %7935 = vmatpush.bf16.msrb.mxu1 %v20983_v3  ;;  %v21025_v3 = vld [vmem:[%s26742_s30 + $0x6b8] sm:$0xff] }
 0x3ff   : > { %7948 = vmatpush.bf16.msrb.mxu2 %v20991_v5  ;;  %v21033_v5 = vld [vmem:[%s26742_s30 + $0x6f8] sm:$0xff] }
 0x400   : > { %7961 = vmatpush.bf16.msrb.mxu3 %v20999_v9  ;;  %v21008_v9 = vld [vmem:[%s26742_s30 + $0x630] sm:$0xff] }
 0x401   : > { %7923 = vmatpush.bf16.msrb.mxu0 %v20974_v13  ;;  %v6737_v51 = vpop.f32.mrf.mxu2  ;;  %v21024_v13 = vld [vmem:[%s26742_s30 + $0x6b0] sm:$0xff] }
 0x402   : > { %7936 = vmatpush.bf16.msrb.mxu1 %v20982_v14  ;;  %v6750_v52 = vpop.f32.mrf.mxu3  ;;  %v21032_v14 = vld [vmem:[%s26742_s30 + $0x6f0] sm:$0xff] }
 0x403   : > { %7949 = vmatpush.bf16.msrb.mxu2 %v20990_v17  ;;  %v21015_v17 = vld [vmem:[%s26742_s30 + $0x668] sm:$0xff]  ;;  %v21020_v51 = vld [vmem:[%s26742_s30 + $0x690] sm:$0xff] }
 0x404   : > { %7962 = vmatpush.bf16.msrb.mxu3 %v20998_v18  ;;  %v21023_v18 = vld [vmem:[%s26742_s30 + $0x6a8] sm:$0xff]  ;;  %v21028_v52 = vld [vmem:[%s26742_s30 + $0x6d0] sm:$0xff] }
 0x405   : > { %7924 = vmatpush.bf16.msrb.mxu0 %v20973_v21 }
 0x406   : > { %7937 = vmatpush.bf16.msrb.mxu1 %v20981_v22  ;;  %v21006_v22 = vld [vmem:[%s26742_s30 + $0x620] sm:$0xff] }
 0x407   : > { %7950 = vmatpush.bf16.msrb.mxu2 %v20989_v25  ;;  %v21014_v25 = vld [vmem:[%s26742_s30 + $0x660] sm:$0xff] }
 0x408   : > { %7963 = vmatpush.bf16.msrb.mxu3 %v20997_v26 }
 0x409   : > { %7925 = vmatpush.bf16.msrb.mxu0 %v20972_v34  ;;  %v21013_v34 = vld [vmem:[%s26742_s30 + $0x658] sm:$0xff] }
 0x40a   : > { %7938 = vmatpush.bf16.msrb.mxu1 %v20980_v35  ;;  %v21021_v35 = vld [vmem:[%s26742_s30 + $0x698] sm:$0xff] }
 0x40b   : > { %7951 = vmatpush.bf16.msrb.mxu2 %v20988_v40 }
 0x40c   : > { %7964 = vmatpush.bf16.msrb.mxu3 %v20996_v41 }
 0x40d   : > { %7926 = vmatpush.bf16.msrb.mxu0 %v20971_v42 }
 0x40e   : > { %7939 = vmatpush.bf16.msrb.mxu1 %v20979_v43  ;;  %v21004_v43 = vld [vmem:[%s26742_s30 + $0x610] sm:$0xff] }
 0x40f   : > { %7952 = vmatpush.bf16.msrb.mxu2 %v20987_v49  ;;  %v21012_v49 = vld [vmem:[%s26742_s30 + $0x650] sm:$0xff] }
 0x410   : > { %7965 = vmatpush.bf16.msrb.mxu3 %v20995_v50 }
 0x411   : > { %7927 = vmatpush.bf16.msrb.mxu0 %v20970_v54  ;;  %v6953_v21 = vpop.f32.mrf.mxu0  ;;  %v21003_v54 = vld [vmem:[%s26742_s30 + $0x608] sm:$0xff] }
 0x412   : > { %7940 = vmatpush.bf16.msrb.mxu1 %v20978_v55  ;;  %v6966_v26 = vpop.f32.mrf.mxu1  ;;  %v21011_v55 = vld [vmem:[%s26742_s30 + $0x648] sm:$0xff] }
 0x413   : > { %7953 = vmatpush.bf16.msrb.mxu2 %v20986_v59  ;;  %v25147_v32 = vadd.f32 %v6966_v26, %v6953_v21  ;;  %v21019_v59 = vld [vmem:[%s26742_s30 + $0x688] sm:$0xff]  ;;  %v21056_v21 = vld [vmem:[%s26742_s30 + $0x7b0] sm:$0xff] }
 0x414   : > { %7966 = vmatpush.bf16.msrb.mxu3 %v20994_v60  ;;  %7928 = vmatmul.bf16.vlgmr.msrb.gmra.mxu0 %v22953_v44  ;;  %v21027_v60 = vld [vmem:[%s26742_s30 + $0x6c8] sm:$0xff] }
 0x415   : > { %8164 = vmatpush.bf16.msra.mxu0 %v21009_v62  ;;  %7941 = vmatmul.bf16.vlgmr.msrb.gmra.mxu1 %v22959_v47  ;;  %v21047_v26 = vld [vmem:[%s26742_s30 + $0x768] sm:$0xff] }
 0x416   : > { %8177 = vmatpush.bf16.msra.mxu1 %v21017_v63  ;;  %7954 = vmatmul.bf16.vlgmr.msrb.gmra.mxu2 %v22955_v45 }
 0x417   : > { %8190 = vmatpush.bf16.msra.mxu2 %v21025_v3  ;;  %7967 = vmatmul.bf16.vlgmr.msrb.gmra.mxu3 %v22957_v46  ;;  %v21002_v3 = vld [vmem:[%s26742_s30 + $0x600] sm:$0xff] }
 0x418   : > { %8203 = vmatpush.bf16.msra.mxu3 %v21033_v5  ;;  %v21010_v5 = vld [vmem:[%s26742_s30 + $0x640] sm:$0xff] }
 0x419   : > { %8165 = vmatpush.bf16.msra.mxu0 %v21008_v9  ;;  %v25161_v40 = vpop.f32.mrf.mxu2  ;;  %v6955_v42 = vpop.f32.mrf.mxu0  ;;  %v21018_v9 = vld [vmem:[%s26742_s30 + $0x680] sm:$0xff] }
 0x41a   : > { %8178 = vmatpush.bf16.msra.mxu1 %v21016_v10  ;;  %v25163_v41 = vpop.f32.mrf.mxu3  ;;  %v6968_v50 = vpop.f32.mrf.mxu1  ;;  %v21026_v10 = vld [vmem:[%s26742_s30 + $0x6c0] sm:$0xff] }
 0x41b   : > { %8191 = vmatpush.bf16.msra.mxu2 %v21024_v13  ;;  %v21041_v13 = vld [vmem:[%s26742_s30 + $0x738] sm:$0xff]  ;;  %v21054_v42 = vld [vmem:[%s26742_s30 + $0x7a0] sm:$0xff] }
 0x41c   : > { %8204 = vmatpush.bf16.msra.mxu3 %v21032_v14  ;;  %v21049_v14 = vld [vmem:[%s26742_s30 + $0x778] sm:$0xff] }
 0x41d   : > { %8166 = vmatpush.bf16.msra.mxu0 %v21007_v16  ;;  %v21057_v16 = vld [vmem:[%s26742_s30 + $0x7b8] sm:$0xff] }
 0x41e   : > { %8179 = vmatpush.bf16.msra.mxu1 %v21015_v17  ;;  %v21065_v17 = vld [vmem:[%s26742_s30 + $0x7f8] sm:$0xff] }
 0x41f   : > { %8192 = vmatpush.bf16.msra.mxu2 %v21023_v18  ;;  %v21040_v18 = vld [vmem:[%s26742_s30 + $0x730] sm:$0xff]  ;;  %v21045_v50 = vld [vmem:[%s26742_s30 + $0x758] sm:$0xff] }
 0x420   : > { %8205 = vmatpush.bf16.msra.mxu3 %v21031_v20  ;;  %v21048_v20 = vld [vmem:[%s26742_s30 + $0x770] sm:$0xff] }
 0x421   : > { %8167 = vmatpush.bf16.msra.mxu0 %v21006_v22  ;;  %v6981_v62 = vpop.f32.mrf.mxu2  ;;  %v21064_v22 = vld [vmem:[%s26742_s30 + $0x7f0] sm:$0xff] }
 0x422   : > { %8180 = vmatpush.bf16.msra.mxu1 %v21014_v25  ;;  %v6994_v63 = vpop.f32.mrf.mxu3  ;;  %v21039_v25 = vld [vmem:[%s26742_s30 + $0x728] sm:$0xff]  ;;  %v21044_v62 = vld [vmem:[%s26742_s30 + $0x750] sm:$0xff] }
 0x423   : > { %8193 = vmatpush.bf16.msra.mxu2 %v21022_v29  ;;  %v21055_v29 = vld [vmem:[%s26742_s30 + $0x7a8] sm:$0xff] }
 0x424   : > { %8206 = vmatpush.bf16.msra.mxu3 %v21030_v31  ;;  %v21063_v31 = vld [vmem:[%s26742_s30 + $0x7e8] sm:$0xff] }
 0x425   : > { %8168 = vmatpush.bf16.msra.mxu0 %v21005_v33 }
 0x426   : > { %8181 = vmatpush.bf16.msra.mxu1 %v21013_v34  ;;  %v21038_v34 = vld [vmem:[%s26742_s30 + $0x720] sm:$0xff] }
 0x427   : > { %8194 = vmatpush.bf16.msra.mxu2 %v21021_v35  ;;  %v21046_v35 = vld [vmem:[%s26742_s30 + $0x760] sm:$0xff] }
 0x428   : > { %8207 = vmatpush.bf16.msra.mxu3 %v21029_v38 }
 0x429   : > { %8169 = vmatpush.bf16.msra.mxu0 %v21004_v43  ;;  %v21062_v43 = vld [vmem:[%s26742_s30 + $0x7e0] sm:$0xff] }
 0x42a   : > { %8182 = vmatpush.bf16.msra.mxu1 %v21012_v49  ;;  %v21037_v49 = vld [vmem:[%s26742_s30 + $0x718] sm:$0xff] }
 0x42b   : > { %8195 = vmatpush.bf16.msra.mxu2 %v21020_v51  ;;  %v21053_v51 = vld [vmem:[%s26742_s30 + $0x798] sm:$0xff] }
 0x42c   : > { %8208 = vmatpush.bf16.msra.mxu3 %v21028_v52  ;;  %v21061_v52 = vld [vmem:[%s26742_s30 + $0x7d8] sm:$0xff] }
 0x42d   : > { %8170 = vmatpush.bf16.msra.mxu0 %v21003_v54 }
 0x42e   : > { %8183 = vmatpush.bf16.msra.mxu1 %v21011_v55 }
 0x42f   : > { %8196 = vmatpush.bf16.msra.mxu2 %v21019_v59 }
 0x430   : > { %8209 = vmatpush.bf16.msra.mxu3 %v21027_v60  ;;  %v21036_v60 = vld [vmem:[%s26742_s30 + $0x710] sm:$0xff] }
 0x431   : > { %8171 = vmatpush.bf16.msra.mxu0 %v21002_v3  ;;  %v25241_v33 = vpop.f32.mrf.mxu0  ;;  %v21052_v3 = vld [vmem:[%s26742_s30 + $0x790] sm:$0xff] }
 0x432   : > { %8184 = vmatpush.bf16.msra.mxu1 %v21010_v5  ;;  %v25249_v38 = vpop.f32.mrf.mxu1  ;;  %v21060_v5 = vld [vmem:[%s26742_s30 + $0x7d0] sm:$0xff] }
 0x433   : > { %8197 = vmatpush.bf16.msra.mxu2 %v21018_v9  ;;  %v21035_v9 = vld [vmem:[%s26742_s30 + $0x708] sm:$0xff] }
 0x434   : > { %8210 = vmatpush.bf16.msra.mxu3 %v21026_v10  ;;  %8172 = vmatmul.bf16.vlgmr.msra.gmra.mxu0 %v22953_v44  ;;  %v21043_v10 = vld [vmem:[%s26742_s30 + $0x748] sm:$0xff] }
 0x435   : > { %8408 = vmatpush.bf16.msrb.mxu0 %v21041_v13  ;;  %8185 = vmatmul.bf16.vlgmr.msra.gmra.mxu1 %v22959_v47  ;;  %v21051_v13 = vld [vmem:[%s26742_s30 + $0x788] sm:$0xff] }
 0x436   : > { %8421 = vmatpush.bf16.msrb.mxu1 %v21049_v14  ;;  %8198 = vmatmul.bf16.vlgmr.msra.gmra.mxu2 %v22955_v45  ;;  %v21059_v14 = vld [vmem:[%s26742_s30 + $0x7c8] sm:$0xff] }
 0x437   : > { %8434 = vmatpush.bf16.msrb.mxu2 %v21057_v16  ;;  %8211 = vmatmul.bf16.vlgmr.msra.gmra.mxu3 %v22957_v46 }
 0x438   : > { %8447 = vmatpush.bf16.msrb.mxu3 %v21065_v17 }
 0x439   : > { %8409 = vmatpush.bf16.msrb.mxu0 %v21040_v18  ;;  %v7223_v54 = vpop.f32.mrf.mxu2  ;;  %v7199_v59 = vpop.f32.mrf.mxu0  ;;  %v5235_v18 = vadd.f32 %v24621_v2, %v24613_v61  ;;  %v21058_v61 = vld [vmem:[%s26742_s30 + $0x7c0] sm:$0xff] }
 0x43a   : > { %8422 = vmatpush.bf16.msrb.mxu1 %v21048_v20  ;;  %v25269_v55 = vpop.f32.mrf.mxu3  ;;  %v7212_v63 = vpop.f32.mrf.mxu1  ;;  %v5479_v20 = vadd.f32 %v24729_v58, %v24721_v53 }
 0x43b   : > { %8435 = vmatpush.bf16.msrb.mxu2 %v21056_v21  ;;  %v21034_v21 = vld [vmem:[%s26742_s30 + $0x700] sm:$0xff]  ;;  %v5248_v2 = vadd.f32 %v24641_v11, %v5235_v18 }
 0x43c   : > { %8448 = vmatpush.bf16.msrb.mxu3 %v21064_v22  ;;  %v21042_v22 = vld [vmem:[%s26742_s30 + $0x740] sm:$0xff]  ;;  %v5492_v53 = vadd.f32 %v24749_v6, %v5479_v20 }
 0x43d   : > { %8410 = vmatpush.bf16.msrb.mxu0 %v21039_v25  ;;  %v21050_v25 = vld [vmem:[%s26742_s30 + $0x780] sm:$0xff]  ;;  %v5261_v11 = vadd.f32 %v24643_v12, %v5248_v2 }
 0x43e   : > { %8423 = vmatpush.bf16.msrb.mxu1 %v21047_v26  ;;  %v5505_v58 = vadd.f32 %v24751_v7, %v5492_v53 }
 0x43f   : > { %8436 = vmatpush.bf16.msrb.mxu2 %v21055_v29 }
 0x440   : > { %8449 = vmatpush.bf16.msrb.mxu3 %v21063_v31 }
 0x441   : > { %8411 = vmatpush.bf16.msrb.mxu0 %v21038_v34  ;;  %v7225_v16 = vpop.f32.mrf.mxu2 }
 0x442   : > { %8424 = vmatpush.bf16.msrb.mxu1 %v21046_v35  ;;  %v7238_v17 = vpop.f32.mrf.mxu3 }
 0x443   : > { %8437 = vmatpush.bf16.msrb.mxu2 %v21054_v42 }
 0x444   : > { %8450 = vmatpush.bf16.msrb.mxu3 %v21062_v43 }
 0x445   : > { %8412 = vmatpush.bf16.msrb.mxu0 %v21037_v49 }
 0x446   : > { %8425 = vmatpush.bf16.msrb.mxu1 %v21045_v50 }
 0x447   : > { %8438 = vmatpush.bf16.msrb.mxu2 %v21053_v51 }
 0x448   : > { %8451 = vmatpush.bf16.msrb.mxu3 %v21061_v52 }
 0x449   : > { %8413 = vmatpush.bf16.msrb.mxu0 %v21036_v60 }
 0x44a   : > { %8426 = vmatpush.bf16.msrb.mxu1 %v21044_v62 }
 0x44b   : > { %8439 = vmatpush.bf16.msrb.mxu2 %v21052_v3 }
 0x44c   : > { %8452 = vmatpush.bf16.msrb.mxu3 %v21060_v5 }
 0x44d   : > { %8414 = vmatpush.bf16.msrb.mxu0 %v21035_v9 }
 0x44e   : > { %8427 = vmatpush.bf16.msrb.mxu1 %v21043_v10 }
 0x44f   : > { %8440 = vmatpush.bf16.msrb.mxu2 %v21051_v13 }
 0x450   : > { %8453 = vmatpush.bf16.msrb.mxu3 %v21059_v14 }
 0x451   : > { %8415 = vmatpush.bf16.msrb.mxu0 %v21034_v21 }
 0x452   : > { %8428 = vmatpush.bf16.msrb.mxu1 %v21042_v22 }
 0x453   : > { %8441 = vmatpush.bf16.msrb.mxu2 %v21050_v25 }
 0x454   : > { %8454 = vmatpush.bf16.msrb.mxu3 %v21058_v61  ;;  %8416 = vmatmul.bf16.vlgmr.msrb.gmra.mxu0 %v22953_v44  ;;  %v7211_v44 = vadd.f32 %v25249_v38, %v25241_v33 }
 0x455   : > { %17675 = vmatpush.xpose.msk.msra.mxu0 %vm8460_vm0, %v24235_v48  ;;  %8429 = vmatmul.bf16.vlgmr.msrb.gmra.mxu1 %v22959_v47  ;;  %v7441_v48 = vpop.f32.mrf.mxu0 }
 0x456   : > { %17677 = vmatpush.xpose.msk.msra.mxu1 %vm8460_vm0, %v24337_v36  ;;  %8442 = vmatmul.bf16.vlgmr.msrb.gmra.mxu2 %v22955_v45  ;;  %v7454_v36 = vpop.f32.mrf.mxu1  ;;  %v6980_v45 = vadd.f32 %v25161_v40, %v25147_v32  ;;  %v7224_v12 = vadd.f32 %v7223_v54, %v7211_v44 }
 0x457   : > { %17679 = vmatpush.xpose.msk.msra.mxu2 %vm8460_vm0, %v24439_v30  ;;  %8455 = vmatmul.bf16.vlgmr.msrb.gmra.mxu3 %v22957_v46  ;;  %v7455_v30 = vadd.f32 %v7454_v36, %v7441_v48 }
 0x458   : > { %17681 = vmatpush.xpose.msk.msra.mxu3 %vm8460_vm0, %v24541_v24 }
 0x459   : > { %17683 = vmatpush.xpose.msk.msrb.mxu0 %vm8460_vm0, %v5261_v11  ;;  %v7467_v47 = vpop.f32.mrf.mxu2 }
 0x45a   : > { %17685 = vmatpush.xpose.msk.msrb.mxu1 %vm8460_vm0, %v5505_v58  ;;  %v7468_v46 = vadd.f32 %v7467_v47, %v7455_v30  ;;  %v7480_v24 = vpop.f32.mrf.mxu3 }
 0x45b   : > { %17687 = vmatpush.xpose.msk.msrb.mxu2 %vm8460_vm0, %v24859_v19  ;;  %v6993_v19 = vadd.f32 %v25163_v41, %v6980_v45 }
 0x45c   : > { %17689 = vmatpush.xpose.msk.msrb.mxu3 %vm8460_vm0, %v24961_v28  ;;  %v7481_v26 = vadd.f32 %v7480_v24, %v7468_v46  ;;  %v7237_v28 = vadd.f32 %v25269_v55, %v7224_v12 }
 0x45d   : > { %v7443_v6 = vpop.f32.mrf.mxu0 }
 0x45e   : > { %v7456_v7 = vpop.f32.mrf.mxu1 }
 0x461   : > { %v7469_v32 = vpop.f32.mrf.mxu2 }
 0x462   : > { %v7482_v40 = vpop.f32.mrf.mxu3 }
 0x464   : > { %17676 = vmatmul.msk.f32.vlgmr.msra.gmra.mxu0 %vm8460_vm0, %v23419_v23 }
 0x465   : > { %17678 = vmatmul.msk.f32.vlgmr.msra.gmra.mxu1 %vm8460_vm0, %v23521_v8  ;;  %8880 = vmatpush.msra.mxu0 %v25063_v37 }
 0x466   : > { %17680 = vmatmul.msk.f32.vlgmr.msra.gmra.mxu2 %vm8460_vm0, %v23623_v56  ;;  %8903 = vmatpush.msra.mxu1 %v6993_v19 }
 0x467   : > { %17682 = vmatmul.msk.f32.vlgmr.msra.gmra.mxu3 %vm8460_vm0, %v23725_v39  ;;  %8926 = vmatpush.msra.mxu2 %v7237_v28 }
 0x468   : > { %8949 = vmatpush.msra.mxu3 %v7481_v26 }
 0x46c   : > { %17684 = vmatmul.msk.f32.vlgmr.msrb.gmra.mxu0 %vm8460_vm0, %v23827_v27 }
 0x46d   : > { %17686 = vmatmul.msk.f32.vlgmr.msrb.gmra.mxu1 %vm8460_vm0, %v23929_v15 }
 0x46e   : > { %17688 = vmatmul.msk.f32.vlgmr.msrb.gmra.mxu2 %vm8460_vm0, %v24031_v4 }
 0x46f   : > { %17690 = vmatmul.msk.f32.vlgmr.msrb.gmra.mxu3 %vm8460_vm0, %v24133_v57 }
 0x471   : > { %v7685_v23 = vpop.f32.mrf.mxu0 }
 0x472   : > { %v7698_v8 = vpop.f32.mrf.mxu1 }
 0x473   : > { %v7699_v56 = vadd.f32 %v7698_v8, %v7685_v23 }
 0x479   : > { %v7711_v39 = vpop.f32.mrf.mxu2  ;;  %v7687_v29 = vpop.f32.mrf.mxu0 }
 0x47a   : > { %v7712_v37 = vadd.f32 %v7711_v39, %v7699_v56  ;;  %v7724_v41 = vpop.f32.mrf.mxu3  ;;  %v7700_v33 = vpop.f32.mrf.mxu1 }
 0x47c   : > { %v7725_v31 = vadd.f32 %v7724_v41, %v7712_v37 }
 0x47e   : > { %8972 = vmatpush.msrb.mxu0 %v7725_v31 }
 0x481   : > { %v7713_v27 = vpop.f32.mrf.mxu2 }
 0x482   : > { %v7726_v34 = vpop.f32.mrf.mxu3 }
 0x491   : > { %v7929_v35 = vpop.f32.mrf.mxu0 }
 0x492   : > { %v7942_v15 = vpop.f32.mrf.mxu1 }
 0x493   : > { %v7943_v38 = vadd.f32 %v7942_v15, %v7929_v35 }
 0x499   : > { %v7955_v42 = vpop.f32.mrf.mxu2  ;;  %v7931_v49 = vpop.f32.mrf.mxu0 }
 0x49a   : > { %v7956_v4 = vadd.f32 %v7955_v42, %v7943_v38  ;;  %v7968_v43 = vpop.f32.mrf.mxu3  ;;  %v7944_v50 = vpop.f32.mrf.mxu1 }
 0x49c   : > { %v7969_v57 = vadd.f32 %v7968_v43, %v7956_v4 }
 0x49e   : > { %8995 = vmatpush.msrb.mxu1 %v7969_v57 }
 0x4a1   : > { %v7957_v51 = vpop.f32.mrf.mxu2 }
 0x4a2   : > { %v7970_v52 = vpop.f32.mrf.mxu3 }
 0x4b1   : > { %v8173_v54 = vpop.f32.mrf.mxu0 }
 0x4b2   : > { %v8186_v55 = vpop.f32.mrf.mxu1 }
 0x4b3   : > { %v8187_v59 = vadd.f32 %v8186_v55, %v8173_v54 }
 0x4b9   : > { %v8199_v60 = vpop.f32.mrf.mxu2  ;;  %v8175_v3 = vpop.f32.mrf.mxu0 }
 0x4ba   : > { %v8200_v62 = vadd.f32 %v8199_v60, %v8187_v59  ;;  %v8212_v63 = vpop.f32.mrf.mxu3  ;;  %v8188_v9 = vpop.f32.mrf.mxu1 }
 0x4bc   : > { %v8213_v5 = vadd.f32 %v8212_v63, %v8200_v62 }
 0x4be   : > { %9018 = vmatpush.msrb.mxu2 %v8213_v5 }
 0x4c1   : > { %v8201_v10 = vpop.f32.mrf.mxu2 }
 0x4c2   : > { %v8214_v13 = vpop.f32.mrf.mxu3 }
 0x4d1   : > { %v8417_v14 = vpop.f32.mrf.mxu0 }
 0x4d2   : > { %v8430_v16 = vpop.f32.mrf.mxu1 }
 0x4d3   : > { %v8431_v17 = vadd.f32 %v8430_v16, %v8417_v14 }
 0x4d9   : > { %v8443_v18 = vpop.f32.mrf.mxu2  ;;  %v8419_v22 = vpop.f32.mrf.mxu0 }
 0x4da   : > { %v8456_v20 = vpop.f32.mrf.mxu3  ;;  %v8444_v21 = vadd.f32 %v8443_v18, %v8431_v17  ;;  %v8432_v25 = vpop.f32.mrf.mxu1 }
 0x4dc   : > { %v8457_v61 = vadd.f32 %v8456_v20, %v8444_v21 }
 0x4de   : > { %9041 = vmatpush.msrb.mxu3 %v8457_v61 }
 0x4e1   : > { %v8445_v2 = vpop.f32.mrf.mxu2  ;;  %v8484_v11 = vpop.f32.mrf.mxu0 }
 0x4e2   : > { %v8458_v53 = vpop.f32.mrf.mxu3  ;;  %v8670_v58 = vsel %vm8669_vm1, %v8484_v11, -inf  ;;  %v8510_v48 = vpop.f32.mrf.mxu1 }
 0x4e3   : > { %8671 = vmax.xlane.f32.xlu0 %v8670_v58  ;;  %v8673_v44 = vsel %vm8669_vm1, %v8510_v48, -inf }
 0x4e9   : > { %v8536_v36 = vpop.f32.mrf.mxu2  ;;  %v8588_v39 = vpop.f32.mrf.mxu0 }
 0x4ea   : > { %v8676_v30 = vsel %vm8669_vm1, %v8536_v36, -inf  ;;  %v8562_v47 = vpop.f32.mrf.mxu3  ;;  %v8682_v27 = vsel %vm8669_vm1, %v8588_v39, -inf  ;;  %v25373_v34 = vpop.f32.mrf.mxu1 }
 0x4eb   : > { %8677 = vmax.xlane.f32.xlu1 %v8676_v30  ;;  %8674 = vmax.xlane.f32.xlu0 %v8673_v44  ;;  %v8679_v45 = vsel %vm8669_vm1, %v8562_v47, -inf  ;;  %v8685_v4 = vsel %vm8669_vm1, %v25373_v34, -inf }
 0x4f1   : > { %v8640_v35 = vpop.f32.mrf.mxu2 }
 0x4f2   : > { %v8688_v42 = vsel %vm8669_vm1, %v8640_v35, -inf  ;;  %v25382_v43 = vpop.f32.mrf.mxu3 }
 0x4f3   : > { %8680 = vmax.xlane.f32.xlu1 %v8679_v45  ;;  %v8691_v49 = vsel %vm8669_vm1, %v25382_v43, -inf }
 0x556   : > { %v8672_v46 = vpop.xlane.xlu0 %8671 }
 0x557   : > { %v8694_v24 = vsub.f32 %v8484_v11, %v8672_v46 }
 0x559   : > { %v8702_v12 = vmul.f32 1.442695, %v8694_v24 }
 0x55b   : > { %21803 = vpow2.f32 %v8702_v12 }
 0x55e   : > { %v8678_v6 = vpop.xlane.xlu1 %8677  ;;  %v8675_v26 = vpop.xlane.xlu0 %8674 }
 0x55f   : > { %v8696_v7 = vsub.f32 %v8536_v36, %v8678_v6  ;;  %v8695_v19 = vsub.f32 %v8510_v48, %v8675_v26 }
 0x561   : > { %v8706_v28 = vmul.f32 1.442695, %v8696_v7  ;;  %v25360_v32 = vpop.eup %21803  ;;  %v8704_v40 = vmul.f32 1.442695, %v8695_v19 }
 0x562   : > { %v8718_v23 = vsel %vm8669_vm1, %v25360_v32, 0.0 }
 0x563   : > { %21805 = vpow2.f32 %v8706_v28  ;;  %8719 = vadd.xlane.f32.xlu2 %v8718_v23 }
 0x564   : > { %21807 = vpow2.f32 %v8704_v40 }
 0x566   : > { %v8681_v8 = vpop.xlane.xlu1 %8680 }
 0x567   : > { %v8697_v56 = vsub.f32 %v8562_v47, %v8681_v8 }
 0x569   : > { %v25364_v37 = vpop.eup %21805  ;;  %v8708_v41 = vmul.f32 1.442695, %v8697_v56 }
 0x56a   : > { %v25366_v29 = vpop.eup %21807  ;;  %v8724_v31 = vsel %vm8669_vm1, %v25364_v37, 0.0 }
 0x56b   : > { %21809 = vpow2.f32 %v8708_v41  ;;  %8725 = vadd.xlane.f32.xlu1 %v8724_v31  ;;  %v8721_v33 = vsel %vm8669_vm1, %v25366_v29, 0.0  ;;  %8683 = vmax.xlane.f32.xlu2 %v8682_v27 }
 0x56c   : > { %8722 = vadd.xlane.f32.xlu0 %v8721_v33 }
 0x571   : > { %v25375_v15 = vpop.eup %21809 }
 0x572   : > { %v8727_v38 = vsel %vm8669_vm1, %v25375_v15, 0.0 }
 0x573   : > { %8728 = vadd.xlane.f32.xlu1 %v8727_v38  ;;  %8686 = vmax.xlane.f32.xlu2 %v8685_v4 }
 0x574   : > { %8689 = vmax.xlane.f32.xlu0 %v8688_v42 }
 0x57b   : > { %8692 = vmax.xlane.f32.xlu2 %v8691_v49 }
 0x5d6   : > { %v8720_v57 = vpop.xlane.xlu2 %8719 }
 0x5d7   : > { %21811 = vrcp.f32 %v8720_v57  ;;  %v8753_v62 = vand.u32 2147483648, %v8720_v57  ;;  %v8751_v3 = vand.u32 2147483647, %v8720_v57  ;;  %vm8747_vm3 = vweird.f32 %v8720_v57 }
 0x5d9   : > { %v8754_v14 = vor.u32 1.1754944e-38, %v8753_v62  ;;  %vm8752_vm5 = vcmp.eq.f32.partialorder %v8751_v3, 8.507059e+37  ;;  %v21080_v62 = vld [vmem:[#allocation8 + $0x6c] sm:$0xf0]  ;;  %v17733_v3 = vld [vmem:[#allocation8 + $0x40] sm:$0xf] }
 0x5dd   : > { %v21812_v50 = vpop.eup %21811 }
 0x5de   : > { %v8726_v51 = vpop.xlane.xlu1 %8725  ;;  %v8743_v52 = vmul.f32 %v21812_v50, %v8720_v57  ;;  %v8684_v55 = vpop.xlane.xlu2 %8683  ;;  %vm8748_vm2 = vweird.f32 %v21812_v50 }
 0x5df   : > { %21813 = vrcp.f32 %v8726_v51  ;;  %v8723_v54 = vpop.xlane.xlu0 %8722  ;;  %v8698_v60 = vsub.f32 %v8588_v39, %v8684_v55  ;;  %vm8749_vm4 = vmor %vm8747_vm3, %vm8748_vm2  ;;  %vm8777_vm6 = vweird.f32 %v8726_v51  ;;  %v8781_v2 = vand.u32 2147483647, %v8726_v51 }
 0x5e0   : > { %21815 = vrcp.f32 %v8723_v54  ;;  %v8744_v59 = vsub.f32 1.0, %v8743_v52  ;;  %v8783_v11 = vand.u32 2147483648, %v8726_v51  ;;  %v8768_v30 = vand.u32 2147483648, %v8723_v54 }
 0x5e1   : > { %v8710_v5 = vmul.f32 1.442695, %v8698_v60  ;;  %v8766_v46 = vand.u32 2147483647, %v8723_v54  ;;  %vm8762_vm9 = vweird.f32 %v8723_v54  ;;  %vm8782_vm11 = vcmp.eq.f32.partialorder %v8781_v2, 8.507059e+37 }
 0x5e2   : > { %v8745_v63 = vmul.f32 %v21812_v50, %v8744_v59  ;;  %v8784_v19 = vor.u32 1.1754944e-38, %v8783_v11  ;;  %v8769_v40 = vor.u32 1.1754944e-38, %v8768_v30  ;;  %v17749_v60 = vld [vmem:[#allocation8 + $0x60] sm:$0xf]  ;;  %v17741_v11 = vld [vmem:[#allocation8 + $0x48] sm:$0xf] }
 0x5e3   : > { %21817 = vpow2.f32 %v8710_v5  ;;  %vm8767_vm13 = vcmp.eq.f32.partialorder %v8766_v46, 8.507059e+37  ;;  %v21076_v5 = vld [vmem:[#allocation8 + $0x4c] sm:$0xf0]  ;;  %v21070_v30 = vld [vmem:[#allocation8 + $0x24] sm:$0xf] }
 0x5e4   : > { %v8746_v10 = vadd.f32 %v21812_v50, %v8745_v63  ;;  %v17750_v63 = vor.u32 %v21080_v62, %v17749_v60  ;;  %v17817_v60 = vld [vmem:[#allocation8 + $0xe0] sm:$0xf]  ;;  %v21096_v62 = vld [vmem:[#allocation8 + $0xec] sm:$0xf0] }
 0x5e5   : > { %v21814_v9 = vpop.eup %21813 }
 0x5e6   : > { %v21816_v13 = vpop.eup %21815  ;;  %v8773_v16 = vmul.f32 %v21814_v9, %v8726_v51  ;;  %v25386_v17 = vpop.xlane.xlu1 %8728  ;;  %v8750_v18 = vsel %vm8749_vm4, %v21812_v50, %v8746_v10  ;;  %vm8778_vm7 = vweird.f32 %v21814_v9  ;;  %v17717_v10 = vld [vmem:[#allocation8 + $0x20] sm:$0xf] }
 0x5e7   : > { %v8758_v20 = vmul.f32 %v21816_v13, %v8723_v54  ;;  %21819 = vrcp.f32 %v25386_v17  ;;  %v8690_v21 = vpop.xlane.xlu0 %8689  ;;  %v8687_v22 = vpop.xlane.xlu2 %8686  ;;  %v8755_v25 = vsel %vm8752_vm5, %v8754_v14, %v8750_v18  ;;  %vm8763_vm8 = vweird.f32 %v21816_v13  ;;  %vm8779_vm10 = vmor %vm8777_vm6, %vm8778_vm7  ;;  %v21078_v14 = vld [vmem:[#allocation8 + $0x64] sm:$0xf]  ;;  %v21081_v18 = vld [vmem:[#allocation8 + $0x74] sm:$0xf0] }
 0x5e8   : > { %v8774_v61 = vsub.f32 1.0, %v8773_v16  ;;  %v8756_v53 = vmul.f32 %v25360_v32, %v8755_v25  ;;  %v8700_v48 = vsub.f32 %v8640_v35, %v8690_v21  ;;  %v8699_v44 = vsub.f32 %v25373_v34, %v8687_v22  ;;  %vm8764_vm12 = vmor %vm8762_vm9, %vm8763_vm8  ;;  %v17751_v16 = vld [vmem:[#allocation8 + $0x70] sm:$0xf0]  ;;  %v17701_v22 = vld [vmem:[#allocation8] sm:$0xf] }
 0x5e9   : > { %v8759_v58 = vsub.f32 1.0, %v8758_v20  ;;  %v25391_v47 = vpop.eup %21817  ;;  %v8798_v35 = vand.u32 2147483648, %v25386_v17  ;;  %v8796_v42 = vand.u32 2147483647, %v25386_v17  ;;  %vm8792_vm15 = vweird.f32 %v25386_v17  ;;  %v21068_v25 = vld [vmem:[#allocation8 + $0xc] sm:$0xf0] }
 0x5ea   : > { %v8775_v36 = vmul.f32 %v21814_v9, %v8774_v61  ;;  %v8714_v24 = vmul.f32 1.442695, %v8700_v48  ;;  %17691 = vmatmul.msk.f32.vlgmr.msra.gmra.mxu0 %vm8669_vm1, %v8756_v53  ;;  %v8712_v6 = vmul.f32 1.442695, %v8699_v44  ;;  %v8730_v7 = vsel %vm8669_vm1, %v25391_v47, 0.0 }
 0x5eb   : > { %v8760_v45 = vmul.f32 %v21816_v13, %v8759_v58  ;;  %8731 = vadd.xlane.f32.xlu0 %v8730_v7  ;;  %vm8797_vm3 = vcmp.eq.f32.partialorder %v8796_v42, 8.507059e+37  ;;  %9269 = vmatpush.bf16.msra.mxu0 %v17750_v63  ;;  %v17754_v20 = vor.u32 %v21078_v14, %v17751_v16  ;;  %v21074_v61 = vld [vmem:[#allocation8 + $0x44] sm:$0xf]  ;;  %v17702_v2 = vor.u32 %v21068_v25, %v17701_v22  ;;  %v17735_v53 = vld [vmem:[#allocation8 + $0x50] sm:$0xf0] }
 0x5ec   : > { %v8776_v12 = vadd.f32 %v21814_v9, %v8775_v36  ;;  %21821 = vpow2.f32 %v8714_v24  ;;  %v21077_v58 = vld [vmem:[#allocation8 + $0x54] sm:$0xf0]  ;;  %v17738_v48 = vor.u32 %v21074_v61, %v17735_v53  ;;  %v17719_v44 = vld [vmem:[#allocation8 + $0x30] sm:$0xf0]  ;;  %v17711_v42 = vld [vmem:[#allocation8 + $0x18] sm:$0xf0]  ;;  %v17818_v16 = vor.u32 %v21096_v62, %v17817_v60 }
 0x5ed   : > { %v21820_v26 = vpop.eup %21819  ;;  %v8761_v28 = vadd.f32 %v21816_v13, %v8760_v45  ;;  %21823 = vpow2.f32 %v8712_v6  ;;  %v17742_v36 = vor.u32 %v21077_v58, %v17741_v11  ;;  %v17725_v45 = vld [vmem:[#allocation8 + $0x28] sm:$0xf]  ;;  %v17722_v46 = vor.u32 %v21070_v30, %v17719_v44  ;;  %v21073_v24 = vld [vmem:[#allocation8 + $0x34] sm:$0xf0]  ;;  %v17759_v6 = vld [vmem:[#allocation8 + $0x78] sm:$0xf0] }
 0x5ee   : > { %v8780_v32 = vsel %vm8779_vm10, %v21814_v9, %v8776_v12  ;;  %v8788_v23 = vmul.f32 %v21820_v26, %v25386_v17  ;;  %vm8793_vm14 = vweird.f32 %v21820_v26  ;;  %v17734_v9 = vor.u32 %v21076_v5, %v17733_v3  ;;  %v17757_v17 = vld [vmem:[#allocation8 + $0x68] sm:$0xf]  ;;  %v21079_v12 = vld [vmem:[#allocation8 + $0x6c] sm:$0xf]  ;;  %v17785_v22 = vld [vmem:[#allocation8 + $0xa0] sm:$0xf] }
 0x5ef   : > { %v8785_v8 = vsel %vm8782_vm11, %v8784_v19, %v8780_v32  ;;  %v8765_v56 = vsel %vm8764_vm12, %v21816_v13, %v8761_v28  ;;  %v8693_v39 = vpop.xlane.xlu2 %8692  ;;  %vm8794_vm2 = vmor %vm8792_vm15, %vm8793_vm14  ;;  %v21072_v13 = vld [vmem:[#allocation8 + $0x2c] sm:$0xf0]  ;;  %v17758_v21 = vor.u32 %v21081_v18, %v17757_v17  ;;  %v17726_v7 = vor.u32 %v21073_v24, %v17725_v45  ;;  %v21066_v28 = vld [vmem:[#allocation8 + $0x4] sm:$0xf] }
 0x5f0   : > { %v8786_v41 = vmul.f32 %v25364_v37, %v8785_v8  ;;  %v8770_v31 = vsel %vm8767_vm13, %v8769_v40, %v8765_v56  ;;  %v8789_v33 = vsub.f32 1.0, %v8788_v23  ;;  %v8701_v27 = vsub.f32 %v25382_v43, %v8693_v39  ;;  %9270 = vmatpush.bf16.msra.mxu0 %v17734_v9  ;;  %v17703_v32 = vld [vmem:[#allocation8 + $0x10] sm:$0xf0]  ;;  %v17709_v40 = vld [vmem:[#allocation8 + $0x8] sm:$0xf] }
 0x5f1   : > { %v8771_v34 = vmul.f32 %v25366_v29, %v8770_v31  ;;  %v8799_v43 = vor.u32 1.1754944e-38, %v8798_v35  ;;  %v21069_v23 = vld [vmem:[#allocation8 + $0x14] sm:$0xf0]  ;;  %v17706_v8 = vor.u32 %v21066_v28, %v17703_v32  ;;  %v21075_v39 = vld [vmem:[#allocation8 + $0x4c] sm:$0xf] }
 0x5f2   : > { %v8790_v38 = vmul.f32 %v21820_v26, %v8789_v33  ;;  %v8716_v4 = vmul.f32 1.442695, %v8701_v27  ;;  %17693 = vmatmul.msk.f32.vlgmr.msra.gmra.mxu2 %vm8669_vm1, %v8786_v41  ;;  %v25405_v49 = vpop.eup %21821  ;;  %v17710_v56 = vor.u32 %v21069_v23, %v17709_v40  ;;  %v17743_v41 = vld [vmem:[#allocation8 + $0x58] sm:$0xf0]  ;;  %v21071_v33 = vld [vmem:[#allocation8 + $0x2c] sm:$0xf] }
 0x5f3   : > { %17692 = vmatmul.msk.f32.vlgmr.msra.gmra.mxu1 %vm8669_vm1, %v8771_v34  ;;  %v25408_v37 = vpop.eup %21823  ;;  %v8736_v29 = vsel %vm8669_vm1, %v25405_v49, 0.0  ;;  %9295 = vmatpush.bf16.msra.mxu2 %v17758_v21  ;;  %v17746_v31 = vor.u32 %v21075_v39, %v17743_v41  ;;  %v17727_v27 = vld [vmem:[#allocation8 + $0x38] sm:$0xf0]  ;;  %v21067_v35 = vld [vmem:[#allocation8 + $0xc] sm:$0xf] }
 0x5f4   : > { %v8791_v57 = vadd.f32 %v21820_v26, %v8790_v38  ;;  %21825 = vpow2.f32 %v8716_v4  ;;  %8737 = vadd.xlane.f32.xlu2 %v8736_v29  ;;  %v8733_v50 = vsel %vm8669_vm1, %v25408_v37, 0.0  ;;  %9282 = vmatpush.bf16.msra.mxu1 %v17754_v20  ;;  %v17730_v34 = vor.u32 %v21071_v33, %v17727_v27  ;;  %v17801_v17 = vld [vmem:[#allocation8 + $0xc0] sm:$0xf]  ;;  %v21092_v18 = vld [vmem:[#allocation8 + $0xcc] sm:$0xf0] }
 0x5f5   : > { %8734 = vadd.xlane.f32.xlu1 %v8733_v50  ;;  %v21088_v25 = vld [vmem:[#allocation8 + $0xac] sm:$0xf0]  ;;  %v21094_v53 = vld [vmem:[#allocation8 + $0xe4] sm:$0xf]  ;;  %v17819_v11 = vld [vmem:[#allocation8 + $0xf0] sm:$0xf0]  ;;  %v17802_v44 = vor.u32 %v21092_v18, %v17801_v17 }
 0x5f6   : > { %v8795_v51 = vsel %vm8794_vm2, %v21820_v26, %v8791_v57  ;;  %v17762_v26 = vor.u32 %v21079_v12, %v17759_v6  ;;  %v17825_v45 = vld [vmem:[#allocation8 + $0xe8] sm:$0xf]  ;;  %v17786_v6 = vor.u32 %v21088_v25, %v17785_v22  ;;  %v21084_v33 = vld [vmem:[#allocation8 + $0x8c] sm:$0xf0]  ;;  %v17827_v60 = vld [vmem:[#allocation8 + $0xf8] sm:$0xf0] }
 0x5f7   : > { %v8800_v52 = vsel %vm8797_vm3, %v8799_v43, %v8795_v51  ;;  %9296 = vmatpush.bf16.msra.mxu2 %v17742_v36  ;;  %v17714_v43 = vor.u32 %v21067_v35, %v17711_v42  ;;  %v21090_v42 = vld [vmem:[#allocation8 + $0xc4] sm:$0xf]  ;;  %v17869_v18 = vld [vmem:[#allocation8 + $0x140] sm:$0xf]  ;;  %v21091_v22 = vld [vmem:[#allocation8 + $0xcc] sm:$0xf] }
 0x5f8   : > { %v8801_v54 = vmul.f32 %v25375_v15, %v8800_v52  ;;  %v17718_v15 = vor.u32 %v21072_v13, %v17717_v10  ;;  %9283 = vmatpush.bf16.msra.mxu1 %v17738_v48  ;;  %v17811_v25 = vld [vmem:[#allocation8 + $0xd8] sm:$0xf0] }
 0x5fa   : > { %v25416_v55 = vpop.eup %21825  ;;  %17694 = vmatmul.msk.f32.vlgmr.msra.gmra.mxu3 %vm8669_vm1, %v8801_v54  ;;  %9271 = vmatpush.bf16.msra.mxu0 %v17718_v15 }
 0x5fb   : > { %v8739_v59 = vsel %vm8669_vm1, %v25416_v55, 0.0  ;;  %9297 = vmatpush.bf16.msra.mxu2 %v17726_v7  ;;  %9308 = vmatpush.bf16.msra.mxu3 %v17762_v26  ;;  %v17822_v7 = vor.u32 %v21094_v53, %v17819_v11  ;;  %v21082_v53 = vld [vmem:[#allocation8 + $0x84] sm:$0xf]  ;;  %v17771_v11 = vld [vmem:[#allocation8 + $0x90] sm:$0xf0] }
 0x5fc   : > { %8740 = vadd.xlane.f32.xlu0 %v8739_v59  ;;  %9284 = vmatpush.bf16.msra.mxu1 %v17722_v46  ;;  %v21097_v46 = vld [vmem:[#allocation8 + $0xf4] sm:$0xf0] }
 0x5fe   : > { %9272 = vmatpush.bf16.msra.mxu0 %v17702_v2 }
 0x5ff   : > { %9298 = vmatpush.bf16.msra.mxu2 %v17710_v56  ;;  %9309 = vmatpush.bf16.msra.mxu3 %v17746_v31  ;;  %v17769_v31 = vld [vmem:[#allocation8 + $0x80] sm:$0xf] }
 0x600   : > { %9285 = vmatpush.bf16.msra.mxu1 %v17706_v8  ;;  %v17826_v8 = vor.u32 %v21097_v46, %v17825_v45  ;;  %v17795_v45 = vld [vmem:[#allocation8 + $0xb8] sm:$0xf0]  ;;  %v21110_v46 = vld [vmem:[#allocation8 + $0x164] sm:$0xf] }
 0x603   : > { %9310 = vmatpush.bf16.msra.mxu3 %v17730_v34 }
 0x607   : > { %9311 = vmatpush.bf16.msra.mxu3 %v17714_v43 }
 0x65e   : > { %v8732_v19 = vpop.xlane.xlu0 %8731 }
 0x65f   : > { %21827 = vrcp.f32 %v8732_v19  ;;  %v8813_v51 = vand.u32 2147483648, %v8732_v19  ;;  %v8811_v54 = vand.u32 2147483647, %v8732_v19  ;;  %vm8807_vm5 = vweird.f32 %v8732_v19 }
 0x661   : > { %v8814_v3 = vor.u32 1.1754944e-38, %v8813_v51  ;;  %vm8812_vm7 = vcmp.eq.f32.partialorder %v8811_v54, 8.507059e+37  ;;  %v21093_v51 = vld [vmem:[#allocation8 + $0xd4] sm:$0xf0] }
 0x665   : > { %v21828_v38 = vpop.eup %21827 }
 0x666   : > { %v8803_v4 = vmul.f32 %v21828_v38, %v8732_v19  ;;  %vm8808_vm4 = vweird.f32 %v21828_v38 }
 0x667   : > { %v25421_v57 = vpop.xlane.xlu2 %8737  ;;  %vm8809_vm6 = vmor %vm8807_vm5, %vm8808_vm4  ;;  %v8882_v28 = vpop.f32.mrf.mxu0 }
 0x668   : > { %v25423_v29 = vpop.xlane.xlu1 %8734  ;;  %21829 = vrcp.f32 %v25421_v57  ;;  %v8804_v50 = vsub.f32 1.0, %v8803_v4  ;;  %v8843_v2 = vand.u32 2147483648, %v25421_v57  ;;  %v8841_v36 = vand.u32 2147483647, %v25421_v57  ;;  %v17803_v4 = vld [vmem:[#allocation8 + $0xd0] sm:$0xf0] }
 0x669   : > { %21831 = vrcp.f32 %v25423_v29  ;;  %v8828_v58 = vand.u32 2147483648, %v25423_v29  ;;  %vm8837_vm10 = vweird.f32 %v25421_v57  ;;  %vm8822_vm11 = vweird.f32 %v25423_v29 }
 0x66a   : > { %v8805_v52 = vmul.f32 %v21828_v38, %v8804_v50  ;;  %v8844_v19 = vor.u32 1.1754944e-38, %v8843_v2  ;;  %vm8842_vm14 = vcmp.eq.f32.partialorder %v8841_v36, 8.507059e+37  ;;  %v25444_v35 = vpack.c.bf16 %v8882_v28, %v8882_v28  ;;  %v17809_v50 = vld [vmem:[#allocation8 + $0xc8] sm:$0xf] }
 0x66b   : > { %v8829_v40 = vor.u32 1.1754944e-38, %v8828_v58  ;;  %v17777_v58 = vld [vmem:[#allocation8 + $0x88] sm:$0xf] }
 0x66c   : > { %v8806_v59 = vadd.f32 %v21828_v38, %v8805_v52  ;;  %v21112_v52 = vld [vmem:[#allocation8 + $0x16c] sm:$0xf0] }
 0x66e   : > { %v21830_v63 = vpop.eup %21829  ;;  %v8810_v10 = vsel %vm8809_vm6, %v21828_v38, %v8806_v59  ;;  %v21095_v59 = vld [vmem:[#allocation8 + $0xec] sm:$0xf] }
 0x66f   : > { %v25427_v5 = vpop.xlane.xlu0 %8740  ;;  %v21832_v9 = vpop.eup %21831  ;;  %v8833_v13 = vmul.f32 %v21830_v63, %v25421_v57  ;;  %v8815_v14 = vsel %vm8812_vm7, %v8814_v3, %v8810_v10  ;;  %vm8838_vm8 = vweird.f32 %v21830_v63  ;;  %v17810_v3 = vor.u32 %v21093_v51, %v17809_v50  ;;  %v17787_v10 = vld [vmem:[#allocation8 + $0xb0] sm:$0xf0] }
 0x670   : > { %21833 = vrcp.f32 %v25427_v5  ;;  %v8818_v15 = vmul.f32 %v21832_v9, %v25423_v29  ;;  %v8816_v20 = vmul.f32 %v25391_v47, %v8815_v14  ;;  %vm8823_vm9 = vweird.f32 %v21832_v9  ;;  %vm8839_vm12 = vmor %vm8837_vm10, %vm8838_vm8  ;;  %v17793_v14 = vld [vmem:[#allocation8 + $0xa8] sm:$0xf] }
 0x671   : > { %v8834_v21 = vsub.f32 1.0, %v8833_v13  ;;  %v8826_v47 = vand.u32 2147483647, %v25423_v29  ;;  %vm8824_vm13 = vmor %vm8822_vm11, %vm8823_vm9  ;;  %v8858_v38 = vand.u32 2147483648, %v25427_v5  ;;  %v8856_v43 = vand.u32 2147483647, %v25427_v5 }
 0x672   : > { %v8819_v61 = vsub.f32 1.0, %v8818_v15  ;;  %17695 = vmatmul.msk.f32.vlgmr.msrb.gmra.mxu0 %vm8669_vm1, %v8816_v20  ;;  %vm8852_vm3 = vweird.f32 %v25427_v5  ;;  %v21089_v15 = vld [vmem:[#allocation8 + $0xb4] sm:$0xf0]  ;;  %v17830_v17 = vor.u32 %v21095_v59, %v17827_v60  ;;  %v21108_v20 = vld [vmem:[#allocation8 + $0x14c] sm:$0xf0] }
 0x673   : > { %v8835_v48 = vmul.f32 %v21830_v63, %v8834_v21  ;;  %9404 = vmatpush.bf16.msrb.mxu0 %v17818_v16  ;;  %vm8827_vm15 = vcmp.eq.f32.partialorder %v8826_v47, 8.507059e+37  ;;  %v8859_v62 = vor.u32 1.1754944e-38, %v8858_v38  ;;  %vm8857_vm5 = vcmp.eq.f32.partialorder %v8856_v43, 8.507059e+37  ;;  %v21104_v47 = vld [vmem:[#allocation8 + $0x12c] sm:$0xf0] }
 0x674   : > { %v8820_v30 = vmul.f32 %v21832_v9, %v8819_v61  ;;  %v17794_v2 = vor.u32 %v21089_v15, %v17793_v14  ;;  %v17870_v36 = vor.u32 %v21108_v20, %v17869_v18  ;;  %v17871_v38 = vld [vmem:[#allocation8 + $0x150] sm:$0xf0]  ;;  %v17895_v43 = vld [vmem:[#allocation8 + $0x178] sm:$0xf0]  ;;  %v21102_v59 = vld [vmem:[#allocation8 + $0x124] sm:$0xf] }
 0x675   : > { %v8836_v12 = vadd.f32 %v21830_v63, %v8835_v48  ;;  %v21085_v48 = vld [vmem:[#allocation8 + $0x94] sm:$0xf0]  ;;  %v17861_v60 = vld [vmem:[#allocation8 + $0x128] sm:$0xf]  ;;  %v17921_v14 = vld [vmem:[#allocation8 + $0x1a0] sm:$0xf] }
 0x676   : > { %v21834_v24 = vpop.eup %21833  ;;  %v8821_v26 = vadd.f32 %v21832_v9, %v8820_v30  ;;  %v17853_v30 = vld [vmem:[#allocation8 + $0x120] sm:$0xf]  ;;  %v21120_v15 = vld [vmem:[#allocation8 + $0x1ac] sm:$0xf0]  ;;  %v21101_v18 = vld [vmem:[#allocation8 + $0x114] sm:$0xf0] }
 0x677   : > { %v8848_v32 = vmul.f32 %v21834_v24, %v25427_v5  ;;  %v8840_v23 = vsel %vm8839_vm12, %v21830_v63, %v8836_v12  ;;  %9405 = vmatpush.bf16.msrb.mxu0 %v17802_v44  ;;  %vm8853_vm2 = vweird.f32 %v21834_v24  ;;  %v17806_v63 = vor.u32 %v21090_v42, %v17803_v4  ;;  %v21087_v44 = vld [vmem:[#allocation8 + $0xac] sm:$0xf]  ;;  %v17877_v42 = vld [vmem:[#allocation8 + $0x148] sm:$0xf]  ;;  %v21109_v4 = vld [vmem:[#allocation8 + $0x154] sm:$0xf0] }
 0x678   : > { %v8825_v56 = vsel %vm8824_vm13, %v21832_v9, %v8821_v26  ;;  %v8845_v39 = vsel %vm8842_vm14, %v8844_v19, %v8840_v23  ;;  %vm8854_vm4 = vmor %vm8852_vm3, %vm8853_vm2  ;;  %v21086_v9 = vld [vmem:[#allocation8 + $0xa4] sm:$0xf]  ;;  %v17778_v12 = vor.u32 %v21085_v48, %v17777_v58  ;;  %v21113_v26 = vld [vmem:[#allocation8 + $0x174] sm:$0xf0]  ;;  %v8905_v19 = vpop.f32.mrf.mxu1  ;;  %v17854_v28 = vor.u32 %v21104_v47, %v17853_v30 }
 0x679   : > { %v8849_v41 = vsub.f32 1.0, %v8848_v32  ;;  %v8830_v27 = vsel %vm8827_vm15, %v8829_v40, %v8825_v56  ;;  %v8846_v34 = vmul.f32 %v25405_v49, %v8845_v39  ;;  %v17885_v49 = vld [vmem:[#allocation8 + $0x160] sm:$0xf]  ;;  %v17790_v61 = vor.u32 %v21086_v9, %v17787_v10  ;;  %v21083_v32 = vld [vmem:[#allocation8 + $0x8c] sm:$0xf] }
 0x67a   : > { %v8831_v57 = vmul.f32 %v25408_v37, %v8830_v27  ;;  %17763 = vmatmul.msk.bf16.vlgmr.msra.gmra.mxu0 %vm8460_vm0, %v25444_v35  ;;  %v17770_v37 = vor.u32 %v21084_v33, %v17769_v31  ;;  %v17886_v5 = vor.u32 %v21112_v52, %v17885_v49  ;;  %v17798_v40 = vor.u32 %v21087_v44, %v17795_v45  ;;  %v17779_v23 = vld [vmem:[#allocation8 + $0x98] sm:$0xf0]  ;;  %v21100_v56 = vld [vmem:[#allocation8 + $0x10c] sm:$0xf0]  ;;  %v21106_v31 = vld [vmem:[#allocation8 + $0x144] sm:$0xf]  ;;  %v8928_v44 = vpop.f32.mrf.mxu2 }
 0x67b   : > { %v8850_v29 = vmul.f32 %v21834_v24, %v8849_v41  ;;  %17697 = vmatmul.msk.f32.vlgmr.msrb.gmra.mxu2 %vm8669_vm1, %v8846_v34  ;;  %9406 = vmatpush.bf16.msrb.mxu0 %v17786_v6  ;;  %v17887_v6 = vld [vmem:[#allocation8 + $0x170] sm:$0xf0]  ;;  %v17953_v33 = vld [vmem:[#allocation8 + $0x1e0] sm:$0xf]  ;;  %v21128_v27 = vld [vmem:[#allocation8 + $0x1ec] sm:$0xf0]  ;;  %v25461_v34 = vpack.c.bf16 %v8905_v19, %v8905_v19  ;;  %v17782_v50 = vor.u32 %v21083_v32, %v17779_v23 }
 0x67c   : > { %17696 = vmatmul.msk.f32.vlgmr.msrb.gmra.mxu1 %vm8669_vm1, %v8831_v57  ;;  %9430 = vmatpush.bf16.msrb.mxu2 %v17826_v8  ;;  %v17837_v8 = vld [vmem:[#allocation8 + $0x100] sm:$0xf]  ;;  %v17890_v39 = vor.u32 %v21110_v46, %v17887_v6  ;;  %v17954_v51 = vor.u32 %v21128_v27, %v17953_v33  ;;  %v17874_v49 = vor.u32 %v21106_v31, %v17871_v38  ;;  %v17879_v9 = vld [vmem:[#allocation8 + $0x158] sm:$0xf0]  ;;  %v17961_v58 = vld [vmem:[#allocation8 + $0x1e8] sm:$0xf] }
 0x67d   : > { %v8851_v54 = vadd.f32 %v21834_v24, %v8850_v29  ;;  %9417 = vmatpush.bf16.msrb.mxu1 %v17822_v7  ;;  %v17893_v7 = vld [vmem:[#allocation8 + $0x168] sm:$0xf]  ;;  %v17838_v57 = vor.u32 %v21100_v56, %v17837_v8  ;;  %v21111_v29 = vld [vmem:[#allocation8 + $0x16c] sm:$0xf]  ;;  %v17878_v52 = vor.u32 %v21109_v4, %v17877_v42  ;;  %v21129_v48 = vld [vmem:[#allocation8 + $0x1f4] sm:$0xf0]  ;;  %v25471_v23 = vpack.c.bf16 %v8928_v44, %v8928_v44 }
 0x67e   : > { %v17894_v41 = vor.u32 %v21113_v26, %v17893_v7  ;;  %v17905_v30 = vld [vmem:[#allocation8 + $0x180] sm:$0xf]  ;;  %v21116_v47 = vld [vmem:[#allocation8 + $0x18c] sm:$0xf0]  ;;  %v21099_v46 = vld [vmem:[#allocation8 + $0x10c] sm:$0xf]  ;;  %v17962_v6 = vor.u32 %v21129_v48, %v17961_v58  ;;  %v8951_v58 = vpop.f32.mrf.mxu3 }
 0x67f   : > { %v8855_v13 = vsel %vm8854_vm4, %v21834_v24, %v8851_v54  ;;  %9407 = vmatpush.bf16.msrb.mxu0 %v17770_v37  ;;  %v17774_v24 = vor.u32 %v21082_v53, %v17771_v11  ;;  %v17937_v54 = vld [vmem:[#allocation8 + $0x1c0] sm:$0xf]  ;;  %v21124_v37 = vld [vmem:[#allocation8 + $0x1cc] sm:$0xf0]  ;;  %v17955_v53 = vld [vmem:[#allocation8 + $0x1f0] sm:$0xf0] }
 0x680   : > { %v8860_v16 = vsel %vm8857_vm5, %v8859_v62, %v8855_v13  ;;  %9431 = vmatpush.bf16.msrb.mxu2 %v17810_v3  ;;  %v21105_v62 = vld [vmem:[#allocation8 + $0x134] sm:$0xf0]  ;;  %v21107_v3 = vld [vmem:[#allocation8 + $0x14c] sm:$0xf]  ;;  %v17938_v10 = vor.u32 %v21124_v37, %v17937_v54  ;;  %v17939_v7 = vld [vmem:[#allocation8 + $0x1d0] sm:$0xf0] }
 0x681   : > { %v8861_v21 = vmul.f32 %v25416_v55, %v8860_v16  ;;  %9418 = vmatpush.bf16.msrb.mxu1 %v17806_v63  ;;  %v17814_v55 = vor.u32 %v21091_v22, %v17811_v25  ;;  %v17855_v63 = vld [vmem:[#allocation8 + $0x130] sm:$0xf0]  ;;  %v17862_v13 = vor.u32 %v21105_v62, %v17861_v60  ;;  %v21098_v16 = vld [vmem:[#allocation8 + $0x104] sm:$0xf]  ;;  %v17882_v20 = vor.u32 %v21107_v3, %v17879_v9  ;;  %v21103_v22 = vld [vmem:[#allocation8 + $0x12c] sm:$0xf] }
 0x682   : > { %v17863_v25 = vld [vmem:[#allocation8 + $0x138] sm:$0xf0]  ;;  %v21127_v26 = vld [vmem:[#allocation8 + $0x1ec] sm:$0xf]  ;;  %v17945_v32 = vld [vmem:[#allocation8 + $0x1c8] sm:$0xf] }
 0x683   : > { %17698 = vmatmul.msk.f32.vlgmr.msrb.gmra.mxu3 %vm8669_vm1, %v8861_v21  ;;  %9539 = vmatpush.bf16.msra.mxu0 %v17886_v5  ;;  %v17858_v5 = vor.u32 %v21102_v59, %v17855_v63  ;;  %v17839_v21 = vld [vmem:[#allocation8 + $0x110] sm:$0xf0]  ;;  %v17963_v19 = vld [vmem:[#allocation8 + $0x1f8] sm:$0xf0]  ;;  %v18021_v33 = vld [vmem:[#allocation8 + $0x260] sm:$0xf] }
 0x684   : > { %17765 = vmatmul.msk.bf16.vlgmr.msra.gmra.mxu2 %vm8460_vm0, %v25444_v35  ;;  %9443 = vmatpush.bf16.msrb.mxu3 %v17830_v17  ;;  %v17845_v17 = vld [vmem:[#allocation8 + $0x108] sm:$0xf]  ;;  %v17966_v31 = vor.u32 %v21127_v26, %v17963_v19  ;;  %v21123_v38 = vld [vmem:[#allocation8 + $0x1cc] sm:$0xf]  ;;  %v17947_v42 = vld [vmem:[#allocation8 + $0x1d8] sm:$0xf0] }
 0x685   : > { %17764 = vmatmul.msk.bf16.vlgmr.msra.gmra.mxu1 %vm8460_vm0, %v25444_v35  ;;  %9432 = vmatpush.bf16.msrb.mxu2 %v17794_v2  ;;  %v21126_v2 = vld [vmem:[#allocation8 + $0x1e4] sm:$0xf]  ;;  %v17846_v11 = vor.u32 %v21101_v18, %v17845_v17  ;;  %v21144_v4 = vld [vmem:[#allocation8 + $0x26c] sm:$0xf0]  ;;  %v17950_v54 = vor.u32 %v21123_v38, %v17947_v42  ;;  %v21119_v37 = vld [vmem:[#allocation8 + $0x1ac] sm:$0xf] }
 0x686   : > { %9419 = vmatpush.bf16.msrb.mxu1 %v17790_v61  ;;  %v17922_v61 = vor.u32 %v21120_v15, %v17921_v14  ;;  %v17958_v45 = vor.u32 %v21126_v2, %v17955_v53  ;;  %v17931_v59 = vld [vmem:[#allocation8 + $0x1b8] sm:$0xf0]  ;;  %v21142_v60 = vld [vmem:[#allocation8 + $0x264] sm:$0xf]  ;;  %v18023_v63 = vld [vmem:[#allocation8 + $0x270] sm:$0xf0] }
 0x687   : > { %9540 = vmatpush.bf16.msra.mxu0 %v17870_v36  ;;  %v17842_v36 = vor.u32 %v21098_v16, %v17839_v21  ;;  %v17989_v3 = vld [vmem:[#allocation8 + $0x220] sm:$0xf]  ;;  %v21136_v9 = vld [vmem:[#allocation8 + $0x22c] sm:$0xf0]  ;;  %v17934_v15 = vor.u32 %v21119_v37, %v17931_v59  ;;  %v21145_v16 = vld [vmem:[#allocation8 + $0x274] sm:$0xf0]  ;;  %v18026_v17 = vor.u32 %v21142_v60, %v18023_v63 }
 0x688   : > { %9444 = vmatpush.bf16.msrb.mxu3 %v17814_v55  ;;  %v17866_v55 = vor.u32 %v21103_v22, %v17863_v25  ;;  %v17990_v18 = vor.u32 %v21136_v9, %v17989_v3  ;;  %v21115_v21 = vld [vmem:[#allocation8 + $0x18c] sm:$0xf]  ;;  %v17915_v22 = vld [vmem:[#allocation8 + $0x198] sm:$0xf0]  ;;  %v21138_v53 = vld [vmem:[#allocation8 + $0x244] sm:$0xf] }
 0x689   : > { %9433 = vmatpush.bf16.msrb.mxu2 %v17778_v12  ;;  %v21122_v12 = vld [vmem:[#allocation8 + $0x1c4] sm:$0xf]  ;;  %v21143_v25 = vld [vmem:[#allocation8 + $0x26c] sm:$0xf]  ;;  %v18031_v2 = vld [vmem:[#allocation8 + $0x278] sm:$0xf0] }
 0x68a   : > { %9420 = vmatpush.bf16.msrb.mxu1 %v17774_v24  ;;  %17831 = vmatmul.msk.bf16.vlgmr.msrb.gmra.mxu0 %vm8460_vm0, %v25461_v34  ;;  %v17847_v24 = vld [vmem:[#allocation8 + $0x118] sm:$0xf0]  ;;  %v17942_v56 = vor.u32 %v21122_v12, %v17939_v7  ;;  %v18013_v48 = vld [vmem:[#allocation8 + $0x248] sm:$0xf]  ;;  %v21139_v44 = vld [vmem:[#allocation8 + $0x24c] sm:$0xf] }
 0x68b   : > { %17766 = vmatmul.msk.bf16.vlgmr.msra.gmra.mxu3 %vm8460_vm0, %v25444_v35  ;;  %9541 = vmatpush.bf16.msra.mxu0 %v17854_v28  ;;  %v17898_v35 = vor.u32 %v21111_v29, %v17895_v43  ;;  %v17906_v28 = vor.u32 %v21116_v47, %v17905_v30  ;;  %v17850_v8 = vor.u32 %v21099_v46, %v17847_v24  ;;  %v21121_v43 = vld [vmem:[#allocation8 + $0x1b4] sm:$0xf0]  ;;  %v18015_v24 = vld [vmem:[#allocation8 + $0x258] sm:$0xf0]  ;;  %v21134_v12 = vld [vmem:[#allocation8 + $0x224] sm:$0xf] }
 0x68c   : > { %9445 = vmatpush.bf16.msrb.mxu3 %v17798_v40  ;;  %v21125_v40 = vld [vmem:[#allocation8 + $0x1d4] sm:$0xf0]  ;;  %v18022_v29 = vor.u32 %v21144_v4, %v18021_v33  ;;  %v18034_v30 = vor.u32 %v21143_v25, %v18031_v2  ;;  %v17997_v7 = vld [vmem:[#allocation8 + $0x228] sm:$0xf]  ;;  %v18018_v19 = vor.u32 %v21139_v44, %v18015_v24  ;;  %v21132_v33 = vld [vmem:[#allocation8 + $0x20c] sm:$0xf0] }
 0x68d   : > { %9565 = vmatpush.bf16.msra.mxu2 %v17894_v41  ;;  %v17923_v41 = vld [vmem:[#allocation8 + $0x1b0] sm:$0xf0]  ;;  %v17946_v27 = vor.u32 %v21125_v40, %v17945_v32  ;;  %v21137_v26 = vld [vmem:[#allocation8 + $0x234] sm:$0xf0]  ;;  %v21135_v40 = vld [vmem:[#allocation8 + $0x22c] sm:$0xf] }
 0x68e   : > { %9552 = vmatpush.bf16.msra.mxu1 %v17890_v39  ;;  %v21118_v39 = vld [vmem:[#allocation8 + $0x1a4] sm:$0xf]  ;;  %v17998_v32 = vor.u32 %v21137_v26, %v17997_v7  ;;  %v17975_v42 = vld [vmem:[#allocation8 + $0x210] sm:$0xf0]  ;;  %v21131_v4 = vld [vmem:[#allocation8 + $0x20c] sm:$0xf] }
 0x68f   : > { %9542 = vmatpush.bf16.msra.mxu0 %v17838_v57  ;;  %v17929_v57 = vld [vmem:[#allocation8 + $0x1a8] sm:$0xf]  ;;  %v18091_v37 = vld [vmem:[#allocation8 + $0x2f0] sm:$0xf0]  ;;  %v21157_v9 = vld [vmem:[#allocation8 + $0x2d4] sm:$0xf0] }
 0x690   : > { %9446 = vmatpush.bf16.msrb.mxu3 %v17782_v50  ;;  %v21140_v50 = vld [vmem:[#allocation8 + $0x24c] sm:$0xf0]  ;;  %v18081_v63 = vld [vmem:[#allocation8 + $0x2c8] sm:$0xf]  ;;  %v21153_v25 = vld [vmem:[#allocation8 + $0x2b4] sm:$0xf0] }
 0x691   : > { %9566 = vmatpush.bf16.msra.mxu2 %v17878_v52  ;;  %v17907_v52 = vld [vmem:[#allocation8 + $0x190] sm:$0xf0]  ;;  %v18049_v44 = vld [vmem:[#allocation8 + $0x288] sm:$0xf] }
 0x692   : > { %9553 = vmatpush.bf16.msra.mxu1 %v17874_v49  ;;  %v21114_v49 = vld [vmem:[#allocation8 + $0x184] sm:$0xf]  ;;  %v18043_v7 = vld [vmem:[#allocation8 + $0x290] sm:$0xf0] }
 0x693   : > { %9674 = vmatpush.bf16.msrb.mxu0 %v17954_v51  ;;  %v17926_v51 = vor.u32 %v21118_v39, %v17923_v41  ;;  %v17910_v14 = vor.u32 %v21114_v49, %v17907_v52  ;;  %v21133_v39 = vld [vmem:[#allocation8 + $0x214] sm:$0xf0]  ;;  %v21160_v52 = vld [vmem:[#allocation8 + $0x2ec] sm:$0xf0] }
 0x694   : > { %9578 = vmatpush.bf16.msra.mxu3 %v17898_v35  ;;  %17833 = vmatmul.msk.bf16.vlgmr.msrb.gmra.mxu2 %vm8460_vm0, %v25461_v34  ;;  %v17930_v35 = vor.u32 %v21121_v43, %v17929_v57  ;;  %v17983_v57 = vld [vmem:[#allocation8 + $0x218] sm:$0xf0] }
 0x695   : > { %17832 = vmatmul.msk.bf16.vlgmr.msrb.gmra.mxu1 %vm8460_vm0, %v25461_v34  ;;  %9567 = vmatpush.bf16.msra.mxu2 %v17862_v13  ;;  %v21117_v13 = vld [vmem:[#allocation8 + $0x194] sm:$0xf0]  ;;  %v17986_v43 = vor.u32 %v21131_v4, %v17983_v57 }
 0x696   : > { %9554 = vmatpush.bf16.msra.mxu1 %v17858_v5  ;;  %v18029_v5 = vld [vmem:[#allocation8 + $0x268] sm:$0xf] }
 0x697   : > { %9675 = vmatpush.bf16.msrb.mxu0 %v17938_v10  ;;  %v17913_v10 = vld [vmem:[#allocation8 + $0x188] sm:$0xf] }
 0x698   : > { %9579 = vmatpush.bf16.msra.mxu3 %v17882_v20  ;;  %v17914_v20 = vor.u32 %v21117_v13, %v17913_v10  ;;  %v18082_v10 = vor.u32 %v21157_v9, %v18081_v63  ;;  %v18073_v13 = vld [vmem:[#allocation8 + $0x2c0] sm:$0xf]  ;;  %v21169_v63 = vld [vmem:[#allocation8 + $0x334] sm:$0xf0] }
 0x699   : > { %9568 = vmatpush.bf16.msra.mxu2 %v17846_v11  ;;  %v18007_v11 = vld [vmem:[#allocation8 + $0x250] sm:$0xf0] }
 0x69a   : > { %9555 = vmatpush.bf16.msra.mxu1 %v17842_v36  ;;  %17899 = vmatmul.msk.bf16.vlgmr.msra.gmra.mxu0 %vm8460_vm0, %v25471_v23  ;;  %v21141_v36 = vld [vmem:[#allocation8 + $0x254] sm:$0xf0]  ;;  %v18010_v47 = vor.u32 %v21138_v53, %v18007_v11  ;;  %v21152_v53 = vld [vmem:[#allocation8 + $0x2ac] sm:$0xf0]  ;;  %v21150_v11 = vld [vmem:[#allocation8 + $0x2a4] sm:$0xf] }
 0x69b   : > { %9676 = vmatpush.bf16.msrb.mxu0 %v17922_v61  ;;  %17834 = vmatmul.msk.bf16.vlgmr.msrb.gmra.mxu3 %vm8460_vm0, %v25461_v34  ;;  %v18005_v34 = vld [vmem:[#allocation8 + $0x240] sm:$0xf]  ;;  %v18030_v61 = vor.u32 %v21145_v16, %v18029_v5  ;;  %v18014_v46 = vor.u32 %v21141_v36, %v18013_v48  ;;  %v18075_v16 = vld [vmem:[#allocation8 + $0x2d0] sm:$0xf0] }
 0x69c   : > { %9580 = vmatpush.bf16.msra.mxu3 %v17866_v55  ;;  %v18006_v62 = vor.u32 %v21140_v50, %v18005_v34  ;;  %v17918_v55 = vor.u32 %v21115_v21, %v17915_v22  ;;  %v18097_v34 = vld [vmem:[#allocation8 + $0x2e8] sm:$0xf]  ;;  %v21161_v50 = vld [vmem:[#allocation8 + $0x2f4] sm:$0xf0] }
 0x69d   : > { %9700 = vmatpush.bf16.msrb.mxu2 %v17962_v6  ;;  %v17991_v6 = vld [vmem:[#allocation8 + $0x230] sm:$0xf0]  ;;  %v18098_v49 = vor.u32 %v21161_v50, %v18097_v34  ;;  %v18065_v22 = vld [vmem:[#allocation8 + $0x2a8] sm:$0xf] }
 0x69e   : > { %9687 = vmatpush.bf16.msrb.mxu1 %v17958_v45  ;;  %v9049_v45 = vpack.c.bf16 %v8951_v58, %v8951_v58  ;;  %v18066_v2 = vor.u32 %v21153_v25, %v18065_v22  ;;  %v18059_v58 = vld [vmem:[#allocation8 + $0x2b0] sm:$0xf0]  ;;  %v18117_v22 = vld [vmem:[#allocation8 + $0x308] sm:$0xf]  ;;  %v21165_v25 = vld [vmem:[#allocation8 + $0x314] sm:$0xf0] }
 0x69f   : > { %9677 = vmatpush.bf16.msrb.mxu0 %v17906_v28  ;;  %v17994_v28 = vor.u32 %v21134_v12, %v17991_v6  ;;  %v18062_v36 = vor.u32 %v21150_v11, %v18059_v58  ;;  %v21148_v12 = vld [vmem:[#allocation8 + $0x28c] sm:$0xf0]  ;;  %v21146_v6 = vld [vmem:[#allocation8 + $0x284] sm:$0xf] }
 0x6a0   : > { %9581 = vmatpush.bf16.msra.mxu3 %v17850_v8  ;;  %v17999_v8 = vld [vmem:[#allocation8 + $0x238] sm:$0xf0]  ;;  %v21164_v11 = vld [vmem:[#allocation8 + $0x30c] sm:$0xf0]  ;;  %v21162_v58 = vld [vmem:[#allocation8 + $0x304] sm:$0xf] }
 0x6a1   : > { %9701 = vmatpush.bf16.msrb.mxu2 %v17946_v27  ;;  %v18002_v41 = vor.u32 %v21135_v40, %v17999_v8  ;;  %v21130_v27 = vld [vmem:[#allocation8 + $0x204] sm:$0xf]  ;;  %v18165_v8 = vld [vmem:[#allocation8 + $0x368] sm:$0xf] }
 0x6a2   : > { %9688 = vmatpush.bf16.msrb.mxu1 %v17942_v56  ;;  %v17981_v56 = vld [vmem:[#allocation8 + $0x208] sm:$0xf] }
 0x6a3   : > { %9809 = vmatpush.bf16.msra.mxu0 %v18022_v29  ;;  %v17978_v29 = vor.u32 %v21130_v27, %v17975_v42  ;;  %v18167_v27 = vld [vmem:[#allocation8 + $0x378] sm:$0xf0] }
 0x6a4   : > { %9713 = vmatpush.bf16.msrb.mxu3 %v17966_v31  ;;  %17901 = vmatmul.msk.bf16.vlgmr.msra.gmra.mxu2 %vm8460_vm0, %v25471_v23  ;;  %v17973_v31 = vld [vmem:[#allocation8 + $0x200] sm:$0xf] }
 0x6a5   : > { %17900 = vmatmul.msk.bf16.vlgmr.msra.gmra.mxu1 %vm8460_vm0, %v25471_v23  ;;  %9702 = vmatpush.bf16.msrb.mxu2 %v17930_v35  ;;  %v17974_v38 = vor.u32 %v21132_v33, %v17973_v31  ;;  %v18099_v35 = vld [vmem:[#allocation8 + $0x2f8] sm:$0xf0]  ;;  %v18159_v31 = vld [vmem:[#allocation8 + $0x370] sm:$0xf0]  ;;  %v21175_v33 = vld [vmem:[#allocation8 + $0x36c] sm:$0xf] }
 0x6a6   : > { %9689 = vmatpush.bf16.msrb.mxu1 %v17926_v51  ;;  %v18089_v51 = vld [vmem:[#allocation8 + $0x2e0] sm:$0xf]  ;;  %v18170_v50 = vor.u32 %v21175_v33, %v18167_v27 }
 0x6a7   : > { %9810 = vmatpush.bf16.msra.mxu0 %v18006_v62  ;;  %v18090_v59 = vor.u32 %v21160_v52, %v18089_v51  ;;  %v21159_v62 = vld [vmem:[#allocation8 + $0x2ec] sm:$0xf]  ;;  %v18141_v51 = vld [vmem:[#allocation8 + $0x340] sm:$0xf]  ;;  %v21170_v52 = vld [vmem:[#allocation8 + $0x344] sm:$0xf] }
 0x6a8   : > { %9714 = vmatpush.bf16.msrb.mxu3 %v17950_v54  ;;  %v21158_v54 = vld [vmem:[#allocation8 + $0x2e4] sm:$0xf]  ;;  %v18102_v3 = vor.u32 %v21159_v62, %v18099_v35  ;;  %v18133_v35 = vld [vmem:[#allocation8 + $0x328] sm:$0xf] }
 0x6a9   : > { %9703 = vmatpush.bf16.msrb.mxu2 %v17914_v20  ;;  %v18094_v60 = vor.u32 %v21158_v54, %v18091_v37  ;;  %v18143_v54 = vld [vmem:[#allocation8 + $0x350] sm:$0xf0]  ;;  %v21171_v37 = vld [vmem:[#allocation8 + $0x34c] sm:$0xf] }
 0x6aa   : > { %9690 = vmatpush.bf16.msrb.mxu1 %v17910_v14  ;;  %17967 = vmatmul.msk.bf16.vlgmr.msrb.gmra.mxu0 %vm8460_vm0, %v9049_v45  ;;  %v21156_v14 = vld [vmem:[#allocation8 + $0x2cc] sm:$0xf0] }
 0x6ab   : > { %9811 = vmatpush.bf16.msra.mxu0 %v17990_v18  ;;  %17902 = vmatmul.msk.bf16.vlgmr.msra.gmra.mxu3 %vm8460_vm0, %v25471_v23  ;;  %v17982_v23 = vor.u32 %v21133_v39, %v17981_v56  ;;  %v18074_v5 = vor.u32 %v21156_v14, %v18073_v13  ;;  %v18083_v18 = vld [vmem:[#allocation8 + $0x2d8] sm:$0xf0]  ;;  %v21177_v56 = vld [vmem:[#allocation8 + $0x374] sm:$0xf0]  ;;  %v18157_v39 = vld [vmem:[#allocation8 + $0x360] sm:$0xf] }
 0x6ac   : > { %9715 = vmatpush.bf16.msrb.mxu3 %v17934_v15  ;;  %v21154_v15 = vld [vmem:[#allocation8 + $0x2c4] sm:$0xf]  ;;  %v18166_v4 = vor.u32 %v21177_v56, %v18165_v8  ;;  %v21168_v13 = vld [vmem:[#allocation8 + $0x32c] sm:$0xf0] }
 0x6ad   : > { %9835 = vmatpush.bf16.msra.mxu2 %v18030_v61  ;;  %v18078_v20 = vor.u32 %v21154_v15, %v18075_v16  ;;  %v18057_v61 = vld [vmem:[#allocation8 + $0x2a0] sm:$0xf]  ;;  %v21166_v14 = vld [vmem:[#allocation8 + $0x324] sm:$0xf]  ;;  %v18127_v15 = vld [vmem:[#allocation8 + $0x330] sm:$0xf0] }
 0x6ae   : > { %9822 = vmatpush.bf16.msra.mxu1 %v18026_v17  ;;  %v21155_v17 = vld [vmem:[#allocation8 + $0x2cc] sm:$0xf]  ;;  %v18058_v48 = vor.u32 %v21152_v53, %v18057_v61  ;;  %v18135_v16 = vld [vmem:[#allocation8 + $0x338] sm:$0xf0]  ;;  %v18130_v61 = vor.u32 %v21166_v14, %v18127_v15  ;;  %v18109_v53 = vld [vmem:[#allocation8 + $0x300] sm:$0xf] }
 0x6af   : > { %9812 = vmatpush.bf16.msra.mxu0 %v17974_v38  ;;  %v18086_v21 = vor.u32 %v21155_v17, %v18083_v18 }
 0x6b0   : > { %9716 = vmatpush.bf16.msrb.mxu3 %v17918_v55  ;;  %v21151_v55 = vld [vmem:[#allocation8 + $0x2ac] sm:$0xf] }
 0x6b1   : > { %9836 = vmatpush.bf16.msra.mxu2 %v18014_v46  ;;  %v18041_v46 = vld [vmem:[#allocation8 + $0x280] sm:$0xf] }
 0x6b2   : > { %9823 = vmatpush.bf16.msra.mxu1 %v18010_v47  ;;  %v18042_v26 = vor.u32 %v21148_v12, %v18041_v46 }
 0x6b3   : > { %9944 = vmatpush.bf16.msrb.mxu0 %v18090_v59  ;;  %v18151_v59 = vld [vmem:[#allocation8 + $0x358] sm:$0xf0] }
 0x6b4   : > { %9848 = vmatpush.bf16.msra.mxu3 %v18034_v30  ;;  %17969 = vmatmul.msk.bf16.vlgmr.msrb.gmra.mxu2 %vm8460_vm0, %v9049_v45  ;;  %v18067_v30 = vld [vmem:[#allocation8 + $0x2b8] sm:$0xf0]  ;;  %v18154_v9 = vor.u32 %v21171_v37, %v18151_v59 }
 0x6b5   : > { %9837 = vmatpush.bf16.msra.mxu2 %v17998_v32  ;;  %17968 = vmatmul.msk.bf16.vlgmr.msrb.gmra.mxu1 %vm8460_vm0, %v9049_v45  ;;  %v18070_v47 = vor.u32 %v21151_v55, %v18067_v30  ;;  %v18051_v32 = vld [vmem:[#allocation8 + $0x298] sm:$0xf0]  ;;  %v18118_v30 = vor.u32 %v21165_v25, %v18117_v22  ;;  %v18177_v22 = vld [vmem:[#allocation8 + $0x380] sm:$0xf]  ;;  %v21180_v25 = vld [vmem:[#allocation8 + $0x38c] sm:$0xf0] }
 0x6b6   : > { %9824 = vmatpush.bf16.msra.mxu1 %v17994_v28  ;;  %v21147_v28 = vld [vmem:[#allocation8 + $0x28c] sm:$0xf]  ;;  %v18119_v55 = vld [vmem:[#allocation8 + $0x318] sm:$0xf0] }
 0x6b7   : > { %9945 = vmatpush.bf16.msrb.mxu0 %v18074_v5  ;;  %v18054_v40 = vor.u32 %v21147_v28, %v18051_v32  ;;  %v21167_v5 = vld [vmem:[#allocation8 + $0x32c] sm:$0xf]  ;;  %v18235_v32 = vld [vmem:[#allocation8 + $0x3f8] sm:$0xf0] }
 0x6b8   : > { %9849 = vmatpush.bf16.msra.mxu3 %v18018_v19  ;;  %v18046_v19 = vor.u32 %v21146_v6, %v18043_v7  ;;  %v18225_v6 = vld [vmem:[#allocation8 + $0x3e0] sm:$0xf]  ;;  %v21192_v7 = vld [vmem:[#allocation8 + $0x3ec] sm:$0xf0]  ;;  %v21191_v28 = vld [vmem:[#allocation8 + $0x3ec] sm:$0xf] }
 0x6b9   : > { %9838 = vmatpush.bf16.msra.mxu2 %v17982_v23  ;;  %v21174_v23 = vld [vmem:[#allocation8 + $0x364] sm:$0xf]  ;;  %v18238_v27 = vor.u32 %v21191_v28, %v18235_v32 }
 0x6ba   : > { %9825 = vmatpush.bf16.msra.mxu1 %v17978_v29  ;;  %v18149_v29 = vld [vmem:[#allocation8 + $0x348] sm:$0xf]  ;;  %v18162_v34 = vor.u32 %v21174_v23, %v18159_v31  ;;  %v21189_v31 = vld [vmem:[#allocation8 + $0x3d4] sm:$0xf0] }
 0x6bb   : > { %17970 = vmatmul.msk.bf16.vlgmr.msrb.gmra.mxu3 %vm8460_vm0, %v9049_v45  ;;  %9946 = vmatpush.bf16.msrb.mxu0 %v18058_v48  ;;  %v21149_v45 = vld [vmem:[#allocation8 + $0x294] sm:$0xf0]  ;;  %v18111_v48 = vld [vmem:[#allocation8 + $0x310] sm:$0xf0]  ;;  %v18217_v23 = vld [vmem:[#allocation8 + $0x3c8] sm:$0xf] }
 0x6bc   : > { %9850 = vmatpush.bf16.msra.mxu3 %v18002_v41  ;;  %v18050_v24 = vor.u32 %v21149_v45, %v18049_v44  ;;  %v21176_v41 = vld [vmem:[#allocation8 + $0x36c] sm:$0xf0]  ;;  %v18233_v44 = vld [vmem:[#allocation8 + $0x3e8] sm:$0xf]  ;;  %v21193_v45 = vld [vmem:[#allocation8 + $0x3f4] sm:$0xf0] }
 0x6bd   : > { %9970 = vmatpush.bf16.msrb.mxu2 %v18098_v49  ;;  %v18158_v57 = vor.u32 %v21176_v41, %v18157_v39  ;;  %v21172_v49 = vld [vmem:[#allocation8 + $0x34c] sm:$0xf0]  ;;  %v18234_v39 = vor.u32 %v21193_v45, %v18233_v44  ;;  %v18226_v41 = vor.u32 %v21192_v7, %v18225_v6 }
 0x6be   : > { %9957 = vmatpush.bf16.msrb.mxu1 %v18094_v60  ;;  %v18142_v62 = vor.u32 %v21172_v49, %v18141_v51  ;;  %v18201_v49 = vld [vmem:[#allocation8 + $0x3a8] sm:$0xf] }
 0x6bf   : > { %9947 = vmatpush.bf16.msrb.mxu0 %v18042_v26  ;;  %v21190_v26 = vld [vmem:[#allocation8 + $0x3e4] sm:$0xf] }
 0x6c0   : > { %9851 = vmatpush.bf16.msra.mxu3 %v17986_v43  ;;  %v21173_v43 = vld [vmem:[#allocation8 + $0x354] sm:$0xf0] }
 0x6c1   : > { %9971 = vmatpush.bf16.msrb.mxu2 %v18082_v10  ;;  %v18150_v60 = vor.u32 %v21173_v43, %v18149_v29  ;;  %v18125_v10 = vld [vmem:[#allocation8 + $0x320] sm:$0xf]  ;;  %v21187_v29 = vld [vmem:[#allocation8 + $0x3cc] sm:$0xf]  ;;  %v18219_v43 = vld [vmem:[#allocation8 + $0x3d8] sm:$0xf0] }
 0x6c2   : > { %9958 = vmatpush.bf16.msrb.mxu1 %v18078_v20  ;;  %v18134_v20 = vor.u32 %v21169_v63, %v18133_v35  ;;  %v18222_v59 = vor.u32 %v21187_v29, %v18219_v43  ;;  %v21182_v35 = vld [vmem:[#allocation8 + $0x3a4] sm:$0xf]  ;;  %v18195_v63 = vld [vmem:[#allocation8 + $0x3b0] sm:$0xf0] }
 0x6c4   : > { %9983 = vmatpush.bf16.msrb.mxu3 %v18102_v3  ;;  %v18146_v3 = vor.u32 %v21170_v52, %v18143_v54  ;;  %v21185_v52 = vld [vmem:[#allocation8 + $0x3b4] sm:$0xf0] }
 0x6c5   : > { %9972 = vmatpush.bf16.msrb.mxu2 %v18066_v2  ;;  %v18138_v2 = vor.u32 %v21167_v5, %v18135_v16  ;;  %v18202_v15 = vor.u32 %v21185_v52, %v18201_v49  ;;  %v18185_v16 = vld [vmem:[#allocation8 + $0x388] sm:$0xf] }
 0x6c6   : > { %9959 = vmatpush.bf16.msrb.mxu1 %v18062_v36  ;;  %v21163_v36 = vld [vmem:[#allocation8 + $0x30c] sm:$0xf] }
 0x6c7   : > { %v18122_v12 = vor.u32 %v21163_v36, %v18119_v55 }
 0x6c8   : > { %9984 = vmatpush.bf16.msrb.mxu3 %v18086_v21  ;;  %v18126_v21 = vor.u32 %v21168_v13, %v18125_v10 }
 0x6c9   : > { %9973 = vmatpush.bf16.msrb.mxu2 %v18050_v24  ;;  %v18114_v24 = vor.u32 %v21162_v58, %v18111_v48  ;;  %v18178_v48 = vor.u32 %v21180_v25, %v18177_v22 }
 0x6ca   : > { %9960 = vmatpush.bf16.msrb.mxu1 %v18046_v19  ;;  %v18227_v19 = vld [vmem:[#allocation8 + $0x3f0] sm:$0xf0] }
 0x6cb   : > { %v18230_v33 = vor.u32 %v21190_v26, %v18227_v19 }
 0x6cc   : > { %9985 = vmatpush.bf16.msrb.mxu3 %v18070_v47  ;;  %v18110_v47 = vor.u32 %v21164_v11, %v18109_v53  ;;  %v21179_v53 = vld [vmem:[#allocation8 + $0x38c] sm:$0xf]  ;;  %v18187_v11 = vld [vmem:[#allocation8 + $0x398] sm:$0xf0] }
 0x6d0   : > { %9986 = vmatpush.bf16.msrb.mxu3 %v18054_v40 }
 0x6ef   : > { %v8974_v38 = vpop.f32.mrf.mxu0 }
 0x6f0   : > { %v9050_v42 = vpack.c.bf16 %v8974_v38, %v8974_v38  ;;  %v18209_v38 = vld [vmem:[#allocation8 + $0x3c0] sm:$0xf] }
 0x6f2   : > { %18035 = vmatmul.msk.bf16.vlgmr.msra.gmra.mxu0 %vm8460_vm0, %v9050_v42  ;;  %18036 = vmatmul.msk.bf16.vlgmr.msra.gmra.mxu1 %vm8460_vm0, %v9050_v42 }
 0x6f3   : > { %18037 = vmatmul.msk.bf16.vlgmr.msra.gmra.mxu2 %vm8460_vm0, %v9050_v42  ;;  %18038 = vmatmul.msk.bf16.vlgmr.msra.gmra.mxu3 %vm8460_vm0, %v9050_v42  ;;  %v21188_v42 = vld [vmem:[#allocation8 + $0x3cc] sm:$0xf0] }
 0x6f4   : > { %10105 = vmatpush.bf16.msra.mxu2 %v18166_v4  ;;  %10079 = vmatpush.bf16.msra.mxu0 %v18158_v57  ;;  %v21186_v4 = vld [vmem:[#allocation8 + $0x3c4] sm:$0xf]  ;;  %v18211_v57 = vld [vmem:[#allocation8 + $0x3d0] sm:$0xf0]  ;;  %v18210_v51 = vor.u32 %v21188_v42, %v18209_v38 }
 0x6f5   : > { %10092 = vmatpush.bf16.msra.mxu1 %v18162_v34  ;;  %10118 = vmatpush.bf16.msra.mxu3 %v18170_v50  ;;  %v18218_v50 = vor.u32 %v21189_v31, %v18217_v23  ;;  %v18214_v37 = vor.u32 %v21186_v4, %v18211_v57 }
 0x6f7   : > { %v25491_v17 = vpop.f32.mrf.mxu0 }
 0x6f8   : > { %10106 = vmatpush.bf16.msra.mxu2 %v18150_v60  ;;  %10080 = vmatpush.bf16.msra.mxu0 %v18142_v62  ;;  %v18193_v60 = vld [vmem:[#allocation8 + $0x3a0] sm:$0xf]  ;;  %v21184_v62 = vld [vmem:[#allocation8 + $0x3ac] sm:$0xf0] }
 0x6f9   : > { %v8997_v18 = vpop.f32.mrf.mxu1  ;;  %10093 = vmatpush.bf16.msra.mxu1 %v18146_v3  ;;  %10119 = vmatpush.bf16.msra.mxu3 %v18154_v9  ;;  %v21183_v3 = vld [vmem:[#allocation8 + $0x3ac] sm:$0xf]  ;;  %v18203_v9 = vld [vmem:[#allocation8 + $0x3b8] sm:$0xf0]  ;;  %v18194_v5 = vor.u32 %v21184_v62, %v18193_v60 }
 0x6fa   : > { %v9051_v8 = vpack.c.bf16 %v8997_v18, %v8997_v18  ;;  %v21181_v18 = vld [vmem:[#allocation8 + $0x394] sm:$0xf0] }
 0x6fc   : > { %10107 = vmatpush.bf16.msra.mxu2 %v18134_v20  ;;  %10081 = vmatpush.bf16.msra.mxu0 %v18126_v21  ;;  %v18198_v20 = vor.u32 %v21182_v35, %v18195_v63  ;;  %v18206_v21 = vor.u32 %v21183_v3, %v18203_v9 }
 0x6fd   : > { %10094 = vmatpush.bf16.msra.mxu1 %v18130_v61  ;;  %10120 = vmatpush.bf16.msra.mxu3 %v18138_v2  ;;  %v21178_v61 = vld [vmem:[#allocation8 + $0x384] sm:$0xf]  ;;  %v18179_v2 = vld [vmem:[#allocation8 + $0x390] sm:$0xf0] }
 0x6fe   : > { %v25493_v46 = vpop.f32.mrf.mxu2  ;;  %v18182_v55 = vor.u32 %v21178_v61, %v18179_v2 }
 0x6ff   : > { %v9276_v40 = vpop.f32.mrf.mxu0  ;;  %v9052_v44 = vpack.c.bf16 %v25493_v46, %v25493_v46 }
 0x700   : > { %10108 = vmatpush.bf16.msra.mxu2 %v18118_v30  ;;  %10082 = vmatpush.bf16.msra.mxu0 %v18110_v47  ;;  %v18190_v30 = vor.u32 %v21179_v53, %v18187_v11 }
 0x701   : > { %10095 = vmatpush.bf16.msra.mxu1 %v18114_v24  ;;  %10121 = vmatpush.bf16.msra.mxu3 %v18122_v12 }
 0x702   : > { %v25495_v56 = vpop.f32.mrf.mxu1  ;;  %18103 = vmatmul.msk.bf16.vlgmr.msrb.gmra.mxu0 %vm8460_vm0, %v9051_v8  ;;  %18104 = vmatmul.msk.bf16.vlgmr.msrb.gmra.mxu1 %vm8460_vm0, %v9051_v8 }
 0x703   : > { %18105 = vmatmul.msk.bf16.vlgmr.msrb.gmra.mxu2 %vm8460_vm0, %v9051_v8  ;;  %18106 = vmatmul.msk.bf16.vlgmr.msrb.gmra.mxu3 %vm8460_vm0, %v9051_v8 }
 0x704   : > { %10240 = vmatpush.bf16.msrb.mxu2 %v18234_v39  ;;  %10214 = vmatpush.bf16.msrb.mxu0 %v18226_v41 }
 0x705   : > { %10227 = vmatpush.bf16.msrb.mxu1 %v18230_v33  ;;  %10253 = vmatpush.bf16.msrb.mxu3 %v18238_v27 }
 0x706   : > { %v25501_v34 = vpop.f32.mrf.mxu3 }
 0x707   : > { %v9300_v54 = vpop.f32.mrf.mxu2  ;;  %v9409_v10 = vpop.f32.mrf.mxu0 }
 0x708   : > { %v10262_v14 = vadd.f32 %v9409_v10, %v25491_v17  ;;  %10241 = vmatpush.bf16.msrb.mxu2 %v18218_v50  ;;  %10215 = vmatpush.bf16.msrb.mxu0 %v18210_v51  ;;  %v18186_v17 = vor.u32 %v21181_v18, %v18185_v16 }
 0x709   : > { %10228 = vmatpush.bf16.msrb.mxu1 %v18214_v37  ;;  %10254 = vmatpush.bf16.msrb.mxu3 %v18222_v59 }
 0x70a   : > { %v9289_v13 = vpop.f32.mrf.mxu1 }
 0x70c   : > { %10242 = vmatpush.bf16.msrb.mxu2 %v18202_v15  ;;  %10216 = vmatpush.bf16.msrb.mxu0 %v18194_v5 }
 0x70d   : > { %10229 = vmatpush.bf16.msrb.mxu1 %v18198_v20  ;;  %10255 = vmatpush.bf16.msrb.mxu3 %v18206_v21 }
 0x70e   : > { %v9313_v58 = vpop.f32.mrf.mxu3 }
 0x70f   : > { %v9302_v36 = vpop.f32.mrf.mxu2  ;;  %v9411_v47 = vpop.f32.mrf.mxu0 }
 0x710   : > { %10243 = vmatpush.bf16.msrb.mxu2 %v18186_v17  ;;  %10217 = vmatpush.bf16.msrb.mxu0 %v18178_v48 }
 0x711   : > { %10230 = vmatpush.bf16.msrb.mxu1 %v18182_v55  ;;  %10256 = vmatpush.bf16.msrb.mxu3 %v18190_v30 }
 0x712   : > { %v9422_v45 = vpop.f32.mrf.mxu1  ;;  %18171 = vmatmul.msk.bf16.vlgmr.msra.gmra.mxu0 %vm8460_vm0, %v9052_v44  ;;  %18172 = vmatmul.msk.bf16.vlgmr.msra.gmra.mxu1 %vm8460_vm0, %v9052_v44 }
 0x713   : > { %v10269_v24 = vadd.f32 %v9422_v45, %v25495_v56  ;;  %18173 = vmatmul.msk.bf16.vlgmr.msra.gmra.mxu2 %vm8460_vm0, %v9052_v44  ;;  %18174 = vmatmul.msk.bf16.vlgmr.msra.gmra.mxu3 %vm8460_vm0, %v9052_v44  ;;  %v9053_v56 = vpack.c.bf16 %v25501_v34, %v25501_v34 }
 0x716   : > { %v9315_v12 = vpop.f32.mrf.mxu3 }
 0x717   : > { %v9435_v6 = vpop.f32.mrf.mxu2  ;;  %v9544_v26 = vpop.f32.mrf.mxu0 }
 0x718   : > { %v10276_v7 = vadd.f32 %v9435_v6, %v9300_v54  ;;  %v10263_v19 = vadd.f32 %v10262_v14, %v9544_v26 }
 0x71a   : > { %v9424_v46 = vpop.f32.mrf.mxu1 }
 0x71e   : > { %v9448_v28 = vpop.f32.mrf.mxu3 }
 0x71f   : > { %v9437_v32 = vpop.f32.mrf.mxu2  ;;  %v10283_v40 = vadd.f32 %v9448_v28, %v9313_v58  ;;  %v9546_v8 = vpop.f32.mrf.mxu0 }
 0x722   : > { %v9557_v39 = vpop.f32.mrf.mxu1  ;;  %18239 = vmatmul.msk.bf16.vlgmr.msrb.gmra.mxu0 %vm8460_vm0, %v9053_v56  ;;  %18240 = vmatmul.msk.bf16.vlgmr.msrb.gmra.mxu1 %vm8460_vm0, %v9053_v56 }
 0x723   : > { %v10270_v41 = vadd.f32 %v10269_v24, %v9557_v39  ;;  %18241 = vmatmul.msk.bf16.vlgmr.msrb.gmra.mxu2 %vm8460_vm0, %v9053_v56  ;;  %18242 = vmatmul.msk.bf16.vlgmr.msrb.gmra.mxu3 %vm8460_vm0, %v9053_v56 }
 0x726   : > { %v9450_v23 = vpop.f32.mrf.mxu3 }
 0x727   : > { %v9570_v31 = vpop.f32.mrf.mxu2  ;;  %v9679_v27 = vpop.f32.mrf.mxu0 }
 0x728   : > { %v10277_v33 = vadd.f32 %v10276_v7, %v9570_v31  ;;  %v10264_v42 = vadd.f32 %v10263_v19, %v9679_v27  ;;  %v21839_v19 = vld [vmem:[#allocation5] sm:$0xff] }
 0x729   : > { %v1050_v28 = vunpack.c.l.bf16 %v21839_v19 }
 0x72a   : > { %v9559_v38 = vpop.f32.mrf.mxu1 }
 0x72e   : > { %v9583_v4 = vpop.f32.mrf.mxu3 }
 0x72f   : > { %v9572_v57 = vpop.f32.mrf.mxu2  ;;  %v10284_v29 = vadd.f32 %v10283_v40, %v9583_v4  ;;  %v9681_v43 = vpop.f32.mrf.mxu0  ;;  %v1051_v40 = vunpack.c.h.bf16 %v21839_v19  ;;  %v10351_v19 = vperm.slane %v22841_v1, 1 }
 0x732   : > { %v9692_v34 = vpop.f32.mrf.mxu1 }
 0x733   : > { %v10271_v50 = vadd.f32 %v10270_v41, %v9692_v34  ;;  %v21840_v41 = vld [vmem:[#allocation5 + $0x8] sm:$0xff] }
 0x734   : > { %v1052_v23 = vunpack.c.l.bf16 %v21840_v41 }
 0x736   : > { %v9585_v51 = vpop.f32.mrf.mxu3 }
 0x737   : > { %v9705_v49 = vpop.f32.mrf.mxu2 }
 0x738   : > { %v10278_v52 = vadd.f32 %v10277_v33, %v9705_v49 }
 0x73a   : > { %v9694_v54 = vpop.f32.mrf.mxu1 }
 0x73e   : > { %v9718_v37 = vpop.f32.mrf.mxu3 }
 0x73f   : > { %v9707_v59 = vpop.f32.mrf.mxu2  ;;  %v10285_v60 = vadd.f32 %v10284_v29, %v9718_v37  ;;  %v1053_v29 = vunpack.c.h.bf16 %v21840_v41 }
 0x746   : > { %v9720_v62 = vpop.f32.mrf.mxu3 }
 0x747   : > { %v22115_v62 = vmov 512.0  }
 0x748   : > { %21835 = vrcp.f32 %v22115_v62 }
 0x76f   : > { %v9814_v35 = vpop.f32.mrf.mxu0  ;;  %v9827_v63 = vpop.f32.mrf.mxu1 }
 0x770   : > { %v10265_v36 = vadd.f32 %v10264_v42, %v9814_v35  ;;  %v10272_v55 = vadd.f32 %v10271_v50, %v9827_v63  ;;  %v21836_v35 = vpop.eup %21835 }
 0x771   : > { %v10300_v63 = vmul.f32 512.0, %v21836_v35  ;;  %vm10304_vm0 = vweird.f32 %v21836_v35 }
 0x776   : > { %v9840_v3 = vpop.f32.mrf.mxu2  ;;  %v9853_v9 = vpop.f32.mrf.mxu3 }
 0x777   : > { %v9816_v10 = vpop.f32.mrf.mxu0  ;;  %v9829_v13 = vpop.f32.mrf.mxu1  ;;  %v10279_v26 = vadd.f32 %v10278_v52, %v9840_v3  ;;  %v10286_v46 = vadd.f32 %v10285_v60, %v9853_v9  ;;  %v10301_v3 = vsub.f32 1.0, %v10300_v63 }
 0x779   : > { %v10302_v9 = vmul.f32 %v21836_v35, %v10301_v3 }
 0x77b   : > { %v10303_v10 = vadd.f32 %v21836_v35, %v10302_v9 }
 0x77d   : > { %v10305_v13 = vsel %vm10304_vm0, %v21836_v35, %v10303_v10 }
 0x77e   : > { %v9842_v14 = vpop.f32.mrf.mxu2  ;;  %v9855_v15 = vpop.f32.mrf.mxu3 }
 0x77f   : > { %v9949_v5 = vpop.f32.mrf.mxu0  ;;  %v9962_v16 = vpop.f32.mrf.mxu1 }
 0x780   : > { %v10266_v30 = vadd.f32 %v10265_v36, %v9949_v5  ;;  %v10273_v47 = vadd.f32 %v10272_v55, %v9962_v16 }
 0x786   : > { %v9975_v18 = vpop.f32.mrf.mxu2  ;;  %v9988_v20 = vpop.f32.mrf.mxu3 }
 0x787   : > { %v9951_v21 = vpop.f32.mrf.mxu0  ;;  %v9964_v22 = vpop.f32.mrf.mxu1  ;;  %v10280_v56 = vadd.f32 %v10279_v26, %v9975_v18  ;;  %v10287_v39 = vadd.f32 %v10286_v46, %v9988_v20  ;;  %v10340_v26 = vperm.slane %v22839_v0, 3  ;;  %v10350_v46 = vperm.slane %v22841_v1, 0 }
 0x78e   : > { %v9977_v25 = vpop.f32.mrf.mxu2  ;;  %v9990_v61 = vpop.f32.mrf.mxu3 }
 0x78f   : > { %v10084_v2 = vpop.f32.mrf.mxu0  ;;  %v10097_v53 = vpop.f32.mrf.mxu1 }
 0x790   : > { %v10267_v24 = vadd.f32 %v10266_v30, %v10084_v2  ;;  %v10274_v12 = vadd.f32 %v10273_v47, %v10097_v53 }
 0x796   : > { %v10110_v11 = vpop.f32.mrf.mxu2  ;;  %v10123_v58 = vpop.f32.mrf.mxu3 }
 0x797   : > { %v10086_v17 = vpop.f32.mrf.mxu0  ;;  %v10099_v48 = vpop.f32.mrf.mxu1  ;;  %v10281_v31 = vadd.f32 %v10280_v56, %v10110_v11  ;;  %v10288_v33 = vadd.f32 %v10287_v39, %v10123_v58 }
 0x798   : > { %v22116_v48 = vmov 0.0  }
 0x799   : > { %10370 = vst [vmem:[#allocation4 + $0x10] sm:$0xff] %v22116_v48 }
 0x79a   : > { %10371 = vst [vmem:[#allocation4] sm:$0xff] %v22116_v48 }
 0x79b   : > { %10372 = vst [vmem:[#allocation4 + $0x8] sm:$0xff] %v22116_v48 }
 0x79c   : > { %10373 = vst [vmem:[#allocation4 + $0x18] sm:$0xff] %v22116_v48 }
 0x79e   : > { %v10112_v44 = vpop.f32.mrf.mxu2  ;;  %v10125_v45 = vpop.f32.mrf.mxu3 }
 0x79f   : > { %v10219_v6 = vpop.f32.mrf.mxu0  ;;  %v10232_v7 = vpop.f32.mrf.mxu1 }
 0x7a0   : > { %v10268_v32 = vadd.f32 %v10267_v24, %v10219_v6  ;;  %v10275_v8 = vadd.f32 %v10274_v12, %v10232_v7  ;;  %v10337_v24 = vperm.slane %v22839_v0, 0  ;;  %v10338_v6 = vperm.slane %v22839_v0, 1 }
 0x7a1   : > { %v10339_v7 = vperm.slane %v22839_v0, 2 }
 0x7a2   : > { %v10290_v27 = vadd.f32 %v10268_v32, %v1050_v28  ;;  %v10291_v38 = vadd.f32 %v10275_v8, %v1051_v40  ;;  %v10352_v28 = vperm.slane %v22841_v1, 2  ;;  %v10353_v32 = vperm.slane %v22841_v1, 3 }
 0x7a4   : > { %v10294_v51 = vadd.f32 %v10291_v38, %v10290_v27 }
 0x7a6   : > { %v10245_v42 = vpop.f32.mrf.mxu2  ;;  %v10258_v4 = vpop.f32.mrf.mxu3 }
 0x7a7   : > { %v10282_v57 = vadd.f32 %v10281_v31, %v10245_v42  ;;  %v10289_v43 = vadd.f32 %v10288_v33, %v10258_v4  ;;  %v10221_v34 = vpop.f32.mrf.mxu0  ;;  %v10234_v50 = vpop.f32.mrf.mxu1 }
 0x7a9   : > { %v10292_v49 = vadd.f32 %v10282_v57, %v1052_v23  ;;  %v10293_v52 = vadd.f32 %v10289_v43, %v1053_v29 }
 0x7ab   : > { %v10295_v54 = vadd.f32 %v10294_v51, %v10292_v49 }
 0x7ad   : > { %v10296_v37 = vadd.f32 %v10295_v54, %v10293_v52 }
 0x7ae   : > { %v10247_v59 = vpop.f32.mrf.mxu2  ;;  %v10260_v60 = vpop.f32.mrf.mxu3 }
 0x7af   : > { %10297 = vadd.xlane.f32.xlu1 %v10296_v37 }
 0x822   : > { %v10298_v14 = vpop.xlane.xlu1 %10297 }
 0x823   : > { %v10306_v15 = vmul.f32 %v10305_v13, %v10298_v14 }
 0x825   : > { %v10307_v5 = vsub.f32 %v10290_v27, %v10306_v15  ;;  %v10308_v16 = vsub.f32 %v10291_v38, %v10306_v15  ;;  %v10309_v18 = vsub.f32 %v10292_v49, %v10306_v15  ;;  %v10310_v20 = vsub.f32 %v10293_v52, %v10306_v15 }
 0x827   : > { %v10311_v21 = vmul.f32 %v10307_v5, %v10307_v5  ;;  %v10312_v22 = vmul.f32 %v10308_v16, %v10308_v16  ;;  %v10313_v25 = vmul.f32 %v10309_v18, %v10309_v18  ;;  %v10314_v2 = vmul.f32 %v10310_v20, %v10310_v20 }
 0x829   : > { %v10315_v61 = vadd.f32 %v10312_v22, %v10311_v21 }
 0x82b   : > { %v10316_v53 = vadd.f32 %v10315_v61, %v10313_v25 }
 0x82d   : > { %v10317_v11 = vadd.f32 %v10316_v53, %v10314_v2 }
 0x82f   : > { %10318 = vadd.xlane.f32.xlu2 %v10317_v11 }
 0x8a2   : > { %v10319_v58 = vpop.xlane.xlu2 %10318 }
 0x8a3   : > { %v10320_v17 = vmul.f32 %v10319_v58, %v10305_v13 }
 0x8a5   : > { %v10321_v36 = vadd.f32 1e-05, %v10320_v17 }
 0x8a7   : > { %21837 = vrsqrt.f32 %v10321_v36  ;;  %vm10328_vm6 = vweird.f32 %v10321_v36 }
 0x8ad   : > { %v21838_v55 = vpop.eup %21837 }
 0x8ae   : > { %v10323_v30 = vmul.f32 %v21838_v55, %v10321_v36  ;;  %vm10329_vm1 = vweird.f32 %v21838_v55 }
 0x8af   : > { %vm10330_vm7 = vmor %vm10328_vm6, %vm10329_vm1 }
 0x8b0   : > { %v10324_v47 = vmul.f32 %v21838_v55, %v10323_v30 }
 0x8b2   : > { %v10325_v44 = vmul.f32 0.5, %v10324_v47 }
 0x8b4   : > { %v10326_v45 = vsub.f32 1.5, %v10325_v44 }
 0x8b6   : > { %v10327_v12 = vmul.f32 %v21838_v55, %v10326_v45 }
 0x8b8   : > { %v10331_v40 = vsel %vm10330_vm7, %v21838_v55, %v10327_v12 }
 0x8b9   : > { %v10332_v8 = vmul.f32 %v10331_v40, %v10307_v5  ;;  %v10333_v56 = vmul.f32 %v10331_v40, %v10308_v16  ;;  %v10334_v39 = vmul.f32 %v10331_v40, %v10309_v18  ;;  %v10335_v41 = vmul.f32 %v10331_v40, %v10310_v20 }
 0x8bb   : > { %v10345_v23 = vmul.f32 %v10337_v24, %v10332_v8  ;;  %v10346_v31 = vmul.f32 %v10338_v6, %v10333_v56  ;;  %v10347_v33 = vmul.f32 %v10339_v7, %v10334_v39  ;;  %v10348_v27 = vmul.f32 %v10340_v26, %v10335_v41 }
 0x8bd   : > { %v10358_v38 = vadd.f32 %v10350_v46, %v10345_v23  ;;  %v10359_v42 = vadd.f32 %v10351_v19, %v10346_v31  ;;  %v10360_v4 = vadd.f32 %v10352_v28, %v10347_v33  ;;  %v10361_v57 = vadd.f32 %v10353_v32, %v10348_v27 }
 0x8bf   : > { %10362 = vst [vmem:[#allocation2 + $0x10] sm:$0xff] %v10358_v38  ;;  %v10366_v29 = vpack.c.bf16 %v10359_v42, %v10358_v38  ;;  %v10367_v43 = vpack.c.bf16 %v10361_v57, %v10360_v4 }
 0x8c0   : > { %10363 = vst [vmem:[#allocation2] sm:$0xff] %v10359_v42 }
 0x8c1   : > { %10364 = vst [vmem:[#allocation2 + $0x18] sm:$0xff] %v10360_v4 }
 0x8c2   : > { %10365 = vst [vmem:[#allocation2 + $0x8] sm:$0xff] %v10361_v57 }
 0x8c3   : > { %10368 = vst [vmem:[#allocation3] sm:$0xff] %v10366_v29 }
 0x8c4   : > { %10369 = vst [vmem:[#allocation3 + $0x8] sm:$0xff] %v10367_v43 }
 0x8c5 PF: > { %v18469_v34 = vld [vmem:[%s22818_s14 + $0x1c0] sm:$0xf]  ;;  %p20291_p5 = scmp.ne.s32.totalorder %s22198_s21, 1 }
 0x8c6   : > { %v21254_v50 = vld [vmem:[%s22818_s14 + $0x1dc] sm:$0xf0] }
 0x8c7   : > { %v18725_v51 = vld [vmem:[%s22818_s14 + $0x3c0] sm:$0xf]  ;;  %v18470_v49 = vor.u32 %v21254_v50, %v18469_v34 }
 0x8c8   : > { %v21318_v52 = vld [vmem:[%s22818_s14 + $0x3dc] sm:$0xf0] }
 0x8c9   : > { %v18981_v54 = vld [vmem:[%s22818_s14 + $0x5c0] sm:$0xf]  ;;  %v18726_v59 = vor.u32 %v21318_v52, %v18725_v51  ;;  %11944 = vmatpush.bf16.msra.mxu0 %v18470_v49 }
 0x8ca   : > { %v21382_v37 = vld [vmem:[%s22818_s14 + $0x5dc] sm:$0xf0] }
 0x8cb   : > { %v18982_v60 = vor.u32 %v21382_v37, %v18981_v54  ;;  %v19237_v62 = vld [vmem:[%s22818_s14 + $0x7c0] sm:$0xf]  ;;  %11957 = vmatpush.bf16.msra.mxu1 %v18726_v59 }
 0x8cc   : > { %v21446_v35 = vld [vmem:[%s22818_s14 + $0x7dc] sm:$0xf0] }
 0x8cd   : > { %v18437_v63 = vld [vmem:[%s22818_s14 + $0x180] sm:$0xf]  ;;  %v19238_v3 = vor.u32 %v21446_v35, %v19237_v62  ;;  %11970 = vmatpush.bf16.msra.mxu2 %v18982_v60 }
 0x8ce   : > { %v21246_v9 = vld [vmem:[%s22818_s14 + $0x19c] sm:$0xf0] }
 0x8cf   : > { %v18693_v10 = vld [vmem:[%s22818_s14 + $0x380] sm:$0xf]  ;;  %v18438_v14 = vor.u32 %v21246_v9, %v18437_v63  ;;  %11983 = vmatpush.bf16.msra.mxu3 %v19238_v3 }
 0x8d0   : > { %v21310_v13 = vld [vmem:[%s22818_s14 + $0x39c] sm:$0xf0] }
 0x8d1   : > { %v18694_v15 = vor.u32 %v21310_v13, %v18693_v10  ;;  %v18949_v5 = vld [vmem:[%s22818_s14 + $0x580] sm:$0xf]  ;;  %11945 = vmatpush.bf16.msra.mxu0 %v18438_v14 }
 0x8d2   : > { %v21374_v16 = vld [vmem:[%s22818_s14 + $0x59c] sm:$0xf0] }
 0x8d3   : > { %v19205_v18 = vld [vmem:[%s22818_s14 + $0x780] sm:$0xf]  ;;  %v18950_v20 = vor.u32 %v21374_v16, %v18949_v5  ;;  %11958 = vmatpush.bf16.msra.mxu1 %v18694_v15 }
 0x8d4   : > { %v21438_v21 = vld [vmem:[%s22818_s14 + $0x79c] sm:$0xf0] }
 0x8d5   : > { %v18405_v22 = vld [vmem:[%s22818_s14 + $0x140] sm:$0xf]  ;;  %v19206_v61 = vor.u32 %v21438_v21, %v19205_v18  ;;  %11971 = vmatpush.bf16.msra.mxu2 %v18950_v20 }
 0x8d6   : > { %v21238_v25 = vld [vmem:[%s22818_s14 + $0x15c] sm:$0xf0] }
 0x8d7   : > { %v18661_v2 = vld [vmem:[%s22818_s14 + $0x340] sm:$0xf]  ;;  %v18406_v58 = vor.u32 %v21238_v25, %v18405_v22  ;;  %11984 = vmatpush.bf16.msra.mxu3 %v19206_v61 }
 0x8d8   : > { %v21302_v53 = vld [vmem:[%s22818_s14 + $0x35c] sm:$0xf0] }
 0x8d9   : > { %v18917_v11 = vld [vmem:[%s22818_s14 + $0x540] sm:$0xf]  ;;  %v18662_v55 = vor.u32 %v21302_v53, %v18661_v2  ;;  %11946 = vmatpush.bf16.msra.mxu0 %v18406_v58 }
 0x8da   : > { %v21366_v17 = vld [vmem:[%s22818_s14 + $0x55c] sm:$0xf0] }
 0x8db   : > { %v19173_v48 = vld [vmem:[%s22818_s14 + $0x740] sm:$0xf]  ;;  %v18918_v30 = vor.u32 %v21366_v17, %v18917_v11  ;;  %11959 = vmatpush.bf16.msra.mxu1 %v18662_v55  ;;  %v21250_v17 = vld [vmem:[%s22818_s14 + $0x1c4] sm:$0xf] }
 0x8dc   : > { %v21430_v36 = vld [vmem:[%s22818_s14 + $0x75c] sm:$0xf0] }
 0x8dd   : > { %v18373_v47 = vld [vmem:[%s22818_s14 + $0x100] sm:$0xf]  ;;  %v19174_v24 = vor.u32 %v21430_v36, %v19173_v48  ;;  %11972 = vmatpush.bf16.msra.mxu2 %v18918_v30  ;;  %v18471_v48 = vld [vmem:[%s22818_s14 + $0x1e0] sm:$0xf0] }
 0x8de   : > { %v21230_v44 = vld [vmem:[%s22818_s14 + $0x11c] sm:$0xf0]  ;;  %v21314_v36 = vld [vmem:[%s22818_s14 + $0x3c4] sm:$0xf] }
 0x8df   : > { %v18629_v45 = vld [vmem:[%s22818_s14 + $0x300] sm:$0xf]  ;;  %v18374_v19 = vor.u32 %v21230_v44, %v18373_v47  ;;  %11985 = vmatpush.bf16.msra.mxu3 %v19174_v24  ;;  %v18727_v30 = vld [vmem:[%s22818_s14 + $0x3e0] sm:$0xf0] }
 0x8e0   : > { %v21294_v12 = vld [vmem:[%s22818_s14 + $0x31c] sm:$0xf0]  ;;  %v21378_v47 = vld [vmem:[%s22818_s14 + $0x5c4] sm:$0xf] }
 0x8e1   : > { %v18885_v6 = vld [vmem:[%s22818_s14 + $0x500] sm:$0xf]  ;;  %v18630_v28 = vor.u32 %v21294_v12, %v18629_v45  ;;  %11947 = vmatpush.bf16.msra.mxu0 %v18374_v19  ;;  %v18983_v44 = vld [vmem:[%s22818_s14 + $0x5e0] sm:$0xf0] }
 0x8e2   : > { %v21358_v7 = vld [vmem:[%s22818_s14 + $0x51c] sm:$0xf0]  ;;  %v21442_v12 = vld [vmem:[%s22818_s14 + $0x7c4] sm:$0xf]  ;;  %v18986_v19 = vor.u32 %v21378_v47, %v18983_v44 }
 0x8e3   : > { %v19141_v26 = vld [vmem:[%s22818_s14 + $0x700] sm:$0xf]  ;;  %v18886_v32 = vor.u32 %v21358_v7, %v18885_v6  ;;  %11960 = vmatpush.bf16.msra.mxu1 %v18630_v28  ;;  %v19239_v6 = vld [vmem:[%s22818_s14 + $0x7e0] sm:$0xf0] }
 0x8e4   : > { %v21422_v46 = vld [vmem:[%s22818_s14 + $0x71c] sm:$0xf0]  ;;  %v21242_v28 = vld [vmem:[%s22818_s14 + $0x184] sm:$0xf] }
 0x8e5   : > { %v18341_v40 = vld [vmem:[%s22818_s14 + $0xc0] sm:$0xf]  ;;  %v19142_v39 = vor.u32 %v21422_v46, %v19141_v26  ;;  %11973 = vmatpush.bf16.msra.mxu2 %v18886_v32  ;;  %v18474_v26 = vor.u32 %v21250_v17, %v18471_v48  ;;  %v18730_v46 = vor.u32 %v21314_v36, %v18727_v30  ;;  %v18439_v32 = vld [vmem:[%s22818_s14 + $0x1a0] sm:$0xf0] }
 0x8e6   : > { %v21222_v8 = vld [vmem:[%s22818_s14 + $0xdc] sm:$0xf0]  ;;  %v18343_v17 = vld [vmem:[%s22818_s14 + $0xe0] sm:$0xf0] }
 0x8e7   : > { %v18597_v56 = vld [vmem:[%s22818_s14 + $0x2c0] sm:$0xf]  ;;  %v18342_v38 = vor.u32 %v21222_v8, %v18341_v40  ;;  %11986 = vmatpush.bf16.msra.mxu3 %v19142_v39  ;;  %v21306_v40 = vld [vmem:[%s22818_s14 + $0x384] sm:$0xf]  ;;  %v19242_v8 = vor.u32 %v21442_v12, %v19239_v6 }
 0x8e8   : > { %v21286_v41 = vld [vmem:[%s22818_s14 + $0x2dc] sm:$0xf0]  ;;  %v21370_v39 = vld [vmem:[%s22818_s14 + $0x584] sm:$0xf] }
 0x8e9   : > { %v18853_v23 = vld [vmem:[%s22818_s14 + $0x4c0] sm:$0xf]  ;;  %v18598_v42 = vor.u32 %v21286_v41, %v18597_v56  ;;  %11948 = vmatpush.bf16.msra.mxu0 %v18342_v38  ;;  %v18695_v56 = vld [vmem:[%s22818_s14 + $0x3a0] sm:$0xf0] }
 0x8ea   : > { %v21350_v31 = vld [vmem:[%s22818_s14 + $0x4dc] sm:$0xf0]  ;;  %v18951_v41 = vld [vmem:[%s22818_s14 + $0x5a0] sm:$0xf0]  ;;  %v18698_v38 = vor.u32 %v21306_v40, %v18695_v56 }
 0x8eb   : > { %v19109_v33 = vld [vmem:[%s22818_s14 + $0x6c0] sm:$0xf]  ;;  %v18854_v4 = vor.u32 %v21350_v31, %v18853_v23  ;;  %11961 = vmatpush.bf16.msra.mxu1 %v18598_v42  ;;  %v21434_v23 = vld [vmem:[%s22818_s14 + $0x784] sm:$0xf]  ;;  %v18954_v42 = vor.u32 %v21370_v39, %v18951_v41 }
 0x8ec   : > { %v21414_v27 = vld [vmem:[%s22818_s14 + $0x6dc] sm:$0xf0]  ;;  %v19207_v31 = vld [vmem:[%s22818_s14 + $0x7a0] sm:$0xf0] }
 0x8ed   : > { %v18309_v57 = vld [vmem:[%s22818_s14 + $0x80] sm:$0xf]  ;;  %v19110_v34 = vor.u32 %v21414_v27, %v19109_v33  ;;  %11974 = vmatpush.bf16.msra.mxu2 %v18854_v4  ;;  %v18442_v33 = vor.u32 %v21242_v28, %v18439_v32  ;;  %v21234_v27 = vld [vmem:[%s22818_s14 + $0x144] sm:$0xf] }
 0x8ee   : > { %v21214_v29 = vld [vmem:[%s22818_s14 + $0x9c] sm:$0xf0]  ;;  %v18407_v4 = vld [vmem:[%s22818_s14 + $0x160] sm:$0xf0] }
 0x8ef   : > { %v18565_v43 = vld [vmem:[%s22818_s14 + $0x280] sm:$0xf]  ;;  %v18310_v37 = vor.u32 %v21214_v29, %v18309_v57  ;;  %11987 = vmatpush.bf16.msra.mxu3 %v19110_v34  ;;  %v21298_v57 = vld [vmem:[%s22818_s14 + $0x344] sm:$0xf] }
 0x8f0   : > { %v21278_v50 = vld [vmem:[%s22818_s14 + $0x29c] sm:$0xf0]  ;;  %v18663_v29 = vld [vmem:[%s22818_s14 + $0x360] sm:$0xf0] }
 0x8f1   : > { %v18821_v51 = vld [vmem:[%s22818_s14 + $0x480] sm:$0xf]  ;;  %v18566_v59 = vor.u32 %v21278_v50, %v18565_v43  ;;  %11949 = vmatpush.bf16.msra.mxu0 %v18310_v37  ;;  %v19210_v43 = vor.u32 %v21434_v23, %v19207_v31  ;;  %v21362_v34 = vld [vmem:[%s22818_s14 + $0x544] sm:$0xf]  ;;  %v10375_v37 = vld [vmem:[#allocation3 + $0x8] sm:$0xff] }
 0x8f2   : > { %v21342_v49 = vld [vmem:[%s22818_s14 + $0x49c] sm:$0xf0]  ;;  %v18919_v50 = vld [vmem:[%s22818_s14 + $0x560] sm:$0xf0] }
 0x8f3   : > { %v19077_v52 = vld [vmem:[%s22818_s14 + $0x680] sm:$0xf]  ;;  %v18822_v60 = vor.u32 %v21342_v49, %v18821_v51  ;;  %11962 = vmatpush.bf16.msra.mxu1 %v18566_v59  ;;  %v21426_v51 = vld [vmem:[%s22818_s14 + $0x744] sm:$0xf] }
 0x8f4   : > { %v21406_v54 = vld [vmem:[%s22818_s14 + $0x69c] sm:$0xf0]  ;;  %v19175_v49 = vld [vmem:[%s22818_s14 + $0x760] sm:$0xf0] }
 0x8f5   : > { %v18277_v62 = vld [vmem:[%s22818_s14 + $0x40] sm:$0xf]  ;;  %v19078_v3 = vor.u32 %v21406_v54, %v19077_v52  ;;  %11975 = vmatpush.bf16.msra.mxu2 %v18822_v60  ;;  %v18410_v52 = vor.u32 %v21234_v27, %v18407_v4  ;;  %v18666_v54 = vor.u32 %v21298_v57, %v18663_v29  ;;  %v18922_v60 = vor.u32 %v21362_v34, %v18919_v50  ;;  %v21282_v48 = vld [vmem:[%s22818_s14 + $0x2c4] sm:$0xf] }
 0x8f6   : > { %v21206_v35 = vld [vmem:[%s22818_s14 + $0x5c] sm:$0xf0]  ;;  %v21346_v30 = vld [vmem:[%s22818_s14 + $0x4c4] sm:$0xf] }
 0x8f7   : > { %v18533_v63 = vld [vmem:[%s22818_s14 + $0x240] sm:$0xf]  ;;  %v18278_v5 = vor.u32 %v21206_v35, %v18277_v62  ;;  %11988 = vmatpush.bf16.msra.mxu3 %v19078_v3  ;;  %v21226_v62 = vld [vmem:[%s22818_s14 + $0x104] sm:$0xf]  ;;  %v10654_v3 = vunpack.c.l.b16 %v10375_v37 }
 0x8f8   : > { %v21270_v9 = vld [vmem:[%s22818_s14 + $0x25c] sm:$0xf0]  ;;  %v18375_v35 = vld [vmem:[%s22818_s14 + $0x120] sm:$0xf0] }
 0x8f9   : > { %v18789_v10 = vld [vmem:[%s22818_s14 + $0x440] sm:$0xf]  ;;  %v18534_v20 = vor.u32 %v21270_v9, %v18533_v63  ;;  %11950 = vmatpush.bf16.msra.mxu0 %v18278_v5  ;;  %v21290_v63 = vld [vmem:[%s22818_s14 + $0x304] sm:$0xf] }
 0x8fa   : > { %v21334_v13 = vld [vmem:[%s22818_s14 + $0x45c] sm:$0xf0]  ;;  %v18887_v5 = vld [vmem:[%s22818_s14 + $0x520] sm:$0xf0] }
 0x8fb   : > { %v19045_v14 = vld [vmem:[%s22818_s14 + $0x640] sm:$0xf]  ;;  %v18790_v21 = vor.u32 %v21334_v13, %v18789_v10  ;;  %11963 = vmatpush.bf16.msra.mxu1 %v18534_v20  ;;  %v10655_v10 = vunpack.c.h.b16 %v10375_v37  ;;  %v19178_v13 = vor.u32 %v21426_v51, %v19175_v49  ;;  %v19143_v20 = vld [vmem:[%s22818_s14 + $0x720] sm:$0xf0] }
 0x8fc   : > { %v21398_v15 = vld [vmem:[%s22818_s14 + $0x65c] sm:$0xf0]  ;;  %v18855_v47 = vld [vmem:[%s22818_s14 + $0x4e0] sm:$0xf0] }
 0x8fd   : > { %v18245_v16 = vld [vmem:[%s22818_s14] sm:$0xf]  ;;  %v19046_v2 = vor.u32 %v21398_v15, %v19045_v14  ;;  %11976 = vmatpush.bf16.msra.mxu2 %v18790_v21  ;;  %v18631_v14 = vld [vmem:[%s22818_s14 + $0x320] sm:$0xf0]  ;;  %v25621_v21 = vpack.c.b16 %v10654_v3, %v10654_v3  ;;  %v18858_v6 = vor.u32 %v21346_v30, %v18855_v47  ;;  %v18477_v3 = vld [vmem:[%s22818_s14 + $0x1c8] sm:$0xf] }
 0x8fe   : > { %v21198_v18 = vld [vmem:[%s22818_s14 + $0x1c] sm:$0xf0]  ;;  %v21354_v15 = vld [vmem:[%s22818_s14 + $0x504] sm:$0xf]  ;;  %v21311_v47 = vld [vmem:[%s22818_s14 + $0x3a4] sm:$0xf0] }
 0x8ff   : > { %v18501_v22 = vld [vmem:[%s22818_s14 + $0x200] sm:$0xf]  ;;  %v18246_v55 = vor.u32 %v21198_v18, %v18245_v16  ;;  %11989 = vmatpush.bf16.msra.mxu3 %v19046_v2  ;;  %v21418_v18 = vld [vmem:[%s22818_s14 + $0x704] sm:$0xf] }
 0x900   : > { %v21262_v25 = vld [vmem:[%s22818_s14 + $0x21c] sm:$0xf0]  ;;  %v19146_v36 = vor.u32 %v21418_v18, %v19143_v20  ;;  %v21410_v44 = vld [vmem:[%s22818_s14 + $0x6c4] sm:$0xf]  ;;  %v19245_v20 = vld [vmem:[%s22818_s14 + $0x7c8] sm:$0xf] }
 0x901   : > { %v18757_v61 = vld [vmem:[%s22818_s14 + $0x400] sm:$0xf]  ;;  %v18502_v45 = vor.u32 %v21262_v25, %v18501_v22  ;;  %11951 = vmatpush.bf16.msra.mxu0 %v18246_v55  ;;  %v25625_v25 = vpack.c.b16 %v10655_v10, %v10655_v10  ;;  %v18599_v55 = vld [vmem:[%s22818_s14 + $0x2e0] sm:$0xf0]  ;;  %v18733_v10 = vld [vmem:[%s22818_s14 + $0x3c8] sm:$0xf] }
 0x902   : > { %v21326_v53 = vld [vmem:[%s22818_s14 + $0x41c] sm:$0xf0]  ;;  %v18602_v12 = vor.u32 %v21282_v48, %v18599_v55  ;;  %v18567_v28 = vld [vmem:[%s22818_s14 + $0x2a0] sm:$0xf0]  ;;  %v18445_v48 = vld [vmem:[%s22818_s14 + $0x188] sm:$0xf] }
 0x903   : > { %v19013_v11 = vld [vmem:[%s22818_s14 + $0x600] sm:$0xf]  ;;  %v18758_v24 = vor.u32 %v21326_v53, %v18757_v61  ;;  %11964 = vmatpush.bf16.msra.mxu1 %v18502_v45  ;;  %v18378_v61 = vor.u32 %v21226_v62, %v18375_v35  ;;  %v18634_v53 = vor.u32 %v21290_v63, %v18631_v14  ;;  %v19111_v45 = vld [vmem:[%s22818_s14 + $0x6e0] sm:$0xf0]  ;;  %v21319_v14 = vld [vmem:[%s22818_s14 + $0x3e4] sm:$0xf0] }
 0x904   : > { %v21390_v58 = vld [vmem:[%s22818_s14 + $0x61c] sm:$0xf0]  ;;  %v21338_v32 = vld [vmem:[%s22818_s14 + $0x484] sm:$0xf]  ;;  %v18701_v55 = vld [vmem:[%s22818_s14 + $0x388] sm:$0xf] }
 0x905   : > { %v19014_v7 = vor.u32 %v21390_v58, %v19013_v11  ;;  %11977 = vmatpush.bf16.msra.mxu2 %v18758_v24  ;;  %11996 = vmatpush.bf16.msrb.mxu0 %v18474_v26  ;;  %v10374_v59 = vld [vmem:[#allocation3] sm:$0xff]  ;;  %v18890_v11 = vor.u32 %v21354_v15, %v18887_v5  ;;  %v18989_v15 = vld [vmem:[%s22818_s14 + $0x5c8] sm:$0xf] }
 0x906   : > { %v10652_v9 = vunpack.c.l.b16 %v10374_v59  ;;  %v10653_v16 = vunpack.c.h.b16 %v10374_v59  ;;  %v21218_v58 = vld [vmem:[%s22818_s14 + $0xc4] sm:$0xf]  ;;  %v21383_v5 = vld [vmem:[%s22818_s14 + $0x5e4] sm:$0xf0] }
 0x907   : > { %11990 = vmatpush.bf16.msra.mxu3 %v19014_v7  ;;  %12009 = vmatpush.bf16.msrb.mxu1 %v18730_v46  ;;  %v18346_v24 = vor.u32 %v21218_v58, %v18343_v17  ;;  %v21210_v7 = vld [vmem:[%s22818_s14 + $0x84] sm:$0xf]  ;;  %v18734_v58 = vor.u32 %v21319_v14, %v18733_v10  ;;  %v18990_v17 = vor.u32 %v21383_v5, %v18989_v15  ;;  %v18317_v15 = vld [vmem:[%s22818_s14 + $0x88] sm:$0xf] }
 0x908   : > { %v25623_v22 = vpack.c.b16 %v10652_v9, %v10652_v9  ;;  %v25627_v2 = vpack.c.b16 %v10653_v16, %v10653_v16  ;;  %11978 = vmatmul.bf16.vlgmr.msra.gmra.mxu2 %v25621_v21  ;;  %v18311_v26 = vld [vmem:[%s22818_s14 + $0xa0] sm:$0xf0]  ;;  %v21255_v9 = vld [vmem:[%s22818_s14 + $0x1e4] sm:$0xf0] }
 0x909   : > { %12022 = vmatpush.bf16.msrb.mxu2 %v18986_v19  ;;  %11997 = vmatpush.bf16.msrb.mxu0 %v18442_v33  ;;  %v21274_v46 = vld [vmem:[%s22818_s14 + $0x284] sm:$0xf]  ;;  %v19114_v19 = vor.u32 %v21410_v44, %v19111_v45  ;;  %v18314_v39 = vor.u32 %v21210_v7, %v18311_v26  ;;  %v18957_v44 = vld [vmem:[%s22818_s14 + $0x588] sm:$0xf]  ;;  %v18702_v7 = vor.u32 %v21311_v47, %v18701_v55 }
 0x90a   : > { %11952 = vmatmul.bf16.vlgmr.msra.gmra.mxu0 %v25623_v22  ;;  %11991 = vmatmul.bf16.vlgmr.msra.gmra.mxu3 %v25625_v25  ;;  %v18823_v40 = vld [vmem:[%s22818_s14 + $0x4a0] sm:$0xf0]  ;;  %v18570_v41 = vor.u32 %v21274_v46, %v18567_v28  ;;  %v21375_v45 = vld [vmem:[%s22818_s14 + $0x5a4] sm:$0xf0] }
 0x90b   : > { %12035 = vmatpush.bf16.msrb.mxu3 %v19242_v8  ;;  %12010 = vmatpush.bf16.msrb.mxu1 %v18698_v38  ;;  %v21402_v8 = vld [vmem:[%s22818_s14 + $0x684] sm:$0xf]  ;;  %v18826_v23 = vor.u32 %v21338_v32, %v18823_v40  ;;  %v18958_v26 = vor.u32 %v21375_v45, %v18957_v44  ;;  %v18413_v46 = vld [vmem:[%s22818_s14 + $0x148] sm:$0xf] }
 0x90c   : > { %11965 = vmatmul.bf16.vlgmr.msra.gmra.mxu1 %v25627_v2  ;;  %v19079_v56 = vld [vmem:[%s22818_s14 + $0x6a0] sm:$0xf0]  ;;  %v18669_v28 = vld [vmem:[%s22818_s14 + $0x348] sm:$0xf] }
 0x90d   : > { %12023 = vmatpush.bf16.msrb.mxu2 %v18954_v42  ;;  %11998 = vmatpush.bf16.msrb.mxu0 %v18410_v52  ;;  %v21202_v31 = vld [vmem:[%s22818_s14 + $0x44] sm:$0xf]  ;;  %v19082_v38 = vor.u32 %v21402_v8, %v19079_v56  ;;  %v21303_v40 = vld [vmem:[%s22818_s14 + $0x364] sm:$0xf0] }
 0x90e   : > { %v18279_v33 = vld [vmem:[%s22818_s14 + $0x60] sm:$0xf0]  ;;  %v18925_v8 = vld [vmem:[%s22818_s14 + $0x548] sm:$0xf] }
 0x90f   : > { %12036 = vmatpush.bf16.msrb.mxu3 %v19210_v43  ;;  %12011 = vmatpush.bf16.msrb.mxu1 %v18666_v54  ;;  %v21266_v27 = vld [vmem:[%s22818_s14 + $0x244] sm:$0xf]  ;;  %v18282_v34 = vor.u32 %v21202_v31, %v18279_v33  ;;  %v21367_v56 = vld [vmem:[%s22818_s14 + $0x564] sm:$0xf0]  ;;  %v18670_v31 = vor.u32 %v21303_v40, %v18669_v28 }
 0x910   : > { %v18535_v42 = vld [vmem:[%s22818_s14 + $0x260] sm:$0xf0]  ;;  %v18926_v33 = vor.u32 %v21367_v56, %v18925_v8  ;;  %v21215_v5 = vld [vmem:[%s22818_s14 + $0xa4] sm:$0xf0] }
 0x911   : > { %12024 = vmatpush.bf16.msrb.mxu2 %v18922_v60  ;;  %11999 = vmatpush.bf16.msrb.mxu0 %v18378_v61  ;;  %v21330_v4 = vld [vmem:[%s22818_s14 + $0x444] sm:$0xf]  ;;  %v18538_v49 = vor.u32 %v21266_v27, %v18535_v42  ;;  %v21447_v61 = vld [vmem:[%s22818_s14 + $0x7e4] sm:$0xf0] }
 0x912   : > { %v18791_v57 = vld [vmem:[%s22818_s14 + $0x460] sm:$0xf0]  ;;  %v19246_v30 = vor.u32 %v21447_v61, %v19245_v20  ;;  %v18381_v27 = vld [vmem:[%s22818_s14 + $0x108] sm:$0xf] }
 0x913   : > { %12037 = vmatpush.bf16.msrb.mxu3 %v19178_v13  ;;  %12012 = vmatpush.bf16.msrb.mxu1 %v18634_v53  ;;  %v21394_v29 = vld [vmem:[%s22818_s14 + $0x644] sm:$0xf]  ;;  %v18794_v52 = vor.u32 %v21330_v4, %v18791_v57  ;;  %v18637_v42 = vld [vmem:[%s22818_s14 + $0x308] sm:$0xf] }
 0x914   : > { %v19047_v43 = vld [vmem:[%s22818_s14 + $0x660] sm:$0xf0]  ;;  %v21295_v57 = vld [vmem:[%s22818_s14 + $0x324] sm:$0xf0] }
 0x915   : > { %12025 = vmatpush.bf16.msrb.mxu2 %v18890_v11  ;;  %12000 = vmatpush.bf16.msrb.mxu0 %v18346_v24  ;;  %v21194_v50 = vld [vmem:[%s22818_s14 + $0x4] sm:$0xf]  ;;  %v19050_v60 = vor.u32 %v21394_v29, %v19047_v43  ;;  %v18478_v11 = vor.u32 %v21255_v9, %v18477_v3  ;;  %v19213_v24 = vld [vmem:[%s22818_s14 + $0x788] sm:$0xf] }
 0x916   : > { %v18247_v51 = vld [vmem:[%s22818_s14 + $0x20] sm:$0xf0]  ;;  %v18893_v29 = vld [vmem:[%s22818_s14 + $0x508] sm:$0xf] }
 0x917   : > { %12038 = vmatpush.bf16.msrb.mxu3 %v19146_v36  ;;  %12013 = vmatpush.bf16.msrb.mxu1 %v18602_v12  ;;  %v21258_v54 = vld [vmem:[%s22818_s14 + $0x204] sm:$0xf]  ;;  %v18250_v13 = vor.u32 %v21194_v50, %v18247_v51  ;;  %v21247_v36 = vld [vmem:[%s22818_s14 + $0x1a4] sm:$0xf0] }
 0x918   : > { %v18503_v37 = vld [vmem:[%s22818_s14 + $0x220] sm:$0xf0]  ;;  %v21439_v12 = vld [vmem:[%s22818_s14 + $0x7a4] sm:$0xf0] }
 0x919   : > { %12026 = vmatpush.bf16.msrb.mxu2 %v18858_v6  ;;  %12001 = vmatpush.bf16.msrb.mxu0 %v18314_v39  ;;  %v21322_v59 = vld [vmem:[%s22818_s14 + $0x404] sm:$0xf]  ;;  %v18506_v16 = vor.u32 %v21258_v54, %v18503_v37  ;;  %v18446_v6 = vor.u32 %v21247_v36, %v18445_v48  ;;  %v19214_v32 = vor.u32 %v21439_v12, %v19213_v24  ;;  %v19181_v39 = vld [vmem:[%s22818_s14 + $0x748] sm:$0xf] }
 0x91a   : > { %v18759_v62 = vld [vmem:[%s22818_s14 + $0x420] sm:$0xf0]  ;;  %v21359_v43 = vld [vmem:[%s22818_s14 + $0x524] sm:$0xf0] }
 0x91b   : > { %12039 = vmatpush.bf16.msrb.mxu3 %v19114_v19  ;;  %12014 = vmatpush.bf16.msrb.mxu1 %v18570_v41  ;;  %v21386_v35 = vld [vmem:[%s22818_s14 + $0x604] sm:$0xf]  ;;  %v18762_v18 = vor.u32 %v21322_v59, %v18759_v62  ;;  %v21239_v19 = vld [vmem:[%s22818_s14 + $0x164] sm:$0xf0] }
 0x91c   : > { %v19015_v63 = vld [vmem:[%s22818_s14 + $0x620] sm:$0xf0]  ;;  %v21431_v41 = vld [vmem:[%s22818_s14 + $0x764] sm:$0xf0] }
 0x91d   : > { %12027 = vmatpush.bf16.msrb.mxu2 %v18826_v23  ;;  %12002 = vmatpush.bf16.msrb.mxu0 %v18282_v34  ;;  %v19018_v53 = vor.u32 %v21386_v35, %v19015_v63  ;;  %v18414_v23 = vor.u32 %v21239_v19, %v18413_v46  ;;  %v19182_v4 = vor.u32 %v21431_v41, %v19181_v39  ;;  %v19149_v34 = vld [vmem:[%s22818_s14 + $0x708] sm:$0xf] }
 0x91e   : > { %v21423_v50 = vld [vmem:[%s22818_s14 + $0x724] sm:$0xf0] }
 0x91f   : > { %12040 = vmatpush.bf16.msrb.mxu3 %v19082_v38  ;;  %12015 = vmatpush.bf16.msrb.mxu1 %v18538_v49  ;;  %v21231_v38 = vld [vmem:[%s22818_s14 + $0x124] sm:$0xf0]  ;;  %v18638_v49 = vor.u32 %v21295_v57, %v18637_v42  ;;  %v21379_v57 = vld [vmem:[%s22818_s14 + $0x5cc] sm:$0xf] }
 0x920   : > { %v18382_v51 = vor.u32 %v21231_v38, %v18381_v27  ;;  %v18349_v54 = vld [vmem:[%s22818_s14 + $0xc8] sm:$0xf]  ;;  %v18479_v27 = vld [vmem:[%s22818_s14 + $0x1e8] sm:$0xf0] }
 0x921   : > { %12028 = vmatpush.bf16.msrb.mxu2 %v18794_v52  ;;  %12003 = vmatpush.bf16.msrb.mxu0 %v18250_v13  ;;  %v18894_v52 = vor.u32 %v21359_v43, %v18893_v29  ;;  %v21223_v37 = vld [vmem:[%s22818_s14 + $0xe4] sm:$0xf0]  ;;  %v21315_v38 = vld [vmem:[%s22818_s14 + $0x3cc] sm:$0xf] }
 0x922   : > { %v18605_v59 = vld [vmem:[%s22818_s14 + $0x2c8] sm:$0xf]  ;;  %v18350_v10 = vor.u32 %v21223_v37, %v18349_v54  ;;  %v18991_v29 = vld [vmem:[%s22818_s14 + $0x5e8] sm:$0xf0] }
 0x923   : > { %12041 = vmatpush.bf16.msrb.mxu3 %v19050_v60  ;;  %12016 = vmatpush.bf16.msrb.mxu1 %v18506_v16  ;;  %v19150_v60 = vor.u32 %v21423_v50, %v19149_v34  ;;  %v21287_v62 = vld [vmem:[%s22818_s14 + $0x2e4] sm:$0xf0]  ;;  %v21443_v50 = vld [vmem:[%s22818_s14 + $0x7cc] sm:$0xf]  ;;  %v18994_v37 = vor.u32 %v21379_v57, %v18991_v29 }
 0x924   : > { %12004 = vmatmul.bf16.vlgmr.msrb.gmra.mxu0 %v25623_v22  ;;  %v18861_v35 = vld [vmem:[%s22818_s14 + $0x4c8] sm:$0xf]  ;;  %v18606_v13 = vor.u32 %v21287_v62, %v18605_v59  ;;  %v21243_v59 = vld [vmem:[%s22818_s14 + $0x18c] sm:$0xf] }
 0x925   : > { %12029 = vmatpush.bf16.msrb.mxu2 %v18762_v18  ;;  %12048 = vmatpush.bf16.msra.mxu0 %v18478_v11  ;;  %v21351_v63 = vld [vmem:[%s22818_s14 + $0x4e4] sm:$0xf0]  ;;  %v21307_v62 = vld [vmem:[%s22818_s14 + $0x38c] sm:$0xf] }
 0x926   : > { %12017 = vmatmul.bf16.vlgmr.msrb.gmra.mxu1 %v25627_v2  ;;  %v19117_v3 = vld [vmem:[%s22818_s14 + $0x6c8] sm:$0xf]  ;;  %v18862_v14 = vor.u32 %v21351_v63, %v18861_v35  ;;  %v18703_v63 = vld [vmem:[%s22818_s14 + $0x3a8] sm:$0xf0] }
 0x927   : > { %12042 = vmatpush.bf16.msrb.mxu3 %v19018_v53  ;;  %12061 = vmatpush.bf16.msra.mxu1 %v18734_v58  ;;  %v21415_v9 = vld [vmem:[%s22818_s14 + $0x6e4] sm:$0xf0]  ;;  %v21211_v57 = vld [vmem:[%s22818_s14 + $0x8c] sm:$0xf] }
 0x928   : > { %12030 = vmatmul.bf16.vlgmr.msrb.gmra.mxu2 %v25621_v21  ;;  %v18573_v16 = vld [vmem:[%s22818_s14 + $0x288] sm:$0xf]  ;;  %v19118_v18 = vor.u32 %v21415_v9, %v19117_v3  ;;  %v21371_v3 = vld [vmem:[%s22818_s14 + $0x58c] sm:$0xf] }
 0x929   : > { %12074 = vmatpush.bf16.msra.mxu2 %v18990_v17  ;;  %12049 = vmatpush.bf16.msra.mxu0 %v18446_v6  ;;  %v21279_v20 = vld [vmem:[%s22818_s14 + $0x2a4] sm:$0xf0]  ;;  %v18318_v17 = vor.u32 %v21215_v5, %v18317_v15  ;;  %v18959_v9 = vld [vmem:[%s22818_s14 + $0x5a8] sm:$0xf0]  ;;  %v18706_v15 = vor.u32 %v21307_v62, %v18703_v63 }
 0x92a   : > { %12043 = vmatmul.bf16.vlgmr.msrb.gmra.mxu3 %v25625_v25  ;;  %v18829_v61 = vld [vmem:[%s22818_s14 + $0x488] sm:$0xf]  ;;  %v18574_v48 = vor.u32 %v21279_v20, %v18573_v16  ;;  %v18962_v5 = vor.u32 %v21371_v3, %v18959_v9  ;;  %v21235_v16 = vld [vmem:[%s22818_s14 + $0x14c] sm:$0xf] }
 0x92b   : > { %12087 = vmatpush.bf16.msra.mxu3 %v19246_v30  ;;  %12062 = vmatpush.bf16.msra.mxu1 %v18702_v7  ;;  %v21343_v53 = vld [vmem:[%s22818_s14 + $0x4a4] sm:$0xf0]  ;;  %v21299_v20 = vld [vmem:[%s22818_s14 + $0x34c] sm:$0xf] }
 0x92c   : > { %v19085_v11 = vld [vmem:[%s22818_s14 + $0x688] sm:$0xf]  ;;  %v18830_v36 = vor.u32 %v21343_v53, %v18829_v61  ;;  %v18671_v53 = vld [vmem:[%s22818_s14 + $0x368] sm:$0xf0] }
 0x92d   : > { %12075 = vmatpush.bf16.msra.mxu2 %v18958_v26  ;;  %12050 = vmatpush.bf16.msra.mxu0 %v18414_v23  ;;  %v21407_v58 = vld [vmem:[%s22818_s14 + $0x6a4] sm:$0xf0]  ;;  %v18319_v29 = vld [vmem:[%s22818_s14 + $0xa8] sm:$0xf0] }
 0x92e   : > { %v18285_v55 = vld [vmem:[%s22818_s14 + $0x48] sm:$0xf]  ;;  %v19086_v44 = vor.u32 %v21407_v58, %v19085_v11  ;;  %v21363_v11 = vld [vmem:[%s22818_s14 + $0x54c] sm:$0xf] }
 0x92f   : > { %12088 = vmatpush.bf16.msra.mxu3 %v19214_v32  ;;  %12063 = vmatpush.bf16.msra.mxu1 %v18670_v31  ;;  %v21207_v30 = vld [vmem:[%s22818_s14 + $0x64] sm:$0xf0]  ;;  %v18927_v58 = vld [vmem:[%s22818_s14 + $0x568] sm:$0xf0] }
 0x930   : > { %v18541_v47 = vld [vmem:[%s22818_s14 + $0x248] sm:$0xf]  ;;  %v18286_v26 = vor.u32 %v21207_v30, %v18285_v55  ;;  %v18674_v55 = vor.u32 %v21299_v20, %v18671_v53  ;;  %v18930_v30 = vor.u32 %v21363_v11, %v18927_v58  ;;  %v21203_v62 = vld [vmem:[%s22818_s14 + $0x4c] sm:$0xf] }
 0x931   : > { %12076 = vmatpush.bf16.msra.mxu2 %v18926_v33  ;;  %12051 = vmatpush.bf16.msra.mxu0 %v18382_v51  ;;  %v21271_v45 = vld [vmem:[%s22818_s14 + $0x264] sm:$0xf0]  ;;  %v21251_v33 = vld [vmem:[%s22818_s14 + $0x1cc] sm:$0xf] }
 0x932   : > { %v18797_v24 = vld [vmem:[%s22818_s14 + $0x448] sm:$0xf]  ;;  %v18542_v28 = vor.u32 %v21271_v45, %v18541_v47  ;;  %v19247_v51 = vld [vmem:[%s22818_s14 + $0x7e8] sm:$0xf0] }
 0x933   : > { %12089 = vmatpush.bf16.msra.mxu3 %v19182_v4  ;;  %12064 = vmatpush.bf16.msra.mxu1 %v18638_v49  ;;  %v21335_v12 = vld [vmem:[%s22818_s14 + $0x464] sm:$0xf0]  ;;  %v18735_v4 = vld [vmem:[%s22818_s14 + $0x3e8] sm:$0xf0]  ;;  %v19250_v35 = vor.u32 %v21443_v50, %v19247_v51 }
 0x934   : > { %v19053_v6 = vld [vmem:[%s22818_s14 + $0x648] sm:$0xf]  ;;  %v18798_v32 = vor.u32 %v21335_v12, %v18797_v24  ;;  %v18738_v54 = vor.u32 %v21315_v38, %v18735_v4  ;;  %v21227_v47 = vld [vmem:[%s22818_s14 + $0x10c] sm:$0xf] }
 0x935   : > { %12077 = vmatpush.bf16.msra.mxu2 %v18894_v52  ;;  %12052 = vmatpush.bf16.msra.mxu0 %v18350_v10  ;;  %v21399_v7 = vld [vmem:[%s22818_s14 + $0x664] sm:$0xf0]  ;;  %v18482_v52 = vor.u32 %v21251_v33, %v18479_v27  ;;  %v21435_v10 = vld [vmem:[%s22818_s14 + $0x78c] sm:$0xf] }
 0x936   : > { %v18253_v46 = vld [vmem:[%s22818_s14 + $0x8] sm:$0xf]  ;;  %v19054_v39 = vor.u32 %v21399_v7, %v19053_v6  ;;  %v21291_v45 = vld [vmem:[%s22818_s14 + $0x30c] sm:$0xf] }
 0x937   : > { %12090 = vmatpush.bf16.msra.mxu3 %v19150_v60  ;;  %12065 = vmatpush.bf16.msra.mxu1 %v18606_v13  ;;  %v21199_v19 = vld [vmem:[%s22818_s14 + $0x24] sm:$0xf0]  ;;  %v18447_v60 = vld [vmem:[%s22818_s14 + $0x1a8] sm:$0xf0] }
 0x938   : > { %v18509_v40 = vld [vmem:[%s22818_s14 + $0x208] sm:$0xf]  ;;  %v18254_v42 = vor.u32 %v21199_v19, %v18253_v46  ;;  %v19215_v13 = vld [vmem:[%s22818_s14 + $0x7a8] sm:$0xf0] }
 0x939   : > { %12078 = vmatpush.bf16.msra.mxu2 %v18862_v14  ;;  %12053 = vmatpush.bf16.msra.mxu0 %v18318_v17  ;;  %v21263_v8 = vld [vmem:[%s22818_s14 + $0x224] sm:$0xf0]  ;;  %v18450_v14 = vor.u32 %v21243_v59, %v18447_v60  ;;  %v19218_v61 = vor.u32 %v21435_v10, %v19215_v13  ;;  %v21427_v17 = vld [vmem:[%s22818_s14 + $0x74c] sm:$0xf] }
 0x93a   : > { %v18765_v56 = vld [vmem:[%s22818_s14 + $0x408] sm:$0xf]  ;;  %v18510_v43 = vor.u32 %v21263_v8, %v18509_v40  ;;  %v18639_v12 = vld [vmem:[%s22818_s14 + $0x328] sm:$0xf0] }
 0x93b   : > { %12091 = vmatpush.bf16.msra.mxu3 %v19118_v18  ;;  %12066 = vmatpush.bf16.msra.mxu1 %v18574_v48  ;;  %v21327_v41 = vld [vmem:[%s22818_s14 + $0x424] sm:$0xf0]  ;;  %v18415_v18 = vld [vmem:[%s22818_s14 + $0x168] sm:$0xf0] }
 0x93c   : > { %v19021_v23 = vld [vmem:[%s22818_s14 + $0x608] sm:$0xf]  ;;  %v18766_v34 = vor.u32 %v21327_v41, %v18765_v56  ;;  %v19183_v48 = vld [vmem:[%s22818_s14 + $0x768] sm:$0xf0] }
 0x93d   : > { %12079 = vmatpush.bf16.msra.mxu2 %v18830_v36  ;;  %v21391_v31 = vld [vmem:[%s22818_s14 + $0x624] sm:$0xf0]  ;;  %12054 = vmatpush.bf16.msra.mxu0 %v18286_v26  ;;  %v18418_v36 = vor.u32 %v21235_v16, %v18415_v18  ;;  %v19186_v24 = vor.u32 %v21427_v17, %v19183_v48  ;;  %v21355_v6 = vld [vmem:[%s22818_s14 + $0x50c] sm:$0xf] }
 0x93e   : > { %v19022_v49 = vor.u32 %v21391_v31, %v19021_v23  ;;  %v18895_v7 = vld [vmem:[%s22818_s14 + $0x528] sm:$0xf0] }
 0x93f   : > { %12092 = vmatpush.bf16.msra.mxu3 %v19086_v44  ;;  %12067 = vmatpush.bf16.msra.mxu1 %v18542_v28  ;;  %v18383_v44 = vld [vmem:[%s22818_s14 + $0x128] sm:$0xf0]  ;;  %v18642_v28 = vor.u32 %v21291_v45, %v18639_v12  ;;  %v18997_v12 = vld [vmem:[%s22818_s14 + $0x5d0] sm:$0xf] }
 0x940   : > { %v21419_v26 = vld [vmem:[%s22818_s14 + $0x70c] sm:$0xf]  ;;  %v18386_v19 = vor.u32 %v21227_v47, %v18383_v44  ;;  %v21256_v47 = vld [vmem:[%s22818_s14 + $0x1ec] sm:$0xf0] }
 0x941   : > { %12080 = vmatpush.bf16.msra.mxu2 %v18798_v32  ;;  %12055 = vmatpush.bf16.msra.mxu0 %v18254_v42  ;;  %v19151_v46 = vld [vmem:[%s22818_s14 + $0x728] sm:$0xf0]  ;;  %v18898_v32 = vor.u32 %v21355_v6, %v18895_v7  ;;  %v18741_v44 = vld [vmem:[%s22818_s14 + $0x3d0] sm:$0xf] }
 0x942   : > { %v21219_v40 = vld [vmem:[%s22818_s14 + $0xcc] sm:$0xf]  ;;  %v21384_v6 = vld [vmem:[%s22818_s14 + $0x5ec] sm:$0xf0] }
 0x943   : > { %12093 = vmatpush.bf16.msra.mxu3 %v19054_v39  ;;  %12068 = vmatpush.bf16.msra.mxu1 %v18510_v43  ;;  %v18351_v8 = vld [vmem:[%s22818_s14 + $0xe8] sm:$0xf0]  ;;  %v19154_v39 = vor.u32 %v21419_v26, %v19151_v46  ;;  %v19253_v46 = vld [vmem:[%s22818_s14 + $0x7d0] sm:$0xf] }
 0x944   : > { %12056 = vmatmul.bf16.vlgmr.msra.gmra.mxu0 %v25623_v22  ;;  %v21283_v56 = vld [vmem:[%s22818_s14 + $0x2cc] sm:$0xf]  ;;  %v18354_v38 = vor.u32 %v21219_v40, %v18351_v8  ;;  %v18998_v8 = vor.u32 %v21384_v6, %v18997_v12  ;;  %v18325_v12 = vld [vmem:[%s22818_s14 + $0x90] sm:$0xf] }
 0x945   : > { %12081 = vmatpush.bf16.msra.mxu2 %v18766_v34  ;;  %12100 = vmatpush.bf16.msrb.mxu0 %v18482_v52  ;;  %v18607_v41 = vld [vmem:[%s22818_s14 + $0x2e8] sm:$0xf0]  ;;  %v21216_v6 = vld [vmem:[%s22818_s14 + $0xac] sm:$0xf0] }
 0x946   : > { %12069 = vmatmul.bf16.vlgmr.msra.gmra.mxu1 %v25627_v2  ;;  %v21347_v23 = vld [vmem:[%s22818_s14 + $0x4cc] sm:$0xf]  ;;  %v18610_v42 = vor.u32 %v21283_v56, %v18607_v41  ;;  %v18453_v56 = vld [vmem:[%s22818_s14 + $0x190] sm:$0xf] }
 0x947   : > { %12094 = vmatpush.bf16.msra.mxu3 %v19022_v49  ;;  %12113 = vmatpush.bf16.msrb.mxu1 %v18738_v54  ;;  %v18863_v31 = vld [vmem:[%s22818_s14 + $0x4e8] sm:$0xf0]  ;;  %v18709_v41 = vld [vmem:[%s22818_s14 + $0x390] sm:$0xf] }
 0x948   : > { %12082 = vmatmul.bf16.vlgmr.msra.gmra.mxu2 %v25621_v21  ;;  %v21411_v33 = vld [vmem:[%s22818_s14 + $0x6cc] sm:$0xf]  ;;  %v18866_v4 = vor.u32 %v21347_v23, %v18863_v31  ;;  %v21312_v31 = vld [vmem:[%s22818_s14 + $0x3ac] sm:$0xf0] }
 0x949   : > { %12126 = vmatpush.bf16.msrb.mxu2 %v18994_v37  ;;  %12101 = vmatpush.bf16.msrb.mxu0 %v18450_v14  ;;  %v19119_v27 = vld [vmem:[%s22818_s14 + $0x6e8] sm:$0xf0]  ;;  %v18322_v37 = vor.u32 %v21211_v57, %v18319_v29  ;;  %v18710_v57 = vor.u32 %v21312_v31, %v18709_v41  ;;  %v18293_v41 = vld [vmem:[%s22818_s14 + $0x50] sm:$0xf] }
 0x94a   : > { %12095 = vmatmul.bf16.vlgmr.msra.gmra.mxu3 %v25625_v25  ;;  %v21275_v43 = vld [vmem:[%s22818_s14 + $0x28c] sm:$0xf]  ;;  %v19122_v34 = vor.u32 %v21411_v33, %v19119_v27  ;;  %v18965_v33 = vld [vmem:[%s22818_s14 + $0x590] sm:$0xf] }
 0x94b   : > { %12139 = vmatpush.bf16.msrb.mxu3 %v19250_v35  ;;  %12114 = vmatpush.bf16.msrb.mxu1 %v18706_v15  ;;  %v18575_v50 = vld [vmem:[%s22818_s14 + $0x2a8] sm:$0xf0]  ;;  %v21376_v27 = vld [vmem:[%s22818_s14 + $0x5ac] sm:$0xf0] }
 0x94c   : > { %v21339_v51 = vld [vmem:[%s22818_s14 + $0x48c] sm:$0xf]  ;;  %v18578_v59 = vor.u32 %v21275_v43, %v18575_v50  ;;  %v18966_v29 = vor.u32 %v21376_v27, %v18965_v33  ;;  %v18421_v43 = vld [vmem:[%s22818_s14 + $0x150] sm:$0xf] }
 0x94d   : > { %12127 = vmatpush.bf16.msrb.mxu2 %v18962_v5  ;;  %12102 = vmatpush.bf16.msrb.mxu0 %v18418_v36  ;;  %v18831_v49 = vld [vmem:[%s22818_s14 + $0x4a8] sm:$0xf0]  ;;  %v18677_v50 = vld [vmem:[%s22818_s14 + $0x350] sm:$0xf] }
 0x94e   : > { %v21403_v52 = vld [vmem:[%s22818_s14 + $0x68c] sm:$0xf]  ;;  %v18834_v60 = vor.u32 %v21339_v51, %v18831_v49  ;;  %v21304_v49 = vld [vmem:[%s22818_s14 + $0x36c] sm:$0xf0] }
 0x94f   : > { %12140 = vmatpush.bf16.msrb.mxu3 %v19218_v61  ;;  %12115 = vmatpush.bf16.msrb.mxu1 %v18674_v55  ;;  %v19087_v54 = vld [vmem:[%s22818_s14 + $0x6a8] sm:$0xf0]  ;;  %v18549_v31 = vld [vmem:[%s22818_s14 + $0x250] sm:$0xf] }
 0x950   : > { %v18287_v35 = vld [vmem:[%s22818_s14 + $0x68] sm:$0xf0]  ;;  %v19090_v3 = vor.u32 %v21403_v52, %v19087_v54  ;;  %v18933_v52 = vld [vmem:[%s22818_s14 + $0x550] sm:$0xf] }
 0x951   : > { %12128 = vmatpush.bf16.msrb.mxu2 %v18930_v30  ;;  %12103 = vmatpush.bf16.msrb.mxu0 %v18386_v19  ;;  %v21267_v63 = vld [vmem:[%s22818_s14 + $0x24c] sm:$0xf]  ;;  %v18290_v5 = vor.u32 %v21203_v62, %v18287_v35  ;;  %v18485_v30 = vld [vmem:[%s22818_s14 + $0x1d0] sm:$0xf]  ;;  %v18678_v62 = vor.u32 %v21304_v49, %v18677_v50 }
 0x952   : > { %v18543_v9 = vld [vmem:[%s22818_s14 + $0x268] sm:$0xf0]  ;;  %v21448_v19 = vld [vmem:[%s22818_s14 + $0x7ec] sm:$0xf0] }
 0x953   : > { %12141 = vmatpush.bf16.msrb.mxu3 %v19186_v24  ;;  %12116 = vmatpush.bf16.msrb.mxu1 %v18642_v28  ;;  %v21331_v10 = vld [vmem:[%s22818_s14 + $0x44c] sm:$0xf]  ;;  %v18546_v20 = vor.u32 %v21267_v63, %v18543_v9  ;;  %v21320_v24 = vld [vmem:[%s22818_s14 + $0x3ec] sm:$0xf0]  ;;  %v19254_v23 = vor.u32 %v21448_v19, %v19253_v46 }
 0x954   : > { %v18799_v13 = vld [vmem:[%s22818_s14 + $0x468] sm:$0xf0]  ;;  %v18742_v40 = vor.u32 %v21320_v24, %v18741_v44  ;;  %v21368_v54 = vld [vmem:[%s22818_s14 + $0x56c] sm:$0xf0] }
 0x955   : > { %12129 = vmatpush.bf16.msrb.mxu2 %v18898_v32  ;;  %12104 = vmatpush.bf16.msrb.mxu0 %v18354_v38  ;;  %v21395_v14 = vld [vmem:[%s22818_s14 + $0x64c] sm:$0xf]  ;;  %v18802_v61 = vor.u32 %v21331_v10, %v18799_v13  ;;  %v18486_v32 = vor.u32 %v21256_v47, %v18485_v30  ;;  %v19221_v38 = vld [vmem:[%s22818_s14 + $0x790] sm:$0xf]  ;;  %v18934_v35 = vor.u32 %v21368_v54, %v18933_v52 }
 0x956   : > { %v19055_v15 = vld [vmem:[%s22818_s14 + $0x668] sm:$0xf0]  ;;  %v18389_v63 = vld [vmem:[%s22818_s14 + $0x110] sm:$0xf] }
 0x957   : > { %12142 = vmatpush.bf16.msrb.mxu3 %v19154_v39  ;;  %12117 = vmatpush.bf16.msrb.mxu1 %v18610_v42  ;;  %v21195_v16 = vld [vmem:[%s22818_s14 + $0xc] sm:$0xf]  ;;  %v19058_v17 = vor.u32 %v21395_v14, %v19055_v15  ;;  %v21248_v39 = vld [vmem:[%s22818_s14 + $0x1ac] sm:$0xf0] }
 0x958   : > { %v18255_v18 = vld [vmem:[%s22818_s14 + $0x28] sm:$0xf0]  ;;  %v21440_v42 = vld [vmem:[%s22818_s14 + $0x7ac] sm:$0xf0] }
 0x959   : > { %12130 = vmatpush.bf16.msrb.mxu2 %v18866_v4  ;;  %12105 = vmatpush.bf16.msrb.mxu0 %v18322_v37  ;;  %v21259_v53 = vld [vmem:[%s22818_s14 + $0x20c] sm:$0xf]  ;;  %v18258_v45 = vor.u32 %v21195_v16, %v18255_v18  ;;  %v18454_v4 = vor.u32 %v21248_v39, %v18453_v56  ;;  %v19222_v51 = vor.u32 %v21440_v42, %v19221_v38  ;;  %v19189_v37 = vld [vmem:[%s22818_s14 + $0x750] sm:$0xf] }
 0x95a   : > { %v18511_v11 = vld [vmem:[%s22818_s14 + $0x228] sm:$0xf0]  ;;  %v18645_v9 = vld [vmem:[%s22818_s14 + $0x310] sm:$0xf] }
 0x95b   : > { %12143 = vmatpush.bf16.msrb.mxu3 %v19122_v34  ;;  %12118 = vmatpush.bf16.msrb.mxu1 %v18578_v59  ;;  %v21323_v58 = vld [vmem:[%s22818_s14 + $0x40c] sm:$0xf]  ;;  %v18514_v7 = vor.u32 %v21259_v53, %v18511_v11  ;;  %v21240_v34 = vld [vmem:[%s22818_s14 + $0x16c] sm:$0xf0] }
 0x95c   : > { %v18767_v48 = vld [vmem:[%s22818_s14 + $0x428] sm:$0xf0]  ;;  %v21432_v59 = vld [vmem:[%s22818_s14 + $0x76c] sm:$0xf0] }
 0x95d   : > { %12131 = vmatpush.bf16.msrb.mxu2 %v18834_v60  ;;  %v21387_v36 = vld [vmem:[%s22818_s14 + $0x60c] sm:$0xf]  ;;  %12106 = vmatpush.bf16.msrb.mxu0 %v18290_v5  ;;  %v18770_v26 = vor.u32 %v21323_v58, %v18767_v48  ;;  %v18422_v60 = vor.u32 %v21240_v34, %v18421_v43  ;;  %v19190_v10 = vor.u32 %v21432_v59, %v19189_v37  ;;  %v21296_v13 = vld [vmem:[%s22818_s14 + $0x32c] sm:$0xf0] }
 0x95e   : > { %v19023_v55 = vld [vmem:[%s22818_s14 + $0x628] sm:$0xf0]  ;;  %v18901_v14 = vld [vmem:[%s22818_s14 + $0x510] sm:$0xf] }
 0x95f   : > { %12144 = vmatpush.bf16.msrb.mxu3 %v19090_v3  ;;  %12119 = vmatpush.bf16.msrb.mxu1 %v18546_v20  ;;  %v19026_v28 = vor.u32 %v21387_v36, %v19023_v55  ;;  %v21232_v3 = vld [vmem:[%s22818_s14 + $0x12c] sm:$0xf0]  ;;  %v18646_v20 = vor.u32 %v21296_v13, %v18645_v9  ;;  %v21380_v13 = vld [vmem:[%s22818_s14 + $0x5d4] sm:$0xf] }
 0x960   : > { %v21360_v15 = vld [vmem:[%s22818_s14 + $0x52c] sm:$0xf0]  ;;  %v18390_v18 = vor.u32 %v21232_v3, %v18389_v63  ;;  %v18487_v63 = vld [vmem:[%s22818_s14 + $0x1f0] sm:$0xf0] }
 0x961   : > { %12132 = vmatpush.bf16.msrb.mxu2 %v18802_v61  ;;  %12107 = vmatpush.bf16.msrb.mxu0 %v18258_v45  ;;  %v19157_v5 = vld [vmem:[%s22818_s14 + $0x710] sm:$0xf]  ;;  %v18902_v61 = vor.u32 %v21360_v15, %v18901_v14  ;;  %v21316_v3 = vld [vmem:[%s22818_s14 + $0x3d4] sm:$0xf] }
 0x962   : > { %v21424_v16 = vld [vmem:[%s22818_s14 + $0x72c] sm:$0xf0]  ;;  %v18999_v14 = vld [vmem:[%s22818_s14 + $0x5f0] sm:$0xf0] }
 0x963   : > { %12145 = vmatpush.bf16.msrb.mxu3 %v19058_v17  ;;  %12120 = vmatpush.bf16.msrb.mxu1 %v18514_v7  ;;  %v18357_v53 = vld [vmem:[%s22818_s14 + $0xd0] sm:$0xf]  ;;  %v19158_v17 = vor.u32 %v21424_v16, %v19157_v5  ;;  %v21444_v16 = vld [vmem:[%s22818_s14 + $0x7d4] sm:$0xf] }
 0x964   : > { %12108 = vmatmul.bf16.vlgmr.msrb.gmra.mxu0 %v25623_v22  ;;  %v21224_v11 = vld [vmem:[%s22818_s14 + $0xec] sm:$0xf0] }
 0x965   : > { %12133 = vmatpush.bf16.msrb.mxu2 %v18770_v26  ;;  %12152 = vmatpush.bf16.msra.mxu0 %v18486_v32  ;;  %v18613_v58 = vld [vmem:[%s22818_s14 + $0x2d0] sm:$0xf]  ;;  %v18358_v44 = vor.u32 %v21224_v11, %v18357_v53  ;;  %v19002_v11 = vor.u32 %v21380_v13, %v18999_v14 }
 0x966   : > { %12121 = vmatmul.bf16.vlgmr.msrb.gmra.mxu1 %v25627_v2  ;;  %v21288_v48 = vld [vmem:[%s22818_s14 + $0x2ec] sm:$0xf0] }
 0x967   : > { %12146 = vmatpush.bf16.msrb.mxu3 %v19026_v28  ;;  %12165 = vmatpush.bf16.msra.mxu1 %v18742_v40  ;;  %v18869_v36 = vld [vmem:[%s22818_s14 + $0x4d0] sm:$0xf]  ;;  %v18614_v45 = vor.u32 %v21288_v48, %v18613_v58  ;;  %v21244_v58 = vld [vmem:[%s22818_s14 + $0x194] sm:$0xf] }
 0x968   : > { %12134 = vmatmul.bf16.vlgmr.msrb.gmra.mxu2 %v25621_v21  ;;  %v21352_v55 = vld [vmem:[%s22818_s14 + $0x4ec] sm:$0xf0]  ;;  %v21308_v48 = vld [vmem:[%s22818_s14 + $0x394] sm:$0xf] }
 0x969   : > { %12178 = vmatpush.bf16.msra.mxu2 %v18998_v8  ;;  %12153 = vmatpush.bf16.msra.mxu0 %v18454_v4  ;;  %v19125_v30 = vld [vmem:[%s22818_s14 + $0x6d0] sm:$0xf]  ;;  %v18870_v24 = vor.u32 %v21352_v55, %v18869_v36  ;;  %v18326_v8 = vor.u32 %v21216_v6, %v18325_v12  ;;  %v18711_v55 = vld [vmem:[%s22818_s14 + $0x3b0] sm:$0xf0] }
 0x96a   : > { %12147 = vmatmul.bf16.vlgmr.msrb.gmra.mxu3 %v25625_v25  ;;  %v21416_v47 = vld [vmem:[%s22818_s14 + $0x6ec] sm:$0xf0]  ;;  %v18714_v12 = vor.u32 %v21308_v48, %v18711_v55 }
 0x96b   : > { %12191 = vmatpush.bf16.msra.mxu3 %v19254_v23  ;;  %12166 = vmatpush.bf16.msra.mxu1 %v18710_v57  ;;  %v18581_v7 = vld [vmem:[%s22818_s14 + $0x290] sm:$0xf]  ;;  %v19126_v26 = vor.u32 %v21416_v47, %v19125_v30  ;;  %v21372_v30 = vld [vmem:[%s22818_s14 + $0x594] sm:$0xf] }
 0x96c   : > { %v21280_v46 = vld [vmem:[%s22818_s14 + $0x2ac] sm:$0xf0]  ;;  %v18967_v47 = vld [vmem:[%s22818_s14 + $0x5b0] sm:$0xf0] }
 0x96d   : > { %12179 = vmatpush.bf16.msra.mxu2 %v18966_v29  ;;  %12154 = vmatpush.bf16.msra.mxu0 %v18422_v60  ;;  %v18837_v19 = vld [vmem:[%s22818_s14 + $0x490] sm:$0xf]  ;;  %v18582_v56 = vor.u32 %v21280_v46, %v18581_v7  ;;  %v18970_v6 = vor.u32 %v21372_v30, %v18967_v47  ;;  %v21236_v7 = vld [vmem:[%s22818_s14 + $0x154] sm:$0xf] }
 0x96e   : > { %v21344_v28 = vld [vmem:[%s22818_s14 + $0x4ac] sm:$0xf0]  ;;  %v21300_v46 = vld [vmem:[%s22818_s14 + $0x354] sm:$0xf] }
 0x96f   : > { %12192 = vmatpush.bf16.msra.mxu3 %v19222_v51  ;;  %12167 = vmatpush.bf16.msra.mxu1 %v18678_v62  ;;  %v19093_v32 = vld [vmem:[%s22818_s14 + $0x690] sm:$0xf]  ;;  %v18838_v39 = vor.u32 %v21344_v28, %v18837_v19  ;;  %v18679_v28 = vld [vmem:[%s22818_s14 + $0x370] sm:$0xf0] }
 0x970   : > { %v21408_v40 = vld [vmem:[%s22818_s14 + $0x6ac] sm:$0xf0]  ;;  %v21204_v30 = vld [vmem:[%s22818_s14 + $0x54] sm:$0xf] }
 0x971   : > { %12180 = vmatpush.bf16.msra.mxu2 %v18934_v35  ;;  %12155 = vmatpush.bf16.msra.mxu0 %v18390_v18  ;;  %v21208_v23 = vld [vmem:[%s22818_s14 + $0x6c] sm:$0xf0]  ;;  %v19094_v33 = vor.u32 %v21408_v40, %v19093_v32  ;;  %v21252_v35 = vld [vmem:[%s22818_s14 + $0x1d4] sm:$0xf] }
 0x972   : > { %v21272_v27 = vld [vmem:[%s22818_s14 + $0x26c] sm:$0xf0]  ;;  %v18294_v29 = vor.u32 %v21208_v23, %v18293_v41  ;;  %v19255_v18 = vld [vmem:[%s22818_s14 + $0x7f0] sm:$0xf0]  ;;  %v18682_v41 = vor.u32 %v21300_v46, %v18679_v28 }
 0x973   : > { %12193 = vmatpush.bf16.msra.mxu3 %v19190_v10  ;;  %12168 = vmatpush.bf16.msra.mxu1 %v18646_v20  ;;  %v18805_v38 = vld [vmem:[%s22818_s14 + $0x450] sm:$0xf]  ;;  %v18550_v50 = vor.u32 %v21272_v27, %v18549_v31  ;;  %v18743_v10 = vld [vmem:[%s22818_s14 + $0x3f0] sm:$0xf0]  ;;  %v19258_v36 = vor.u32 %v21444_v16, %v19255_v18 }
 0x974   : > { %v21336_v42 = vld [vmem:[%s22818_s14 + $0x46c] sm:$0xf0]  ;;  %v18746_v53 = vor.u32 %v21316_v3, %v18743_v10  ;;  %v21364_v32 = vld [vmem:[%s22818_s14 + $0x554] sm:$0xf] }
 0x975   : > { %12181 = vmatpush.bf16.msra.mxu2 %v18902_v61  ;;  %12156 = vmatpush.bf16.msra.mxu0 %v18358_v44  ;;  %v19061_v4 = vld [vmem:[%s22818_s14 + $0x650] sm:$0xf]  ;;  %v18806_v51 = vor.u32 %v21336_v42, %v18805_v38  ;;  %v18490_v61 = vor.u32 %v21252_v35, %v18487_v63  ;;  %v21436_v44 = vld [vmem:[%s22818_s14 + $0x794] sm:$0xf]  ;;  %v25913_v35 = vld [vmem:[%s972_s4] sm:$0xff] }
 0x976   : > { %v21400_v57 = vld [vmem:[%s22818_s14 + $0x66c] sm:$0xf0]  ;;  %v18935_v40 = vld [vmem:[%s22818_s14 + $0x570] sm:$0xf0]  ;;  %v10634_v16 = vperm.slane %v25913_v35, 0 }
 0x977   : > { %12194 = vmatpush.bf16.msra.mxu3 %v19158_v17  ;;  %12169 = vmatpush.bf16.msra.mxu1 %v18614_v45  ;;  %v18261_v43 = vld [vmem:[%s22818_s14 + $0x10] sm:$0xf]  ;;  %v19062_v37 = vor.u32 %v21400_v57, %v19061_v4  ;;  %v18455_v17 = vld [vmem:[%s22818_s14 + $0x1b0] sm:$0xf0]  ;;  %v18938_v23 = vor.u32 %v21364_v32, %v18935_v40 }
 0x978   : > { %v21200_v34 = vld [vmem:[%s22818_s14 + $0x2c] sm:$0xf0]  ;;  %v19223_v45 = vld [vmem:[%s22818_s14 + $0x7b0] sm:$0xf0] }
 0x979   : > { %12182 = vmatpush.bf16.msra.mxu2 %v18870_v24  ;;  %12157 = vmatpush.bf16.msra.mxu0 %v18326_v8  ;;  %v18517_v49 = vld [vmem:[%s22818_s14 + $0x210] sm:$0xf]  ;;  %v18262_v9 = vor.u32 %v21200_v34, %v18261_v43  ;;  %v18458_v24 = vor.u32 %v21244_v58, %v18455_v17  ;;  %v19226_v19 = vor.u32 %v21436_v44, %v19223_v45  ;;  %v21428_v8 = vld [vmem:[%s22818_s14 + $0x754] sm:$0xf] }
 0x97a   : > { %v21264_v52 = vld [vmem:[%s22818_s14 + $0x22c] sm:$0xf0]  ;;  %v21228_v31 = vld [vmem:[%s22818_s14 + $0x114] sm:$0xf] }
 0x97b   : > { %12195 = vmatpush.bf16.msra.mxu3 %v19126_v26  ;;  %12170 = vmatpush.bf16.msra.mxu1 %v18582_v56  ;;  %v18773_v54 = vld [vmem:[%s22818_s14 + $0x410] sm:$0xf]  ;;  %v18518_v15 = vor.u32 %v21264_v52, %v18517_v49  ;;  %v18423_v26 = vld [vmem:[%s22818_s14 + $0x170] sm:$0xf0] }
 0x97c   : > { %v21328_v59 = vld [vmem:[%s22818_s14 + $0x42c] sm:$0xf0]  ;;  %v19191_v56 = vld [vmem:[%s22818_s14 + $0x770] sm:$0xf0] }
 0x97d   : > { %12183 = vmatpush.bf16.msra.mxu2 %v18838_v39  ;;  %v19029_v60 = vld [vmem:[%s22818_s14 + $0x610] sm:$0xf]  ;;  %12158 = vmatpush.bf16.msra.mxu0 %v18294_v29  ;;  %v18774_v5 = vor.u32 %v21328_v59, %v18773_v54  ;;  %v18426_v39 = vor.u32 %v21236_v7, %v18423_v26  ;;  %v21292_v27 = vld [vmem:[%s22818_s14 + $0x314] sm:$0xf]  ;;  %v19194_v38 = vor.u32 %v21428_v8, %v19191_v56 }
 0x97e   : > { %v21392_v62 = vld [vmem:[%s22818_s14 + $0x62c] sm:$0xf0]  ;;  %v18647_v42 = vld [vmem:[%s22818_s14 + $0x330] sm:$0xf0] }
 0x97f   : > { %12196 = vmatpush.bf16.msra.mxu3 %v19094_v33  ;;  %12171 = vmatpush.bf16.msra.mxu1 %v18550_v50  ;;  %v19030_v20 = vor.u32 %v21392_v62, %v19029_v60  ;;  %v18391_v33 = vld [vmem:[%s22818_s14 + $0x130] sm:$0xf0] }
 0x980   : > { %v21356_v4 = vld [vmem:[%s22818_s14 + $0x514] sm:$0xf]  ;;  %v18394_v34 = vor.u32 %v21228_v31, %v18391_v33 }
 0x981   : > { %12184 = vmatpush.bf16.msra.mxu2 %v18806_v51  ;;  %12159 = vmatpush.bf16.msra.mxu0 %v18262_v9  ;;  %v18903_v57 = vld [vmem:[%s22818_s14 + $0x530] sm:$0xf0]  ;;  %v18650_v51 = vor.u32 %v21292_v27, %v18647_v42 }
 0x982   : > { %v21420_v29 = vld [vmem:[%s22818_s14 + $0x714] sm:$0xf]  ;;  %v18906_v49 = vor.u32 %v21356_v4, %v18903_v57 }
 0x983   : > { %12197 = vmatpush.bf16.msra.mxu3 %v19062_v37  ;;  %12172 = vmatpush.bf16.msra.mxu1 %v18518_v15  ;;  %v19159_v43 = vld [vmem:[%s22818_s14 + $0x730] sm:$0xf0] }
 0x984   : > { %12160 = vmatmul.bf16.vlgmr.msra.gmra.mxu0 %v25623_v22  ;;  %v21220_v50 = vld [vmem:[%s22818_s14 + $0xd4] sm:$0xf]  ;;  %v19162_v59 = vor.u32 %v21420_v29, %v19159_v43  ;;  %v18493_v43 = vld [vmem:[%s22818_s14 + $0x1d8] sm:$0xf] }
 0x985   : > { %12185 = vmatpush.bf16.msra.mxu2 %v18774_v5  ;;  %12204 = vmatpush.bf16.msrb.mxu0 %v18490_v61  ;;  %v18359_v52 = vld [vmem:[%s22818_s14 + $0xf0] sm:$0xf0] }
 0x986   : > { %12173 = vmatmul.bf16.vlgmr.msra.gmra.mxu1 %v25627_v2  ;;  %v21284_v54 = vld [vmem:[%s22818_s14 + $0x2d4] sm:$0xf]  ;;  %v18362_v9 = vor.u32 %v21220_v50, %v18359_v52  ;;  %v18749_v50 = vld [vmem:[%s22818_s14 + $0x3d8] sm:$0xf] }
 0x987   : > { %12198 = vmatpush.bf16.msra.mxu3 %v19030_v20  ;;  %12217 = vmatpush.bf16.msrb.mxu1 %v18746_v53  ;;  %v18615_v37 = vld [vmem:[%s22818_s14 + $0x2f0] sm:$0xf0]  ;;  %v11953_v48 = vpop.f32.mrf.mxu0  ;;  %v19005_v52 = vld [vmem:[%s22818_s14 + $0x5d8] sm:$0xf] }
 0x988   : > { %12186 = vmatmul.bf16.vlgmr.msra.gmra.mxu2 %v25621_v21  ;;  %v21348_v60 = vld [vmem:[%s22818_s14 + $0x4d4] sm:$0xf]  ;;  %v18618_v13 = vor.u32 %v21284_v54, %v18615_v37  ;;  %v11954_v45 = vadd.f32 %v11953_v48, %v10634_v16  ;;  %v21385_v54 = vld [vmem:[%s22818_s14 + $0x5f4] sm:$0xf0] }
 0x989   : > { %12230 = vmatpush.bf16.msrb.mxu2 %v19002_v11  ;;  %12205 = vmatpush.bf16.msrb.mxu0 %v18458_v24  ;;  %v18871_v62 = vld [vmem:[%s22818_s14 + $0x4f0] sm:$0xf0]  ;;  %v11966_v24 = vpop.f32.mrf.mxu1  ;;  %v21249_v16 = vld [vmem:[%s22818_s14 + $0x1b4] sm:$0xf0] }
 0x98a   : > { %12199 = vmatmul.bf16.vlgmr.msra.gmra.mxu3 %v25625_v25  ;;  %v21412_v63 = vld [vmem:[%s22818_s14 + $0x6d4] sm:$0xf]  ;;  %v18874_v14 = vor.u32 %v21348_v60, %v18871_v62  ;;  %v11967_v28 = vadd.f32 %v11966_v24, %v11954_v45  ;;  %v21241_v45 = vld [vmem:[%s22818_s14 + $0x174] sm:$0xf0] }
 0x98b   : > { %12243 = vmatpush.bf16.msrb.mxu3 %v19258_v36  ;;  %12218 = vmatpush.bf16.msrb.mxu1 %v18714_v12  ;;  %v19127_v3 = vld [vmem:[%s22818_s14 + $0x6f0] sm:$0xf0]  ;;  %v11979_v33 = vpop.f32.mrf.mxu2  ;;  %v18685_v24 = vld [vmem:[%s22818_s14 + $0x358] sm:$0xf] }
 0x98c   : > { %v21212_v10 = vld [vmem:[%s22818_s14 + $0x94] sm:$0xf]  ;;  %v19130_v18 = vor.u32 %v21412_v63, %v19127_v3  ;;  %v11980_v57 = vadd.f32 %v11979_v33, %v11967_v28  ;;  %v19261_v63 = vld [vmem:[%s22818_s14 + $0x7d8] sm:$0xf] }
 0x98d   : > { %12231 = vmatpush.bf16.msrb.mxu2 %v18970_v6  ;;  %12206 = vmatpush.bf16.msrb.mxu0 %v18426_v39  ;;  %v18327_v15 = vld [vmem:[%s22818_s14 + $0xb0] sm:$0xf0]  ;;  %v11992_v29 = vpop.f32.mrf.mxu3  ;;  %v21449_v3 = vld [vmem:[%s22818_s14 + $0x7f4] sm:$0xf0] }
 0x98e   : > { %v21276_v5 = vld [vmem:[%s22818_s14 + $0x294] sm:$0xf]  ;;  %v18330_v17 = vor.u32 %v21212_v10, %v18327_v15  ;;  %v25948_v37 = vadd.f32 %v11992_v29, %v11980_v57  ;;  %v19006_v15 = vor.u32 %v21385_v54, %v19005_v52  ;;  %v18909_v33 = vld [vmem:[%s22818_s14 + $0x518] sm:$0xf] }
 0x98f   : > { %12244 = vmatpush.bf16.msrb.mxu3 %v19226_v19  ;;  %12219 = vmatpush.bf16.msrb.mxu1 %v18682_v41  ;;  %v18583_v20 = vld [vmem:[%s22818_s14 + $0x2b0] sm:$0xf0] }
 0x990   : > { %v21340_v61 = vld [vmem:[%s22818_s14 + $0x494] sm:$0xf]  ;;  %v18586_v36 = vor.u32 %v21276_v5, %v18583_v20  ;;  %v18461_v5 = vld [vmem:[%s22818_s14 + $0x198] sm:$0xf]  ;;  %v19262_v20 = vor.u32 %v21449_v3, %v19261_v63 }
 0x991   : > { %12232 = vmatpush.bf16.msrb.mxu2 %v18938_v23  ;;  %12207 = vmatpush.bf16.msrb.mxu0 %v18394_v34  ;;  %v18839_v53 = vld [vmem:[%s22818_s14 + $0x4b0] sm:$0xf0]  ;;  %v21257_v34 = vld [vmem:[%s22818_s14 + $0x1f4] sm:$0xf0] }
 0x992   : > { %v21404_v11 = vld [vmem:[%s22818_s14 + $0x694] sm:$0xf]  ;;  %v18842_v55 = vor.u32 %v21340_v61, %v18839_v53  ;;  %v21313_v61 = vld [vmem:[%s22818_s14 + $0x3b4] sm:$0xf0] }
 0x993   : > { %12245 = vmatpush.bf16.msrb.mxu3 %v19194_v38  ;;  %12220 = vmatpush.bf16.msrb.mxu1 %v18650_v51  ;;  %v19095_v58 = vld [vmem:[%s22818_s14 + $0x6b0] sm:$0xf0]  ;;  %v18973_v53 = vld [vmem:[%s22818_s14 + $0x598] sm:$0xf]  ;;  %v11981_v48 = vpop.f32.mrf.mxu2 }
 0x994   : > { %v18295_v47 = vld [vmem:[%s22818_s14 + $0x70] sm:$0xf0]  ;;  %v19098_v12 = vor.u32 %v21404_v11, %v19095_v58  ;;  %v21377_v11 = vld [vmem:[%s22818_s14 + $0x5b4] sm:$0xf0] }
 0x995   : > { %12233 = vmatpush.bf16.msrb.mxu2 %v18906_v49  ;;  %12208 = vmatpush.bf16.msrb.mxu0 %v18362_v9  ;;  %v21268_v44 = vld [vmem:[%s22818_s14 + $0x254] sm:$0xf]  ;;  %v18298_v32 = vor.u32 %v21204_v30, %v18295_v47  ;;  %v21321_v49 = vld [vmem:[%s22818_s14 + $0x3f4] sm:$0xf0]  ;;  %v11968_v9 = vpop.f32.mrf.mxu1  ;;  %v18974_v47 = vor.u32 %v21377_v11, %v18973_v53 }
 0x996   : > { %v18551_v6 = vld [vmem:[%s22818_s14 + $0x270] sm:$0xf0]  ;;  %v19229_v58 = vld [vmem:[%s22818_s14 + $0x798] sm:$0xf] }
 0x997   : > { %12246 = vmatpush.bf16.msrb.mxu3 %v19162_v59  ;;  %12221 = vmatpush.bf16.msrb.mxu1 %v18618_v13  ;;  %v21332_v7 = vld [vmem:[%s22818_s14 + $0x454] sm:$0xf]  ;;  %v18554_v56 = vor.u32 %v21268_v44, %v18551_v6  ;;  %v11955_v59 = vpop.f32.mrf.mxu0  ;;  %v18494_v13 = vor.u32 %v21257_v34, %v18493_v43  ;;  %v18429_v44 = vld [vmem:[%s22818_s14 + $0x158] sm:$0xf] }
 0x998   : > { %v18807_v26 = vld [vmem:[%s22818_s14 + $0x470] sm:$0xf0]  ;;  %v21305_v6 = vld [vmem:[%s22818_s14 + $0x374] sm:$0xf0]  ;;  %v18430_v28 = vor.u32 %v21241_v45, %v18429_v44 }
 0x999   : > { %12234 = vmatpush.bf16.msrb.mxu2 %v18874_v14  ;;  %v21396_v46 = vld [vmem:[%s22818_s14 + $0x654] sm:$0xf]  ;;  %12209 = vmatpush.bf16.msrb.mxu0 %v18330_v17  ;;  %v18810_v39 = vor.u32 %v21332_v7, %v18807_v26  ;;  %v18750_v14 = vor.u32 %v21321_v49, %v18749_v50  ;;  %v21441_v17 = vld [vmem:[%s22818_s14 + $0x7b4] sm:$0xf0] }
 0x99a   : > { %v19063_v19 = vld [vmem:[%s22818_s14 + $0x670] sm:$0xf0]  ;;  %v18941_v7 = vld [vmem:[%s22818_s14 + $0x558] sm:$0xf] }
 0x99b   : > { %12247 = vmatpush.bf16.msrb.mxu3 %v19130_v18  ;;  %v21196_v40 = vld [vmem:[%s22818_s14 + $0x14] sm:$0xf]  ;;  %12222 = vmatpush.bf16.msrb.mxu1 %v18586_v36  ;;  %v19066_v27 = vor.u32 %v21396_v46, %v19063_v19  ;;  %v18717_v18 = vld [vmem:[%s22818_s14 + $0x398] sm:$0xf]  ;;  %v18462_v36 = vor.u32 %v21249_v16, %v18461_v5 }
 0x99c   : > { %v18263_v8 = vld [vmem:[%s22818_s14 + $0x30] sm:$0xf0]  ;;  %v18718_v30 = vor.u32 %v21313_v61, %v18717_v18  ;;  %v21369_v26 = vld [vmem:[%s22818_s14 + $0x574] sm:$0xf0] }
 0x99d   : > { %12235 = vmatpush.bf16.msrb.mxu2 %v18842_v55  ;;  %v21260_v41 = vld [vmem:[%s22818_s14 + $0x214] sm:$0xf]  ;;  %12210 = vmatpush.bf16.msrb.mxu0 %v18298_v32  ;;  %v18266_v51 = vor.u32 %v21196_v40, %v18263_v8  ;;  %v11994_v55 = vpop.f32.mrf.mxu3  ;;  %v19197_v46 = vld [vmem:[%s22818_s14 + $0x758] sm:$0xf]  ;;  %v18686_v40 = vor.u32 %v21305_v6, %v18685_v24  ;;  %v18942_v8 = vor.u32 %v21369_v26, %v18941_v7 }
 0x99e   : > { %v18519_v23 = vld [vmem:[%s22818_s14 + $0x230] sm:$0xf0]  ;;  %v21433_v19 = vld [vmem:[%s22818_s14 + $0x774] sm:$0xf0] }
 0x99f   : > { %v21324_v31 = vld [vmem:[%s22818_s14 + $0x414] sm:$0xf]  ;;  %12248 = vmatpush.bf16.msrb.mxu3 %v19098_v12  ;;  %12223 = vmatpush.bf16.msrb.mxu1 %v18554_v56  ;;  %v18522_v60 = vor.u32 %v21260_v41, %v18519_v23  ;;  %v19230_v12 = vor.u32 %v21441_v17, %v19229_v58  ;;  %v18397_v32 = vld [vmem:[%s22818_s14 + $0x118] sm:$0xf]  ;;  %v10635_v41 = vperm.slane %v25913_v35, 1  ;;  %v19198_v23 = vor.u32 %v21433_v19, %v19197_v46 }
 0x9a0   : > { %v18775_v38 = vld [vmem:[%s22818_s14 + $0x430] sm:$0xf0]  ;;  %v21233_v56 = vld [vmem:[%s22818_s14 + $0x134] sm:$0xf0] }
 0x9a1   : > { %v21388_v42 = vld [vmem:[%s22818_s14 + $0x614] sm:$0xf]  ;;  %12236 = vmatpush.bf16.msrb.mxu2 %v18810_v39  ;;  %v18778_v62 = vor.u32 %v21324_v31, %v18775_v38  ;;  %12211 = vmatpush.bf16.msrb.mxu0 %v18266_v51  ;;  %v18653_v39 = vld [vmem:[%s22818_s14 + $0x318] sm:$0xf]  ;;  %v12005_v57 = vpop.f32.mrf.mxu0 }
 0x9a2   : > { %v19031_v4 = vld [vmem:[%s22818_s14 + $0x630] sm:$0xf0]  ;;  %v21297_v31 = vld [vmem:[%s22818_s14 + $0x334] sm:$0xf0]  ;;  %v12006_v49 = vadd.f32 %v12005_v57, %v10635_v41 }
 0x9a3   : > { %12249 = vmatpush.bf16.msrb.mxu3 %v19066_v27  ;;  %v19034_v10 = vor.u32 %v21388_v42, %v19031_v4  ;;  %12224 = vmatpush.bf16.msrb.mxu1 %v18522_v60  ;;  %v21361_v27 = vld [vmem:[%s22818_s14 + $0x534] sm:$0xf0]  ;;  %v18398_v4 = vor.u32 %v21233_v56, %v18397_v32  ;;  %v18654_v29 = vor.u32 %v21297_v31, %v18653_v39  ;;  %v12018_v52 = vpop.f32.mrf.mxu1 }
 0x9a4   : > { %12212 = vmatmul.bf16.vlgmr.msrb.gmra.mxu0 %v25623_v22  ;;  %v19165_v38 = vld [vmem:[%s22818_s14 + $0x718] sm:$0xf]  ;;  %v18910_v43 = vor.u32 %v21361_v27, %v18909_v33  ;;  %v12019_v9 = vadd.f32 %v12018_v52, %v12006_v49  ;;  %v18751_v52 = vld [vmem:[%s22818_s14 + $0x3f8] sm:$0xf0] }
 0x9a5   : > { %12237 = vmatpush.bf16.msrb.mxu2 %v18778_v62  ;;  %12256 = vmatpush.bf16.msra.mxu0 %v18494_v13  ;;  %v21425_v42 = vld [vmem:[%s22818_s14 + $0x734] sm:$0xf0] }
 0x9a6   : > { %12225 = vmatmul.bf16.vlgmr.msrb.gmra.mxu1 %v25627_v2  ;;  %v18365_v34 = vld [vmem:[%s22818_s14 + $0xd8] sm:$0xf]  ;;  %v19166_v54 = vor.u32 %v21425_v42, %v19165_v38 }
 0x9a7   : > { %12250 = vmatpush.bf16.msrb.mxu3 %v19034_v10  ;;  %12269 = vmatpush.bf16.msra.mxu1 %v18750_v14  ;;  %v21225_v50 = vld [vmem:[%s22818_s14 + $0xf4] sm:$0xf0] }
 0x9a8   : > { %12238 = vmatmul.bf16.vlgmr.msrb.gmra.mxu2 %v25621_v21  ;;  %v18621_v51 = vld [vmem:[%s22818_s14 + $0x2d8] sm:$0xf]  ;;  %v18366_v10 = vor.u32 %v21225_v50, %v18365_v34  ;;  %v21253_v34 = vld [vmem:[%s22818_s14 + $0x1dc] sm:$0xf] }
 0x9a9   : > { %12282 = vmatpush.bf16.msra.mxu2 %v19006_v15  ;;  %12257 = vmatpush.bf16.msra.mxu0 %v18462_v36  ;;  %v21289_v59 = vld [vmem:[%s22818_s14 + $0x2f4] sm:$0xf0]  ;;  %v18495_v50 = vld [vmem:[%s22818_s14 + $0x1f8] sm:$0xf0] }
 0x9aa   : > { %12251 = vmatmul.bf16.vlgmr.msrb.gmra.mxu3 %v25625_v25  ;;  %v18877_v60 = vld [vmem:[%s22818_s14 + $0x4d8] sm:$0xf]  ;;  %v18622_v13 = vor.u32 %v21289_v59, %v18621_v51  ;;  %v21317_v51 = vld [vmem:[%s22818_s14 + $0x3dc] sm:$0xf] }
 0x9ab   : > { %12295 = vmatpush.bf16.msra.mxu3 %v19262_v20  ;;  %12270 = vmatpush.bf16.msra.mxu1 %v18718_v30  ;;  %v21353_v62 = vld [vmem:[%s22818_s14 + $0x4f4] sm:$0xf0]  ;;  %v12031_v18 = vpop.f32.mrf.mxu2  ;;  %v12020_v7 = vpop.f32.mrf.mxu1  ;;  %v19007_v59 = vld [vmem:[%s22818_s14 + $0x5f8] sm:$0xf0] }
 0x9ac   : > { %v19133_v63 = vld [vmem:[%s22818_s14 + $0x6d8] sm:$0xf]  ;;  %v18878_v14 = vor.u32 %v21353_v62, %v18877_v60  ;;  %v12032_v58 = vadd.f32 %v12031_v18, %v12019_v9  ;;  %v21429_v7 = vld [vmem:[%s22818_s14 + $0x75c] sm:$0xf] }
 0x9ad   : > { %12283 = vmatpush.bf16.msra.mxu2 %v18974_v47  ;;  %12258 = vmatpush.bf16.msra.mxu0 %v18430_v28  ;;  %v21417_v3 = vld [vmem:[%s22818_s14 + $0x6f4] sm:$0xf0]  ;;  %v12044_v17 = vpop.f32.mrf.mxu3  ;;  %v12007_v47 = vpop.f32.mrf.mxu0 }
 0x9ae   : > { %v18333_v15 = vld [vmem:[%s22818_s14 + $0x98] sm:$0xf]  ;;  %v19134_v20 = vor.u32 %v21417_v3, %v19133_v63  ;;  %v25997_v30 = vadd.f32 %v12044_v17, %v12032_v58  ;;  %v21445_v63 = vld [vmem:[%s22818_s14 + $0x7dc] sm:$0xf] }
 0x9af   : > { %12296 = vmatpush.bf16.msra.mxu3 %v19230_v12  ;;  %12271 = vmatpush.bf16.msra.mxu1 %v18686_v40  ;;  %v21217_v5 = vld [vmem:[%s22818_s14 + $0xb4] sm:$0xf0]  ;;  %v19263_v3 = vld [vmem:[%s22818_s14 + $0x7f8] sm:$0xf0] }
 0x9b0   : > { %v18589_v16 = vld [vmem:[%s22818_s14 + $0x298] sm:$0xf]  ;;  %v18334_v55 = vor.u32 %v21217_v5, %v18333_v15  ;;  %v21245_v15 = vld [vmem:[%s22818_s14 + $0x19c] sm:$0xf]  ;;  %v19266_v18 = vor.u32 %v21445_v63, %v19263_v3 }
 0x9b1   : > { %12284 = vmatpush.bf16.msra.mxu2 %v18942_v8  ;;  %12259 = vmatpush.bf16.msra.mxu0 %v18398_v4  ;;  %v21281_v61 = vld [vmem:[%s22818_s14 + $0x2b4] sm:$0xf0]  ;;  %v18463_v5 = vld [vmem:[%s22818_s14 + $0x1b8] sm:$0xf0] }
 0x9b2   : > { %v18845_v53 = vld [vmem:[%s22818_s14 + $0x498] sm:$0xf]  ;;  %v18590_v44 = vor.u32 %v21281_v61, %v18589_v16  ;;  %v21309_v16 = vld [vmem:[%s22818_s14 + $0x39c] sm:$0xf]  ;;  %v18466_v17 = vor.u32 %v21245_v15, %v18463_v5 }
 0x9b3   : > { %12297 = vmatpush.bf16.msra.mxu3 %v19198_v23  ;;  %12272 = vmatpush.bf16.msra.mxu1 %v18654_v29  ;;  %v21345_v11 = vld [vmem:[%s22818_s14 + $0x4b4] sm:$0xf0]  ;;  %v12033_v38 = vpop.f32.mrf.mxu2  ;;  %v21373_v61 = vld [vmem:[%s22818_s14 + $0x59c] sm:$0xf] }
 0x9b4   : > { %v19101_v48 = vld [vmem:[%s22818_s14 + $0x698] sm:$0xf]  ;;  %v18846_v45 = vor.u32 %v21345_v11, %v18845_v53  ;;  %v18975_v53 = vld [vmem:[%s22818_s14 + $0x5b8] sm:$0xf0] }
 0x9b5   : > { %12285 = vmatpush.bf16.msra.mxu2 %v18910_v43  ;;  %v21409_v36 = vld [vmem:[%s22818_s14 + $0x6b4] sm:$0xf0]  ;;  %12260 = vmatpush.bf16.msra.mxu0 %v18366_v10  ;;  %v12046_v43 = vpop.f32.mrf.mxu3  ;;  %v18498_v10 = vor.u32 %v21253_v34, %v18495_v50  ;;  %v21437_v11 = vld [vmem:[%s22818_s14 + $0x79c] sm:$0xf] }
 0x9b6   : > { %v18301_v24 = vld [vmem:[%s22818_s14 + $0x58] sm:$0xf]  ;;  %v19102_v26 = vor.u32 %v21409_v36, %v19101_v48  ;;  %v19231_v58 = vld [vmem:[%s22818_s14 + $0x7b8] sm:$0xf0]  ;;  %v18978_v36 = vor.u32 %v21373_v61, %v18975_v53 }
 0x9b7   : > { %12298 = vmatpush.bf16.msra.mxu3 %v19166_v54  ;;  %12273 = vmatpush.bf16.msra.mxu1 %v18622_v13  ;;  %v21209_v12 = vld [vmem:[%s22818_s14 + $0x74] sm:$0xf0]  ;;  %v21381_v54 = vld [vmem:[%s22818_s14 + $0x5dc] sm:$0xf]  ;;  %v18754_v13 = vor.u32 %v21317_v51, %v18751_v52 }
 0x9b8   : > { %v18557_v6 = vld [vmem:[%s22818_s14 + $0x258] sm:$0xf]  ;;  %v18302_v8 = vor.u32 %v21209_v12, %v18301_v24  ;;  %v18431_v47 = vld [vmem:[%s22818_s14 + $0x178] sm:$0xf0] }
 0x9b9   : > { %12286 = vmatpush.bf16.msra.mxu2 %v18878_v14  ;;  %v21273_v46 = vld [vmem:[%s22818_s14 + $0x274] sm:$0xf0]  ;;  %12261 = vmatpush.bf16.msra.mxu0 %v18334_v55  ;;  %v19010_v14 = vor.u32 %v21381_v54, %v19007_v59  ;;  %v21237_v55 = vld [vmem:[%s22818_s14 + $0x15c] sm:$0xf] }
 0x9ba   : > { %v18813_v19 = vld [vmem:[%s22818_s14 + $0x458] sm:$0xf]  ;;  %v18558_v41 = vor.u32 %v21273_v46, %v18557_v6  ;;  %v18687_v24 = vld [vmem:[%s22818_s14 + $0x378] sm:$0xf0]  ;;  %v18434_v46 = vor.u32 %v21237_v55, %v18431_v47 }
 0x9bb   : > { %12299 = vmatpush.bf16.msra.mxu3 %v19134_v20  ;;  %v21337_v28 = vld [vmem:[%s22818_s14 + $0x474] sm:$0xf0]  ;;  %12274 = vmatpush.bf16.msra.mxu1 %v18590_v44  ;;  %v18719_v20 = vld [vmem:[%s22818_s14 + $0x3b8] sm:$0xf0] }
 0x9bc   : > { %v19069_v32 = vld [vmem:[%s22818_s14 + $0x658] sm:$0xf]  ;;  %v18814_v23 = vor.u32 %v21337_v28, %v18813_v19  ;;  %v18722_v48 = vor.u32 %v21309_v16, %v18719_v20  ;;  %v21301_v44 = vld [vmem:[%s22818_s14 + $0x35c] sm:$0xf] }
 0x9bd   : > { %v21401_v40 = vld [vmem:[%s22818_s14 + $0x674] sm:$0xf0]  ;;  %12287 = vmatpush.bf16.msra.mxu2 %v18846_v45  ;;  %12262 = vmatpush.bf16.msra.mxu0 %v18302_v8  ;;  %v19234_v45 = vor.u32 %v21437_v11, %v19231_v58  ;;  %v21365_v12 = vld [vmem:[%s22818_s14 + $0x55c] sm:$0xf]  ;;  %v18690_v19 = vor.u32 %v21301_v44, %v18687_v24 }
 0x9be   : > { %v18269_v56 = vld [vmem:[%s22818_s14 + $0x18] sm:$0xf]  ;;  %v19070_v42 = vor.u32 %v21401_v40, %v19069_v32  ;;  %v18943_v6 = vld [vmem:[%s22818_s14 + $0x578] sm:$0xf0] }
 0x9bf   : > { %v21201_v39 = vld [vmem:[%s22818_s14 + $0x34] sm:$0xf0]  ;;  %12300 = vmatpush.bf16.msra.mxu3 %v19102_v26  ;;  %12275 = vmatpush.bf16.msra.mxu1 %v18558_v41  ;;  %v19199_v26 = vld [vmem:[%s22818_s14 + $0x778] sm:$0xf0]  ;;  %v18946_v28 = vor.u32 %v21365_v12, %v18943_v6 }
 0x9c0   : > { %v18525_v31 = vld [vmem:[%s22818_s14 + $0x218] sm:$0xf]  ;;  %v18270_v49 = vor.u32 %v21201_v39, %v18269_v56  ;;  %v21229_v32 = vld [vmem:[%s22818_s14 + $0x11c] sm:$0xf]  ;;  %v19202_v56 = vor.u32 %v21429_v7, %v19199_v26 }
 0x9c1   : > { %v21265_v33 = vld [vmem:[%s22818_s14 + $0x234] sm:$0xf0]  ;;  %12288 = vmatpush.bf16.msra.mxu2 %v18814_v23  ;;  %v18399_v40 = vld [vmem:[%s22818_s14 + $0x138] sm:$0xf0]  ;;  %v26051_v38 = vpop.f32.mrf.mxu0 }
 0x9c2   : > { %v18781_v27 = vld [vmem:[%s22818_s14 + $0x418] sm:$0xf]  ;;  %v18526_v60 = vor.u32 %v21265_v33, %v18525_v31  ;;  %12263 = vmatpush.bf16.msra.mxu0 %v18270_v49  ;;  %v21293_v8 = vld [vmem:[%s22818_s14 + $0x31c] sm:$0xf] }
 0x9c3   : > { %v21329_v4 = vld [vmem:[%s22818_s14 + $0x434] sm:$0xf0]  ;;  %12301 = vmatpush.bf16.msra.mxu3 %v19070_v42  ;;  %v18655_v39 = vld [vmem:[%s22818_s14 + $0x338] sm:$0xf0]  ;;  %v26056_v34 = vpop.f32.mrf.mxu1 }
 0x9c4   : > { %v19037_v57 = vld [vmem:[%s22818_s14 + $0x618] sm:$0xf]  ;;  %v18782_v62 = vor.u32 %v21329_v4, %v18781_v27  ;;  %12276 = vmatpush.bf16.msra.mxu1 %v18526_v60  ;;  %v21357_v41 = vld [vmem:[%s22818_s14 + $0x51c] sm:$0xf]  ;;  %v18402_v27 = vor.u32 %v21229_v32, %v18399_v40  ;;  %v18658_v42 = vor.u32 %v21293_v8, %v18655_v39 }
 0x9c5   : > { %v21393_v29 = vld [vmem:[%s22818_s14 + $0x634] sm:$0xf0]  ;;  %12264 = vmatmul.bf16.vlgmr.msra.gmra.mxu0 %v25623_v22  ;;  %v18911_v23 = vld [vmem:[%s22818_s14 + $0x538] sm:$0xf0] }
 0x9c6   : > { %v19038_v9 = vor.u32 %v21393_v29, %v19037_v57  ;;  %12289 = vmatpush.bf16.msra.mxu2 %v18782_v62  ;;  %12308 = vmatpush.bf16.msrb.mxu0 %v18498_v10  ;;  %v21421_v31 = vld [vmem:[%s22818_s14 + $0x71c] sm:$0xf]  ;;  %v18914_v4 = vor.u32 %v21357_v41, %v18911_v23 }
 0x9c7   : > { %12277 = vmatmul.bf16.vlgmr.msra.gmra.mxu1 %v25627_v2  ;;  %v19167_v33 = vld [vmem:[%s22818_s14 + $0x738] sm:$0xf0] }
 0x9c8   : > { %12302 = vmatpush.bf16.msra.mxu3 %v19038_v9  ;;  %12321 = vmatpush.bf16.msrb.mxu1 %v18754_v13  ;;  %v21221_v57 = vld [vmem:[%s22818_s14 + $0xdc] sm:$0xf]  ;;  %v19170_v50 = vor.u32 %v21421_v31, %v19167_v33 }
 0x9c9   : > { %12290 = vmatmul.bf16.vlgmr.msra.gmra.mxu2 %v25621_v21  ;;  %v18367_v29 = vld [vmem:[%s22818_s14 + $0xf8] sm:$0xf0]  ;;  %v12059_v11 = vpop.f32.mrf.mxu0 }
 0x9ca   : > { %12334 = vmatpush.bf16.msrb.mxu2 %v19010_v14  ;;  %12309 = vmatpush.bf16.msrb.mxu0 %v18466_v17  ;;  %v21285_v43 = vld [vmem:[%s22818_s14 + $0x2dc] sm:$0xf]  ;;  %v18370_v60 = vor.u32 %v21221_v57, %v18367_v29  ;;  %v19509_v57 = vld [vmem:[%s22837_s3 + $0x1e0] sm:$0xf]  ;;  %v21572_v11 = vld [vmem:[%s22837_s3 + $0x3cc] sm:$0xf0] }
 0x9cb   : > { %12303 = vmatmul.bf16.vlgmr.msra.gmra.mxu3 %v25625_v25  ;;  %v18623_v51 = vld [vmem:[%s22818_s14 + $0x2f8] sm:$0xf0]  ;;  %v26066_v13 = vpop.f32.mrf.mxu2  ;;  %v12072_v47 = vpop.f32.mrf.mxu1 }
 0x9cc   : > { %12347 = vmatpush.bf16.msrb.mxu3 %v19266_v18  ;;  %12322 = vmatpush.bf16.msrb.mxu1 %v18722_v48  ;;  %v21349_v49 = vld [vmem:[%s22818_s14 + $0x4dc] sm:$0xf]  ;;  %v18626_v62 = vor.u32 %v21285_v43, %v18623_v51  ;;  %v21512_v43 = vld [vmem:[%s22837_s3 + $0x1ec] sm:$0xf0] }
 0x9cd   : > { %v18879_v52 = vld [vmem:[%s22818_s14 + $0x4f8] sm:$0xf0]  ;;  %v26071_v18 = vpop.f32.mrf.mxu3  ;;  %v21544_v51 = vld [vmem:[%s22837_s3 + $0x2ec] sm:$0xf0] }
 0x9ce   : > { %12335 = vmatpush.bf16.msrb.mxu2 %v18978_v36  ;;  %12310 = vmatpush.bf16.msrb.mxu0 %v18434_v46  ;;  %v21413_v54 = vld [vmem:[%s22818_s14 + $0x6dc] sm:$0xf]  ;;  %v18882_v63 = vor.u32 %v21349_v49, %v18879_v52  ;;  %v21504_v47 = vld [vmem:[%s22837_s3 + $0x1ac] sm:$0xf0] }
 0x9cf   : > { %v19135_v59 = vld [vmem:[%s22818_s14 + $0x6f8] sm:$0xf0] }
 0x9d0   : > { %12348 = vmatpush.bf16.msrb.mxu3 %v19234_v45  ;;  %12323 = vmatpush.bf16.msrb.mxu1 %v18690_v19  ;;  %v21213_v3 = vld [vmem:[%s22818_s14 + $0x9c] sm:$0xf]  ;;  %v19138_v14 = vor.u32 %v21413_v54, %v19135_v59 }
 0x9d1   : > { %v18335_v9 = vld [vmem:[%s22818_s14 + $0xb8] sm:$0xf0] }
 0x9d2   : > { %12336 = vmatpush.bf16.msrb.mxu2 %v18946_v28  ;;  %12311 = vmatpush.bf16.msrb.mxu0 %v18402_v27  ;;  %v21277_v10 = vld [vmem:[%s22818_s14 + $0x29c] sm:$0xf]  ;;  %v18338_v53 = vor.u32 %v21213_v3, %v18335_v9  ;;  %v19365_v9 = vld [vmem:[%s22837_s3 + $0xc0] sm:$0xf] }
 0x9d3   : > { %v18591_v15 = vld [vmem:[%s22818_s14 + $0x2b8] sm:$0xf0]  ;;  %v12085_v39 = vpop.f32.mrf.mxu2 }
 0x9d4   : > { %12349 = vmatpush.bf16.msrb.mxu3 %v19202_v56  ;;  %12324 = vmatpush.bf16.msrb.mxu1 %v18658_v42  ;;  %v21341_v5 = vld [vmem:[%s22818_s14 + $0x49c] sm:$0xf]  ;;  %v18594_v58 = vor.u32 %v21277_v10, %v18591_v15  ;;  %v19381_v42 = vld [vmem:[%s22837_s3 + $0xe0] sm:$0xf]  ;;  %v21476_v10 = vld [vmem:[%s22837_s3 + $0xcc] sm:$0xf0] }
 0x9d5   : > { %v18847_v16 = vld [vmem:[%s22818_s14 + $0x4b8] sm:$0xf0]  ;;  %v12098_v27 = vpop.f32.mrf.mxu3  ;;  %v21508_v15 = vld [vmem:[%s22837_s3 + $0x1cc] sm:$0xf0]  ;;  %v19717_v39 = vld [vmem:[%s22837_s3 + $0x380] sm:$0xf] }
 0x9d6   : > { %12337 = vmatpush.bf16.msrb.mxu2 %v18914_v4  ;;  %v21405_v20 = vld [vmem:[%s22818_s14 + $0x69c] sm:$0xf]  ;;  %12312 = vmatpush.bf16.msrb.mxu0 %v18370_v60  ;;  %v18850_v17 = vor.u32 %v21341_v5, %v18847_v16  ;;  %v21480_v4 = vld [vmem:[%s22837_s3 + $0xec] sm:$0xf0]  ;;  %v19765_v60 = vld [vmem:[%s22837_s3 + $0x3e0] sm:$0xf] }
 0x9d7   : > { %v19103_v61 = vld [vmem:[%s22818_s14 + $0x6b8] sm:$0xf0]  ;;  %v19382_v59 = vor.u32 %v21480_v4, %v19381_v42  ;;  %v19621_v5 = vld [vmem:[%s22837_s3 + $0x2c0] sm:$0xf]  ;;  %v21540_v16 = vld [vmem:[%s22837_s3 + $0x2cc] sm:$0xf0] }
 0x9d8   : > { %12350 = vmatpush.bf16.msrb.mxu3 %v19170_v50  ;;  %12325 = vmatpush.bf16.msrb.mxu1 %v18626_v62  ;;  %v21205_v48 = vld [vmem:[%s22818_s14 + $0x5c] sm:$0xf]  ;;  %v19106_v44 = vor.u32 %v21405_v20, %v19103_v61  ;;  %v19637_v50 = vld [vmem:[%s22837_s3 + $0x2e0] sm:$0xf]  ;;  %v21576_v62 = vld [vmem:[%s22837_s3 + $0x3ec] sm:$0xf0]  ;;  %v19366_v61 = vor.u32 %v21476_v10, %v19365_v9 }
 0x9d9   : > { %v18303_v36 = vld [vmem:[%s22818_s14 + $0x78] sm:$0xf0]  ;;  %v19638_v3 = vor.u32 %v21544_v51, %v19637_v50  ;;  %v19766_v20 = vor.u32 %v21576_v62, %v19765_v60  ;;  %v19317_v27 = vld [vmem:[%s22837_s3 + $0x60] sm:$0xf]  ;;  %v21464_v42 = vld [vmem:[%s22837_s3 + $0x6c] sm:$0xf0] }
 0x9da   : > { %12338 = vmatpush.bf16.msrb.mxu2 %v18882_v63  ;;  %v21269_v55 = vld [vmem:[%s22818_s14 + $0x25c] sm:$0xf]  ;;  %12313 = vmatpush.bf16.msrb.mxu0 %v18338_v53  ;;  %v18306_v26 = vor.u32 %v21205_v48, %v18303_v36  ;;  %v19510_v63 = vor.u32 %v21512_v43, %v19509_v57  ;;  %v19749_v53 = vld [vmem:[%s22837_s3 + $0x3c0] sm:$0xf]  ;;  %v21472_v36 = vld [vmem:[%s22837_s3 + $0xac] sm:$0xf0] }
 0x9db   : > { %v18559_v45 = vld [vmem:[%s22818_s14 + $0x278] sm:$0xf0]  ;;  %v19349_v48 = vld [vmem:[%s22837_s3 + $0xa0] sm:$0xf]  ;;  %v21496_v57 = vld [vmem:[%s22837_s3 + $0x16c] sm:$0xf0] }
 0x9dc   : > { %12351 = vmatpush.bf16.msrb.mxu3 %v19138_v14  ;;  %v21333_v24 = vld [vmem:[%s22818_s14 + $0x45c] sm:$0xf]  ;;  %12326 = vmatpush.bf16.msrb.mxu1 %v18594_v58  ;;  %v18562_v28 = vor.u32 %v21269_v55, %v18559_v45  ;;  %v19493_v14 = vld [vmem:[%s22837_s3 + $0x1c0] sm:$0xf]  ;;  %v21536_v45 = vld [vmem:[%s22837_s3 + $0x2ac] sm:$0xf0] }
 0x9dd   : > { %v18815_v12 = vld [vmem:[%s22818_s14 + $0x478] sm:$0xf0]  ;;  %v19494_v58 = vor.u32 %v21508_v15, %v19493_v14  ;;  %v19477_v55 = vld [vmem:[%s22837_s3 + $0x1a0] sm:$0xf]  ;;  %v21528_v43 = vld [vmem:[%s22837_s3 + $0x26c] sm:$0xf0] }
 0x9de   : > { %v21397_v6 = vld [vmem:[%s22818_s14 + $0x65c] sm:$0xf]  ;;  %12339 = vmatpush.bf16.msrb.mxu2 %v18850_v17  ;;  %v18818_v32 = vor.u32 %v21333_v24, %v18815_v12  ;;  %12314 = vmatpush.bf16.msrb.mxu0 %v18306_v26  ;;  %v19622_v17 = vor.u32 %v21540_v16, %v19621_v5  ;;  %v19750_v24 = vor.u32 %v21572_v11, %v19749_v53  ;;  %v19333_v26 = vld [vmem:[%s22837_s3 + $0x80] sm:$0xf]  ;;  %v21492_v10 = vld [vmem:[%s22837_s3 + $0x14c] sm:$0xf0] }
 0x9df   : > { %v19071_v7 = vld [vmem:[%s22818_s14 + $0x678] sm:$0xf0]  ;;  %v19350_v12 = vor.u32 %v21472_v36, %v19349_v48  ;;  %v19445_v4 = vld [vmem:[%s22837_s3 + $0x160] sm:$0xf]  ;;  %v21524_v15 = vld [vmem:[%s22837_s3 + $0x24c] sm:$0xf0] }
 0x9e0   : > { %v21197_v46 = vld [vmem:[%s22818_s14 + $0x1c] sm:$0xf]  ;;  %12352 = vmatpush.bf16.msrb.mxu3 %v19106_v44  ;;  %v19074_v41 = vor.u32 %v21397_v6, %v19071_v7  ;;  %12327 = vmatpush.bf16.msrb.mxu1 %v18562_v28  ;;  %v19605_v44 = vld [vmem:[%s22837_s3 + $0x2a0] sm:$0xf]  ;;  %v21568_v6 = vld [vmem:[%s22837_s3 + $0x3ac] sm:$0xf0]  ;;  %v19446_v60 = vor.u32 %v21496_v57, %v19445_v4 }
 0x9e1   : > { %v18271_v19 = vld [vmem:[%s22818_s14 + $0x38] sm:$0xf0]  ;;  %v19606_v7 = vor.u32 %v21536_v45, %v19605_v44  ;;  %v19589_v28 = vld [vmem:[%s22837_s3 + $0x280] sm:$0xf]  ;;  %v21488_v45 = vld [vmem:[%s22837_s3 + $0x12c] sm:$0xf0] }
 0x9e2   : > { %v21261_v40 = vld [vmem:[%s22818_s14 + $0x21c] sm:$0xf]  ;;  %v18274_v29 = vor.u32 %v21197_v46, %v18271_v19  ;;  %12340 = vmatpush.bf16.msrb.mxu2 %v18818_v32  ;;  %v21468_v46 = vld [vmem:[%s22837_s3 + $0x8c] sm:$0xf0]  ;;  %v19461_v19 = vld [vmem:[%s22837_s3 + $0x180] sm:$0xf] }
 0x9e3   : > { %v18527_v8 = vld [vmem:[%s22818_s14 + $0x238] sm:$0xf0]  ;;  %v10636_v32 = vperm.slane %v25913_v35, 2  ;;  %v19429_v9 = vld [vmem:[%s22837_s3 + $0x140] sm:$0xf] }
 0x9e4   : > { %v21325_v56 = vld [vmem:[%s22818_s14 + $0x41c] sm:$0xf]  ;;  %v18530_v49 = vor.u32 %v21261_v40, %v18527_v8  ;;  %12353 = vmatpush.bf16.msrb.mxu3 %v19074_v41  ;;  %12315 = vmatpush.bf16.msrb.mxu0 %v18274_v29  ;;  %v10637_v40 = vperm.slane %v25913_v35, 3  ;;  %v21564_v41 = vld [vmem:[%s22837_s3 + $0x38c] sm:$0xf0]  ;;  %v12122_v35 = vpop.f32.mrf.mxu1  ;;  %v19430_v48 = vor.u32 %v21492_v10, %v19429_v9 }
 0x9e5   : > { %v18783_v23 = vld [vmem:[%s22818_s14 + $0x438] sm:$0xf0]  ;;  %v19573_v29 = vld [vmem:[%s22837_s3 + $0x260] sm:$0xf]  ;;  %v12058_v50 = vadd.f32 %v26051_v38, %v10636_v32  ;;  %v21484_v32 = vld [vmem:[%s22837_s3 + $0x10c] sm:$0xf0] }
 0x9e6   : > { %v21389_v31 = vld [vmem:[%s22818_s14 + $0x61c] sm:$0xf]  ;;  %v18786_v52 = vor.u32 %v21325_v56, %v18783_v23  ;;  %12328 = vmatpush.bf16.msrb.mxu1 %v18530_v49  ;;  %v19334_v56 = vor.u32 %v21468_v46, %v19333_v26  ;;  %v12109_v23 = vpop.f32.mrf.mxu0  ;;  %v19718_v49 = vor.u32 %v21564_v41, %v19717_v39  ;;  %v19574_v62 = vor.u32 %v21528_v43, %v19573_v29  ;;  %v19557_v14 = vld [vmem:[%s22837_s3 + $0x240] sm:$0xf]  ;;  %v21552_v46 = vld [vmem:[%s22837_s3 + $0x32c] sm:$0xf0] }
 0x9e7   : > { %v19039_v33 = vld [vmem:[%s22818_s14 + $0x638] sm:$0xf0]  ;;  %12316 = vmatmul.bf16.vlgmr.msrb.gmra.mxu0 %v25623_v22  ;;  %v19733_v22 = vld [vmem:[%s22837_s3 + $0x3a0] sm:$0xf]  ;;  %v12110_v51 = vadd.f32 %v12109_v23, %v10637_v40  ;;  %v12071_v16 = vadd.f32 %v26056_v34, %v12058_v50  ;;  %v19558_v36 = vor.u32 %v21524_v15, %v19557_v14  ;;  %v21456_v34 = vld [vmem:[%s22837_s3 + $0x2c] sm:$0xf0] }
 0x9e8   : > { %v19042_v54 = vor.u32 %v21389_v31, %v19039_v33  ;;  %12341 = vmatpush.bf16.msrb.mxu2 %v18786_v52  ;;  %13916 = vmatpush.bf16.msra.mxu0 %v19382_v59  ;;  %v19734_v8 = vor.u32 %v21568_v6, %v19733_v22  ;;  %v19318_v52 = vor.u32 %v21464_v42, %v19317_v27  ;;  %v21560_v59 = vld [vmem:[%s22837_s3 + $0x36c] sm:$0xf0]  ;;  %v19685_v11 = vld [vmem:[%s22837_s3 + $0x340] sm:$0xf]  ;;  %v12360_v43 = vmax.f32 %v25948_v37, 0.0 }
 0x9e9   : > { %12329 = vmatmul.bf16.vlgmr.msrb.gmra.mxu1 %v25627_v2  ;;  %v19478_v2 = vor.u32 %v21504_v47, %v19477_v55  ;;  %v19285_v55 = vld [vmem:[%s22837_s3 + $0x20] sm:$0xf]  ;;  %v12084_v22 = vadd.f32 %v26066_v13, %v12071_v16  ;;  %v21640_v42 = vld [vmem:[%s22837_s3 + $0x5ec] sm:$0xf0] }
 0x9ea   : > { %12354 = vmatpush.bf16.msrb.mxu3 %v19042_v54  ;;  %13929 = vmatpush.bf16.msra.mxu1 %v19510_v63  ;;  %v19701_v54 = vld [vmem:[%s22837_s3 + $0x360] sm:$0xf]  ;;  %v21672_v29 = vld [vmem:[%s22837_s3 + $0x6ec] sm:$0xf0] }
 0x9eb   : > { %12342 = vmatmul.bf16.vlgmr.msrb.gmra.mxu2 %v25621_v21  ;;  %v21500_v21 = vld [vmem:[%s22837_s3 + $0x18c] sm:$0xf0]  ;;  %v19301_v63 = vld [vmem:[%s22837_s3 + $0x40] sm:$0xf]  ;;  %v12135_v38 = vpop.f32.mrf.mxu2  ;;  %v12097_v23 = vadd.f32 %v26071_v18, %v12084_v22 }
 0x9ec   : > { %13942 = vmatpush.bf16.msra.mxu2 %v19638_v3  ;;  %13917 = vmatpush.bf16.msra.mxu0 %v19366_v61  ;;  %v19462_v31 = vor.u32 %v21500_v21, %v19461_v19  ;;  %v21460_v3 = vld [vmem:[%s22837_s3 + $0x4c] sm:$0xf0]  ;;  %v19702_v61 = vor.u32 %v21560_v59, %v19701_v54  ;;  %v19413_v47 = vld [vmem:[%s22837_s3 + $0x120] sm:$0xf]  ;;  %v12124_v44 = vpop.f32.mrf.mxu1 }
 0x9ed   : > { %12355 = vmatmul.bf16.vlgmr.msrb.gmra.mxu3 %v25625_v25  ;;  %v21532_v25 = vld [vmem:[%s22837_s3 + $0x28c] sm:$0xf0]  ;;  %v12148_v5 = vpop.f32.mrf.mxu3  ;;  %v19302_v53 = vor.u32 %v21460_v3, %v19301_v63  ;;  %v19669_v26 = vld [vmem:[%s22837_s3 + $0x320] sm:$0xf]  ;;  %v19414_v21 = vor.u32 %v21488_v45, %v19413_v47  ;;  %v12362_v63 = vmax.f32 %v12097_v23, 0.0 }
 0x9ee   : > { %13955 = vmatpush.bf16.msra.mxu3 %v19766_v20  ;;  %13930 = vmatpush.bf16.msra.mxu1 %v19494_v58  ;;  %v19590_v33 = vor.u32 %v21532_v25, %v19589_v28  ;;  %v12123_v20 = vadd.f32 %v12122_v35, %v12110_v51  ;;  %v21556_v58 = vld [vmem:[%s22837_s3 + $0x34c] sm:$0xf0]  ;;  %v19269_v19 = vld [vmem:[%s22837_s3] sm:$0xf]  ;;  %v19670_v4 = vor.u32 %v21552_v46, %v19669_v26 }
 0x9ef   : > { %v21452_v25 = vld [vmem:[%s22837_s3 + $0xc] sm:$0xf0]  ;;  %v19397_v13 = vld [vmem:[%s22837_s3 + $0x100] sm:$0xf] }
 0x9f0   : > { %13943 = vmatpush.bf16.msra.mxu2 %v19622_v17  ;;  %13918 = vmatpush.bf16.msra.mxu0 %v19350_v12  ;;  %v12111_v17 = vpop.f32.mrf.mxu0  ;;  %v21520_v12 = vld [vmem:[%s22837_s3 + $0x22c] sm:$0xf0]  ;;  %v12136_v6 = vadd.f32 %v12135_v38, %v12123_v20  ;;  %v19893_v39 = vld [vmem:[%s22837_s3 + $0x4e0] sm:$0xf]  ;;  %v19270_v35 = vor.u32 %v21452_v25, %v19269_v19  ;;  %v19398_v18 = vor.u32 %v21484_v32, %v19397_v13 }
 0x9f1   : > { %v20021_v27 = vld [vmem:[%s22837_s3 + $0x5e0] sm:$0xf]  ;;  %v21636_v38 = vld [vmem:[%s22837_s3 + $0x5cc] sm:$0xf0] }
 0x9f2   : > { %13956 = vmatpush.bf16.msra.mxu3 %v19750_v24  ;;  %13931 = vmatpush.bf16.msra.mxu1 %v19478_v2  ;;  %v19541_v24 = vld [vmem:[%s22837_s3 + $0x220] sm:$0xf]  ;;  %v19686_v2 = vor.u32 %v21556_v58, %v19685_v11  ;;  %v20022_v59 = vor.u32 %v21640_v42, %v20021_v27  ;;  %v21668_v15 = vld [vmem:[%s22837_s3 + $0x6cc] sm:$0xf0] }
 0x9f3   : > { %v19542_v28 = vor.u32 %v21520_v12, %v19541_v24  ;;  %v12137_v40 = vpop.f32.mrf.mxu2  ;;  %v20149_v57 = vld [vmem:[%s22837_s3 + $0x6e0] sm:$0xf]  ;;  %v21600_v58 = vld [vmem:[%s22837_s3 + $0x4ac] sm:$0xf0] }
 0x9f4   : > { %13944 = vmatpush.bf16.msra.mxu2 %v19606_v7  ;;  %13919 = vmatpush.bf16.msra.mxu0 %v19334_v56  ;;  %v19286_v7 = vor.u32 %v21456_v34, %v19285_v55  ;;  %v21516_v56 = vld [vmem:[%s22837_s3 + $0x20c] sm:$0xf0]  ;;  %v19653_v51 = vld [vmem:[%s22837_s3 + $0x300] sm:$0xf]  ;;  %v20150_v37 = vor.u32 %v21672_v29, %v20149_v57 }
 0x9f5   : > { %v12150_v41 = vpop.f32.mrf.mxu3  ;;  %v20005_v9 = vld [vmem:[%s22837_s3 + $0x5c0] sm:$0xf]  ;;  %v21664_v34 = vld [vmem:[%s22837_s3 + $0x6ac] sm:$0xf0] }
 0x9f6   : > { %13957 = vmatpush.bf16.msra.mxu3 %v19734_v8  ;;  %13932 = vmatpush.bf16.msra.mxu1 %v19462_v31  ;;  %v19525_v8 = vld [vmem:[%s22837_s3 + $0x200] sm:$0xf]  ;;  %v12149_v31 = vadd.f32 %v12148_v5, %v12136_v6  ;;  %v26179_v5 = vpack.c.bf16 %v12360_v43, %v12360_v43  ;;  %v20006_v20 = vor.u32 %v21636_v38, %v20005_v9  ;;  %v21596_v24 = vld [vmem:[%s22837_s3 + $0x48c] sm:$0xf0] }
 0x9f7   : > { %v19526_v50 = vor.u32 %v21516_v56, %v19525_v8  ;;  %v20133_v14 = vld [vmem:[%s22837_s3 + $0x6c0] sm:$0xf]  ;;  %v21628_v22 = vld [vmem:[%s22837_s3 + $0x58c] sm:$0xf0] }
 0x9f8   : > { %13945 = vmatpush.bf16.msra.mxu2 %v19590_v33  ;;  %13920 = vmatpush.bf16.msra.mxu0 %v19318_v52  ;;  %v21608_v33 = vld [vmem:[%s22837_s3 + $0x4ec] sm:$0xf0]  ;;  %v12361_v52 = vmax.f32 %v25997_v30, 0.0  ;;  %v12363_v3 = vmax.f32 %v12149_v31, 0.0  ;;  %v19989_v17 = vld [vmem:[%s22837_s3 + $0x5a0] sm:$0xf] }
 0x9f9   : > { %v19894_v54 = vor.u32 %v21608_v33, %v19893_v39  ;;  %v20117_v55 = vld [vmem:[%s22837_s3 + $0x6a0] sm:$0xf]  ;;  %v21660_v46 = vld [vmem:[%s22837_s3 + $0x68c] sm:$0xf0] }
 0x9fa   : > { %13958 = vmatpush.bf16.msra.mxu3 %v19718_v49  ;;  %13933 = vmatpush.bf16.msra.mxu1 %v19446_v60  ;;  %v21548_v49 = vld [vmem:[%s22837_s3 + $0x30c] sm:$0xf0]  ;;  %v19877_v60 = vld [vmem:[%s22837_s3 + $0x4c0] sm:$0xf]  ;;  %v26181_v30 = vpack.c.bf16 %v12361_v52, %v12361_v52  ;;  %v26186_v11 = vpack.c.bf16 %v12363_v3, %v12363_v3 }
 0x9fb   : > { %v19654_v10 = vor.u32 %v21548_v49, %v19653_v51  ;;  %v19845_v45 = vld [vmem:[%s22837_s3 + $0x480] sm:$0xf]  ;;  %v21592_v13 = vld [vmem:[%s22837_s3 + $0x46c] sm:$0xf0] }
 0x9fc   : > { %13946 = vmatpush.bf16.msra.mxu2 %v19574_v62  ;;  %13921 = vmatpush.bf16.msra.mxu0 %v19302_v53  ;;  %v21604_v62 = vld [vmem:[%s22837_s3 + $0x4cc] sm:$0xf0]  ;;  %v26184_v53 = vpack.c.bf16 %v12362_v63, %v12362_v63  ;;  %v19973_v12 = vld [vmem:[%s22837_s3 + $0x580] sm:$0xf]  ;;  %v19846_v19 = vor.u32 %v21596_v24, %v19845_v45  ;;  %v21510_v45 = vld [vmem:[%s22837_s3 + $0x1e4] sm:$0xf] }
 0x9fd   : > { %v19878_v16 = vor.u32 %v21604_v62, %v19877_v60  ;;  %v26203_v6 = vld [vmem:[%s972_s4] sm:$0xff]  ;;  %v21624_v40 = vld [vmem:[%s22837_s3 + $0x56c] sm:$0xf0]  ;;  %v19511_v24 = vld [vmem:[%s22837_s3 + $0x1f0] sm:$0xf0] }
 0x9fe   : > { %13959 = vmatpush.bf16.msra.mxu3 %v19702_v61  ;;  %13934 = vmatpush.bf16.msra.mxu1 %v19430_v48  ;;  %v19861_v61 = vld [vmem:[%s22837_s3 + $0x4a0] sm:$0xf]  ;;  %v21632_v48 = vld [vmem:[%s22837_s3 + $0x5ac] sm:$0xf0] }
 0x9ff   : > { %v19862_v47 = vor.u32 %v21600_v58, %v19861_v61  ;;  %v19990_v44 = vor.u32 %v21632_v48, %v19989_v17  ;;  %v20101_v26 = vld [vmem:[%s22837_s3 + $0x680] sm:$0xf]  ;;  %v21656_v23 = vld [vmem:[%s22837_s3 + $0x66c] sm:$0xf0]  ;;  %v21478_v48 = vld [vmem:[%s22837_s3 + $0xe4] sm:$0xf] }
 0xa00   : > { %13947 = vmatpush.bf16.msra.mxu2 %v19558_v36  ;;  %13922 = vmatpush.bf16.msra.mxu0 %v19286_v7  ;;  %v20134_v36 = vor.u32 %v21668_v15, %v20133_v14  ;;  %v20118_v7 = vor.u32 %v21664_v34, %v20117_v55  ;;  %v19957_v32 = vld [vmem:[%s22837_s3 + $0x560] sm:$0xf]  ;;  %v20102_v39 = vor.u32 %v21660_v46, %v20101_v26  ;;  %v21620_v57 = vld [vmem:[%s22837_s3 + $0x54c] sm:$0xf0] }
 0xa01   : > { %v12161_v25 = vpop.f32.mrf.mxu0  ;;  %v20085_v41 = vld [vmem:[%s22837_s3 + $0x660] sm:$0xf]  ;;  %v19958_v27 = vor.u32 %v21624_v40, %v19957_v32  ;;  %v21652_v51 = vld [vmem:[%s22837_s3 + $0x64c] sm:$0xf0]  ;;  %v21474_v32 = vld [vmem:[%s22837_s3 + $0xc4] sm:$0xf] }
 0xa02   : > { %13960 = vmatpush.bf16.msra.mxu3 %v19686_v2  ;;  %13935 = vmatpush.bf16.msra.mxu1 %v19414_v21  ;;  %v10638_v2 = vperm.slane %v26203_v6, 4  ;;  %v19974_v21 = vor.u32 %v21628_v22, %v19973_v12  ;;  %v19813_v42 = vld [vmem:[%s22837_s3 + $0x440] sm:$0xf]  ;;  %v20086_v43 = vor.u32 %v21656_v23, %v20085_v41  ;;  %v21584_v62 = vld [vmem:[%s22837_s3 + $0x42c] sm:$0xf0] }
 0xa03   : > { %v12174_v56 = vpop.f32.mrf.mxu1  ;;  %v19925_v63 = vld [vmem:[%s22837_s3 + $0x520] sm:$0xf]  ;;  %v21616_v3 = vld [vmem:[%s22837_s3 + $0x52c] sm:$0xf0]  ;;  %v19495_v41 = vld [vmem:[%s22837_s3 + $0x1d0] sm:$0xf0] }
 0xa04   : > { %13948 = vmatpush.bf16.msra.mxu2 %v19542_v28  ;;  %13923 = vmatpush.bf16.msra.mxu0 %v19270_v35  ;;  %v19829_v28 = vld [vmem:[%s22837_s3 + $0x460] sm:$0xf]  ;;  %v12162_v8 = vadd.f32 %v12161_v25, %v10638_v2  ;;  %v21580_v61 = vld [vmem:[%s22837_s3 + $0x40c] sm:$0xf0] }
 0xa05   : > { %v19830_v33 = vor.u32 %v21592_v13, %v19829_v28  ;;  %v19941_v35 = vld [vmem:[%s22837_s3 + $0x540] sm:$0xf]  ;;  %v21612_v17 = vld [vmem:[%s22837_s3 + $0x50c] sm:$0xf0]  ;;  %v19639_v28 = vld [vmem:[%s22837_s3 + $0x2f0] sm:$0xf0]  ;;  %v19514_v13 = vor.u32 %v21510_v45, %v19511_v24 }
 0xa06   : > { %13961 = vmatpush.bf16.msra.mxu3 %v19670_v4  ;;  %13936 = vmatpush.bf16.msra.mxu1 %v19398_v18  ;;  %v12175_v31 = vadd.f32 %v12174_v56, %v12162_v8  ;;  %v21588_v4 = vld [vmem:[%s22837_s3 + $0x44c] sm:$0xf0]  ;;  %v19781_v15 = vld [vmem:[%s22837_s3 + $0x400] sm:$0xf]  ;;  %v19367_v56 = vld [vmem:[%s22837_s3 + $0xd0] sm:$0xf0] }
 0xa07   : > { %13924 = vmatmul.bf16.vlgmr.msra.gmra.mxu0 %v26179_v5  ;;  %v19814_v52 = vor.u32 %v21588_v4, %v19813_v42  ;;  %v19909_v58 = vld [vmem:[%s22837_s3 + $0x500] sm:$0xf]  ;;  %v21644_v26 = vld [vmem:[%s22837_s3 + $0x60c] sm:$0xf0]  ;;  %v19782_v46 = vor.u32 %v21580_v61, %v19781_v15  ;;  %v21538_v42 = vld [vmem:[%s22837_s3 + $0x2c4] sm:$0xf] }
 0xa08   : > { %13949 = vmatpush.bf16.msra.mxu2 %v19526_v50  ;;  %13968 = vmatpush.bf16.msrb.mxu0 %v19894_v54  ;;  %v20069_v50 = vld [vmem:[%s22837_s3 + $0x640] sm:$0xf]  ;;  %v19942_v54 = vor.u32 %v21620_v57, %v19941_v35  ;;  %v21700_v8 = vld [vmem:[%s22837_s3 + $0x7cc] sm:$0xf0]  ;;  %v19623_v4 = vld [vmem:[%s22837_s3 + $0x2d0] sm:$0xf0]  ;;  %v19370_v35 = vor.u32 %v21474_v32, %v19367_v56 }
 0xa09   : > { %13937 = vmatmul.bf16.vlgmr.msra.gmra.mxu1 %v26181_v30  ;;  %v12163_v60 = vpop.f32.mrf.mxu0  ;;  %v20070_v38 = vor.u32 %v21652_v51, %v20069_v50  ;;  %v20277_v34 = vld [vmem:[%s22837_s3 + $0x7e0] sm:$0xf]  ;;  %v19351_v50 = vld [vmem:[%s22837_s3 + $0xb0] sm:$0xf0]  ;;  %v21502_v51 = vld [vmem:[%s22837_s3 + $0x1a4] sm:$0xf] }
 0xa0a   : > { %13981 = vmatpush.bf16.msrb.mxu1 %v20022_v59  ;;  %13962 = vmatpush.bf16.msra.mxu3 %v19654_v10  ;;  %v19797_v59 = vld [vmem:[%s22837_s3 + $0x420] sm:$0xf]  ;;  %v21648_v10 = vld [vmem:[%s22837_s3 + $0x62c] sm:$0xf0]  ;;  %v19607_v60 = vld [vmem:[%s22837_s3 + $0x2b0] sm:$0xf0] }
 0xa0b   : > { %13950 = vmatmul.bf16.vlgmr.msra.gmra.mxu2 %v26184_v53  ;;  %v12187_v29 = vpop.f32.mrf.mxu2  ;;  %v12176_v9 = vpop.f32.mrf.mxu1  ;;  %v20261_v40 = vld [vmem:[%s22837_s3 + $0x7c0] sm:$0xf]  ;;  %v21530_v61 = vld [vmem:[%s22837_s3 + $0x284] sm:$0xf]  ;;  %v19447_v24 = vld [vmem:[%s22837_s3 + $0x170] sm:$0xf0] }
 0xa0c   : > { %13994 = vmatpush.bf16.msrb.mxu2 %v20150_v37  ;;  %13969 = vmatpush.bf16.msrb.mxu0 %v19878_v16  ;;  %v12188_v49 = vadd.f32 %v12187_v29, %v12175_v31  ;;  %v20053_v37 = vld [vmem:[%s22837_s3 + $0x620] sm:$0xf]  ;;  %v19798_v16 = vor.u32 %v21584_v62, %v19797_v59  ;;  %v20262_v31 = vor.u32 %v21700_v8, %v20261_v40  ;;  %v21470_v29 = vld [vmem:[%s22837_s3 + $0xa4] sm:$0xf]  ;;  %v21684_v32 = vld [vmem:[%s22837_s3 + $0x74c] sm:$0xf0] }
 0xa0d   : > { %13963 = vmatmul.bf16.vlgmr.msra.gmra.mxu3 %v26186_v11  ;;  %v12200_v18 = vpop.f32.mrf.mxu3  ;;  %v20054_v55 = vor.u32 %v21648_v10, %v20053_v37  ;;  %v21534_v59 = vld [vmem:[%s22837_s3 + $0x2a4] sm:$0xf]  ;;  %v19354_v62 = vor.u32 %v21470_v29, %v19351_v50  ;;  %v20229_v9 = vld [vmem:[%s22837_s3 + $0x780] sm:$0xf]  ;;  %v19335_v37 = vld [vmem:[%s22837_s3 + $0x90] sm:$0xf0] }
 0xa0e   : > { %13982 = vmatpush.bf16.msrb.mxu1 %v20006_v20  ;;  %v12201_v14 = vadd.f32 %v12200_v18, %v12188_v49  ;;  %v19926_v20 = vor.u32 %v21616_v3, %v19925_v63  ;;  %v21696_v18 = vld [vmem:[%s22837_s3 + $0x7ac] sm:$0xf0]  ;;  %v19479_v49 = vld [vmem:[%s22837_s3 + $0x1b0] sm:$0xf0]  ;;  %v21466_v3 = vld [vmem:[%s22837_s3 + $0x84] sm:$0xf] }
 0xa0f   : > { %v19482_v63 = vor.u32 %v21502_v51, %v19479_v49  ;;  %v21498_v10 = vld [vmem:[%s22837_s3 + $0x184] sm:$0xf]  ;;  %v19303_v40 = vld [vmem:[%s22837_s3 + $0x50] sm:$0xf0] }
 0xa10   : > { %13995 = vmatpush.bf16.msrb.mxu2 %v20134_v36  ;;  %13970 = vmatpush.bf16.msrb.mxu0 %v19862_v47  ;;  %v21704_v47 = vld [vmem:[%s22837_s3 + $0x7ec] sm:$0xf0]  ;;  %v12364_v2 = vmax.f32 %v12201_v14, 0.0  ;;  %v19463_v14 = vld [vmem:[%s22837_s3 + $0x190] sm:$0xf0] }
 0xa11   : > { %v20278_v22 = vor.u32 %v21704_v47, %v20277_v34  ;;  %v21688_v34 = vld [vmem:[%s22837_s3 + $0x76c] sm:$0xf0]  ;;  %v21494_v45 = vld [vmem:[%s22837_s3 + $0x164] sm:$0xf]  ;;  %v19431_v56 = vld [vmem:[%s22837_s3 + $0x150] sm:$0xf0] }
 0xa12   : > { %13983 = vmatpush.bf16.msrb.mxu1 %v19990_v44  ;;  %v19383_v44 = vld [vmem:[%s22837_s3 + $0xf0] sm:$0xf0]  ;;  %v21490_v8 = vld [vmem:[%s22837_s3 + $0x144] sm:$0xf] }
 0xa13   : > { %v12189_v36 = vpop.f32.mrf.mxu2  ;;  %v19386_v25 = vor.u32 %v21478_v48, %v19383_v44  ;;  %14007 = vmatpush.bf16.msrb.mxu3 %v20278_v22  ;;  %v19466_v48 = vor.u32 %v21498_v10, %v19463_v14  ;;  %v19319_v44 = vld [vmem:[%s22837_s3 + $0x70] sm:$0xf0]  ;;  %v21454_v29 = vld [vmem:[%s22837_s3 + $0x24] sm:$0xf] }
 0xa14   : > { %13996 = vmatpush.bf16.msrb.mxu2 %v20118_v7  ;;  %13971 = vmatpush.bf16.msrb.mxu0 %v19846_v19  ;;  %v20037_v7 = vld [vmem:[%s22837_s3 + $0x600] sm:$0xf]  ;;  %v19910_v19 = vor.u32 %v21612_v17, %v19909_v58  ;;  %v19591_v58 = vld [vmem:[%s22837_s3 + $0x290] sm:$0xf0]  ;;  %v19338_v17 = vor.u32 %v21466_v3, %v19335_v37  ;;  %v21462_v36 = vld [vmem:[%s22837_s3 + $0x64] sm:$0xf] }
 0xa15   : > { %v12202_v12 = vpop.f32.mrf.mxu3  ;;  %v20038_v23 = vor.u32 %v21644_v26, %v20037_v7  ;;  %v19594_v7 = vor.u32 %v21530_v61, %v19591_v58  ;;  %v21526_v26 = vld [vmem:[%s22837_s3 + $0x264] sm:$0xf]  ;;  %v19287_v51 = vld [vmem:[%s22837_s3 + $0x30] sm:$0xf0]  ;;  %v20165_v61 = vld [vmem:[%s22837_s3 + $0x700] sm:$0xf] }
 0xa16   : > { %13984 = vmatpush.bf16.msrb.mxu1 %v19974_v21  ;;  %v21542_v21 = vld [vmem:[%s22837_s3 + $0x2e4] sm:$0xf]  ;;  %v19543_v10 = vld [vmem:[%s22837_s3 + $0x230] sm:$0xf0]  ;;  %v19290_v14 = vor.u32 %v21454_v29, %v19287_v51 }
 0xa17   : > { %14008 = vmatpush.bf16.msrb.mxu3 %v20262_v31  ;;  %v21486_v49 = vld [vmem:[%s22837_s3 + $0x124] sm:$0xf] }
 0xa18   : > { %13997 = vmatpush.bf16.msrb.mxu2 %v20102_v39  ;;  %13972 = vmatpush.bf16.msrb.mxu0 %v19830_v33  ;;  %v21506_v39 = vld [vmem:[%s22837_s3 + $0x1c4] sm:$0xf]  ;;  %v26246_v33 = vpack.c.bf16 %v12364_v2, %v12364_v2 }
 0xa19   : > { %v19498_v57 = vor.u32 %v21506_v39, %v19495_v41  ;;  %v21450_v3 = vld [vmem:[%s22837_s3 + $0x4] sm:$0xf] }
 0xa1a   : > { %13985 = vmatpush.bf16.msrb.mxu1 %v19958_v27  ;;  %v19642_v27 = vor.u32 %v21542_v21, %v19639_v28  ;;  %v19322_v21 = vor.u32 %v21462_v36, %v19319_v44  ;;  %v19450_v28 = vor.u32 %v21494_v45, %v19447_v24  ;;  %v21518_v37 = vld [vmem:[%s22837_s3 + $0x224] sm:$0xf]  ;;  %v21676_v36 = vld [vmem:[%s22837_s3 + $0x70c] sm:$0xf0]  ;;  %v19767_v24 = vld [vmem:[%s22837_s3 + $0x3f0] sm:$0xf0] }
 0xa1b   : > { %v20166_v44 = vor.u32 %v21676_v36, %v20165_v61  ;;  %v21574_v45 = vld [vmem:[%s22837_s3 + $0x3e4] sm:$0xf] }
 0xa1c   : > { %13998 = vmatpush.bf16.msrb.mxu2 %v20086_v43  ;;  %13973 = vmatpush.bf16.msrb.mxu0 %v19814_v52  ;;  %v20245_v43 = vld [vmem:[%s22837_s3 + $0x7a0] sm:$0xf]  ;;  %v21562_v51 = vld [vmem:[%s22837_s3 + $0x384] sm:$0xf] }
 0xa1d   : > { %v20246_v52 = vor.u32 %v21696_v18, %v20245_v43  ;;  %v20181_v43 = vld [vmem:[%s22837_s3 + $0x720] sm:$0xf]  ;;  %v21680_v18 = vld [vmem:[%s22837_s3 + $0x72c] sm:$0xf0] }
 0xa1e   : > { %13986 = vmatpush.bf16.msrb.mxu1 %v19942_v54  ;;  %v19626_v54 = vor.u32 %v21538_v42, %v19623_v4  ;;  %v21522_v42 = vld [vmem:[%s22837_s3 + $0x244] sm:$0xf]  ;;  %v19559_v4 = vld [vmem:[%s22837_s3 + $0x250] sm:$0xf0] }
 0xa1f   : > { %14009 = vmatpush.bf16.msrb.mxu3 %v20246_v52  ;;  %v19415_v52 = vld [vmem:[%s22837_s3 + $0x130] sm:$0xf0] }
 0xa20   : > { %13999 = vmatpush.bf16.msrb.mxu2 %v20070_v38  ;;  %13974 = vmatpush.bf16.msrb.mxu0 %v19798_v16  ;;  %v21692_v38 = vld [vmem:[%s22837_s3 + $0x78c] sm:$0xf0]  ;;  %v10639_v16 = vperm.slane %v26203_v6, 5 }
 0xa21   : > { %v20230_v15 = vor.u32 %v21692_v38, %v20229_v9  ;;  %v12213_v47 = vpop.f32.mrf.mxu0  ;;  %v19271_v9 = vld [vmem:[%s22837_s3 + $0x10] sm:$0xf0]  ;;  %v21482_v38 = vld [vmem:[%s22837_s3 + $0x104] sm:$0xf] }
 0xa22   : > { %13987 = vmatpush.bf16.msrb.mxu1 %v19926_v20  ;;  %v19610_v20 = vor.u32 %v21534_v59, %v19607_v60  ;;  %v12214_v22 = vadd.f32 %v12213_v47, %v10639_v16  ;;  %v20182_v59 = vor.u32 %v21680_v18, %v20181_v43  ;;  %v19399_v16 = vld [vmem:[%s22837_s3 + $0x110] sm:$0xf0]  ;;  %v19546_v47 = vor.u32 %v21518_v37, %v19543_v10 }
 0xa23   : > { %14010 = vmatpush.bf16.msrb.mxu3 %v20230_v15  ;;  %v12226_v2 = vpop.f32.mrf.mxu1  ;;  %v19418_v15 = vor.u32 %v21486_v49, %v19415_v52  ;;  %v19719_v49 = vld [vmem:[%s22837_s3 + $0x390] sm:$0xf0] }
 0xa24   : > { %14000 = vmatpush.bf16.msrb.mxu2 %v20054_v55  ;;  %13975 = vmatpush.bf16.msrb.mxu0 %v19782_v46  ;;  %v20213_v55 = vld [vmem:[%s22837_s3 + $0x760] sm:$0xf]  ;;  %v19575_v46 = vld [vmem:[%s22837_s3 + $0x270] sm:$0xf0] }
 0xa25   : > { %v20214_v12 = vor.u32 %v21688_v34, %v20213_v55  ;;  %v20023_v55 = vld [vmem:[%s22837_s3 + $0x5f0] sm:$0xf0] }
 0xa26   : > { %13988 = vmatpush.bf16.msrb.mxu1 %v19910_v19  ;;  %v12227_v19 = vadd.f32 %v12226_v2, %v12214_v22  ;;  %v21514_v22 = vld [vmem:[%s22837_s3 + $0x204] sm:$0xf]  ;;  %v19527_v2 = vld [vmem:[%s22837_s3 + $0x210] sm:$0xf0] }
 0xa27   : > { %13976 = vmatmul.bf16.vlgmr.msrb.gmra.mxu0 %v26246_v33  ;;  %14011 = vmatpush.bf16.msrb.mxu3 %v20214_v12  ;;  %v19847_v52 = vld [vmem:[%s22837_s3 + $0x490] sm:$0xf0] }
 0xa28   : > { %14020 = vmatpush.bf16.msra.mxu0 %v19386_v25  ;;  %14001 = vmatpush.bf16.msrb.mxu2 %v20038_v23  ;;  %v21458_v25 = vld [vmem:[%s22837_s3 + $0x44] sm:$0xf]  ;;  %v19578_v23 = vor.u32 %v21526_v26, %v19575_v46  ;;  %v19274_v26 = vor.u32 %v21450_v3, %v19271_v9  ;;  %v19402_v46 = vor.u32 %v21482_v38, %v19399_v16  ;;  %v19703_v37 = vld [vmem:[%s22837_s3 + $0x370] sm:$0xf0] }
 0xa29   : > { %v21590_v9 = vld [vmem:[%s22837_s3 + $0x464] sm:$0xf]  ;;  %v19831_v10 = vld [vmem:[%s22837_s3 + $0x470] sm:$0xf0] }
 0xa2a   : > { %14033 = vmatpush.bf16.msra.mxu1 %v19514_v13  ;;  %v20197_v13 = vld [vmem:[%s22837_s3 + $0x740] sm:$0xf]  ;;  %v21558_v38 = vld [vmem:[%s22837_s3 + $0x364] sm:$0xf] }
 0xa2b   : > { %v20198_v39 = vor.u32 %v21684_v32, %v20197_v13  ;;  %v12239_v41 = vpop.f32.mrf.mxu2  ;;  %v12228_v60 = vpop.f32.mrf.mxu1  ;;  %v21634_v13 = vld [vmem:[%s22837_s3 + $0x5c4] sm:$0xf]  ;;  %v20007_v32 = vld [vmem:[%s22837_s3 + $0x5d0] sm:$0xf0]  ;;  %v19706_v16 = vor.u32 %v21558_v38, %v19703_v37 }
 0xa2c   : > { %14046 = vmatpush.bf16.msra.mxu2 %v19642_v27  ;;  %14021 = vmatpush.bf16.msra.mxu0 %v19370_v35  ;;  %v12240_v31 = vadd.f32 %v12239_v41, %v12227_v19  ;;  %v19306_v35 = vor.u32 %v21458_v25, %v19303_v40  ;;  %v19879_v25 = vld [vmem:[%s22837_s3 + $0x4d0] sm:$0xf0]  ;;  %v19530_v40 = vor.u32 %v21514_v22, %v19527_v2 }
 0xa2d   : > { %v12252_v27 = vpop.f32.mrf.mxu3  ;;  %14012 = vmatpush.bf16.msrb.mxu3 %v20198_v39  ;;  %v19722_v60 = vor.u32 %v21562_v51, %v19719_v49  ;;  %v19655_v51 = vld [vmem:[%s22837_s3 + $0x310] sm:$0xf0] }
 0xa2e   : > { %14034 = vmatpush.bf16.msra.mxu1 %v19498_v57  ;;  %v19434_v57 = vor.u32 %v21490_v8, %v19431_v56  ;;  %v12253_v50 = vadd.f32 %v12252_v27, %v12240_v31  ;;  %v21570_v8 = vld [vmem:[%s22837_s3 + $0x3c4] sm:$0xf]  ;;  %v19751_v56 = vld [vmem:[%s22837_s3 + $0x3d0] sm:$0xf0] }
 0xa2f   : > { %v19754_v39 = vor.u32 %v21570_v8, %v19751_v56  ;;  %v21598_v31 = vld [vmem:[%s22837_s3 + $0x4a4] sm:$0xf] }
 0xa30   : > { %14047 = vmatpush.bf16.msra.mxu2 %v19626_v54  ;;  %14022 = vmatpush.bf16.msra.mxu0 %v19354_v62  ;;  %v12215_v54 = vpop.f32.mrf.mxu0  ;;  %v19562_v62 = vor.u32 %v21522_v42, %v19559_v4  ;;  %v21566_v27 = vld [vmem:[%s22837_s3 + $0x3a4] sm:$0xf]  ;;  %v19735_v42 = vld [vmem:[%s22837_s3 + $0x3b0] sm:$0xf0] }
 0xa31   : > { %14013 = vmatpush.bf16.msrb.mxu3 %v20182_v59  ;;  %v19863_v4 = vld [vmem:[%s22837_s3 + $0x4b0] sm:$0xf0]  ;;  %v19738_v29 = vor.u32 %v21566_v27, %v19735_v42  ;;  %v21626_v54 = vld [vmem:[%s22837_s3 + $0x584] sm:$0xf] }
 0xa32   : > { %14035 = vmatpush.bf16.msra.mxu1 %v19482_v63  ;;  %v12365_v63 = vmax.f32 %v12253_v50, 0.0  ;;  %v19866_v43 = vor.u32 %v21598_v31, %v19863_v4  ;;  %v21594_v50 = vld [vmem:[%s22837_s3 + $0x484] sm:$0xf]  ;;  %v19975_v59 = vld [vmem:[%s22837_s3 + $0x590] sm:$0xf0] }
 0xa33   : > { %v12241_v34 = vpop.f32.mrf.mxu2  ;;  %v19978_v3 = vor.u32 %v21626_v54, %v19975_v59  ;;  %v21578_v27 = vld [vmem:[%s22837_s3 + $0x404] sm:$0xf]  ;;  %v19783_v42 = vld [vmem:[%s22837_s3 + $0x410] sm:$0xf0]  ;;  %v21481_v54 = vld [vmem:[%s22837_s3 + $0xf4] sm:$0xf0] }
 0xa34   : > { %14048 = vmatpush.bf16.msra.mxu2 %v19610_v20  ;;  %14023 = vmatpush.bf16.msra.mxu0 %v19338_v17  ;;  %v21606_v20 = vld [vmem:[%s22837_s3 + $0x4e4] sm:$0xf]  ;;  %v26298_v58 = vpack.c.bf16 %v12365_v63, %v12365_v63  ;;  %v19895_v17 = vld [vmem:[%s22837_s3 + $0x4f0] sm:$0xf0]  ;;  %v19850_v63 = vor.u32 %v21594_v50, %v19847_v52  ;;  %v19389_v50 = vld [vmem:[%s22837_s3 + $0xe8] sm:$0xf]  ;;  %v19786_v38 = vor.u32 %v21578_v27, %v19783_v42 }
 0xa35   : > { %v12254_v12 = vpop.f32.mrf.mxu3  ;;  %v19898_v19 = vor.u32 %v21606_v20, %v19895_v17  ;;  %14014 = vmatpush.bf16.msrb.mxu3 %v20166_v44  ;;  %v21554_v34 = vld [vmem:[%s22837_s3 + $0x344] sm:$0xf]  ;;  %v19517_v59 = vld [vmem:[%s22837_s3 + $0x1e8] sm:$0xf]  ;;  %v21497_v27 = vld [vmem:[%s22837_s3 + $0x174] sm:$0xf0] }
 0xa36   : > { %14036 = vmatpush.bf16.msra.mxu1 %v19466_v48  ;;  %v21638_v48 = vld [vmem:[%s22837_s3 + $0x5e4] sm:$0xf]  ;;  %v19943_v12 = vld [vmem:[%s22837_s3 + $0x550] sm:$0xf0] }
 0xa37   : > { %13989 = vmatmul.bf16.vlgmr.msrb.gmra.mxu1 %v26298_v58 }
 0xa38   : > { %14049 = vmatpush.bf16.msra.mxu2 %v19594_v7  ;;  %14024 = vmatpush.bf16.msra.mxu0 %v19322_v21  ;;  %v19770_v7 = vor.u32 %v21574_v45, %v19767_v24  ;;  %v20026_v21 = vor.u32 %v21638_v48, %v20023_v55  ;;  %v19834_v48 = vor.u32 %v21590_v9, %v19831_v10  ;;  %v21586_v55 = vld [vmem:[%s22837_s3 + $0x444] sm:$0xf]  ;;  %v19815_v45 = vld [vmem:[%s22837_s3 + $0x450] sm:$0xf0] }
 0xa39   : > { %v21618_v24 = vld [vmem:[%s22837_s3 + $0x544] sm:$0xf]  ;;  %v20135_v9 = vld [vmem:[%s22837_s3 + $0x6d0] sm:$0xf0] }
 0xa3a   : > { %14037 = vmatpush.bf16.msra.mxu1 %v19450_v28  ;;  %v21602_v28 = vld [vmem:[%s22837_s3 + $0x4c4] sm:$0xf]  ;;  %14059 = vmatpush.bf16.msra.mxu3 %v19770_v7 }
 0xa3b   : > { %v19882_v41 = vor.u32 %v21602_v28, %v19879_v25  ;;  %v21550_v28 = vld [vmem:[%s22837_s3 + $0x324] sm:$0xf]  ;;  %v19671_v25 = vld [vmem:[%s22837_s3 + $0x330] sm:$0xf0] }
 0xa3c   : > { %14050 = vmatpush.bf16.msra.mxu2 %v19578_v23  ;;  %14025 = vmatpush.bf16.msra.mxu0 %v19306_v35  ;;  %v20010_v23 = vor.u32 %v21634_v13, %v20007_v32  ;;  %v21630_v35 = vld [vmem:[%s22837_s3 + $0x5a4] sm:$0xf]  ;;  %v19799_v13 = vld [vmem:[%s22837_s3 + $0x430] sm:$0xf0]  ;;  %v19674_v8 = vor.u32 %v21550_v28, %v19671_v25  ;;  %v21469_v28 = vld [vmem:[%s22837_s3 + $0x94] sm:$0xf0] }
 0xa3d   : > { %v21614_v32 = vld [vmem:[%s22837_s3 + $0x524] sm:$0xf]  ;;  %v19469_v25 = vld [vmem:[%s22837_s3 + $0x188] sm:$0xf] }
 0xa3e   : > { %14038 = vmatpush.bf16.msra.mxu1 %v19434_v57  ;;  %v19991_v57 = vld [vmem:[%s22837_s3 + $0x5b0] sm:$0xf0]  ;;  %14060 = vmatpush.bf16.msra.mxu3 %v19754_v39 }
 0xa3f   : > { %v19994_v18 = vor.u32 %v21630_v35, %v19991_v57 }
 0xa40   : > { %14051 = vmatpush.bf16.msra.mxu2 %v19562_v62  ;;  %14026 = vmatpush.bf16.msra.mxu0 %v19290_v14  ;;  %v10640_v62 = vperm.slane %v26203_v6, 6  ;;  %v21622_v14 = vld [vmem:[%s22837_s3 + $0x564] sm:$0xf] }
 0xa42   : > { %14039 = vmatpush.bf16.msra.mxu1 %v19418_v15  ;;  %14061 = vmatpush.bf16.msra.mxu3 %v19738_v29  ;;  %v19959_v15 = vld [vmem:[%s22837_s3 + $0x570] sm:$0xf0]  ;;  %v12265_v20 = vpop.f32.mrf.mxu0  ;;  %v21610_v29 = vld [vmem:[%s22837_s3 + $0x504] sm:$0xf] }
 0xa43   : > { %v12266_v61 = vadd.f32 %v12265_v20, %v10640_v62  ;;  %v19962_v36 = vor.u32 %v21622_v14, %v19959_v15  ;;  %v19390_v14 = vor.u32 %v21481_v54, %v19389_v50  ;;  %v19309_v50 = vld [vmem:[%s22837_s3 + $0x48] sm:$0xf]  ;;  %v21493_v54 = vld [vmem:[%s22837_s3 + $0x154] sm:$0xf0] }
 0xa44   : > { %14052 = vmatpush.bf16.msra.mxu2 %v19546_v47  ;;  %14027 = vmatpush.bf16.msra.mxu0 %v19274_v26  ;;  %v12278_v17 = vpop.f32.mrf.mxu1  ;;  %v19687_v47 = vld [vmem:[%s22837_s3 + $0x350] sm:$0xf0] }
 0xa45   : > { %v12279_v44 = vadd.f32 %v12278_v17, %v12266_v61  ;;  %v19690_v22 = vor.u32 %v21554_v34, %v19687_v47  ;;  %v21477_v61 = vld [vmem:[%s22837_s3 + $0xd4] sm:$0xf0]  ;;  %v19501_v17 = vld [vmem:[%s22837_s3 + $0x1c8] sm:$0xf] }
 0xa46   : > { %14040 = vmatpush.bf16.msra.mxu1 %v19402_v46  ;;  %14062 = vmatpush.bf16.msra.mxu3 %v19722_v60  ;;  %v19818_v46 = vor.u32 %v21586_v55, %v19815_v45  ;;  %v21513_v60 = vld [vmem:[%s22837_s3 + $0x1f4] sm:$0xf0]  ;;  %v20119_v55 = vld [vmem:[%s22837_s3 + $0x6b0] sm:$0xf0] }
 0xa47   : > { %14028 = vmatmul.bf16.vlgmr.msra.gmra.mxu0 %v26179_v5  ;;  %v19518_v15 = vor.u32 %v21513_v60, %v19517_v59 }
 0xa48   : > { %14072 = vmatpush.bf16.msrb.mxu0 %v19898_v19  ;;  %14053 = vmatpush.bf16.msra.mxu2 %v19530_v40  ;;  %v19946_v19 = vor.u32 %v21618_v24, %v19943_v12  ;;  %v19927_v40 = vld [vmem:[%s22837_s3 + $0x530] sm:$0xf0]  ;;  %v21473_v24 = vld [vmem:[%s22837_s3 + $0xb4] sm:$0xf0]  ;;  %v19485_v12 = vld [vmem:[%s22837_s3 + $0x1a8] sm:$0xf] }
 0xa49   : > { %14041 = vmatmul.bf16.vlgmr.msra.gmra.mxu1 %v26181_v30  ;;  %v19930_v57 = vor.u32 %v21614_v32, %v19927_v40  ;;  %v10641_v32 = vperm.slane %v26203_v6, 7  ;;  %v21654_v40 = vld [vmem:[%s22837_s3 + $0x664] sm:$0xf] }
 0xa4a   : > { %14085 = vmatpush.bf16.msrb.mxu1 %v20026_v21  ;;  %14063 = vmatpush.bf16.msra.mxu3 %v19706_v16  ;;  %v21582_v21 = vld [vmem:[%s22837_s3 + $0x424] sm:$0xf]  ;;  %v12267_v39 = vpop.f32.mrf.mxu0  ;;  %v19373_v16 = vld [vmem:[%s22837_s3 + $0xc8] sm:$0xf] }
 0xa4b   : > { %v19802_v35 = vor.u32 %v21582_v21, %v19799_v13  ;;  %v19374_v34 = vor.u32 %v21477_v61, %v19373_v16  ;;  %v21501_v13 = vld [vmem:[%s22837_s3 + $0x194] sm:$0xf0] }
 0xa4c   : > { %14073 = vmatpush.bf16.msrb.mxu0 %v19882_v41  ;;  %v12291_v2 = vpop.f32.mrf.mxu2  ;;  %v21670_v41 = vld [vmem:[%s22837_s3 + $0x6e4] sm:$0xf]  ;;  %v12280_v31 = vpop.f32.mrf.mxu1  ;;  %v19470_v39 = vor.u32 %v21501_v13, %v19469_v25  ;;  %v21489_v16 = vld [vmem:[%s22837_s3 + $0x134] sm:$0xf0] }
 0xa4d   : > { %v12292_v7 = vadd.f32 %v12291_v2, %v12279_v44  ;;  %v19357_v44 = vld [vmem:[%s22837_s3 + $0xa8] sm:$0xf]  ;;  %v21658_v2 = vld [vmem:[%s22837_s3 + $0x684] sm:$0xf]  ;;  %v21609_v25 = vld [vmem:[%s22837_s3 + $0x4f4] sm:$0xf0] }
 0xa4e   : > { %14086 = vmatpush.bf16.msrb.mxu1 %v20010_v23  ;;  %v12304_v26 = vpop.f32.mrf.mxu3  ;;  %14064 = vmatpush.bf16.msra.mxu3 %v19690_v22  ;;  %v20151_v23 = vld [vmem:[%s22837_s3 + $0x6f0] sm:$0xf0]  ;;  %v21505_v22 = vld [vmem:[%s22837_s3 + $0x1b4] sm:$0xf0]  ;;  %v19453_v31 = vld [vmem:[%s22837_s3 + $0x168] sm:$0xf] }
 0xa4f   : > { %v12305_v56 = vadd.f32 %v12304_v26, %v12292_v7  ;;  %v20154_v52 = vor.u32 %v21670_v41, %v20151_v23  ;;  %v20103_v7 = vld [vmem:[%s22837_s3 + $0x690] sm:$0xf0]  ;;  %v19358_v26 = vor.u32 %v21473_v24, %v19357_v44  ;;  %v19325_v41 = vld [vmem:[%s22837_s3 + $0x68] sm:$0xf]  ;;  %v21465_v23 = vld [vmem:[%s22837_s3 + $0x74] sm:$0xf0] }
 0xa50   : > { %14074 = vmatpush.bf16.msrb.mxu0 %v19866_v43  ;;  %v21546_v43 = vld [vmem:[%s22837_s3 + $0x304] sm:$0xf]  ;;  %v20106_v21 = vor.u32 %v21658_v2, %v20103_v7  ;;  %v19277_v2 = vld [vmem:[%s22837_s3 + $0x8] sm:$0xf]  ;;  %v21453_v7 = vld [vmem:[%s22837_s3 + $0x14] sm:$0xf0] }
 0xa51   : > { %v12366_v4 = vmax.f32 %v12305_v56, 0.0  ;;  %v19658_v62 = vor.u32 %v21546_v43, %v19655_v51  ;;  %v19326_v43 = vor.u32 %v21465_v23, %v19325_v41  ;;  %v21461_v51 = vld [vmem:[%s22837_s3 + $0x54] sm:$0xf0]  ;;  %v19278_v41 = vor.u32 %v21453_v7, %v19277_v2  ;;  %v19581_v2 = vld [vmem:[%s22837_s3 + $0x268] sm:$0xf] }
 0xa52   : > { %14087 = vmatpush.bf16.msrb.mxu1 %v19994_v18  ;;  %v19911_v18 = vld [vmem:[%s22837_s3 + $0x510] sm:$0xf0]  ;;  %14065 = vmatpush.bf16.msra.mxu3 %v19674_v8  ;;  %v21529_v7 = vld [vmem:[%s22837_s3 + $0x274] sm:$0xf0] }
 0xa53   : > { %v26357_v49 = vpack.c.bf16 %v12366_v4, %v12366_v4  ;;  %v19914_v37 = vor.u32 %v21610_v29, %v19911_v18  ;;  %v20087_v8 = vld [vmem:[%s22837_s3 + $0x670] sm:$0xf0]  ;;  %v19454_v18 = vor.u32 %v21497_v27, %v19453_v31  ;;  %v19629_v27 = vld [vmem:[%s22837_s3 + $0x2c8] sm:$0xf] }
 0xa54   : > { %14075 = vmatpush.bf16.msrb.mxu0 %v19850_v63  ;;  %v12293_v63 = vpop.f32.mrf.mxu2  ;;  %v20090_v6 = vor.u32 %v21654_v40, %v20087_v8  ;;  %v20071_v29 = vld [vmem:[%s22837_s3 + $0x650] sm:$0xf0]  ;;  %v20029_v40 = vld [vmem:[%s22837_s3 + $0x5e8] sm:$0xf]  ;;  %v21641_v8 = vld [vmem:[%s22837_s3 + $0x5f4] sm:$0xf0] }
 0xa55   : > { %14002 = vmatmul.bf16.vlgmr.msrb.gmra.mxu2 %v26357_v49  ;;  %v20055_v63 = vld [vmem:[%s22837_s3 + $0x630] sm:$0xf0] }
 0xa56   : > { %14088 = vmatpush.bf16.msrb.mxu1 %v19978_v3  ;;  %v21666_v3 = vld [vmem:[%s22837_s3 + $0x6c4] sm:$0xf]  ;;  %v12306_v10 = vpop.f32.mrf.mxu3  ;;  %14066 = vmatpush.bf16.msra.mxu3 %v19658_v62  ;;  %v20263_v31 = vld [vmem:[%s22837_s3 + $0x7d0] sm:$0xf0] }
 0xa57   : > { %14098 = vmatpush.bf16.msrb.mxu2 %v20154_v52  ;;  %v20138_v20 = vor.u32 %v21666_v3, %v20135_v9  ;;  %v19437_v52 = vld [vmem:[%s22837_s3 + $0x148] sm:$0xf]  ;;  %v21646_v62 = vld [vmem:[%s22837_s3 + $0x624] sm:$0xf]  ;;  %v19310_v3 = vor.u32 %v21461_v51, %v19309_v50 }
 0xa58   : > { %14076 = vmatpush.bf16.msrb.mxu0 %v19834_v48  ;;  %v21509_v48 = vld [vmem:[%s22837_s3 + $0x1d4] sm:$0xf0]  ;;  %v19438_v9 = vor.u32 %v21493_v54, %v19437_v52  ;;  %v20013_v51 = vld [vmem:[%s22837_s3 + $0x5c8] sm:$0xf]  ;;  %v21694_v54 = vld [vmem:[%s22837_s3 + $0x7a4] sm:$0xf] }
 0xa59   : > { %v19502_v47 = vor.u32 %v21509_v48, %v19501_v17  ;;  %v20058_v48 = vor.u32 %v21646_v62, %v20055_v63  ;;  %v21637_v52 = vld [vmem:[%s22837_s3 + $0x5d4] sm:$0xf0] }
 0xa5a   : > { %14089 = vmatpush.bf16.msrb.mxu1 %v19962_v36  ;;  %v21662_v36 = vld [vmem:[%s22837_s3 + $0x6a4] sm:$0xf]  ;;  %v21537_v62 = vld [vmem:[%s22837_s3 + $0x2b4] sm:$0xf0] }
 0xa5b   : > { %14099 = vmatpush.bf16.msrb.mxu2 %v20138_v20  ;;  %v20122_v45 = vor.u32 %v21662_v36, %v20119_v55  ;;  %v21642_v36 = vld [vmem:[%s22837_s3 + $0x604] sm:$0xf]  ;;  %v20039_v55 = vld [vmem:[%s22837_s3 + $0x610] sm:$0xf0] }
 0xa5c   : > { %14077 = vmatpush.bf16.msrb.mxu0 %v19818_v46  ;;  %v19486_v46 = vor.u32 %v21505_v22, %v19485_v12  ;;  %v19645_v12 = vld [vmem:[%s22837_s3 + $0x2e8] sm:$0xf]  ;;  %v21545_v22 = vld [vmem:[%s22837_s3 + $0x2f4] sm:$0xf0] }
 0xa5e   : > { %14090 = vmatpush.bf16.msrb.mxu1 %v19946_v19  ;;  %v19341_v19 = vld [vmem:[%s22837_s3 + $0x88] sm:$0xf] }
 0xa5f   : > { %14100 = vmatpush.bf16.msrb.mxu2 %v20122_v45  ;;  %v19342_v56 = vor.u32 %v21469_v28, %v19341_v19  ;;  %v19901_v28 = vld [vmem:[%s22837_s3 + $0x4e8] sm:$0xf] }
 0xa60   : > { %14078 = vmatpush.bf16.msrb.mxu0 %v19802_v35 }
 0xa62   : > { %14091 = vmatpush.bf16.msrb.mxu1 %v19930_v57  ;;  %v21650_v57 = vld [vmem:[%s22837_s3 + $0x644] sm:$0xf] }
 0xa63   : > { %14101 = vmatpush.bf16.msrb.mxu2 %v20106_v21  ;;  %v20074_v60 = vor.u32 %v21650_v57, %v20071_v29  ;;  %v20042_v21 = vor.u32 %v21642_v36, %v20039_v55  ;;  %v20030_v57 = vor.u32 %v21641_v8, %v20029_v40  ;;  %v19885_v29 = vld [vmem:[%s22837_s3 + $0x4c8] sm:$0xf]  ;;  %v21625_v40 = vld [vmem:[%s22837_s3 + $0x574] sm:$0xf0]  ;;  %v21682_v8 = vld [vmem:[%s22837_s3 + $0x744] sm:$0xf] }
 0xa64   : > { %14079 = vmatpush.bf16.msrb.mxu0 %v19786_v38  ;;  %v12317_v42 = vpop.f32.mrf.mxu0  ;;  %v19293_v38 = vld [vmem:[%s22837_s3 + $0x28] sm:$0xf] }
 0xa65   : > { %v12318_v35 = vadd.f32 %v12317_v42, %v10641_v32  ;;  %14054 = vmatmul.bf16.vlgmr.msra.gmra.mxu2 %v26184_v53  ;;  %v19646_v32 = vor.u32 %v21545_v22, %v19645_v12  ;;  %v21541_v42 = vld [vmem:[%s22837_s3 + $0x2d4] sm:$0xf0]  ;;  %v19853_v55 = vld [vmem:[%s22837_s3 + $0x488] sm:$0xf]  ;;  %v21686_v12 = vld [vmem:[%s22837_s3 + $0x764] sm:$0xf] }
 0xa66   : > { %14092 = vmatpush.bf16.msrb.mxu1 %v19914_v37  ;;  %v12330_v4 = vpop.f32.mrf.mxu1  ;;  %v19630_v50 = vor.u32 %v21541_v42, %v19629_v27  ;;  %v20215_v22 = vld [vmem:[%s22837_s3 + $0x770] sm:$0xf0] }
 0xa67   : > { %14080 = vmatmul.bf16.vlgmr.msrb.gmra.mxu0 %v26246_v33  ;;  %v12331_v59 = vadd.f32 %v12330_v4, %v12318_v35  ;;  %14102 = vmatpush.bf16.msrb.mxu2 %v20090_v6  ;;  %v19902_v35 = vor.u32 %v21609_v25, %v19901_v28  ;;  %v20218_v25 = vor.u32 %v21686_v12, %v20215_v22  ;;  %v19789_v22 = vld [vmem:[%s22837_s3 + $0x408] sm:$0xf] }
 0xa68   : > { %14124 = vmatpush.bf16.msra.mxu0 %v19390_v14  ;;  %v21457_v14 = vld [vmem:[%s22837_s3 + $0x34] sm:$0xf0] }
 0xa69   : > { %14093 = vmatmul.bf16.vlgmr.msrb.gmra.mxu1 %v26298_v58  ;;  %v19294_v45 = vor.u32 %v21457_v14, %v19293_v38  ;;  %v21601_v38 = vld [vmem:[%s22837_s3 + $0x4b4] sm:$0xf0]  ;;  %v19997_v14 = vld [vmem:[%s22837_s3 + $0x5a8] sm:$0xf] }
 0xa6a   : > { %14137 = vmatpush.bf16.msra.mxu1 %v19518_v15  ;;  %v19421_v15 = vld [vmem:[%s22837_s3 + $0x128] sm:$0xf] }
 0xa6b   : > { %14103 = vmatpush.bf16.msrb.mxu2 %v20074_v60  ;;  %v19422_v24 = vor.u32 %v21489_v16, %v19421_v15  ;;  %v19613_v60 = vld [vmem:[%s22837_s3 + $0x2a8] sm:$0xf]  ;;  %v21633_v15 = vld [vmem:[%s22837_s3 + $0x5b4] sm:$0xf0]  ;;  %v21690_v16 = vld [vmem:[%s22837_s3 + $0x784] sm:$0xf] }
 0xa6c   : > { %14125 = vmatpush.bf16.msra.mxu0 %v19374_v34  ;;  %v12319_v61 = vpop.f32.mrf.mxu0  ;;  %v21702_v34 = vld [vmem:[%s22837_s3 + $0x7e4] sm:$0xf]  ;;  %v19998_v36 = vor.u32 %v21633_v15, %v19997_v14  ;;  %v21617_v14 = vld [vmem:[%s22837_s3 + $0x534] sm:$0xf0] }
 0xa6d   : > { %v19597_v61 = vld [vmem:[%s22837_s3 + $0x288] sm:$0xf]  ;;  %v21674_v15 = vld [vmem:[%s22837_s3 + $0x704] sm:$0xf] }
 0xa6e   : > { %14138 = vmatpush.bf16.msra.mxu1 %v19502_v47  ;;  %v12343_v37 = vpop.f32.mrf.mxu2  ;;  %v12332_v17 = vpop.f32.mrf.mxu1  ;;  %v20279_v47 = vld [vmem:[%s22837_s3 + $0x7f0] sm:$0xf0] }
 0xa6f   : > { %v12344_v20 = vadd.f32 %v12343_v37, %v12331_v59  ;;  %14104 = vmatpush.bf16.msrb.mxu2 %v20058_v48  ;;  %v20282_v13 = vor.u32 %v21702_v34, %v20279_v47  ;;  %v20247_v59 = vld [vmem:[%s22837_s3 + $0x7b0] sm:$0xf0]  ;;  %v21533_v17 = vld [vmem:[%s22837_s3 + $0x294] sm:$0xf0] }
 0xa70   : > { %14126 = vmatpush.bf16.msra.mxu0 %v19358_v26  ;;  %v12356_v10 = vpop.f32.mrf.mxu3  ;;  %v19405_v26 = vld [vmem:[%s22837_s3 + $0x108] sm:$0xf]  ;;  %v20250_v37 = vor.u32 %v21694_v54, %v20247_v59  ;;  %v21597_v34 = vld [vmem:[%s22837_s3 + $0x494] sm:$0xf0] }
 0xa71   : > { %v12357_v44 = vadd.f32 %v12356_v10, %v12344_v20  ;;  %v19614_v10 = vor.u32 %v21537_v62, %v19613_v60  ;;  %v20231_v20 = vld [vmem:[%s22837_s3 + $0x790] sm:$0xf0]  ;;  %v21521_v54 = vld [vmem:[%s22837_s3 + $0x234] sm:$0xf0]  ;;  %v19805_v62 = vld [vmem:[%s22837_s3 + $0x428] sm:$0xf] }
 0xa72   : > { %14139 = vmatpush.bf16.msra.mxu1 %v19486_v46  ;;  %v21485_v46 = vld [vmem:[%s22837_s3 + $0x114] sm:$0xf0]  ;;  %v20234_v47 = vor.u32 %v21690_v16, %v20231_v20  ;;  %v20167_v16 = vld [vmem:[%s22837_s3 + $0x710] sm:$0xf0] }
 0xa73   : > { %v12367_v19 = vmax.f32 %v12357_v44, 0.0  ;;  %v19406_v23 = vor.u32 %v21485_v46, %v19405_v26  ;;  %14105 = vmatpush.bf16.msrb.mxu2 %v20042_v21  ;;  %v19598_v44 = vor.u32 %v21533_v17, %v19597_v61  ;;  %v19854_v26 = vor.u32 %v21597_v34, %v19853_v55  ;;  %v21593_v21 = vld [vmem:[%s22837_s3 + $0x474] sm:$0xf0]  ;;  %v19533_v17 = vld [vmem:[%s22837_s3 + $0x208] sm:$0xf] }
 0xa74   : > { %14127 = vmatpush.bf16.msra.mxu0 %v19342_v56  ;;  %v21698_v56 = vld [vmem:[%s22837_s3 + $0x7c4] sm:$0xf] }
 0xa76   : > { %14140 = vmatpush.bf16.msra.mxu1 %v19470_v39  ;;  %v26418_v39 = vpack.c.bf16 %v12367_v19, %v12367_v19  ;;  %v12345_v4 = vpop.f32.mrf.mxu2  ;;  %14106 = vmatmul.bf16.vlgmr.msrb.gmra.mxu2 %v26357_v49  ;;  %v19837_v19 = vld [vmem:[%s22837_s3 + $0x468] sm:$0xf] }
 0xa77   : > { %14150 = vmatpush.bf16.msra.mxu2 %v19646_v32  ;;  %v19965_v32 = vld [vmem:[%s22837_s3 + $0x568] sm:$0xf]  ;;  %v19838_v42 = vor.u32 %v21593_v21, %v19837_v19  ;;  %v21613_v19 = vld [vmem:[%s22837_s3 + $0x514] sm:$0xf0] }
 0xa78   : > { %14128 = vmatpush.bf16.msra.mxu0 %v19326_v43  ;;  %v12358_v6 = vpop.f32.mrf.mxu3  ;;  %14015 = vmatmul.bf16.vlgmr.msrb.gmra.mxu3 %v26418_v39  ;;  %v21605_v43 = vld [vmem:[%s22837_s3 + $0x4d4] sm:$0xf0]  ;;  %v19966_v4 = vor.u32 %v21625_v40, %v19965_v32  ;;  %v21511_v32 = vld [vmem:[%s22837_s3 + $0x1ec] sm:$0xf] }
 0xa79   : > { %14111 = vmatpush.bf16.msrb.mxu3 %v20282_v13  ;;  %v19886_v63 = vor.u32 %v21605_v43, %v19885_v29  ;;  %v19582_v13 = vor.u32 %v21529_v7, %v19581_v2  ;;  %v19821_v6 = vld [vmem:[%s22837_s3 + $0x448] sm:$0xf]  ;;  %v21581_v2 = vld [vmem:[%s22837_s3 + $0x414] sm:$0xf0]  ;;  %v20170_v7 = vor.u32 %v21674_v15, %v20167_v16 }
 0xa7a   : > { %14141 = vmatpush.bf16.msra.mxu1 %v19454_v18  ;;  %v20266_v18 = vor.u32 %v21698_v56, %v20263_v31  ;;  %v21525_v31 = vld [vmem:[%s22837_s3 + $0x254] sm:$0xf0]  ;;  %v19949_v43 = vld [vmem:[%s22837_s3 + $0x548] sm:$0xf]  ;;  %v19790_v40 = vor.u32 %v21581_v2, %v19789_v22 }
 0xa7b   : > { %14151 = vmatpush.bf16.msra.mxu2 %v19630_v50  ;;  %v21678_v50 = vld [vmem:[%s22837_s3 + $0x724] sm:$0xf]  ;;  %v19725_v15 = vld [vmem:[%s22837_s3 + $0x388] sm:$0xf]  ;;  %v21565_v16 = vld [vmem:[%s22837_s3 + $0x394] sm:$0xf0] }
 0xa7c   : > { %14129 = vmatpush.bf16.msra.mxu0 %v19310_v3  ;;  %v20014_v3 = vor.u32 %v21637_v52, %v20013_v51  ;;  %v20183_v51 = vld [vmem:[%s22837_s3 + $0x730] sm:$0xf0]  ;;  %v19549_v52 = vld [vmem:[%s22837_s3 + $0x228] sm:$0xf]  ;;  %v21561_v22 = vld [vmem:[%s22837_s3 + $0x374] sm:$0xf0] }
 0xa7d   : > { %14112 = vmatpush.bf16.msrb.mxu3 %v20266_v18  ;;  %v21621_v18 = vld [vmem:[%s22837_s3 + $0x554] sm:$0xf0]  ;;  %v20093_v2 = vld [vmem:[%s22837_s3 + $0x668] sm:$0xf] }
 0xa7e   : > { %14142 = vmatpush.bf16.msra.mxu1 %v19438_v9  ;;  %v19869_v9 = vld [vmem:[%s22837_s3 + $0x4a8] sm:$0xf]  ;;  %v19950_v60 = vor.u32 %v21621_v18, %v19949_v43  ;;  %v21507_v43 = vld [vmem:[%s22837_s3 + $0x1cc] sm:$0xf] }
 0xa7f   : > { %v19870_v48 = vor.u32 %v21601_v38, %v19869_v9  ;;  %14152 = vmatpush.bf16.msra.mxu2 %v19614_v10  ;;  %v19550_v10 = vor.u32 %v21521_v54, %v19549_v52  ;;  %v21569_v52 = vld [vmem:[%s22837_s3 + $0x3b4] sm:$0xf0] }
 0xa80   : > { %14130 = vmatpush.bf16.msra.mxu0 %v19294_v45  ;;  %v19981_v45 = vld [vmem:[%s22837_s3 + $0x588] sm:$0xf] }
 0xa81   : > { %14113 = vmatpush.bf16.msrb.mxu3 %v20250_v37  ;;  %v20186_v37 = vor.u32 %v21678_v50, %v20183_v51  ;;  %v19503_v50 = vld [vmem:[%s22837_s3 + $0x1d8] sm:$0xf0]  ;;  %v19741_v51 = vld [vmem:[%s22837_s3 + $0x3a8] sm:$0xf] }
 0xa82   : > { %14143 = vmatpush.bf16.msra.mxu1 %v19422_v24  ;;  %v21629_v24 = vld [vmem:[%s22837_s3 + $0x594] sm:$0xf0] }
 0xa83   : > { %v19982_v46 = vor.u32 %v21629_v24, %v19981_v45  ;;  %14153 = vmatpush.bf16.msra.mxu2 %v19598_v44  ;;  %v20157_v44 = vld [vmem:[%s22837_s3 + $0x6e8] sm:$0xf]  ;;  %v21673_v45 = vld [vmem:[%s22837_s3 + $0x6f4] sm:$0xf0] }
 0xa84   : > { %14131 = vmatpush.bf16.msra.mxu0 %v19278_v41  ;;  %v13925_v28 = vpop.f32.mrf.mxu0  ;;  %v20199_v41 = vld [vmem:[%s22837_s3 + $0x750] sm:$0xf0] }
 0xa85   : > { %14114 = vmatpush.bf16.msrb.mxu3 %v20234_v47  ;;  %v21577_v47 = vld [vmem:[%s22837_s3 + $0x3f4] sm:$0xf0] }
 0xa86   : > { %14144 = vmatpush.bf16.msra.mxu1 %v19406_v23  ;;  %v13938_v56 = vpop.f32.mrf.mxu1  ;;  %v19565_v23 = vld [vmem:[%s22837_s3 + $0x248] sm:$0xf] }
 0xa87   : > { %14132 = vmatmul.bf16.vlgmr.msra.gmra.mxu0 %v26179_v5  ;;  %v13939_v27 = vadd.f32 %v13938_v56, %v13925_v28  ;;  %14154 = vmatpush.bf16.msra.mxu2 %v19582_v13  ;;  %v19566_v29 = vor.u32 %v21525_v31, %v19565_v23  ;;  %v20158_v28 = vor.u32 %v21673_v45, %v20157_v44  ;;  %v19391_v13 = vld [vmem:[%s22837_s3 + $0xf8] sm:$0xf0]  ;;  %v19757_v56 = vld [vmem:[%s22837_s3 + $0x3c8] sm:$0xf] }
 0xa88   : > { %14176 = vmatpush.bf16.msrb.mxu0 %v19902_v35  ;;  %14067 = vmatmul.bf16.vlgmr.msra.gmra.mxu3 %v26186_v11  ;;  %v21589_v35 = vld [vmem:[%s22837_s3 + $0x454] sm:$0xf0]  ;;  %v20141_v31 = vld [vmem:[%s22837_s3 + $0x6c8] sm:$0xf]  ;;  %v19471_v45 = vld [vmem:[%s22837_s3 + $0x198] sm:$0xf0] }
 0xa89   : > { %14145 = vmatmul.bf16.vlgmr.msra.gmra.mxu1 %v26181_v30  ;;  %14115 = vmatpush.bf16.msrb.mxu3 %v20218_v25  ;;  %v19822_v59 = vor.u32 %v21589_v35, %v19821_v6  ;;  %v21479_v25 = vld [vmem:[%s22837_s3 + $0xec] sm:$0xf] }
 0xa8a   : > { %14189 = vmatpush.bf16.msrb.mxu1 %v20030_v57  ;;  %v20202_v57 = vor.u32 %v21682_v8, %v20199_v41  ;;  %v19519_v8 = vld [vmem:[%s22837_s3 + $0x1f8] sm:$0xf0]  ;;  %v21573_v41 = vld [vmem:[%s22837_s3 + $0x3d4] sm:$0xf0] }
 0xa8b   : > { %14155 = vmatpush.bf16.msra.mxu2 %v19566_v29  ;;  %v19522_v6 = vor.u32 %v21511_v32, %v19519_v8  ;;  %v19758_v35 = vor.u32 %v21573_v41, %v19757_v56  ;;  %v19375_v29 = vld [vmem:[%s22837_s3 + $0xd8] sm:$0xf0]  ;;  %v19693_v8 = vld [vmem:[%s22837_s3 + $0x348] sm:$0xf]  ;;  %v21557_v56 = vld [vmem:[%s22837_s3 + $0x354] sm:$0xf0] }
 0xa8c   : > { %14177 = vmatpush.bf16.msrb.mxu0 %v19886_v63  ;;  %v21585_v63 = vld [vmem:[%s22837_s3 + $0x434] sm:$0xf0]  ;;  %v13927_v38 = vpop.f32.mrf.mxu0 }
 0xa8d   : > { %14116 = vmatpush.bf16.msrb.mxu3 %v20202_v57  ;;  %v19806_v34 = vor.u32 %v21585_v63, %v19805_v62  ;;  %v21475_v57 = vld [vmem:[%s22837_s3 + $0xcc] sm:$0xf]  ;;  %v19506_v63 = vor.u32 %v21507_v43, %v19503_v50  ;;  %v19359_v38 = vld [vmem:[%s22837_s3 + $0xb8] sm:$0xf0]  ;;  %v19677_v43 = vld [vmem:[%s22837_s3 + $0x328] sm:$0xf] }
 0xa8e   : > { %14190 = vmatpush.bf16.msrb.mxu1 %v20014_v3  ;;  %v19933_v3 = vld [vmem:[%s22837_s3 + $0x528] sm:$0xf]  ;;  %v13951_v9 = vpop.f32.mrf.mxu2  ;;  %v13940_v61 = vpop.f32.mrf.mxu1  ;;  %v19378_v62 = vor.u32 %v21475_v57, %v19375_v29  ;;  %v21491_v57 = vld [vmem:[%s22837_s3 + $0x14c] sm:$0xf]  ;;  %v19439_v29 = vld [vmem:[%s22837_s3 + $0x158] sm:$0xf0] }
 0xa8f   : > { %v13952_v20 = vadd.f32 %v13951_v9, %v13939_v27  ;;  %v19934_v12 = vor.u32 %v21617_v14, %v19933_v3  ;;  %14156 = vmatpush.bf16.msra.mxu2 %v19550_v10  ;;  %v21669_v27 = vld [vmem:[%s22837_s3 + $0x6d4] sm:$0xf0]  ;;  %v19742_v3 = vor.u32 %v21569_v52, %v19741_v51  ;;  %v21471_v9 = vld [vmem:[%s22837_s3 + $0xac] sm:$0xf]  ;;  %v19487_v14 = vld [vmem:[%s22837_s3 + $0x1b8] sm:$0xf0] }
 0xa90   : > { %14178 = vmatpush.bf16.msrb.mxu0 %v19870_v48  ;;  %v21517_v48 = vld [vmem:[%s22837_s3 + $0x214] sm:$0xf0]  ;;  %v13964_v55 = vpop.f32.mrf.mxu3  ;;  %v20142_v18 = vor.u32 %v21669_v27, %v20141_v31  ;;  %v20061_v50 = vld [vmem:[%s22837_s3 + $0x628] sm:$0xf] }
 0xa91   : > { %v26480_v24 = vadd.f32 %v13964_v55, %v13952_v20  ;;  %14117 = vmatpush.bf16.msrb.mxu3 %v20186_v37  ;;  %v21503_v37 = vld [vmem:[%s22837_s3 + $0x1ac] sm:$0xf]  ;;  %v20109_v20 = vld [vmem:[%s22837_s3 + $0x688] sm:$0xf]  ;;  %v21661_v61 = vld [vmem:[%s22837_s3 + $0x694] sm:$0xf0] }
 0xa92   : > { %14191 = vmatpush.bf16.msrb.mxu1 %v19998_v36  ;;  %v19773_v36 = vld [vmem:[%s22837_s3 + $0x3e8] sm:$0xf]  ;;  %v21467_v55 = vld [vmem:[%s22837_s3 + $0x8c] sm:$0xf]  ;;  %v20110_v44 = vor.u32 %v21661_v61, %v20109_v20  ;;  %v21653_v31 = vld [vmem:[%s22837_s3 + $0x654] sm:$0xf0] }
 0xa93   : > { %v19774_v21 = vor.u32 %v21577_v47, %v19773_v36  ;;  %v19726_v36 = vor.u32 %v21565_v16, %v19725_v15  ;;  %v21499_v47 = vld [vmem:[%s22837_s3 + $0x18c] sm:$0xf]  ;;  %v21649_v51 = vld [vmem:[%s22837_s3 + $0x634] sm:$0xf0]  ;;  %v20285_v16 = vld [vmem:[%s22837_s3 + $0x7e8] sm:$0xf] }
 0xa94   : > { %14179 = vmatpush.bf16.msrb.mxu0 %v19854_v26  ;;  %v19534_v26 = vor.u32 %v21517_v48, %v19533_v17  ;;  %v19362_v17 = vor.u32 %v21471_v9, %v19359_v38  ;;  %v19490_v48 = vor.u32 %v21503_v37, %v19487_v14  ;;  %v20062_v9 = vor.u32 %v21649_v51, %v20061_v50  ;;  %v19661_v38 = vld [vmem:[%s22837_s3 + $0x308] sm:$0xf]  ;;  %v21549_v37 = vld [vmem:[%s22837_s3 + $0x314] sm:$0xf0]  ;;  %v21599_v50 = vld [vmem:[%s22837_s3 + $0x4ac] sm:$0xf] }
 0xa95   : > { %14118 = vmatpush.bf16.msrb.mxu3 %v20170_v7  ;;  %v21657_v7 = vld [vmem:[%s22837_s3 + $0x674] sm:$0xf0]  ;;  %v19871_v51 = vld [vmem:[%s22837_s3 + $0x4b8] sm:$0xf0] }
 0xa96   : > { %14192 = vmatpush.bf16.msrb.mxu1 %v19982_v46  ;;  %v19917_v46 = vld [vmem:[%s22837_s3 + $0x508] sm:$0xf]  ;;  %14157 = vmatpush.bf16.msra.mxu2 %v19534_v26  ;;  %v20094_v32 = vor.u32 %v21657_v7, %v20093_v2  ;;  %v21645_v15 = vld [vmem:[%s22837_s3 + $0x614] sm:$0xf0]  ;;  %v21607_v2 = vld [vmem:[%s22837_s3 + $0x4ec] sm:$0xf] }
 0xa97   : > { %v19918_v23 = vor.u32 %v21613_v19, %v19917_v46  ;;  %v19474_v46 = vor.u32 %v21499_v47, %v19471_v45  ;;  %v21705_v20 = vld [vmem:[%s22837_s3 + $0x7f4] sm:$0xf0]  ;;  %v19279_v47 = vld [vmem:[%s22837_s3 + $0x18] sm:$0xf0] }
 0xa98   : > { %14180 = vmatpush.bf16.msrb.mxu0 %v19838_v42  ;;  %v13953_v42 = vpop.f32.mrf.mxu2  ;;  %v13966_v54 = vpop.f32.mrf.mxu3  ;;  %14119 = vmatmul.bf16.vlgmr.msrb.gmra.mxu3 %v26418_v39  ;;  %v19903_v7 = vld [vmem:[%s22837_s3 + $0x4f8] sm:$0xf0] }
 0xa99   : > { %14163 = vmatpush.bf16.msra.mxu3 %v19774_v21  ;;  %14158 = vmatmul.bf16.vlgmr.msra.gmra.mxu2 %v26184_v53  ;;  %v21463_v21 = vld [vmem:[%s22837_s3 + $0x6c] sm:$0xf] }
 0xa9a   : > { %14193 = vmatpush.bf16.msrb.mxu1 %v19966_v4  ;;  %v19394_v4 = vor.u32 %v21479_v25, %v19391_v13  ;;  %14202 = vmatpush.bf16.msrb.mxu2 %v20158_v28  ;;  %v19327_v28 = vld [vmem:[%s22837_s3 + $0x78] sm:$0xf0]  ;;  %v21495_v25 = vld [vmem:[%s22837_s3 + $0x16c] sm:$0xf] }
 0xa9b   : > { %v19330_v27 = vor.u32 %v21463_v21, %v19327_v28  ;;  %v21455_v54 = vld [vmem:[%s22837_s3 + $0x2c] sm:$0xf]  ;;  %v20269_v21 = vld [vmem:[%s22837_s3 + $0x7c8] sm:$0xf] }
 0xa9c   : > { %14181 = vmatpush.bf16.msrb.mxu0 %v19822_v59  ;;  %v20125_v59 = vld [vmem:[%s22837_s3 + $0x6a8] sm:$0xf] }
 0xa9d   : > { %14164 = vmatpush.bf16.msra.mxu3 %v19758_v35  ;;  %v19311_v35 = vld [vmem:[%s22837_s3 + $0x58] sm:$0xf0] }
 0xa9e   : > { %14194 = vmatpush.bf16.msrb.mxu1 %v19950_v60  ;;  %v21665_v60 = vld [vmem:[%s22837_s3 + $0x6b4] sm:$0xf0]  ;;  %14203 = vmatpush.bf16.msrb.mxu2 %v20142_v18 }
 0xa9f   : > { %v20126_v10 = vor.u32 %v21665_v60, %v20125_v59  ;;  %v21553_v18 = vld [vmem:[%s22837_s3 + $0x334] sm:$0xf0]  ;;  %v19442_v59 = vor.u32 %v21491_v57, %v19439_v29  ;;  %v19615_v29 = vld [vmem:[%s22837_s3 + $0x2b8] sm:$0xf0] }
 0xaa0   : > { %14182 = vmatpush.bf16.msrb.mxu0 %v19806_v34  ;;  %v19343_v34 = vld [vmem:[%s22837_s3 + $0x98] sm:$0xf0]  ;;  %v19678_v60 = vor.u32 %v21553_v18, %v19677_v43  ;;  %v21697_v57 = vld [vmem:[%s22837_s3 + $0x7b4] sm:$0xf0] }
 0xaa1   : > { %14165 = vmatpush.bf16.msra.mxu3 %v19742_v3  ;;  %v19346_v26 = vor.u32 %v21467_v55, %v19343_v34  ;;  %v19423_v3 = vld [vmem:[%s22837_s3 + $0x138] sm:$0xf0]  ;;  %v19662_v55 = vor.u32 %v21549_v37, %v19661_v38  ;;  %v21451_v34 = vld [vmem:[%s22837_s3 + $0xc] sm:$0xf] }
 0xaa2   : > { %14195 = vmatpush.bf16.msrb.mxu1 %v19934_v12  ;;  %14204 = vmatpush.bf16.msrb.mxu2 %v20126_v10  ;;  %v19709_v12 = vld [vmem:[%s22837_s3 + $0x368] sm:$0xf]  ;;  %v19282_v28 = vor.u32 %v21451_v34, %v19279_v47  ;;  %v21531_v38 = vld [vmem:[%s22837_s3 + $0x28c] sm:$0xf]  ;;  %v19599_v37 = vld [vmem:[%s22837_s3 + $0x298] sm:$0xf0] }
 0xaa3   : > { %v19710_v19 = vor.u32 %v21561_v22, %v19709_v12  ;;  %v20045_v10 = vld [vmem:[%s22837_s3 + $0x608] sm:$0xf]  ;;  %v20286_v12 = vor.u32 %v21705_v20, %v20285_v16  ;;  %v19407_v22 = vld [vmem:[%s22837_s3 + $0x118] sm:$0xf0]  ;;  %v21627_v16 = vld [vmem:[%s22837_s3 + $0x58c] sm:$0xf] }
 0xaa4   : > { %14183 = vmatpush.bf16.msrb.mxu0 %v19790_v40  ;;  %v13977_v13 = vpop.f32.mrf.mxu0  ;;  %v19455_v40 = vld [vmem:[%s22837_s3 + $0x178] sm:$0xf0]  ;;  %v20046_v45 = vor.u32 %v21645_v15, %v20045_v10  ;;  %v19874_v10 = vor.u32 %v21599_v50, %v19871_v51  ;;  %v21595_v15 = vld [vmem:[%s22837_s3 + $0x48c] sm:$0xf] }
 0xaa5   : > { %14166 = vmatpush.bf16.msra.mxu3 %v19726_v36  ;;  %v26529_v41 = vadd.f32 %v13977_v13, %v26480_v24  ;;  %v19458_v42 = vor.u32 %v21495_v25, %v19455_v40  ;;  %v21701_v25 = vld [vmem:[%s22837_s3 + $0x7d4] sm:$0xf0]  ;;  %v21539_v13 = vld [vmem:[%s22837_s3 + $0x2cc] sm:$0xf]  ;;  %v19983_v20 = vld [vmem:[%s22837_s3 + $0x598] sm:$0xf0] }
 0xaa6   : > { %14196 = vmatpush.bf16.msrb.mxu1 %v19918_v23  ;;  %14205 = vmatpush.bf16.msrb.mxu2 %v20110_v44  ;;  %v20077_v23 = vld [vmem:[%s22837_s3 + $0x648] sm:$0xf]  ;;  %v21483_v44 = vld [vmem:[%s22837_s3 + $0x10c] sm:$0xf]  ;;  %v19986_v34 = vor.u32 %v21627_v16, %v19983_v20  ;;  %v19791_v20 = vld [vmem:[%s22837_s3 + $0x418] sm:$0xf0] }
 0xaa7   : > { %14184 = vmatmul.bf16.vlgmr.msrb.gmra.mxu0 %v26246_v33  ;;  %v20078_v24 = vor.u32 %v21653_v31, %v20077_v23  ;;  %v19410_v40 = vor.u32 %v21483_v44, %v19407_v22  ;;  %v21603_v23 = vld [vmem:[%s22837_s3 + $0x4cc] sm:$0xf]  ;;  %v19887_v31 = vld [vmem:[%s22837_s3 + $0x4d8] sm:$0xf0] }
 0xaa8   : > { %14228 = vmatpush.bf16.msra.mxu0 %v19394_v4  ;;  %v19694_v4 = vor.u32 %v21557_v56, %v19693_v8  ;;  %v19906_v8 = vor.u32 %v21607_v2, %v19903_v7  ;;  %v19890_v43 = vor.u32 %v21603_v23, %v19887_v31  ;;  %v21591_v47 = vld [vmem:[%s22837_s3 + $0x46c] sm:$0xf]  ;;  %v19839_v44 = vld [vmem:[%s22837_s3 + $0x478] sm:$0xf0] }
 0xaa9   : > { %14197 = vmatmul.bf16.vlgmr.msrb.gmra.mxu1 %v26298_v58  ;;  %14167 = vmatpush.bf16.msra.mxu3 %v19710_v19  ;;  %v20031_v19 = vld [vmem:[%s22837_s3 + $0x5f8] sm:$0xf0]  ;;  %v21623_v7 = vld [vmem:[%s22837_s3 + $0x56c] sm:$0xf] }
 0xaaa   : > { %14241 = vmatpush.bf16.msra.mxu1 %v19522_v6  ;;  %v21459_v6 = vld [vmem:[%s22837_s3 + $0x4c] sm:$0xf]  ;;  %14206 = vmatpush.bf16.msrb.mxu2 %v20094_v32  ;;  %v19631_v32 = vld [vmem:[%s22837_s3 + $0x2d8] sm:$0xf0] }
 0xaab   : > { %v19314_v52 = vor.u32 %v21459_v6, %v19311_v35  ;;  %v20015_v6 = vld [vmem:[%s22837_s3 + $0x5d8] sm:$0xf0]  ;;  %v20253_v35 = vld [vmem:[%s22837_s3 + $0x7a8] sm:$0xf]  ;;  %v21619_v23 = vld [vmem:[%s22837_s3 + $0x54c] sm:$0xf] }
 0xaac   : > { %14229 = vmatpush.bf16.msra.mxu0 %v19378_v62  ;;  %v19295_v62 = vld [vmem:[%s22837_s3 + $0x38] sm:$0xf0]  ;;  %v13979_v14 = vpop.f32.mrf.mxu0  ;;  %v21579_v16 = vld [vmem:[%s22837_s3 + $0x40c] sm:$0xf] }
 0xaad   : > { %14168 = vmatpush.bf16.msra.mxu3 %v19694_v4  ;;  %v19298_v61 = vor.u32 %v21455_v54, %v19295_v62  ;;  %v21635_v4 = vld [vmem:[%s22837_s3 + $0x5cc] sm:$0xf]  ;;  %v19999_v62 = vld [vmem:[%s22837_s3 + $0x5b8] sm:$0xf0] }
 0xaae   : > { %14242 = vmatpush.bf16.msra.mxu1 %v19506_v63  ;;  %v21487_v63 = vld [vmem:[%s22837_s3 + $0x12c] sm:$0xf]  ;;  %14207 = vmatpush.bf16.msrb.mxu2 %v20078_v24  ;;  %v20018_v18 = vor.u32 %v21635_v4, %v20015_v6  ;;  %v19951_v31 = vld [vmem:[%s22837_s3 + $0x558] sm:$0xf0] }
 0xaaf   : > { %v19426_v36 = vor.u32 %v21487_v63, %v19423_v3  ;;  %v21535_v24 = vld [vmem:[%s22837_s3 + $0x2ac] sm:$0xf]  ;;  %v20237_v63 = vld [vmem:[%s22837_s3 + $0x788] sm:$0xf]  ;;  %v19551_v6 = vld [vmem:[%s22837_s3 + $0x238] sm:$0xf0] }
 0xab0   : > { %14230 = vmatpush.bf16.msra.mxu0 %v19362_v17  ;;  %v21543_v17 = vld [vmem:[%s22837_s3 + $0x2ec] sm:$0xf]  ;;  %v19618_v54 = vor.u32 %v21535_v24, %v19615_v29  ;;  %v19807_v29 = vld [vmem:[%s22837_s3 + $0x438] sm:$0xf0] }
 0xab1   : > { %14169 = vmatpush.bf16.msra.mxu3 %v19678_v60  ;;  %v21631_v60 = vld [vmem:[%s22837_s3 + $0x5ac] sm:$0xf] }
 0xab2   : > { %14243 = vmatpush.bf16.msra.mxu1 %v19490_v48  ;;  %v19647_v48 = vld [vmem:[%s22837_s3 + $0x2f8] sm:$0xf0]  ;;  %14208 = vmatpush.bf16.msrb.mxu2 %v20062_v9  ;;  %v21693_v9 = vld [vmem:[%s22837_s3 + $0x794] sm:$0xf0]  ;;  %v20002_v14 = vor.u32 %v21631_v60, %v19999_v62  ;;  %v21519_v4 = vld [vmem:[%s22837_s3 + $0x22c] sm:$0xf] }
 0xab3   : > { %v21583_v24 = vld [vmem:[%s22837_s3 + $0x42c] sm:$0xf]  ;;  %v19554_v51 = vor.u32 %v21519_v4, %v19551_v6  ;;  %v21677_v60 = vld [vmem:[%s22837_s3 + $0x714] sm:$0xf0] }
 0xab4   : > { %14231 = vmatpush.bf16.msra.mxu0 %v19346_v26  ;;  %v19650_v26 = vor.u32 %v21543_v17, %v19647_v48  ;;  %v21689_v17 = vld [vmem:[%s22837_s3 + $0x774] sm:$0xf0]  ;;  %v21527_v48 = vld [vmem:[%s22837_s3 + $0x26c] sm:$0xf] }
 0xab5   : > { %14170 = vmatpush.bf16.msra.mxu3 %v19662_v55 }
 0xab6   : > { %14244 = vmatpush.bf16.msra.mxu1 %v19474_v46  ;;  %v21639_v46 = vld [vmem:[%s22837_s3 + $0x5ec] sm:$0xf]  ;;  %14209 = vmatpush.bf16.msrb.mxu2 %v20046_v45 }
 0xab7   : > { %v20034_v56 = vor.u32 %v21639_v46, %v20031_v19  ;;  %v20205_v46 = vld [vmem:[%s22837_s3 + $0x748] sm:$0xf]  ;;  %v21685_v19 = vld [vmem:[%s22837_s3 + $0x754] sm:$0xf0] }
 0xab8   : > { %14232 = vmatpush.bf16.msra.mxu0 %v19330_v27  ;;  %v20270_v27 = vor.u32 %v21701_v25, %v20269_v21  ;;  %14171 = vmatmul.bf16.vlgmr.msra.gmra.mxu3 %v26186_v11  ;;  %v21523_v21 = vld [vmem:[%s22837_s3 + $0x24c] sm:$0xf]  ;;  %v19842_v25 = vor.u32 %v21591_v47, %v19839_v44  ;;  %v20143_v44 = vld [vmem:[%s22837_s3 + $0x6d8] sm:$0xf0] }
 0xab9   : > { %14215 = vmatpush.bf16.msrb.mxu3 %v20286_v12  ;;  %14210 = vmatmul.bf16.vlgmr.msrb.gmra.mxu2 %v26357_v49  ;;  %v21667_v47 = vld [vmem:[%s22837_s3 + $0x6cc] sm:$0xf] }
 0xaba   : > { %14245 = vmatpush.bf16.msra.mxu1 %v19458_v42  ;;  %14254 = vmatpush.bf16.msra.mxu2 %v19650_v26  ;;  %v19634_v42 = vor.u32 %v21539_v13, %v19631_v32  ;;  %v19967_v26 = vld [vmem:[%s22837_s3 + $0x578] sm:$0xf0]  ;;  %v21587_v32 = vld [vmem:[%s22837_s3 + $0x44c] sm:$0xf] }
 0xabb   : > { %v19970_v13 = vor.u32 %v21623_v7, %v19967_v26  ;;  %v20146_v7 = vor.u32 %v21667_v47, %v20143_v44  ;;  %v21567_v26 = vld [vmem:[%s22837_s3 + $0x3ac] sm:$0xf]  ;;  %v20255_v47 = vld [vmem:[%s22837_s3 + $0x7b8] sm:$0xf0] }
 0xabc   : > { %14233 = vmatpush.bf16.msra.mxu0 %v19314_v52  ;;  %v20254_v52 = vor.u32 %v21697_v57, %v20253_v35  ;;  %v19954_v57 = vor.u32 %v21619_v23, %v19951_v31  ;;  %v21559_v23 = vld [vmem:[%s22837_s3 + $0x36c] sm:$0xf]  ;;  %v19711_v31 = vld [vmem:[%s22837_s3 + $0x378] sm:$0xf0] }
 0xabd   : > { %14216 = vmatpush.bf16.msrb.mxu3 %v20270_v27  ;;  %v20189_v27 = vld [vmem:[%s22837_s3 + $0x728] sm:$0xf]  ;;  %v19714_v4 = vor.u32 %v21559_v23, %v19711_v31  ;;  %v21679_v23 = vld [vmem:[%s22837_s3 + $0x72c] sm:$0xf]  ;;  %v20191_v31 = vld [vmem:[%s22837_s3 + $0x738] sm:$0xf0] }
 0xabe   : > { %14246 = vmatpush.bf16.msra.mxu1 %v19442_v59  ;;  %14255 = vmatpush.bf16.msra.mxu2 %v19634_v42  ;;  %v13990_v59 = vpop.f32.mrf.mxu1  ;;  %v21681_v42 = vld [vmem:[%s22837_s3 + $0x734] sm:$0xf0] }
 0xabf   : > { %v26583_v3 = vadd.f32 %v13990_v59, %v26529_v41  ;;  %v19602_v41 = vor.u32 %v21531_v38, %v19599_v37  ;;  %v20190_v50 = vor.u32 %v21681_v42, %v20189_v27  ;;  %v20173_v59 = vld [vmem:[%s22837_s3 + $0x708] sm:$0xf]  ;;  %v21575_v38 = vld [vmem:[%s22837_s3 + $0x3ec] sm:$0xf]  ;;  %v19775_v37 = vld [vmem:[%s22837_s3 + $0x3f8] sm:$0xf0] }
 0xac0   : > { %14234 = vmatpush.bf16.msra.mxu0 %v19298_v61  ;;  %v20221_v61 = vld [vmem:[%s22837_s3 + $0x768] sm:$0xf]  ;;  %v21655_v27 = vld [vmem:[%s22837_s3 + $0x66c] sm:$0xf]  ;;  %v20095_v42 = vld [vmem:[%s22837_s3 + $0x678] sm:$0xf0] }
 0xac1   : > { %14217 = vmatpush.bf16.msrb.mxu3 %v20254_v52  ;;  %v20222_v12 = vor.u32 %v21689_v17, %v20221_v61  ;;  %v19778_v61 = vor.u32 %v21575_v38, %v19775_v37  ;;  %v20098_v6 = vor.u32 %v21655_v27, %v20095_v42  ;;  %v21547_v37 = vld [vmem:[%s22837_s3 + $0x30c] sm:$0xf]  ;;  %v20194_v27 = vor.u32 %v21679_v23, %v20191_v31 }
 0xac2   : > { %14247 = vmatpush.bf16.msra.mxu1 %v19426_v36  ;;  %14256 = vmatpush.bf16.msra.mxu2 %v19618_v54  ;;  %v19583_v36 = vld [vmem:[%s22837_s3 + $0x278] sm:$0xf0]  ;;  %v12379_v23 = vld [vmem:[#allocation4 + $0x18] sm:$0xff] }
 0xac3   : > { %v19586_v22 = vor.u32 %v21527_v48, %v19583_v36  ;;  %v19935_v54 = vld [vmem:[%s22837_s3 + $0x538] sm:$0xf0]  ;;  %v21611_v48 = vld [vmem:[%s22837_s3 + $0x50c] sm:$0xf] }
 0xac4   : > { %14235 = vmatpush.bf16.msra.mxu0 %v19282_v28  ;;  %v14029_v45 = vpop.f32.mrf.mxu0  ;;  %v19567_v28 = vld [vmem:[%s22837_s3 + $0x258] sm:$0xf0] }
 0xac5   : > { %v19919_v36 = vld [vmem:[%s22837_s3 + $0x518] sm:$0xf0] }
 0xac6   : > { %14248 = vmatpush.bf16.msra.mxu1 %v19410_v40  ;;  %14257 = vmatpush.bf16.msra.mxu2 %v19602_v41  ;;  %v13992_v2 = vpop.f32.mrf.mxu1  ;;  %v19823_v40 = vld [vmem:[%s22837_s3 + $0x458] sm:$0xf0] }
 0xac7   : > { %14236 = vmatmul.bf16.vlgmr.msra.gmra.mxu0 %v26179_v5  ;;  %v19855_v5 = vld [vmem:[%s22837_s3 + $0x498] sm:$0xf0]  ;;  %v19826_v35 = vor.u32 %v21587_v32, %v19823_v40  ;;  %v21659_v40 = vld [vmem:[%s22837_s3 + $0x68c] sm:$0xf] }
 0xac8   : > { %14280 = vmatpush.bf16.msrb.mxu0 %v19906_v8  ;;  %v19858_v55 = vor.u32 %v21595_v15, %v19855_v5  ;;  %v20206_v8 = vor.u32 %v21685_v19, %v20205_v46  ;;  %v19810_v15 = vor.u32 %v21583_v24, %v19807_v29  ;;  %v19743_v46 = vld [vmem:[%s22837_s3 + $0x3b8] sm:$0xf0]  ;;  %v21663_v19 = vld [vmem:[%s22837_s3 + $0x6ac] sm:$0xf] }
 0xac9   : > { %14249 = vmatmul.bf16.vlgmr.msra.gmra.mxu1 %v26181_v30  ;;  %v20238_v30 = vor.u32 %v21693_v9, %v20237_v63  ;;  %v21515_v63 = vld [vmem:[%s22837_s3 + $0x20c] sm:$0xf]  ;;  %v19535_v9 = vld [vmem:[%s22837_s3 + $0x218] sm:$0xf0] }
 0xaca   : > { %14293 = vmatpush.bf16.msrb.mxu1 %v20034_v56  ;;  %14258 = vmatpush.bf16.msra.mxu2 %v19586_v22  ;;  %v19570_v56 = vor.u32 %v21523_v21, %v19567_v28  ;;  %v19538_v41 = vor.u32 %v21515_v63, %v19535_v9  ;;  %v20127_v21 = vld [vmem:[%s22837_s3 + $0x6b8] sm:$0xf0]  ;;  %v19746_v28 = vor.u32 %v21567_v26, %v19743_v46  ;;  %v21651_v29 = vld [vmem:[%s22837_s3 + $0x64c] sm:$0xf] }
 0xacb   : > { %14218 = vmatpush.bf16.msrb.mxu3 %v20238_v30  ;;  %v20174_v30 = vor.u32 %v21677_v60, %v20173_v59  ;;  %v19727_v32 = vld [vmem:[%s22837_s3 + $0x398] sm:$0xf0] }
 0xacc   : > { %14281 = vmatpush.bf16.msrb.mxu0 %v19890_v43  ;;  %v21615_v43 = vld [vmem:[%s22837_s3 + $0x52c] sm:$0xf]  ;;  %v19695_v24 = vld [vmem:[%s22837_s3 + $0x358] sm:$0xf0] }
 0xacd   : > { %v19938_v5 = vor.u32 %v21615_v43, %v19935_v54  ;;  %v20079_v43 = vld [vmem:[%s22837_s3 + $0x658] sm:$0xf0]  ;;  %v21647_v54 = vld [vmem:[%s22837_s3 + $0x62c] sm:$0xf] }
 0xace   : > { %14294 = vmatpush.bf16.msrb.mxu1 %v20018_v18  ;;  %14259 = vmatpush.bf16.msra.mxu2 %v19570_v56  ;;  %v14031_v18 = vpop.f32.mrf.mxu0  ;;  %v14042_v52 = vpop.f32.mrf.mxu1  ;;  %v20063_v59 = vld [vmem:[%s22837_s3 + $0x638] sm:$0xf0] }
 0xacf   : > { %14219 = vmatpush.bf16.msrb.mxu3 %v20222_v12  ;;  %v26618_v62 = vadd.f32 %v14042_v52, %v14029_v45  ;;  %v19794_v45 = vor.u32 %v21579_v16, %v19791_v20  ;;  %v19922_v12 = vor.u32 %v21611_v48, %v19919_v36  ;;  %v19679_v52 = vld [vmem:[%s22837_s3 + $0x338] sm:$0xf0]  ;;  %v20066_v38 = vor.u32 %v21647_v54, %v20063_v59 }
 0xad0   : > { %14282 = vmatpush.bf16.msrb.mxu0 %v19874_v10  ;;  %v21671_v10 = vld [vmem:[%s22837_s3 + $0x6ec] sm:$0xf]  ;;  %v20271_v48 = vld [vmem:[%s22837_s3 + $0x7d8] sm:$0xf0] }
 0xad1   : > { %v20223_v26 = vld [vmem:[%s22837_s3 + $0x778] sm:$0xf0] }
 0xad2   : > { %14295 = vmatpush.bf16.msrb.mxu1 %v20002_v14  ;;  %v20159_v14 = vld [vmem:[%s22837_s3 + $0x6f8] sm:$0xf0]  ;;  %14260 = vmatpush.bf16.msra.mxu2 %v19554_v51  ;;  %v21551_v51 = vld [vmem:[%s22837_s3 + $0x32c] sm:$0xf] }
 0xad3   : > { %14220 = vmatpush.bf16.msrb.mxu3 %v20206_v8  ;;  %v20162_v17 = vor.u32 %v21671_v10, %v20159_v14  ;;  %v20111_v8 = vld [vmem:[%s22837_s3 + $0x698] sm:$0xf0]  ;;  %v19682_v9 = vor.u32 %v21551_v51, %v19679_v52 }
 0xad4   : > { %14283 = vmatpush.bf16.msrb.mxu0 %v19858_v55  ;;  %v21571_v55 = vld [vmem:[%s22837_s3 + $0x3cc] sm:$0xf]  ;;  %v20114_v56 = vor.u32 %v21659_v40, %v20111_v8  ;;  %v19663_v14 = vld [vmem:[%s22837_s3 + $0x318] sm:$0xf0] }
 0xad5   : > { %v19666_v16 = vor.u32 %v21547_v37, %v19663_v14 }
 0xad6   : > { %14296 = vmatpush.bf16.msrb.mxu1 %v19986_v34  ;;  %v19759_v34 = vld [vmem:[%s22837_s3 + $0x3d8] sm:$0xf0]  ;;  %14261 = vmatpush.bf16.msra.mxu2 %v19538_v41  ;;  %v14044_v22 = vpop.f32.mrf.mxu1 }
 0xad7   : > { %14221 = vmatpush.bf16.msrb.mxu3 %v20190_v50  ;;  %v19762_v2 = vor.u32 %v21571_v55, %v19759_v34  ;;  %v20082_v50 = vor.u32 %v21651_v29, %v20079_v43  ;;  %v20287_v41 = vld [vmem:[%s22837_s3 + $0x7f8] sm:$0xf0]  ;;  %v21695_v34 = vld [vmem:[%s22837_s3 + $0x7ac] sm:$0xf] }
 0xad8   : > { %14284 = vmatpush.bf16.msrb.mxu0 %v19842_v25  ;;  %v20130_v25 = vor.u32 %v21663_v19, %v20127_v21  ;;  %v20258_v44 = vor.u32 %v21695_v34, %v20255_v47 }
 0xad9   : > { %14262 = vmatmul.bf16.vlgmr.msra.gmra.mxu2 %v26184_v53 }
 0xada   : > { %14297 = vmatpush.bf16.msrb.mxu1 %v19970_v13  ;;  %14306 = vmatpush.bf16.msrb.mxu2 %v20162_v17  ;;  %v21563_v13 = vld [vmem:[%s22837_s3 + $0x38c] sm:$0xf] }
 0xadb   : > { %14222 = vmatpush.bf16.msrb.mxu3 %v20174_v30  ;;  %v19730_v53 = vor.u32 %v21563_v13, %v19727_v32  ;;  %v21703_v30 = vld [vmem:[%s22837_s3 + $0x7ec] sm:$0xf]  ;;  %v12376_v13 = vld [vmem:[#allocation4 + $0x10] sm:$0xff] }
 0xadc   : > { %14285 = vmatpush.bf16.msrb.mxu0 %v19826_v35  ;;  %v21555_v35 = vld [vmem:[%s22837_s3 + $0x34c] sm:$0xf] }
 0xadd   : > { %v19698_v18 = vor.u32 %v21555_v35, %v19695_v24  ;;  %v21699_v17 = vld [vmem:[%s22837_s3 + $0x7cc] sm:$0xf] }
 0xade   : > { %14298 = vmatpush.bf16.msrb.mxu1 %v19954_v57  ;;  %14223 = vmatmul.bf16.vlgmr.msrb.gmra.mxu3 %v26418_v39  ;;  %v14003_v57 = vpop.f32.mrf.mxu2  ;;  %v20274_v55 = vor.u32 %v21699_v17, %v20271_v48 }
 0xadf   : > { %14267 = vmatpush.bf16.msra.mxu3 %v19778_v61  ;;  %14307 = vmatpush.bf16.msrb.mxu2 %v20146_v7  ;;  %v20290_v61 = vor.u32 %v21703_v30, %v20287_v41  ;;  %v21687_v7 = vld [vmem:[%s22837_s3 + $0x76c] sm:$0xf]  ;;  %v14004_v19 = vadd.f32 %v14003_v57, %v26583_v3 }
 0xae0   : > { %14286 = vmatpush.bf16.msrb.mxu0 %v19810_v15  ;;  %v21643_v15 = vld [vmem:[%s22837_s3 + $0x60c] sm:$0xf]  ;;  %v20226_v46 = vor.u32 %v21687_v7, %v20223_v26 }
 0xae2   : > { %14299 = vmatpush.bf16.msrb.mxu1 %v19938_v5  ;;  %v20047_v5 = vld [vmem:[%s22837_s3 + $0x618] sm:$0xf0] }
 0xae3   : > { %14268 = vmatpush.bf16.msra.mxu3 %v19762_v2  ;;  %14308 = vmatpush.bf16.msrb.mxu2 %v20130_v25  ;;  %v20050_v20 = vor.u32 %v21643_v15, %v20047_v5 }
 0xae4   : > { %14287 = vmatpush.bf16.msrb.mxu0 %v19794_v45  ;;  %v21691_v45 = vld [vmem:[%s22837_s3 + $0x78c] sm:$0xf] }
 0xae6   : > { %14300 = vmatpush.bf16.msrb.mxu1 %v19922_v12  ;;  %v14005_v10 = vpop.f32.mrf.mxu2  ;;  %v20239_v12 = vld [vmem:[%s22837_s3 + $0x798] sm:$0xf0] }
 0xae7   : > { %14288 = vmatmul.bf16.vlgmr.msrb.gmra.mxu0 %v26246_v33  ;;  %14269 = vmatpush.bf16.msra.mxu3 %v19746_v28  ;;  %v26650_v33 = vpop.f32.mrf.mxu0  ;;  %v20242_v2 = vor.u32 %v21691_v45, %v20239_v12  ;;  %v21683_v28 = vld [vmem:[%s22837_s3 + $0x74c] sm:$0xf]  ;;  %v12378_v12 = vld [vmem:[#allocation4 + $0x8] sm:$0xff] }
 0xae8   : > { %14309 = vmatpush.bf16.msrb.mxu2 %v20114_v56 }
 0xae9   : > { %14301 = vmatmul.bf16.vlgmr.msrb.gmra.mxu1 %v26298_v58  ;;  %v26652_v58 = vpop.f32.mrf.mxu1 }
 0xaeb   : > { %14270 = vmatpush.bf16.msra.mxu3 %v19730_v53 }
 0xaec   : > { %14310 = vmatpush.bf16.msrb.mxu2 %v20098_v6  ;;  %v20175_v6 = vld [vmem:[%s22837_s3 + $0x718] sm:$0xf0] }
 0xaee   : > { %v14055_v36 = vpop.f32.mrf.mxu2 }
 0xaef   : > { %14271 = vmatpush.bf16.msra.mxu3 %v19714_v4  ;;  %v14083_v60 = vpop.f32.mrf.mxu0  ;;  %v21675_v4 = vld [vmem:[%s22837_s3 + $0x70c] sm:$0xf]  ;;  %v14056_v43 = vadd.f32 %v14055_v36, %v26618_v62 }
 0xaf0   : > { %14311 = vmatpush.bf16.msrb.mxu2 %v20082_v50  ;;  %v20178_v24 = vor.u32 %v21675_v4, %v20175_v6 }
 0xaf1   : > { %v14096_v63 = vpop.f32.mrf.mxu1 }
 0xaf3   : > { %14272 = vmatpush.bf16.msra.mxu3 %v19698_v18 }
 0xaf4   : > { %14312 = vmatpush.bf16.msrb.mxu2 %v20066_v38 }
 0xaf6   : > { %v14057_v22 = vpop.f32.mrf.mxu2 }
 0xaf7   : > { %14273 = vmatpush.bf16.msra.mxu3 %v19682_v9  ;;  %v12377_v9 = vld [vmem:[#allocation4] sm:$0xff] }
 0xaf8   : > { %14313 = vmatpush.bf16.msrb.mxu2 %v20050_v20 }
 0xafb   : > { %14274 = vmatpush.bf16.msra.mxu3 %v19666_v16  ;;  %14314 = vmatmul.bf16.vlgmr.msrb.gmra.mxu2 %v26357_v49  ;;  %v20207_v49 = vld [vmem:[%s22837_s3 + $0x758] sm:$0xf0]  ;;  %v14016_v32 = vpop.f32.mrf.mxu3 }
 0xafc   : > { %v14017_v40 = vadd.f32 %v14016_v32, %v14004_v19  ;;  %v20210_v53 = vor.u32 %v21683_v28, %v20207_v49 }
 0xafe   : > { %14275 = vmatmul.bf16.vlgmr.msra.gmra.mxu3 %v26186_v11  ;;  %v14107_v8 = vpop.f32.mrf.mxu2  ;;  %v14332_v56 = vadd.f32 %v14017_v40, %v12376_v13 }
 0xaff   : > { %14319 = vmatpush.bf16.msrb.mxu3 %v20290_v61 }
 0xb00   : > { %14336 = vst [vmem:[#allocation4 + $0x10] sm:$0xff] %v14332_v56 }
 0xb03   : > { %14320 = vmatpush.bf16.msrb.mxu3 %v20274_v55  ;;  %v14018_v35 = vpop.f32.mrf.mxu3 }
 0xb04   : > { %v14133_v11 = vpop.f32.mrf.mxu0 }
 0xb06   : > { %v14146_v21 = vpop.f32.mrf.mxu1  ;;  %v14109_v57 = vpop.f32.mrf.mxu2 }
 0xb07   : > { %14321 = vmatpush.bf16.msrb.mxu3 %v20258_v44  ;;  %v14147_v25 = vadd.f32 %v14146_v21, %v14133_v11 }
 0xb0b   : > { %14322 = vmatpush.bf16.msrb.mxu3 %v20242_v2  ;;  %v14068_v29 = vpop.f32.mrf.mxu3 }
 0xb0c   : > { %v14135_v3 = vpop.f32.mrf.mxu0  ;;  %v14069_v18 = vadd.f32 %v14068_v29, %v14056_v43 }
 0xb0e   : > { %v14148_v42 = vpop.f32.mrf.mxu1  ;;  %v14082_v50 = vadd.f32 %v26650_v33, %v14069_v18 }
 0xb0f   : > { %14323 = vmatpush.bf16.msrb.mxu3 %v20226_v46 }
 0xb10   : > { %v14095_v52 = vadd.f32 %v26652_v58, %v14082_v50 }
 0xb12   : > { %v14108_v63 = vadd.f32 %v14107_v8, %v14095_v52 }
 0xb13   : > { %14324 = vmatpush.bf16.msrb.mxu3 %v20210_v53  ;;  %v14070_v51 = vpop.f32.mrf.mxu3 }
 0xb17   : > { %14325 = vmatpush.bf16.msrb.mxu3 %v20194_v27 }
 0xb1b   : > { %14326 = vmatpush.bf16.msrb.mxu3 %v20178_v24  ;;  %v14120_v38 = vpop.f32.mrf.mxu3 }
 0xb1c   : > { %v14159_v60 = vpop.f32.mrf.mxu2  ;;  %v14121_v37 = vadd.f32 %v14120_v38, %v14108_v63 }
 0xb1d   : > { %v14160_v48 = vadd.f32 %v14159_v60, %v14147_v25 }
 0xb1e   : > { %14327 = vmatmul.bf16.vlgmr.msrb.gmra.mxu3 %v26418_v39  ;;  %v14333_v10 = vadd.f32 %v14121_v37, %v12377_v9 }
 0xb20   : > { %14337 = vst [vmem:[#allocation4] sm:$0xff] %v14333_v10 }
 0xb23   : > { %v14122_v5 = vpop.f32.mrf.mxu3 }
 0xb24   : > { %v14185_v54 = vpop.f32.mrf.mxu0  ;;  %v14161_v62 = vpop.f32.mrf.mxu2 }
 0xb26   : > { %v14198_v59 = vpop.f32.mrf.mxu1 }
 0xb2c   : > { %v14187_v14 = vpop.f32.mrf.mxu0 }
 0xb2e   : > { %v14200_v15 = vpop.f32.mrf.mxu1 }
 0xb3b   : > { %v14172_v33 = vpop.f32.mrf.mxu3 }
 0xb3c   : > { %v14211_v16 = vpop.f32.mrf.mxu2  ;;  %v14173_v36 = vadd.f32 %v14172_v33, %v14160_v48 }
 0xb3e   : > { %v14186_v55 = vadd.f32 %v14185_v54, %v14173_v36 }
 0xb40   : > { %v14199_v34 = vadd.f32 %v14198_v59, %v14186_v55 }
 0xb42   : > { %v14212_v45 = vadd.f32 %v14211_v16, %v14199_v34 }
 0xb43   : > { %v14174_v61 = vpop.f32.mrf.mxu3 }
 0xb44   : > { %v14237_v39 = vpop.f32.mrf.mxu0  ;;  %v14213_v17 = vpop.f32.mrf.mxu2 }
 0xb46   : > { %v14250_v30 = vpop.f32.mrf.mxu1 }
 0xb47   : > { %v14251_v41 = vadd.f32 %v14250_v30, %v14237_v39 }
 0xb4c   : > { %v14239_v20 = vpop.f32.mrf.mxu0 }
 0xb4e   : > { %v14252_v58 = vpop.f32.mrf.mxu1 }
 0xb5c   : > { %v14263_v2 = vpop.f32.mrf.mxu2 }
 0xb5d   : > { %v14264_v32 = vadd.f32 %v14263_v2, %v14251_v41 }
 0xb61   : > { %v14224_v22 = vpop.f32.mrf.mxu3 }
 0xb62   : > { %v14225_v7 = vadd.f32 %v14224_v22, %v14212_v45 }
 0xb64   : > { %v14289_v47 = vpop.f32.mrf.mxu0  ;;  %v14334_v26 = vadd.f32 %v14225_v7, %v12378_v12  ;;  %v14265_v21 = vpop.f32.mrf.mxu2 }
 0xb66   : > { %v14302_v44 = vpop.f32.mrf.mxu1  ;;  %14338 = vst [vmem:[#allocation4 + $0x8] sm:$0xff] %v14334_v26 }
 0xb69   : > { %v14226_v11 = vpop.f32.mrf.mxu3 }
 0xb6c   : > { %v14291_v46 = vpop.f32.mrf.mxu0 }
 0xb6e   : > { %v14304_v19 = vpop.f32.mrf.mxu1 }
 0xb7e   : > { %v14315_v49 = vpop.f32.mrf.mxu2 }
 0xb81   : > { %v14276_v28 = vpop.f32.mrf.mxu3 }
 0xb82   : > { %v14277_v40 = vadd.f32 %v14276_v28, %v14264_v32 }
 0xb84   : > { %v14290_v8 = vadd.f32 %v14289_v47, %v14277_v40 }
 0xb86   : > { %v14317_v25 = vpop.f32.mrf.mxu2  ;;  %v14303_v53 = vadd.f32 %v14302_v44, %v14290_v8 }
 0xb88   : > { %v14316_v56 = vadd.f32 %v14315_v49, %v14303_v53 }
 0xb89   : > { %v14278_v13 = vpop.f32.mrf.mxu3 }
 0xba1   : > { %v14328_v31 = vpop.f32.mrf.mxu3 }
 0xba2   : > { %v14329_v27 = vadd.f32 %v14328_v31, %v14316_v56 }
 0xba4   : > { %v14335_v3 = vadd.f32 %v14329_v27, %v12379_v23 }
 0xba5   : > { %14343 = sbr.rel (%p20291_p5) target bundleno = 3276 (0xccc), region = 119 }
 0xba6   : > { %14339 = vst [vmem:[#allocation4 + $0x18] sm:$0xff] %v14335_v3 }
 0xba9   : > { %v14330_v42 = vpop.f32.mrf.mxu3 }
 0xbaa   : > { %v14344_v4 = vld [vmem:[#allocation4 + $0x10] sm:$0xff]  ;;  %v14345_v6 = vld [vmem:[#allocation4] sm:$0xff]  ;;  %v14346_v35 = vld [vmem:[#allocation4 + $0x8] sm:$0xff]  ;;  %v22117_v30 = vmov 512.0   ;;  %v14413_v40 = vperm.slane %v22839_v0, 0  ;;  %v14414_v8 = vperm.slane %v22839_v0, 1 }
 0xbab   : > { %v14348_v24 = vld [vmem:[#allocation12] sm:$0xf]  ;;  %v14363_v52 = vld [vmem:[#allocation2] sm:$0xff]  ;;  %v14364_v54 = vld [vmem:[#allocation2 + $0x18] sm:$0xff]  ;;  %21842 = vrcp.f32 %v22117_v30  ;;  %v14415_v53 = vperm.slane %v22839_v0, 2  ;;  %v14416_v56 = vperm.slane %v22839_v0, 3 }
 0xbac   : > { %v14350_v29 = vperm.slane %v14348_v24, 0  ;;  %v14351_v43 = vperm.slane %v14348_v24, 1  ;;  %v14352_v18 = vperm.slane %v14348_v24, 2  ;;  %v14353_v50 = vperm.slane %v14348_v24, 3  ;;  %v14362_v51 = vld [vmem:[#allocation2 + $0x10] sm:$0xff]  ;;  %v14365_v38 = vld [vmem:[#allocation2 + $0x8] sm:$0xff] }
 0xbad   : > { %v14347_v57 = vld [vmem:[#allocation4 + $0x18] sm:$0xff]  ;;  %v14426_v23 = vperm.slane %v22841_v1, 0  ;;  %v14427_v31 = vperm.slane %v22841_v1, 1  ;;  %v14428_v27 = vperm.slane %v22841_v1, 2 }
 0xbae   : > { %v14358_v59 = vadd.f32 %v14350_v29, %v14344_v4  ;;  %v14359_v60 = vadd.f32 %v14351_v43, %v14345_v6  ;;  %v14360_v63 = vadd.f32 %v14352_v18, %v14346_v35  ;;  %v14361_v9 = vadd.f32 %v14353_v50, %v14347_v57 }
 0xbaf   : > { %v14429_v57 = vperm.slane %v22841_v1, 3 }
 0xbb0   : > { %v14366_v37 = vadd.f32 %v14362_v51, %v14358_v59  ;;  %v14367_v10 = vadd.f32 %v14363_v52, %v14359_v60  ;;  %v14368_v14 = vadd.f32 %v14364_v54, %v14360_v63  ;;  %v14369_v15 = vadd.f32 %v14365_v38, %v14361_v9 }
 0xbb1   : > { %v21843_v41 = vpop.eup %21842 }
 0xbb2   : > { %v14370_v62 = vadd.f32 %v14367_v10, %v14366_v37  ;;  %v14376_v33 = vmul.f32 512.0, %v21843_v41  ;;  %vm14380_vm8 = vweird.f32 %v21843_v41 }
 0xbb4   : > { %v14371_v5 = vadd.f32 %v14370_v62, %v14368_v14  ;;  %v14377_v16 = vsub.f32 1.0, %v14376_v33 }
 0xbb6   : > { %v14372_v39 = vadd.f32 %v14371_v5, %v14369_v15  ;;  %v14378_v20 = vmul.f32 %v21843_v41, %v14377_v16 }
 0xbb8   : > { %14373 = vadd.xlane.f32.xlu0 %v14372_v39  ;;  %v14379_v58 = vadd.f32 %v21843_v41, %v14378_v20 }
 0xbba   : > { %v14381_v61 = vsel %vm14380_vm8, %v21843_v41, %v14379_v58 }
 0xc2b   : > { %v14374_v17 = vpop.xlane.xlu0 %14373 }
 0xc2c   : > { %v14382_v48 = vmul.f32 %v14381_v61, %v14374_v17 }
 0xc2e   : > { %v14383_v36 = vsub.f32 %v14366_v37, %v14382_v48  ;;  %v14384_v55 = vsub.f32 %v14367_v10, %v14382_v48  ;;  %v14385_v34 = vsub.f32 %v14368_v14, %v14382_v48  ;;  %v14386_v47 = vsub.f32 %v14369_v15, %v14382_v48 }
 0xc30   : > { %v14387_v44 = vmul.f32 %v14383_v36, %v14383_v36  ;;  %v14388_v45 = vmul.f32 %v14384_v55, %v14384_v55  ;;  %v14389_v12 = vmul.f32 %v14385_v34, %v14385_v34  ;;  %v14390_v2 = vmul.f32 %v14386_v47, %v14386_v47 }
 0xc32   : > { %v14391_v22 = vadd.f32 %v14388_v45, %v14387_v44 }
 0xc34   : > { %v14392_v7 = vadd.f32 %v14391_v22, %v14389_v12 }
 0xc36   : > { %v14393_v26 = vadd.f32 %v14392_v7, %v14390_v2 }
 0xc38   : > { %14394 = vadd.xlane.f32.xlu0 %v14393_v26 }
 0xcab   : > { %v14395_v46 = vpop.xlane.xlu0 %14394 }
 0xcac   : > { %v14396_v19 = vmul.f32 %v14395_v46, %v14381_v61 }
 0xcae   : > { %v14397_v11 = vadd.f32 1e-05, %v14396_v19 }
 0xcb0   : > { %21844 = vrsqrt.f32 %v14397_v11  ;;  %vm14404_vm10 = vweird.f32 %v14397_v11 }
 0xcb6   : > { %v21845_v21 = vpop.eup %21844 }
 0xcb7   : > { %v14399_v28 = vmul.f32 %v21845_v21, %v14397_v11  ;;  %vm14405_vm9 = vweird.f32 %v21845_v21 }
 0xcb8   : > { %vm14406_vm11 = vmor %vm14404_vm10, %vm14405_vm9 }
 0xcb9   : > { %v14400_v49 = vmul.f32 %v21845_v21, %v14399_v28 }
 0xcbb   : > { %v14401_v13 = vmul.f32 0.5, %v14400_v49 }
 0xcbd   : > { %v14402_v25 = vsub.f32 1.5, %v14401_v13 }
 0xcbf   : > { %v14403_v32 = vmul.f32 %v21845_v21, %v14402_v25 }
 0xcc1   : > { %v14407_v3 = vsel %vm14406_vm11, %v21845_v21, %v14403_v32 }
 0xcc2   : > { %v14408_v42 = vmul.f32 %v14407_v3, %v14383_v36  ;;  %v14409_v4 = vmul.f32 %v14407_v3, %v14384_v55  ;;  %v14410_v6 = vmul.f32 %v14407_v3, %v14385_v34  ;;  %v14411_v35 = vmul.f32 %v14407_v3, %v14386_v47 }
 0xcc4   : > { %v14421_v24 = vmul.f32 %v14413_v40, %v14408_v42  ;;  %v14422_v29 = vmul.f32 %v14414_v8, %v14409_v4  ;;  %v14423_v43 = vmul.f32 %v14415_v53, %v14410_v6  ;;  %v14424_v18 = vmul.f32 %v14416_v56, %v14411_v35 }
 0xcc6   : > { %v14434_v50 = vadd.f32 %v14426_v23, %v14421_v24  ;;  %v14435_v0 = vadd.f32 %v14427_v31, %v14422_v29  ;;  %v14436_v51 = vadd.f32 %v14428_v27, %v14423_v43  ;;  %v14437_v52 = vadd.f32 %v14429_v57, %v14424_v18 }
 0xcc8   : > { %14438 = vst [vmem:[#allocation16] sm:$0xff] %v14434_v50 }
 0xcc9   : > { %14439 = vst [vmem:[#allocation16 + $0x8] sm:$0xff] %v14435_v0 }
 0xcca   : > { %14440 = vst [vmem:[#allocation16 + $0x10] sm:$0xff] %v14436_v51 }
 0xccb   : > { %14441 = vst [vmem:[#allocation16 + $0x18] sm:$0xff] %v14437_v52 }
 0xccc PF: > { %p21758_p8 = scmp.eq.s32.totalorder %s22198_s21, 1  ;;  %s22118_s28 = smov [#allocation16]  }
 0xccd   : > { %s14448_s14 = sshll.u32 %s22118_s28, 4  ;;  %s26743_s13 = sld [smem:[#allocation28_spill]]  ;;  %s14449_s14 = int_to_ptr.vmem [resolvable:$true] %s14448_s14 }
 0xcd3   : > { %s14450_s9 = sshll.u32 %s26743_s13, 4  ;;  %s14451_s9 = int_to_ptr.hbm [resolvable:$true] %s14450_s9 }
 0xcd4   : > { %21729 = dma.vmem_to_hbm [thread:$0]  (%p21758_p8), %s14449_s14, 512, %s14451_s9, [#allocation7]  }
 0xcd5   : > { %22089 = dma.done.wait (%p21758_p8), [#allocation7], 512  }
 0xcd6   : > { %22091 = vsyncadd (%p21758_p8), [#allocation7], 4294966784 }
 0xcd7 PF: > { %s26744_s20 = sld [smem:[#allocation23_spill]]  ;;  %s26746_s17 = smov %s22098_s18 }
 0xcd8   : > { %s26745_s15 = sld [smem:[#allocation24_spill]]  ;;  %s26747_s18 = smov %s22102_s19 }
 0xcdd   : > { %p22_p9 = scmp.ge.s32.totalorder %s26744_s20, 4  }
 0xcde   : > { %s26748_s19 = smov %s26745_s15 }
 0xcdf   :  { %24 = sbr.rel (!%p22_p9) target bundleno = 10 (0xa), region = 162 }
 0xce4   :  { %14464 = vsyncpa [#allocation6], 1 }
 0xce5   :  { %14466 = vsyncpa [#allocation6 + $0x1], 1 }
 0xce6   :  { %14467 = vsyncpa [#allocation9], 1 }
 0xce7   :  { %14468 = vsyncpa [#allocation14], 1 }
 0xce8   :  { %14469 = vsyncpa [#allocation7], 1 }
 0xce9   :  { %14471 = vsyncpa [#allocation7 + $0x1], 1 }

</bundles_post_ra>
